<compile_context>
chip_gen: v6e
topology: v6e:2x2x1
jax: 0.10.0
libtpu: 0.0.40
codegen_flags: <defaults>
</compile_context>

<pallas_src>
import jax
import jax.numpy as jnp
from jax.experimental import pallas as pl
from jax.experimental.pallas import tpu as pltpu

_PAD = 8  # interior row offset inside padded activation scratch buffers


# ----------------------------------------------------------------------------
# Single fused kernel: conv stack + pools + transition + fc1 + log_softmax
# ----------------------------------------------------------------------------
def _fused_net_kernel(
    x_ref, m28_ref, m14_ref, m7_ref, y28_ref, y14_ref,
    t0_ref, t1_ref, t2_ref, t3_ref, t4_ref,
    sb0_ref, sb1_ref, sb2_ref, sb3_ref, sb4_ref,
    p28_ref, p14_ref, tt_ref, bt_ref,
    fcw_ref, fcb_ref, msk_ref, fsel_ref, gsel_ref,
    out_ref,
    pad_in, pad28, pad14, pad7,
):
    f32 = jnp.float32
    bf16 = jnp.bfloat16
    r28 = x_ref.shape[0]          # BT * 28
    r14 = r28 // 2
    r7 = r14 // 2

    def load_into(dst, value, rows):
        # Place `value` in the interior of a padded scratch buffer and zero the
        # two boundary rows that the shifted conv taps may read.
        dst[_PAD:_PAD + rows, :] = value
        zrow = jnp.zeros((1, dst.shape[1]), f32)
        dst[_PAD - 1:_PAD, :] = zrow
        dst[_PAD + rows:_PAD + rows + 1, :] = zrow

    def conv3x3(src, t_ref, sb_ref, m_ref, rows):
        # 3x3 conv (+ folded BN + ReLU) as 3 banded MXU matmuls (one per dy).
        mt = m_ref[:, 0:1]   # 0 where "row above" would cross an image border
        mb = m_ref[:, 1:2]   # 0 where "row below" would cross an image border
        up = (src[_PAD - 1:_PAD - 1 + rows, :] * mt).astype(bf16)
        mid = src[_PAD:_PAD + rows, :].astype(bf16)
        dn = (src[_PAD + 1:_PAD + 1 + rows, :] * mb).astype(bf16)
        acc = jnp.dot(up, t_ref[0], preferred_element_type=f32)
        acc = acc + jnp.dot(mid, t_ref[1], preferred_element_type=f32)
        acc = acc + jnp.dot(dn, t_ref[2], preferred_element_type=f32)
        y = acc * sb_ref[0:1, :] + sb_ref[1:2, :]
        return jnp.maximum(y, 0.0)

    def maxpool2x2(v, s_ref, y_ref):
        # x-direction: select even/odd columns with 0/1 matmuls, take max.
        vb = v.astype(bf16)
        ve = jnp.dot(vb, s_ref[0], preferred_element_type=f32)
        vo = jnp.dot(vb, s_ref[1], preferred_element_type=f32)
        u = jnp.maximum(ve, vo)
        # y-direction: max of adjacent rows, then pick rows 2*yo via 0/1 matmul.
        r = u.shape[0]
        t = jnp.maximum(u[0:r - 1, :], u[1:r, :])
        return jnp.dot(y_ref[...], t.astype(bf16), preferred_element_type=f32)

    # ---- stage 1: 28x28, 1 -> 16 -> 16 channels ----
    load_into(pad_in, x_ref[...], r28)
    v0 = conv3x3(pad_in, t0_ref, sb0_ref, m28_ref, r28)       # (r28, 28*16)
    load_into(pad28, v0, r28)
    v1 = conv3x3(pad28, t1_ref, sb1_ref, m28_ref, r28)        # (r28, 28*16)
    # dropout1: identity in eval mode
    p1 = maxpool2x2(v1, p28_ref, y28_ref)                     # (r14, 14*16)

    # ---- stage 2: 14x14, 16 -> 16 -> 16 channels ----
    load_into(pad14, p1, r14)
    v2 = conv3x3(pad14, t2_ref, sb2_ref, m14_ref, r14)
    load_into(pad14, v2, r14)                                  # buffer reused
    v3 = conv3x3(pad14, t3_ref, sb3_ref, m14_ref, r14)
    # dropout2: identity in eval mode
    p2 = maxpool2x2(v3, p14_ref, y14_ref)                     # (r7, 7*16)

    # ---- stage 3: 7x7, 16 -> 32 channels, then 1x1 transition -> 8 ----
    load_into(pad7, p2, r7)
    v4 = conv3x3(pad7, t4_ref, sb4_ref, m7_ref, r7)           # (r7, 7*32)
    tr = jnp.dot(v4.astype(bf16), tt_ref[...],
                 preferred_element_type=f32) + bt_ref[...]    # (r7, 7*8)

    # ---- fc1 directly on the (rows=(b,y), lanes=(x,c)) layout ----
    # P[b*7+y', y*10+o] = tr[b*7+y', :] @ Wfc_perm[:, y*10+o]
    p = jnp.dot(tr.astype(bf16), fcw_ref[...], preferred_element_type=f32)  # (r7, 70)
    # exact 0/1 selections kept in f32: pick the y'==y diagonal, then sum over y per batch
    z = jnp.dot(p * msk_ref[...], fsel_ref[...], preferred_element_type=f32)      # (r7, 10)
    logits = jnp.dot(gsel_ref[...], z, preferred_element_type=f32) + fcb_ref[...]  # (BT, 10)

    # ---- log_softmax ----
    m = jnp.max(logits, axis=-1, keepdims=True)
    lse = m + jnp.log(jnp.sum(jnp.exp(logits - m), axis=-1, keepdims=True))
    out_ref[...] = logits - lse


# ----------------------------------------------------------------------------
# Parameter init (PyTorch-like layouts) and packing into kernel operands
# ----------------------------------------------------------------------------
def _uniform(key, shape, fan_in):
    bound = 1.0 / jnp.sqrt(jnp.float32(fan_in))
    return jax.random.uniform(key, shape, jnp.float32, -bound, bound)


def init_params(key):
    keys = jax.random.split(key, 14)
    p = {}

    def conv(kw, kb, co, ci, k):
        fan_in = ci * k * k
        return (_uniform(kw, (co, ci, k, k), fan_in), _uniform(kb, (co,), fan_in))

    def bn(c):
        return (jnp.ones((c,), jnp.float32), jnp.zeros((c,), jnp.float32),
                jnp.zeros((c,), jnp.float32), jnp.ones((c,), jnp.float32), 1e-5)

    p["conv0"] = conv(keys[0], keys[1], 16, 1, 3);  p["bn0"] = bn(16)
    p["conv1"] = conv(keys[2], keys[3], 16, 16, 3); p["bn1"] = bn(16)
    p["conv2"] = conv(keys[4], keys[5], 16, 16, 3); p["bn2"] = bn(16)
    p["conv3"] = conv(keys[6], keys[7], 16, 16, 3); p["bn3"] = bn(16)
    p["conv4"] = conv(keys[8], keys[9], 32, 16, 3); p["bn4"] = bn(32)
    p["trans"] = conv(keys[10], keys[11], 8, 32, 1)
    p["fc"] = (_uniform(keys[12], (10, 392), 392), _uniform(keys[13], (10,), 392))
    return p


def _band_matrices(w_pt, width):
    """3x3 conv -> 3 block-banded (W*Ci, W*Co) matmul weights (one per dy)."""
    co, ci = w_pt.shape[0], w_pt.shape[1]
    mats = []
    for dy in range(3):
        t = jnp.zeros((width * ci, width * co), jnp.float32)
        for dx in range(3):
            wm = jnp.transpose(w_pt[:, :, dy, dx])              # (Ci, Co)
            eye = jnp.eye(width, k=1 - dx, dtype=jnp.float32)    # out[x] += in[x+dx-1]
            t = t + jnp.kron(eye, wm)
        mats.append(t)
    return jnp.stack(mats).astype(jnp.bfloat16)                  # (3, W*Ci, W*Co)


def _pool_select(width, ch):
    """0/1 matrices selecting even / odd x columns (2x2 pool, x direction)."""
    wo = width // 2
    idx = jnp.arange(wo)
    pe = jnp.zeros((width, wo), jnp.float32).at[2 * idx, idx].set(1.0)
    po = jnp.zeros((width, wo), jnp.float32).at[2 * idx + 1, idx].set(1.0)
    eye = jnp.eye(ch, dtype=jnp.float32)
    return jnp.stack([jnp.kron(pe, eye), jnp.kron(po, eye)]).astype(jnp.bfloat16)


def pack_params(p):
    """Convert PyTorch-layout parameters into kernel-ready resident operands."""
    packed = {}
    widths = [28, 28, 14, 14, 7]
    for i in range(5):
        w, b = p["conv%d" % i]
        gamma, beta, mean, var, eps = p["bn%d" % i]
        width = widths[i]
        scale = gamma / jnp.sqrt(var + eps)                      # folded BN (eval)
        bias = (b - mean) * scale + beta
        packed["T%d" % i] = _band_matrices(w, width)
        packed["sb%d" % i] = jnp.stack(
            [jnp.tile(scale, width), jnp.tile(bias, width)]).astype(jnp.float32)
    packed["S28"] = _pool_select(28, 16)
    packed["S14"] = _pool_select(14, 16)

    wt, bt = p["trans"]                                          # (8,32,1,1), (8,)
    wt_m = jnp.transpose(wt.reshape(8, 32))                      # (32, 8)
    packed["Tt"] = jnp.kron(jnp.eye(7, dtype=jnp.float32), wt_m).astype(jnp.bfloat16)
    packed["bt"] = jnp.tile(bt, 7).reshape(1, 56).astype(jnp.float32)

    # fc1 weight, permuted so it can be applied to the (rows=(b,y), lanes=(x,c))
    # transition-conv layout:  Wp[x*8+c, y*10+o] = Wfc[o, c*49 + y*7 + x]
    wf, bf = p["fc"]                                             # (10, 392), (10,)
    wr = wf.reshape(10, 8, 7, 7)                                 # [o, c, y, x]
    packed["fc_w"] = jnp.transpose(wr, (3, 1, 2, 0)).reshape(56, 70).astype(jnp.bfloat16)
    packed["fc_b"] = bf.reshape(1, 10).astype(jnp.float32)
    packed["fsel"] = jnp.tile(jnp.eye(10, dtype=jnp.float32), (7, 1))   # (70, 10)
    return packed


# ----------------------------------------------------------------------------
# Forward pass
# ----------------------------------------------------------------------------
def _y_masks(bt, h):
    r = jnp.arange(bt * h) % h
    top = (r != 0).astype(jnp.float32)
    bot = (r != h - 1).astype(jnp.float32)
    return jnp.stack([top, bot], axis=1)                         # (bt*h, 2)


def _row_select(rows_out, rows_in):
    idx = jnp.arange(rows_out)
    z = jnp.zeros((rows_out, rows_in - 1), jnp.float32)
    return z.at[idx, 2 * idx].set(1.0).astype(jnp.bfloat16)


def _resident(arr):
    if arr.ndim == 2:
        return pl.BlockSpec(arr.shape, lambda g: (0, 0))
    return pl.BlockSpec(arr.shape, lambda g: (0, 0, 0))


@jax.jit
def net_forward(x_nchw, packed):
    B = x_nchw.shape[0]
    BT = B if B <= 8 else 8                       # batch tile (VMEM-safe on all chips)
    Bp = ((B + BT - 1) // BT) * BT
    G = Bp // BT
    R28, R14, R7 = BT * 28, BT * 14, BT * 7

    x = x_nchw.astype(jnp.float32).reshape(B, 784)
    if Bp != B:
        x = jnp.pad(x, ((0, Bp - B), (0, 0)))
    x2d = x.reshape(Bp * 28, 28)                  # rows = (b, y), lanes = x

    m28, m14, m7 = _y_masks(BT, 28), _y_masks(BT, 14), _y_masks(BT, 7)
    y28, y14 = _row_select(R14, R28), _row_select(R7, R14)

    # fc selection constants (depend only on BT): pick the y'==y diagonal block
    # of P = tr @ Wp, then sum the 7 y-rows of each image.
    rows_y = jnp.arange(R7) % 7
    cols_y = jnp.arange(70) // 10
    fc_mask = (cols_y[None, :] == rows_y[:, None]).astype(jnp.float32)        # (R7, 70)
    gsel = jnp.kron(jnp.eye(BT, dtype=jnp.float32),
                    jnp.ones((1, 7), jnp.float32))                            # (BT, R7)

    operands = (
        x2d, m28, m14, m7, y28, y14,
        packed["T0"], packed["T1"], packed["T2"], packed["T3"], packed["T4"],
        packed["sb0"], packed["sb1"], packed["sb2"], packed["sb3"], packed["sb4"],
        packed["S28"], packed["S14"], packed["Tt"], packed["bt"],
        packed["fc_w"], packed["fc_b"], fc_mask, packed["fsel"], gsel,
    )
    in_specs = [pl.BlockSpec((R28, 28), lambda g: (g, 0))]
    in_specs += [_resident(a) for a in operands[1:]]

    flops = int(Bp * 8e7)                                         # advisory
    bytes_accessed = int(Bp * 784 * 4 + Bp * 40 + 3_500_000)

    out = pl.pallas_call(
        _fused_net_kernel,
        out_shape=jax.ShapeDtypeStruct((Bp, 10), jnp.float32),
        grid=(G,),
        in_specs=in_specs,
        out_specs=pl.BlockSpec((BT, 10), lambda g: (g, 0)),
        scratch_shapes=[
            pltpu.VMEM((R28 + 16, 28), jnp.float32),    # padded conv0 input
            pltpu.VMEM((R28 + 16, 448), jnp.float32),   # padded 28x28 activation
            pltpu.VMEM((R14 + 16, 224), jnp.float32),   # padded 14x14 activation (reused)
            pltpu.VMEM((R7 + 16, 112), jnp.float32),    # padded 7x7 activation
        ],
        compiler_params=pltpu.CompilerParams(
            dimension_semantics=("parallel",),
            vmem_limit_bytes=32 * 1024 * 1024,
        ),
        cost_estimate=pl.CostEstimate(
            flops=flops, transcendentals=int(Bp * 16),
            bytes_accessed=bytes_accessed),
    )(*operands)

    return out[:B]


# ----------------------------------------------------------------------------
if __name__ == "__main__":
    key = jax.random.PRNGKey(0)
    k_x, k_p = jax.random.split(key)
    # batch=2; spatial must be 28x28 so fc1 sees 8*7*7 features
    x = jax.random.normal(k_x, (2, 1, 28, 28), dtype=jnp.float32)
    params = init_params(k_p)
    packed = pack_params(params)

    out = net_forward(x, packed)
    out = jax.block_until_ready(out)
    assert out.shape == (2, 10)
    # log_softmax rows must (approximately) exponentiate-sum to 1
    assert bool(jnp.allclose(jnp.sum(jnp.exp(out), axis=-1), 1.0, atol=1e-4))
    print("KERNEL_OK")
</pallas_src>

<mosaic_0001>
module attributes {stable_mosaic.version = 11 : i64} {
  func.func @_fused_net_kernel(%arg0: i32, %arg1: memref<56x28xf32, #tpu.memory_space<vmem>>, %arg2: memref<56x2xf32, #tpu.memory_space<vmem>>, %arg3: memref<28x2xf32, #tpu.memory_space<vmem>>, %arg4: memref<14x2xf32, #tpu.memory_space<vmem>>, %arg5: memref<28x55xbf16, #tpu.memory_space<vmem>>, %arg6: memref<14x27xbf16, #tpu.memory_space<vmem>>, %arg7: memref<3x28x448xbf16, #tpu.memory_space<vmem>>, %arg8: memref<3x448x448xbf16, #tpu.memory_space<vmem>>, %arg9: memref<3x224x224xbf16, #tpu.memory_space<vmem>>, %arg10: memref<3x224x224xbf16, #tpu.memory_space<vmem>>, %arg11: memref<3x112x224xbf16, #tpu.memory_space<vmem>>, %arg12: memref<2x448xf32, #tpu.memory_space<vmem>>, %arg13: memref<2x448xf32, #tpu.memory_space<vmem>>, %arg14: memref<2x224xf32, #tpu.memory_space<vmem>>, %arg15: memref<2x224xf32, #tpu.memory_space<vmem>>, %arg16: memref<2x224xf32, #tpu.memory_space<vmem>>, %arg17: memref<2x448x224xbf16, #tpu.memory_space<vmem>>, %arg18: memref<2x224x112xbf16, #tpu.memory_space<vmem>>, %arg19: memref<224x56xbf16, #tpu.memory_space<vmem>>, %arg20: memref<1x56xf32, #tpu.memory_space<vmem>>, %arg21: memref<56x70xbf16, #tpu.memory_space<vmem>>, %arg22: memref<1x10xf32, #tpu.memory_space<vmem>>, %arg23: memref<14x70xf32, #tpu.memory_space<vmem>>, %arg24: memref<70x10xf32, #tpu.memory_space<vmem>>, %arg25: memref<2x14xf32, #tpu.memory_space<vmem>>, %arg26: memref<2x10xf32, #tpu.memory_space<vmem>>, %arg27: memref<72x28xf32, #tpu.memory_space<vmem>>, %arg28: memref<72x448xf32, #tpu.memory_space<vmem>>, %arg29: memref<44x224xf32, #tpu.memory_space<vmem>>, %arg30: memref<30x112xf32, #tpu.memory_space<vmem>>) attributes {dimension_semantics = [#tpu.dimension_semantics<parallel>], iteration_bounds = array<i64: 1>, scalar_prefetch = 0 : i64, scratch_operands = 4 : i64, tpu.core_type = #tpu.core_type<tc>, window_params = [{transform_indices = @transform_0, window_bounds = array<i64: 56, 28>}, {pipeline_mode = #tpu.pipeline_mode<synchronous>, transform_indices = @transform_1, window_bounds = array<i64: 56, 2>}, {pipeline_mode = #tpu.pipeline_mode<synchronous>, transform_indices = @transform_2, window_bounds = array<i64: 28, 2>}, {pipeline_mode = #tpu.pipeline_mode<synchronous>, transform_indices = @transform_3, window_bounds = array<i64: 14, 2>}, {pipeline_mode = #tpu.pipeline_mode<synchronous>, transform_indices = @transform_4, window_bounds = array<i64: 28, 55>}, {pipeline_mode = #tpu.pipeline_mode<synchronous>, transform_indices = @transform_5, window_bounds = array<i64: 14, 27>}, {pipeline_mode = #tpu.pipeline_mode<synchronous>, transform_indices = @transform_6, window_bounds = array<i64: 3, 28, 448>}, {pipeline_mode = #tpu.pipeline_mode<synchronous>, transform_indices = @transform_7, window_bounds = array<i64: 3, 448, 448>}, {pipeline_mode = #tpu.pipeline_mode<synchronous>, transform_indices = @transform_8, window_bounds = array<i64: 3, 224, 224>}, {pipeline_mode = #tpu.pipeline_mode<synchronous>, transform_indices = @transform_9, window_bounds = array<i64: 3, 224, 224>}, {pipeline_mode = #tpu.pipeline_mode<synchronous>, transform_indices = @transform_10, window_bounds = array<i64: 3, 112, 224>}, {pipeline_mode = #tpu.pipeline_mode<synchronous>, transform_indices = @transform_11, window_bounds = array<i64: 2, 448>}, {pipeline_mode = #tpu.pipeline_mode<synchronous>, transform_indices = @transform_12, window_bounds = array<i64: 2, 448>}, {pipeline_mode = #tpu.pipeline_mode<synchronous>, transform_indices = @transform_13, window_bounds = array<i64: 2, 224>}, {pipeline_mode = #tpu.pipeline_mode<synchronous>, transform_indices = @transform_14, window_bounds = array<i64: 2, 224>}, {pipeline_mode = #tpu.pipeline_mode<synchronous>, transform_indices = @transform_15, window_bounds = array<i64: 2, 224>}, {pipeline_mode = #tpu.pipeline_mode<synchronous>, transform_indices = @transform_16, window_bounds = array<i64: 2, 448, 224>}, {pipeline_mode = #tpu.pipeline_mode<synchronous>, transform_indices = @transform_17, window_bounds = array<i64: 2, 224, 112>}, {pipeline_mode = #tpu.pipeline_mode<synchronous>, transform_indices = @transform_18, window_bounds = array<i64: 224, 56>}, {pipeline_mode = #tpu.pipeline_mode<synchronous>, transform_indices = @transform_19, window_bounds = array<i64: 1, 56>}, {pipeline_mode = #tpu.pipeline_mode<synchronous>, transform_indices = @transform_20, window_bounds = array<i64: 56, 70>}, {pipeline_mode = #tpu.pipeline_mode<synchronous>, transform_indices = @transform_21, window_bounds = array<i64: 1, 10>}, {pipeline_mode = #tpu.pipeline_mode<synchronous>, transform_indices = @transform_22, window_bounds = array<i64: 14, 70>}, {pipeline_mode = #tpu.pipeline_mode<synchronous>, transform_indices = @transform_23, window_bounds = array<i64: 70, 10>}, {pipeline_mode = #tpu.pipeline_mode<synchronous>, transform_indices = @transform_24, window_bounds = array<i64: 2, 14>}, {transform_indices = @transform_25, window_bounds = array<i64: 2, 10>}]} {
    %c0 = arith.constant 0 : index
    %c0_0 = arith.constant 0 : index
    %0 = vector.load %arg1[%c0, %c0_0] : memref<56x28xf32, #tpu.memory_space<vmem>>, vector<56x28xf32>
    %c8 = arith.constant 8 : index
    %c0_1 = arith.constant 0 : index
    %1 = vector.load %arg27[%c8, %c0_1] : memref<72x28xf32, #tpu.memory_space<vmem>>, vector<56x28xf32>
    tpu.vector_store %arg27[%c8, %c0_1], %0 {strides = array<i32>} : memref<72x28xf32, #tpu.memory_space<vmem>>, vector<56x28xf32>,
    %cst = arith.constant 0.000000e+00 : f32
    %2 = vector.broadcast %cst : f32 to vector<1x28xf32>
    %c7 = arith.constant 7 : index
    %c0_2 = arith.constant 0 : index
    %3 = vector.load %arg27[%c7, %c0_2] : memref<72x28xf32, #tpu.memory_space<vmem>>, vector<1x28xf32>
    tpu.vector_store %arg27[%c7, %c0_2], %2 {strides = array<i32>} : memref<72x28xf32, #tpu.memory_space<vmem>>, vector<1x28xf32>,
    %c64 = arith.constant 64 : index
    %c0_3 = arith.constant 0 : index
    %4 = vector.load %arg27[%c64, %c0_3] : memref<72x28xf32, #tpu.memory_space<vmem>>, vector<1x28xf32>
    tpu.vector_store %arg27[%c64, %c0_3], %2 {strides = array<i32>} : memref<72x28xf32, #tpu.memory_space<vmem>>, vector<1x28xf32>,
    %c0_4 = arith.constant 0 : index
    %c0_5 = arith.constant 0 : index
    %5 = vector.load %arg2[%c0_4, %c0_5] : memref<56x2xf32, #tpu.memory_space<vmem>>, vector<56x1xf32>
    %c0_6 = arith.constant 0 : index
    %c1 = arith.constant 1 : index
    %6 = vector.load %arg2[%c0_6, %c1] : memref<56x2xf32, #tpu.memory_space<vmem>>, vector<56x1xf32>
    %c7_7 = arith.constant 7 : index
    %c0_8 = arith.constant 0 : index
    %7 = vector.load %arg27[%c7_7, %c0_8] : memref<72x28xf32, #tpu.memory_space<vmem>>, vector<56x28xf32>
    %8 = vector.broadcast %5 : vector<56x1xf32> to vector<56x28xf32>
    %9 = arith.mulf %7, %8 : vector<56x28xf32>
    %10 = arith.truncf %9 : vector<56x28xf32> to vector<56x28xbf16>
    %c8_9 = arith.constant 8 : index
    %c0_10 = arith.constant 0 : index
    %11 = vector.load %arg27[%c8_9, %c0_10] : memref<72x28xf32, #tpu.memory_space<vmem>>, vector<56x28xf32>
    %12 = arith.truncf %11 : vector<56x28xf32> to vector<56x28xbf16>
    %c9 = arith.constant 9 : index
    %c0_11 = arith.constant 0 : index
    %13 = vector.load %arg27[%c9, %c0_11] : memref<72x28xf32, #tpu.memory_space<vmem>>, vector<56x28xf32>
    %14 = vector.broadcast %6 : vector<56x1xf32> to vector<56x28xf32>
    %15 = arith.mulf %13, %14 : vector<56x28xf32>
    %16 = arith.truncf %15 : vector<56x28xf32> to vector<56x28xbf16>
    %c0_12 = arith.constant 0 : index
    %c0_13 = arith.constant 0 : index
    %c0_14 = arith.constant 0 : index
    %17 = vector.load %arg7[%c0_12, %c0_13, %c0_14] : memref<3x28x448xbf16, #tpu.memory_space<vmem>>, vector<1x28x448xbf16>
    %18 = vector.shape_cast %17 : vector<1x28x448xbf16> to vector<28x448xbf16>
    %cst_15 = arith.constant dense<0.000000e+00> : vector<56x448xf32>
    %19 = tpu.matmul %10, %18, %cst_15 {dimension_numbers = #tpu.dot_dimension_numbers<[1], [0], [0], [1], [0, 0, 1, 1], [], []>} : vector<56x28xbf16>, vector<28x448xbf16>, vector<56x448xf32> -> vector<56x448xf32>
    %c1_16 = arith.constant 1 : index
    %c0_17 = arith.constant 0 : index
    %c0_18 = arith.constant 0 : index
    %20 = vector.load %arg7[%c1_16, %c0_17, %c0_18] : memref<3x28x448xbf16, #tpu.memory_space<vmem>>, vector<1x28x448xbf16>
    %21 = vector.shape_cast %20 : vector<1x28x448xbf16> to vector<28x448xbf16>
    %cst_19 = arith.constant dense<0.000000e+00> : vector<56x448xf32>
    %22 = tpu.matmul %12, %21, %cst_19 {dimension_numbers = #tpu.dot_dimension_numbers<[1], [0], [0], [1], [0, 0, 1, 1], [], []>} : vector<56x28xbf16>, vector<28x448xbf16>, vector<56x448xf32> -> vector<56x448xf32>
    %23 = arith.addf %19, %22 : vector<56x448xf32>
    %c2 = arith.constant 2 : index
    %c0_20 = arith.constant 0 : index
    %c0_21 = arith.constant 0 : index
    %24 = vector.load %arg7[%c2, %c0_20, %c0_21] : memref<3x28x448xbf16, #tpu.memory_space<vmem>>, vector<1x28x448xbf16>
    %25 = vector.shape_cast %24 : vector<1x28x448xbf16> to vector<28x448xbf16>
    %cst_22 = arith.constant dense<0.000000e+00> : vector<56x448xf32>
    %26 = tpu.matmul %16, %25, %cst_22 {dimension_numbers = #tpu.dot_dimension_numbers<[1], [0], [0], [1], [0, 0, 1, 1], [], []>} : vector<56x28xbf16>, vector<28x448xbf16>, vector<56x448xf32> -> vector<56x448xf32>
    %27 = arith.addf %23, %26 : vector<56x448xf32>
    %c0_23 = arith.constant 0 : index
    %c0_24 = arith.constant 0 : index
    %28 = vector.load %arg12[%c0_23, %c0_24] : memref<2x448xf32, #tpu.memory_space<vmem>>, vector<1x448xf32>
    %29 = vector.broadcast %28 : vector<1x448xf32> to vector<56x448xf32>
    %30 = arith.mulf %27, %29 : vector<56x448xf32>
    %c1_25 = arith.constant 1 : index
    %c0_26 = arith.constant 0 : index
    %31 = vector.load %arg12[%c1_25, %c0_26] : memref<2x448xf32, #tpu.memory_space<vmem>>, vector<1x448xf32>
    %32 = vector.broadcast %31 : vector<1x448xf32> to vector<56x448xf32>
    %33 = arith.addf %30, %32 : vector<56x448xf32>
    %cst_27 = arith.constant 0.000000e+00 : f32
    %34 = vector.broadcast %cst_27 : f32 to vector<56x448xf32>
    %35 = arith.maximumf %33, %34 : vector<56x448xf32>
    %c8_28 = arith.constant 8 : index
    %c0_29 = arith.constant 0 : index
    %36 = vector.load %arg28[%c8_28, %c0_29] : memref<72x448xf32, #tpu.memory_space<vmem>>, vector<56x448xf32>
    tpu.vector_store %arg28[%c8_28, %c0_29], %35 {strides = array<i32>} : memref<72x448xf32, #tpu.memory_space<vmem>>, vector<56x448xf32>,
    %cst_30 = arith.constant 0.000000e+00 : f32
    %37 = vector.broadcast %cst_30 : f32 to vector<1x448xf32>
    %c7_31 = arith.constant 7 : index
    %c0_32 = arith.constant 0 : index
    %38 = vector.load %arg28[%c7_31, %c0_32] : memref<72x448xf32, #tpu.memory_space<vmem>>, vector<1x448xf32>
    tpu.vector_store %arg28[%c7_31, %c0_32], %37 {strides = array<i32>} : memref<72x448xf32, #tpu.memory_space<vmem>>, vector<1x448xf32>,
    %c64_33 = arith.constant 64 : index
    %c0_34 = arith.constant 0 : index
    %39 = vector.load %arg28[%c64_33, %c0_34] : memref<72x448xf32, #tpu.memory_space<vmem>>, vector<1x448xf32>
    tpu.vector_store %arg28[%c64_33, %c0_34], %37 {strides = array<i32>} : memref<72x448xf32, #tpu.memory_space<vmem>>, vector<1x448xf32>,
    %c0_35 = arith.constant 0 : index
    %c0_36 = arith.constant 0 : index
    %40 = vector.load %arg2[%c0_35, %c0_36] : memref<56x2xf32, #tpu.memory_space<vmem>>, vector<56x1xf32>
    %c0_37 = arith.constant 0 : index
    %c1_38 = arith.constant 1 : index
    %41 = vector.load %arg2[%c0_37, %c1_38] : memref<56x2xf32, #tpu.memory_space<vmem>>, vector<56x1xf32>
    %c7_39 = arith.constant 7 : index
    %c0_40 = arith.constant 0 : index
    %42 = vector.load %arg28[%c7_39, %c0_40] : memref<72x448xf32, #tpu.memory_space<vmem>>, vector<56x448xf32>
    %43 = vector.broadcast %40 : vector<56x1xf32> to vector<56x448xf32>
    %44 = arith.mulf %42, %43 : vector<56x448xf32>
    %45 = arith.truncf %44 : vector<56x448xf32> to vector<56x448xbf16>
    %c8_41 = arith.constant 8 : index
    %c0_42 = arith.constant 0 : index
    %46 = vector.load %arg28[%c8_41, %c0_42] : memref<72x448xf32, #tpu.memory_space<vmem>>, vector<56x448xf32>
    %47 = arith.truncf %46 : vector<56x448xf32> to vector<56x448xbf16>
    %c9_43 = arith.constant 9 : index
    %c0_44 = arith.constant 0 : index
    %48 = vector.load %arg28[%c9_43, %c0_44] : memref<72x448xf32, #tpu.memory_space<vmem>>, vector<56x448xf32>
    %49 = vector.broadcast %41 : vector<56x1xf32> to vector<56x448xf32>
    %50 = arith.mulf %48, %49 : vector<56x448xf32>
    %51 = arith.truncf %50 : vector<56x448xf32> to vector<56x448xbf16>
    %c0_45 = arith.constant 0 : index
    %c0_46 = arith.constant 0 : index
    %c0_47 = arith.constant 0 : index
    %52 = vector.load %arg8[%c0_45, %c0_46, %c0_47] : memref<3x448x448xbf16, #tpu.memory_space<vmem>>, vector<1x448x448xbf16>
    %53 = vector.shape_cast %52 : vector<1x448x448xbf16> to vector<448x448xbf16>
    %cst_48 = arith.constant dense<0.000000e+00> : vector<56x448xf32>
    %54 = tpu.matmul %45, %53, %cst_48 {dimension_numbers = #tpu.dot_dimension_numbers<[1], [0], [0], [1], [0, 0, 1, 1], [], []>} : vector<56x448xbf16>, vector<448x448xbf16>, vector<56x448xf32> -> vector<56x448xf32>
    %c1_49 = arith.constant 1 : index
    %c0_50 = arith.constant 0 : index
    %c0_51 = arith.constant 0 : index
    %55 = vector.load %arg8[%c1_49, %c0_50, %c0_51] : memref<3x448x448xbf16, #tpu.memory_space<vmem>>, vector<1x448x448xbf16>
    %56 = vector.shape_cast %55 : vector<1x448x448xbf16> to vector<448x448xbf16>
    %cst_52 = arith.constant dense<0.000000e+00> : vector<56x448xf32>
    %57 = tpu.matmul %47, %56, %cst_52 {dimension_numbers = #tpu.dot_dimension_numbers<[1], [0], [0], [1], [0, 0, 1, 1], [], []>} : vector<56x448xbf16>, vector<448x448xbf16>, vector<56x448xf32> -> vector<56x448xf32>
    %58 = arith.addf %54, %57 : vector<56x448xf32>
    %c2_53 = arith.constant 2 : index
    %c0_54 = arith.constant 0 : index
    %c0_55 = arith.constant 0 : index
    %59 = vector.load %arg8[%c2_53, %c0_54, %c0_55] : memref<3x448x448xbf16, #tpu.memory_space<vmem>>, vector<1x448x448xbf16>
    %60 = vector.shape_cast %59 : vector<1x448x448xbf16> to vector<448x448xbf16>
    %cst_56 = arith.constant dense<0.000000e+00> : vector<56x448xf32>
    %61 = tpu.matmul %51, %60, %cst_56 {dimension_numbers = #tpu.dot_dimension_numbers<[1], [0], [0], [1], [0, 0, 1, 1], [], []>} : vector<56x448xbf16>, vector<448x448xbf16>, vector<56x448xf32> -> vector<56x448xf32>
    %62 = arith.addf %58, %61 : vector<56x448xf32>
    %c0_57 = arith.constant 0 : index
    %c0_58 = arith.constant 0 : index
    %63 = vector.load %arg13[%c0_57, %c0_58] : memref<2x448xf32, #tpu.memory_space<vmem>>, vector<1x448xf32>
    %64 = vector.broadcast %63 : vector<1x448xf32> to vector<56x448xf32>
    %65 = arith.mulf %62, %64 : vector<56x448xf32>
    %c1_59 = arith.constant 1 : index
    %c0_60 = arith.constant 0 : index
    %66 = vector.load %arg13[%c1_59, %c0_60] : memref<2x448xf32, #tpu.memory_space<vmem>>, vector<1x448xf32>
    %67 = vector.broadcast %66 : vector<1x448xf32> to vector<56x448xf32>
    %68 = arith.addf %65, %67 : vector<56x448xf32>
    %cst_61 = arith.constant 0.000000e+00 : f32
    %69 = vector.broadcast %cst_61 : f32 to vector<56x448xf32>
    %70 = arith.maximumf %68, %69 : vector<56x448xf32>
    %71 = arith.truncf %70 : vector<56x448xf32> to vector<56x448xbf16>
    %c0_62 = arith.constant 0 : index
    %c0_63 = arith.constant 0 : index
    %c0_64 = arith.constant 0 : index
    %72 = vector.load %arg17[%c0_62, %c0_63, %c0_64] : memref<2x448x224xbf16, #tpu.memory_space<vmem>>, vector<1x448x224xbf16>
    %73 = vector.shape_cast %72 : vector<1x448x224xbf16> to vector<448x224xbf16>
    %cst_65 = arith.constant dense<0.000000e+00> : vector<56x224xf32>
    %74 = tpu.matmul %71, %73, %cst_65 {dimension_numbers = #tpu.dot_dimension_numbers<[1], [0], [0], [1], [0, 0, 1, 1], [], []>} : vector<56x448xbf16>, vector<448x224xbf16>, vector<56x224xf32> -> vector<56x224xf32>
    %c1_66 = arith.constant 1 : index
    %c0_67 = arith.constant 0 : index
    %c0_68 = arith.constant 0 : index
    %75 = vector.load %arg17[%c1_66, %c0_67, %c0_68] : memref<2x448x224xbf16, #tpu.memory_space<vmem>>, vector<1x448x224xbf16>
    %76 = vector.shape_cast %75 : vector<1x448x224xbf16> to vector<448x224xbf16>
    %cst_69 = arith.constant dense<0.000000e+00> : vector<56x224xf32>
    %77 = tpu.matmul %71, %76, %cst_69 {dimension_numbers = #tpu.dot_dimension_numbers<[1], [0], [0], [1], [0, 0, 1, 1], [], []>} : vector<56x448xbf16>, vector<448x224xbf16>, vector<56x224xf32> -> vector<56x224xf32>
    %78 = arith.maximumf %74, %77 : vector<56x224xf32>
    %79 = vector.extract_strided_slice %78 {offsets = [0, 0], sizes = [55, 224], strides = [1, 1]} : vector<56x224xf32> to vector<55x224xf32>
    %80 = vector.extract_strided_slice %78 {offsets = [1, 0], sizes = [55, 224], strides = [1, 1]} : vector<56x224xf32> to vector<55x224xf32>
    %81 = arith.maximumf %79, %80 : vector<55x224xf32>
    %c0_70 = arith.constant 0 : index
    %c0_71 = arith.constant 0 : index
    %82 = vector.load %arg5[%c0_70, %c0_71] : memref<28x55xbf16, #tpu.memory_space<vmem>>, vector<28x55xbf16>
    %83 = arith.truncf %81 : vector<55x224xf32> to vector<55x224xbf16>
    %cst_72 = arith.constant dense<0.000000e+00> : vector<28x224xf32>
    %84 = tpu.matmul %82, %83, %cst_72 {dimension_numbers = #tpu.dot_dimension_numbers<[1], [0], [0], [1], [0, 0, 1, 1], [], []>} : vector<28x55xbf16>, vector<55x224xbf16>, vector<28x224xf32> -> vector<28x224xf32>
    %c8_73 = arith.constant 8 : index
    %c0_74 = arith.constant 0 : index
    %85 = vector.load %arg29[%c8_73, %c0_74] : memref<44x224xf32, #tpu.memory_space<vmem>>, vector<28x224xf32>
    tpu.vector_store %arg29[%c8_73, %c0_74], %84 {strides = array<i32>} : memref<44x224xf32, #tpu.memory_space<vmem>>, vector<28x224xf32>,
    %cst_75 = arith.constant 0.000000e+00 : f32
    %86 = vector.broadcast %cst_75 : f32 to vector<1x224xf32>
    %c7_76 = arith.constant 7 : index
    %c0_77 = arith.constant 0 : index
    %87 = vector.load %arg29[%c7_76, %c0_77] : memref<44x224xf32, #tpu.memory_space<vmem>>, vector<1x224xf32>
    tpu.vector_store %arg29[%c7_76, %c0_77], %86 {strides = array<i32>} : memref<44x224xf32, #tpu.memory_space<vmem>>, vector<1x224xf32>,
    %c36 = arith.constant 36 : index
    %c0_78 = arith.constant 0 : index
    %88 = vector.load %arg29[%c36, %c0_78] : memref<44x224xf32, #tpu.memory_space<vmem>>, vector<1x224xf32>
    tpu.vector_store %arg29[%c36, %c0_78], %86 {strides = array<i32>} : memref<44x224xf32, #tpu.memory_space<vmem>>, vector<1x224xf32>,
    %c0_79 = arith.constant 0 : index
    %c0_80 = arith.constant 0 : index
    %89 = vector.load %arg3[%c0_79, %c0_80] : memref<28x2xf32, #tpu.memory_space<vmem>>, vector<28x1xf32>
    %c0_81 = arith.constant 0 : index
    %c1_82 = arith.constant 1 : index
    %90 = vector.load %arg3[%c0_81, %c1_82] : memref<28x2xf32, #tpu.memory_space<vmem>>, vector<28x1xf32>
    %c7_83 = arith.constant 7 : index
    %c0_84 = arith.constant 0 : index
    %91 = vector.load %arg29[%c7_83, %c0_84] : memref<44x224xf32, #tpu.memory_space<vmem>>, vector<28x224xf32>
    %92 = vector.broadcast %89 : vector<28x1xf32> to vector<28x224xf32>
    %93 = arith.mulf %91, %92 : vector<28x224xf32>
    %94 = arith.truncf %93 : vector<28x224xf32> to vector<28x224xbf16>
    %c8_85 = arith.constant 8 : index
    %c0_86 = arith.constant 0 : index
    %95 = vector.load %arg29[%c8_85, %c0_86] : memref<44x224xf32, #tpu.memory_space<vmem>>, vector<28x224xf32>
    %96 = arith.truncf %95 : vector<28x224xf32> to vector<28x224xbf16>
    %c9_87 = arith.constant 9 : index
    %c0_88 = arith.constant 0 : index
    %97 = vector.load %arg29[%c9_87, %c0_88] : memref<44x224xf32, #tpu.memory_space<vmem>>, vector<28x224xf32>
    %98 = vector.broadcast %90 : vector<28x1xf32> to vector<28x224xf32>
    %99 = arith.mulf %97, %98 : vector<28x224xf32>
    %100 = arith.truncf %99 : vector<28x224xf32> to vector<28x224xbf16>
    %c0_89 = arith.constant 0 : index
    %c0_90 = arith.constant 0 : index
    %c0_91 = arith.constant 0 : index
    %101 = vector.load %arg9[%c0_89, %c0_90, %c0_91] : memref<3x224x224xbf16, #tpu.memory_space<vmem>>, vector<1x224x224xbf16>
    %102 = vector.shape_cast %101 : vector<1x224x224xbf16> to vector<224x224xbf16>
    %cst_92 = arith.constant dense<0.000000e+00> : vector<28x224xf32>
    %103 = tpu.matmul %94, %102, %cst_92 {dimension_numbers = #tpu.dot_dimension_numbers<[1], [0], [0], [1], [0, 0, 1, 1], [], []>} : vector<28x224xbf16>, vector<224x224xbf16>, vector<28x224xf32> -> vector<28x224xf32>
    %c1_93 = arith.constant 1 : index
    %c0_94 = arith.constant 0 : index
    %c0_95 = arith.constant 0 : index
    %104 = vector.load %arg9[%c1_93, %c0_94, %c0_95] : memref<3x224x224xbf16, #tpu.memory_space<vmem>>, vector<1x224x224xbf16>
    %105 = vector.shape_cast %104 : vector<1x224x224xbf16> to vector<224x224xbf16>
    %cst_96 = arith.constant dense<0.000000e+00> : vector<28x224xf32>
    %106 = tpu.matmul %96, %105, %cst_96 {dimension_numbers = #tpu.dot_dimension_numbers<[1], [0], [0], [1], [0, 0, 1, 1], [], []>} : vector<28x224xbf16>, vector<224x224xbf16>, vector<28x224xf32> -> vector<28x224xf32>
    %107 = arith.addf %103, %106 : vector<28x224xf32>
    %c2_97 = arith.constant 2 : index
    %c0_98 = arith.constant 0 : index
    %c0_99 = arith.constant 0 : index
    %108 = vector.load %arg9[%c2_97, %c0_98, %c0_99] : memref<3x224x224xbf16, #tpu.memory_space<vmem>>, vector<1x224x224xbf16>
    %109 = vector.shape_cast %108 : vector<1x224x224xbf16> to vector<224x224xbf16>
    %cst_100 = arith.constant dense<0.000000e+00> : vector<28x224xf32>
    %110 = tpu.matmul %100, %109, %cst_100 {dimension_numbers = #tpu.dot_dimension_numbers<[1], [0], [0], [1], [0, 0, 1, 1], [], []>} : vector<28x224xbf16>, vector<224x224xbf16>, vector<28x224xf32> -> vector<28x224xf32>
    %111 = arith.addf %107, %110 : vector<28x224xf32>
    %c0_101 = arith.constant 0 : index
    %c0_102 = arith.constant 0 : index
    %112 = vector.load %arg14[%c0_101, %c0_102] : memref<2x224xf32, #tpu.memory_space<vmem>>, vector<1x224xf32>
    %113 = vector.broadcast %112 : vector<1x224xf32> to vector<28x224xf32>
    %114 = arith.mulf %111, %113 : vector<28x224xf32>
    %c1_103 = arith.constant 1 : index
    %c0_104 = arith.constant 0 : index
    %115 = vector.load %arg14[%c1_103, %c0_104] : memref<2x224xf32, #tpu.memory_space<vmem>>, vector<1x224xf32>
    %116 = vector.broadcast %115 : vector<1x224xf32> to vector<28x224xf32>
    %117 = arith.addf %114, %116 : vector<28x224xf32>
    %cst_105 = arith.constant 0.000000e+00 : f32
    %118 = vector.broadcast %cst_105 : f32 to vector<28x224xf32>
    %119 = arith.maximumf %117, %118 : vector<28x224xf32>
    %c8_106 = arith.constant 8 : index
    %c0_107 = arith.constant 0 : index
    %120 = vector.load %arg29[%c8_106, %c0_107] : memref<44x224xf32, #tpu.memory_space<vmem>>, vector<28x224xf32>
    tpu.vector_store %arg29[%c8_106, %c0_107], %119 {strides = array<i32>} : memref<44x224xf32, #tpu.memory_space<vmem>>, vector<28x224xf32>,
    %cst_108 = arith.constant 0.000000e+00 : f32
    %121 = vector.broadcast %cst_108 : f32 to vector<1x224xf32>
    %c7_109 = arith.constant 7 : index
    %c0_110 = arith.constant 0 : index
    %122 = vector.load %arg29[%c7_109, %c0_110] : memref<44x224xf32, #tpu.memory_space<vmem>>, vector<1x224xf32>
    tpu.vector_store %arg29[%c7_109, %c0_110], %121 {strides = array<i32>} : memref<44x224xf32, #tpu.memory_space<vmem>>, vector<1x224xf32>,
    %c36_111 = arith.constant 36 : index
    %c0_112 = arith.constant 0 : index
    %123 = vector.load %arg29[%c36_111, %c0_112] : memref<44x224xf32, #tpu.memory_space<vmem>>, vector<1x224xf32>
    tpu.vector_store %arg29[%c36_111, %c0_112], %121 {strides = array<i32>} : memref<44x224xf32, #tpu.memory_space<vmem>>, vector<1x224xf32>,
    %c0_113 = arith.constant 0 : index
    %c0_114 = arith.constant 0 : index
    %124 = vector.load %arg3[%c0_113, %c0_114] : memref<28x2xf32, #tpu.memory_space<vmem>>, vector<28x1xf32>
    %c0_115 = arith.constant 0 : index
    %c1_116 = arith.constant 1 : index
    %125 = vector.load %arg3[%c0_115, %c1_116] : memref<28x2xf32, #tpu.memory_space<vmem>>, vector<28x1xf32>
    %c7_117 = arith.constant 7 : index
    %c0_118 = arith.constant 0 : index
    %126 = vector.load %arg29[%c7_117, %c0_118] : memref<44x224xf32, #tpu.memory_space<vmem>>, vector<28x224xf32>
    %127 = vector.broadcast %124 : vector<28x1xf32> to vector<28x224xf32>
    %128 = arith.mulf %126, %127 : vector<28x224xf32>
    %129 = arith.truncf %128 : vector<28x224xf32> to vector<28x224xbf16>
    %c8_119 = arith.constant 8 : index
    %c0_120 = arith.constant 0 : index
    %130 = vector.load %arg29[%c8_119, %c0_120] : memref<44x224xf32, #tpu.memory_space<vmem>>, vector<28x224xf32>
    %131 = arith.truncf %130 : vector<28x224xf32> to vector<28x224xbf16>
    %c9_121 = arith.constant 9 : index
    %c0_122 = arith.constant 0 : index
    %132 = vector.load %arg29[%c9_121, %c0_122] : memref<44x224xf32, #tpu.memory_space<vmem>>, vector<28x224xf32>
    %133 = vector.broadcast %125 : vector<28x1xf32> to vector<28x224xf32>
    %134 = arith.mulf %132, %133 : vector<28x224xf32>
    %135 = arith.truncf %134 : vector<28x224xf32> to vector<28x224xbf16>
    %c0_123 = arith.constant 0 : index
    %c0_124 = arith.constant 0 : index
    %c0_125 = arith.constant 0 : index
    %136 = vector.load %arg10[%c0_123, %c0_124, %c0_125] : memref<3x224x224xbf16, #tpu.memory_space<vmem>>, vector<1x224x224xbf16>
    %137 = vector.shape_cast %136 : vector<1x224x224xbf16> to vector<224x224xbf16>
    %cst_126 = arith.constant dense<0.000000e+00> : vector<28x224xf32>
    %138 = tpu.matmul %129, %137, %cst_126 {dimension_numbers = #tpu.dot_dimension_numbers<[1], [0], [0], [1], [0, 0, 1, 1], [], []>} : vector<28x224xbf16>, vector<224x224xbf16>, vector<28x224xf32> -> vector<28x224xf32>
    %c1_127 = arith.constant 1 : index
    %c0_128 = arith.constant 0 : index
    %c0_129 = arith.constant 0 : index
    %139 = vector.load %arg10[%c1_127, %c0_128, %c0_129] : memref<3x224x224xbf16, #tpu.memory_space<vmem>>, vector<1x224x224xbf16>
    %140 = vector.shape_cast %139 : vector<1x224x224xbf16> to vector<224x224xbf16>
    %cst_130 = arith.constant dense<0.000000e+00> : vector<28x224xf32>
    %141 = tpu.matmul %131, %140, %cst_130 {dimension_numbers = #tpu.dot_dimension_numbers<[1], [0], [0], [1], [0, 0, 1, 1], [], []>} : vector<28x224xbf16>, vector<224x224xbf16>, vector<28x224xf32> -> vector<28x224xf32>
    %142 = arith.addf %138, %141 : vector<28x224xf32>
    %c2_131 = arith.constant 2 : index
    %c0_132 = arith.constant 0 : index
    %c0_133 = arith.constant 0 : index
    %143 = vector.load %arg10[%c2_131, %c0_132, %c0_133] : memref<3x224x224xbf16, #tpu.memory_space<vmem>>, vector<1x224x224xbf16>
    %144 = vector.shape_cast %143 : vector<1x224x224xbf16> to vector<224x224xbf16>
    %cst_134 = arith.constant dense<0.000000e+00> : vector<28x224xf32>
    %145 = tpu.matmul %135, %144, %cst_134 {dimension_numbers = #tpu.dot_dimension_numbers<[1], [0], [0], [1], [0, 0, 1, 1], [], []>} : vector<28x224xbf16>, vector<224x224xbf16>, vector<28x224xf32> -> vector<28x224xf32>
    %146 = arith.addf %142, %145 : vector<28x224xf32>
    %c0_135 = arith.constant 0 : index
    %c0_136 = arith.constant 0 : index
    %147 = vector.load %arg15[%c0_135, %c0_136] : memref<2x224xf32, #tpu.memory_space<vmem>>, vector<1x224xf32>
    %148 = vector.broadcast %147 : vector<1x224xf32> to vector<28x224xf32>
    %149 = arith.mulf %146, %148 : vector<28x224xf32>
    %c1_137 = arith.constant 1 : index
    %c0_138 = arith.constant 0 : index
    %150 = vector.load %arg15[%c1_137, %c0_138] : memref<2x224xf32, #tpu.memory_space<vmem>>, vector<1x224xf32>
    %151 = vector.broadcast %150 : vector<1x224xf32> to vector<28x224xf32>
    %152 = arith.addf %149, %151 : vector<28x224xf32>
    %cst_139 = arith.constant 0.000000e+00 : f32
    %153 = vector.broadcast %cst_139 : f32 to vector<28x224xf32>
    %154 = arith.maximumf %152, %153 : vector<28x224xf32>
    %155 = arith.truncf %154 : vector<28x224xf32> to vector<28x224xbf16>
    %c0_140 = arith.constant 0 : index
    %c0_141 = arith.constant 0 : index
    %c0_142 = arith.constant 0 : index
    %156 = vector.load %arg18[%c0_140, %c0_141, %c0_142] : memref<2x224x112xbf16, #tpu.memory_space<vmem>>, vector<1x224x112xbf16>
    %157 = vector.shape_cast %156 : vector<1x224x112xbf16> to vector<224x112xbf16>
    %cst_143 = arith.constant dense<0.000000e+00> : vector<28x112xf32>
    %158 = tpu.matmul %155, %157, %cst_143 {dimension_numbers = #tpu.dot_dimension_numbers<[1], [0], [0], [1], [0, 0, 1, 1], [], []>} : vector<28x224xbf16>, vector<224x112xbf16>, vector<28x112xf32> -> vector<28x112xf32>
    %c1_144 = arith.constant 1 : index
    %c0_145 = arith.constant 0 : index
    %c0_146 = arith.constant 0 : index
    %159 = vector.load %arg18[%c1_144, %c0_145, %c0_146] : memref<2x224x112xbf16, #tpu.memory_space<vmem>>, vector<1x224x112xbf16>
    %160 = vector.shape_cast %159 : vector<1x224x112xbf16> to vector<224x112xbf16>
    %cst_147 = arith.constant dense<0.000000e+00> : vector<28x112xf32>
    %161 = tpu.matmul %155, %160, %cst_147 {dimension_numbers = #tpu.dot_dimension_numbers<[1], [0], [0], [1], [0, 0, 1, 1], [], []>} : vector<28x224xbf16>, vector<224x112xbf16>, vector<28x112xf32> -> vector<28x112xf32>
    %162 = arith.maximumf %158, %161 : vector<28x112xf32>
    %163 = vector.extract_strided_slice %162 {offsets = [0, 0], sizes = [27, 112], strides = [1, 1]} : vector<28x112xf32> to vector<27x112xf32>
    %164 = vector.extract_strided_slice %162 {offsets = [1, 0], sizes = [27, 112], strides = [1, 1]} : vector<28x112xf32> to vector<27x112xf32>
    %165 = arith.maximumf %163, %164 : vector<27x112xf32>
    %c0_148 = arith.constant 0 : index
    %c0_149 = arith.constant 0 : index
    %166 = vector.load %arg6[%c0_148, %c0_149] : memref<14x27xbf16, #tpu.memory_space<vmem>>, vector<14x27xbf16>
    %167 = arith.truncf %165 : vector<27x112xf32> to vector<27x112xbf16>
    %cst_150 = arith.constant dense<0.000000e+00> : vector<14x112xf32>
    %168 = tpu.matmul %166, %167, %cst_150 {dimension_numbers = #tpu.dot_dimension_numbers<[1], [0], [0], [1], [0, 0, 1, 1], [], []>} : vector<14x27xbf16>, vector<27x112xbf16>, vector<14x112xf32> -> vector<14x112xf32>
    %c8_151 = arith.constant 8 : index
    %c0_152 = arith.constant 0 : index
    %169 = vector.load %arg30[%c8_151, %c0_152] : memref<30x112xf32, #tpu.memory_space<vmem>>, vector<14x112xf32>
    tpu.vector_store %arg30[%c8_151, %c0_152], %168 {strides = array<i32>} : memref<30x112xf32, #tpu.memory_space<vmem>>, vector<14x112xf32>,
    %cst_153 = arith.constant 0.000000e+00 : f32
    %170 = vector.broadcast %cst_153 : f32 to vector<1x112xf32>
    %c7_154 = arith.constant 7 : index
    %c0_155 = arith.constant 0 : index
    %171 = vector.load %arg30[%c7_154, %c0_155] : memref<30x112xf32, #tpu.memory_space<vmem>>, vector<1x112xf32>
    tpu.vector_store %arg30[%c7_154, %c0_155], %170 {strides = array<i32>} : memref<30x112xf32, #tpu.memory_space<vmem>>, vector<1x112xf32>,
    %c22 = arith.constant 22 : index
    %c0_156 = arith.constant 0 : index
    %172 = vector.load %arg30[%c22, %c0_156] : memref<30x112xf32, #tpu.memory_space<vmem>>, vector<1x112xf32>
    tpu.vector_store %arg30[%c22, %c0_156], %170 {strides = array<i32>} : memref<30x112xf32, #tpu.memory_space<vmem>>, vector<1x112xf32>,
    %c0_157 = arith.constant 0 : index
    %c0_158 = arith.constant 0 : index
    %173 = vector.load %arg4[%c0_157, %c0_158] : memref<14x2xf32, #tpu.memory_space<vmem>>, vector<14x1xf32>
    %c0_159 = arith.constant 0 : index
    %c1_160 = arith.constant 1 : index
    %174 = vector.load %arg4[%c0_159, %c1_160] : memref<14x2xf32, #tpu.memory_space<vmem>>, vector<14x1xf32>
    %c7_161 = arith.constant 7 : index
    %c0_162 = arith.constant 0 : index
    %175 = vector.load %arg30[%c7_161, %c0_162] : memref<30x112xf32, #tpu.memory_space<vmem>>, vector<14x112xf32>
    %176 = vector.broadcast %173 : vector<14x1xf32> to vector<14x112xf32>
    %177 = arith.mulf %175, %176 : vector<14x112xf32>
    %178 = arith.truncf %177 : vector<14x112xf32> to vector<14x112xbf16>
    %c8_163 = arith.constant 8 : index
    %c0_164 = arith.constant 0 : index
    %179 = vector.load %arg30[%c8_163, %c0_164] : memref<30x112xf32, #tpu.memory_space<vmem>>, vector<14x112xf32>
    %180 = arith.truncf %179 : vector<14x112xf32> to vector<14x112xbf16>
    %c9_165 = arith.constant 9 : index
    %c0_166 = arith.constant 0 : index
    %181 = vector.load %arg30[%c9_165, %c0_166] : memref<30x112xf32, #tpu.memory_space<vmem>>, vector<14x112xf32>
    %182 = vector.broadcast %174 : vector<14x1xf32> to vector<14x112xf32>
    %183 = arith.mulf %181, %182 : vector<14x112xf32>
    %184 = arith.truncf %183 : vector<14x112xf32> to vector<14x112xbf16>
    %c0_167 = arith.constant 0 : index
    %c0_168 = arith.constant 0 : index
    %c0_169 = arith.constant 0 : index
    %185 = vector.load %arg11[%c0_167, %c0_168, %c0_169] : memref<3x112x224xbf16, #tpu.memory_space<vmem>>, vector<1x112x224xbf16>
    %186 = vector.shape_cast %185 : vector<1x112x224xbf16> to vector<112x224xbf16>
    %cst_170 = arith.constant dense<0.000000e+00> : vector<14x224xf32>
    %187 = tpu.matmul %178, %186, %cst_170 {dimension_numbers = #tpu.dot_dimension_numbers<[1], [0], [0], [1], [0, 0, 1, 1], [], []>} : vector<14x112xbf16>, vector<112x224xbf16>, vector<14x224xf32> -> vector<14x224xf32>
    %c1_171 = arith.constant 1 : index
    %c0_172 = arith.constant 0 : index
    %c0_173 = arith.constant 0 : index
    %188 = vector.load %arg11[%c1_171, %c0_172, %c0_173] : memref<3x112x224xbf16, #tpu.memory_space<vmem>>, vector<1x112x224xbf16>
    %189 = vector.shape_cast %188 : vector<1x112x224xbf16> to vector<112x224xbf16>
    %cst_174 = arith.constant dense<0.000000e+00> : vector<14x224xf32>
    %190 = tpu.matmul %180, %189, %cst_174 {dimension_numbers = #tpu.dot_dimension_numbers<[1], [0], [0], [1], [0, 0, 1, 1], [], []>} : vector<14x112xbf16>, vector<112x224xbf16>, vector<14x224xf32> -> vector<14x224xf32>
    %191 = arith.addf %187, %190 : vector<14x224xf32>
    %c2_175 = arith.constant 2 : index
    %c0_176 = arith.constant 0 : index
    %c0_177 = arith.constant 0 : index
    %192 = vector.load %arg11[%c2_175, %c0_176, %c0_177] : memref<3x112x224xbf16, #tpu.memory_space<vmem>>, vector<1x112x224xbf16>
    %193 = vector.shape_cast %192 : vector<1x112x224xbf16> to vector<112x224xbf16>
    %cst_178 = arith.constant dense<0.000000e+00> : vector<14x224xf32>
    %194 = tpu.matmul %184, %193, %cst_178 {dimension_numbers = #tpu.dot_dimension_numbers<[1], [0], [0], [1], [0, 0, 1, 1], [], []>} : vector<14x112xbf16>, vector<112x224xbf16>, vector<14x224xf32> -> vector<14x224xf32>
    %195 = arith.addf %191, %194 : vector<14x224xf32>
    %c0_179 = arith.constant 0 : index
    %c0_180 = arith.constant 0 : index
    %196 = vector.load %arg16[%c0_179, %c0_180] : memref<2x224xf32, #tpu.memory_space<vmem>>, vector<1x224xf32>
    %197 = vector.broadcast %196 : vector<1x224xf32> to vector<14x224xf32>
    %198 = arith.mulf %195, %197 : vector<14x224xf32>
    %c1_181 = arith.constant 1 : index
    %c0_182 = arith.constant 0 : index
    %199 = vector.load %arg16[%c1_181, %c0_182] : memref<2x224xf32, #tpu.memory_space<vmem>>, vector<1x224xf32>
    %200 = vector.broadcast %199 : vector<1x224xf32> to vector<14x224xf32>
    %201 = arith.addf %198, %200 : vector<14x224xf32>
    %cst_183 = arith.constant 0.000000e+00 : f32
    %202 = vector.broadcast %cst_183 : f32 to vector<14x224xf32>
    %203 = arith.maximumf %201, %202 : vector<14x224xf32>
    %204 = arith.truncf %203 : vector<14x224xf32> to vector<14x224xbf16>
    %c0_184 = arith.constant 0 : index
    %c0_185 = arith.constant 0 : index
    %205 = vector.load %arg19[%c0_184, %c0_185] : memref<224x56xbf16, #tpu.memory_space<vmem>>, vector<224x56xbf16>
    %cst_186 = arith.constant dense<0.000000e+00> : vector<14x56xf32>
    %206 = tpu.matmul %204, %205, %cst_186 {dimension_numbers = #tpu.dot_dimension_numbers<[1], [0], [0], [1], [0, 0, 1, 1], [], []>} : vector<14x224xbf16>, vector<224x56xbf16>, vector<14x56xf32> -> vector<14x56xf32>
    %c0_187 = arith.constant 0 : index
    %c0_188 = arith.constant 0 : index
    %207 = vector.load %arg20[%c0_187, %c0_188] : memref<1x56xf32, #tpu.memory_space<vmem>>, vector<1x56xf32>
    %208 = vector.broadcast %207 : vector<1x56xf32> to vector<14x56xf32>
    %209 = arith.addf %206, %208 : vector<14x56xf32>
    %210 = arith.truncf %209 : vector<14x56xf32> to vector<14x56xbf16>
    %c0_189 = arith.constant 0 : index
    %c0_190 = arith.constant 0 : index
    %211 = vector.load %arg21[%c0_189, %c0_190] : memref<56x70xbf16, #tpu.memory_space<vmem>>, vector<56x70xbf16>
    %cst_191 = arith.constant dense<0.000000e+00> : vector<14x70xf32>
    %212 = tpu.matmul %210, %211, %cst_191 {dimension_numbers = #tpu.dot_dimension_numbers<[1], [0], [0], [1], [0, 0, 1, 1], [], []>} : vector<14x56xbf16>, vector<56x70xbf16>, vector<14x70xf32> -> vector<14x70xf32>
    %c0_192 = arith.constant 0 : index
    %c0_193 = arith.constant 0 : index
    %213 = vector.load %arg23[%c0_192, %c0_193] : memref<14x70xf32, #tpu.memory_space<vmem>>, vector<14x70xf32>
    %214 = arith.mulf %212, %213 : vector<14x70xf32>
    %c0_194 = arith.constant 0 : index
    %c0_195 = arith.constant 0 : index
    %215 = vector.load %arg24[%c0_194, %c0_195] : memref<70x10xf32, #tpu.memory_space<vmem>>, vector<70x10xf32>
    %cst_196 = arith.constant dense<0.000000e+00> : vector<14x10xf32>
    %216 = tpu.matmul %214, %215, %cst_196 {dimension_numbers = #tpu.dot_dimension_numbers<[1], [0], [0], [1], [0, 0, 1, 1], [], []>} : vector<14x70xf32>, vector<70x10xf32>, vector<14x10xf32> -> vector<14x10xf32>
    %c0_197 = arith.constant 0 : index
    %c0_198 = arith.constant 0 : index
    %217 = vector.load %arg25[%c0_197, %c0_198] : memref<2x14xf32, #tpu.memory_space<vmem>>, vector<2x14xf32>
    %cst_199 = arith.constant dense<0.000000e+00> : vector<2x10xf32>
    %218 = tpu.matmul %217, %216, %cst_199 {dimension_numbers = #tpu.dot_dimension_numbers<[1], [0], [0], [1], [0, 0, 1, 1], [], []>} : vector<2x14xf32>, vector<14x10xf32>, vector<2x10xf32> -> vector<2x10xf32>
    %c0_200 = arith.constant 0 : index
    %c0_201 = arith.constant 0 : index
    %219 = vector.load %arg22[%c0_200, %c0_201] : memref<1x10xf32, #tpu.memory_space<vmem>>, vector<1x10xf32>
    %220 = vector.broadcast %219 : vector<1x10xf32> to vector<2x10xf32>
    %221 = arith.addf %218, %220 : vector<2x10xf32>
    %cst_202 = arith.constant dense<0xFF800000> : vector<2xf32>
    %222 = vector.multi_reduction <maximumf>, %221, %cst_202 [1] : vector<2x10xf32> to vector<2xf32>
    %223 = vector.shape_cast %222 : vector<2xf32> to vector<2x1xf32>
    %224 = vector.broadcast %223 : vector<2x1xf32> to vector<2x10xf32>
    %225 = arith.subf %221, %224 : vector<2x10xf32>
    %226 = math.exp %225 : vector<2x10xf32>
    %cst_203 = arith.constant dense<0.000000e+00> : vector<2xf32>
    %227 = vector.multi_reduction <add>, %226, %cst_203 [1] : vector<2x10xf32> to vector<2xf32>
    %228 = vector.shape_cast %227 : vector<2xf32> to vector<2x1xf32>
    %229 = math.log %228 : vector<2x1xf32>
    %230 = arith.addf %223, %229 : vector<2x1xf32>
    %231 = vector.broadcast %230 : vector<2x1xf32> to vector<2x10xf32>
    %232 = arith.subf %221, %231 : vector<2x10xf32>
    %c0_204 = arith.constant 0 : index
    %c0_205 = arith.constant 0 : index
    %233 = vector.load %arg26[%c0_204, %c0_205] : memref<2x10xf32, #tpu.memory_space<vmem>>, vector<2x10xf32>
    tpu.vector_store %arg26[%c0_204, %c0_205], %232 {strides = array<i32>} : memref<2x10xf32, #tpu.memory_space<vmem>>, vector<2x10xf32>,
    return
  }
  func.func @transform_0(%arg0: i32) -> (i32, i32) {
    %c0_i32 = arith.constant 0 : i32
    %c0_i32_0 = arith.constant 0 : i32
    return %arg0, %c0_i32 : i32, i32
  }
  func.func @transform_1(%arg0: i32) -> (i32, i32) {
    %c0_i32 = arith.constant 0 : i32
    %c0_i32_0 = arith.constant 0 : i32
    %c0_i32_1 = arith.constant 0 : i32
    return %c0_i32, %c0_i32_0 : i32, i32
  }
  func.func @transform_2(%arg0: i32) -> (i32, i32) {
    %c0_i32 = arith.constant 0 : i32
    %c0_i32_0 = arith.constant 0 : i32
    %c0_i32_1 = arith.constant 0 : i32
    return %c0_i32, %c0_i32_0 : i32, i32
  }
  func.func @transform_3(%arg0: i32) -> (i32, i32) {
    %c0_i32 = arith.constant 0 : i32
    %c0_i32_0 = arith.constant 0 : i32
    %c0_i32_1 = arith.constant 0 : i32
    return %c0_i32, %c0_i32_0 : i32, i32
  }
  func.func @transform_4(%arg0: i32) -> (i32, i32) {
    %c0_i32 = arith.constant 0 : i32
    %c0_i32_0 = arith.constant 0 : i32
    %c0_i32_1 = arith.constant 0 : i32
    return %c0_i32, %c0_i32_0 : i32, i32
  }
  func.func @transform_5(%arg0: i32) -> (i32, i32) {
    %c0_i32 = arith.constant 0 : i32
    %c0_i32_0 = arith.constant 0 : i32
    %c0_i32_1 = arith.constant 0 : i32
    return %c0_i32, %c0_i32_0 : i32, i32
  }
  func.func @transform_6(%arg0: i32) -> (i32, i32, i32) {
    %c0_i32 = arith.constant 0 : i32
    %c0_i32_0 = arith.constant 0 : i32
    %c0_i32_1 = arith.constant 0 : i32
    %c0_i32_2 = arith.constant 0 : i32
    return %c0_i32, %c0_i32_0, %c0_i32_1 : i32, i32, i32
  }
  func.func @transform_7(%arg0: i32) -> (i32, i32, i32) {
    %c0_i32 = arith.constant 0 : i32
    %c0_i32_0 = arith.constant 0 : i32
    %c0_i32_1 = arith.constant 0 : i32
    %c0_i32_2 = arith.constant 0 : i32
    return %c0_i32, %c0_i32_0, %c0_i32_1 : i32, i32, i32
  }
  func.func @transform_8(%arg0: i32) -> (i32, i32, i32) {
    %c0_i32 = arith.constant 0 : i32
    %c0_i32_0 = arith.constant 0 : i32
    %c0_i32_1 = arith.constant 0 : i32
    %c0_i32_2 = arith.constant 0 : i32
    return %c0_i32, %c0_i32_0, %c0_i32_1 : i32, i32, i32
  }
  func.func @transform_9(%arg0: i32) -> (i32, i32, i32) {
    %c0_i32 = arith.constant 0 : i32
    %c0_i32_0 = arith.constant 0 : i32
    %c0_i32_1 = arith.constant 0 : i32
    %c0_i32_2 = arith.constant 0 : i32
    return %c0_i32, %c0_i32_0, %c0_i32_1 : i32, i32, i32
  }
  func.func @transform_10(%arg0: i32) -> (i32, i32, i32) {
    %c0_i32 = arith.constant 0 : i32
    %c0_i32_0 = arith.constant 0 : i32
    %c0_i32_1 = arith.constant 0 : i32
    %c0_i32_2 = arith.constant 0 : i32
    return %c0_i32, %c0_i32_0, %c0_i32_1 : i32, i32, i32
  }
  func.func @transform_11(%arg0: i32) -> (i32, i32) {
    %c0_i32 = arith.constant 0 : i32
    %c0_i32_0 = arith.constant 0 : i32
    %c0_i32_1 = arith.constant 0 : i32
    return %c0_i32, %c0_i32_0 : i32, i32
  }
  func.func @transform_12(%arg0: i32) -> (i32, i32) {
    %c0_i32 = arith.constant 0 : i32
    %c0_i32_0 = arith.constant 0 : i32
    %c0_i32_1 = arith.constant 0 : i32
    return %c0_i32, %c0_i32_0 : i32, i32
  }
  func.func @transform_13(%arg0: i32) -> (i32, i32) {
    %c0_i32 = arith.constant 0 : i32
    %c0_i32_0 = arith.constant 0 : i32
    %c0_i32_1 = arith.constant 0 : i32
    return %c0_i32, %c0_i32_0 : i32, i32
  }
  func.func @transform_14(%arg0: i32) -> (i32, i32) {
    %c0_i32 = arith.constant 0 : i32
    %c0_i32_0 = arith.constant 0 : i32
    %c0_i32_1 = arith.constant 0 : i32
    return %c0_i32, %c0_i32_0 : i32, i32
  }
  func.func @transform_15(%arg0: i32) -> (i32, i32) {
    %c0_i32 = arith.constant 0 : i32
    %c0_i32_0 = arith.constant 0 : i32
    %c0_i32_1 = arith.constant 0 : i32
    return %c0_i32, %c0_i32_0 : i32, i32
  }
  func.func @transform_16(%arg0: i32) -> (i32, i32, i32) {
    %c0_i32 = arith.constant 0 : i32
    %c0_i32_0 = arith.constant 0 : i32
    %c0_i32_1 = arith.constant 0 : i32
    %c0_i32_2 = arith.constant 0 : i32
    return %c0_i32, %c0_i32_0, %c0_i32_1 : i32, i32, i32
  }
  func.func @transform_17(%arg0: i32) -> (i32, i32, i32) {
    %c0_i32 = arith.constant 0 : i32
    %c0_i32_0 = arith.constant 0 : i32
    %c0_i32_1 = arith.constant 0 : i32
    %c0_i32_2 = arith.constant 0 : i32
    return %c0_i32, %c0_i32_0, %c0_i32_1 : i32, i32, i32
  }
  func.func @transform_18(%arg0: i32) -> (i32, i32) {
    %c0_i32 = arith.constant 0 : i32
    %c0_i32_0 = arith.constant 0 : i32
    %c0_i32_1 = arith.constant 0 : i32
    return %c0_i32, %c0_i32_0 : i32, i32
  }
  func.func @transform_19(%arg0: i32) -> (i32, i32) {
    %c0_i32 = arith.constant 0 : i32
    %c0_i32_0 = arith.constant 0 : i32
    %c0_i32_1 = arith.constant 0 : i32
    return %c0_i32, %c0_i32_0 : i32, i32
  }
  func.func @transform_20(%arg0: i32) -> (i32, i32) {
    %c0_i32 = arith.constant 0 : i32
    %c0_i32_0 = arith.constant 0 : i32
    %c0_i32_1 = arith.constant 0 : i32
    return %c0_i32, %c0_i32_0 : i32, i32
  }
  func.func @transform_21(%arg0: i32) -> (i32, i32) {
    %c0_i32 = arith.constant 0 : i32
    %c0_i32_0 = arith.constant 0 : i32
    %c0_i32_1 = arith.constant 0 : i32
    return %c0_i32, %c0_i32_0 : i32, i32
  }
  func.func @transform_22(%arg0: i32) -> (i32, i32) {
    %c0_i32 = arith.constant 0 : i32
    %c0_i32_0 = arith.constant 0 : i32
    %c0_i32_1 = arith.constant 0 : i32
    return %c0_i32, %c0_i32_0 : i32, i32
  }
  func.func @transform_23(%arg0: i32) -> (i32, i32) {
    %c0_i32 = arith.constant 0 : i32
    %c0_i32_0 = arith.constant 0 : i32
    %c0_i32_1 = arith.constant 0 : i32
    return %c0_i32, %c0_i32_0 : i32, i32
  }
  func.func @transform_24(%arg0: i32) -> (i32, i32) {
    %c0_i32 = arith.constant 0 : i32
    %c0_i32_0 = arith.constant 0 : i32
    %c0_i32_1 = arith.constant 0 : i32
    return %c0_i32, %c0_i32_0 : i32, i32
  }
  func.func @transform_25(%arg0: i32) -> (i32, i32) {
    %c0_i32 = arith.constant 0 : i32
    %c0_i32_0 = arith.constant 0 : i32
    return %arg0, %c0_i32 : i32, i32
  }
}

</mosaic_0001>

<bundles_post_ra>
// kernel: net_forward.1
= control target key start
LH: loop header
LB: loop body
LE: loop exit
PB: predicated region body
PF: predicated region fallthrough
CT: control target
= control target key end

     0   :  { %s15679_s0 = inlined_call_operand.vmem [shape: f32[56,28], index: 0, kind: input, shape index: {}]   ;;  %s15680_s1 = inlined_call_operand.vmem [shape: f32[56,2], index: 1, kind: input, shape index: {}]   ;;  %s15681_s2 = inlined_call_operand.vmem [shape: f32[28,2], index: 2, kind: input, shape index: {}]   ;;  %s15682_s3 = inlined_call_operand.vmem [shape: f32[14,2], index: 3, kind: input, shape index: {}]   ;;  %s15683_s4 = inlined_call_operand.vmem [shape: bf16[28,55], index: 4, kind: input, shape index: {}]   ;;  %s15684_s5 = inlined_call_operand.vmem [shape: bf16[14,27], index: 5, kind: input, shape index: {}]   ;;  %s15685_s6 = inlined_call_operand.hbm [shape: bf16[3,28,448], index: 6, kind: input, shape index: {}]   ;;  %s15686_s7 = inlined_call_operand.vmem [shape: bf16[3,448,448], index: 7, kind: input, shape index: {}]   ;;  %s15687_s8 = inlined_call_operand.vmem [shape: bf16[3,224,224], index: 8, kind: input, shape index: {}]   ;;  %s15688_s9 = inlined_call_operand.hbm [shape: bf16[3,224,224], index: 9, kind: input, shape index: {}]   ;;  %s15689_s10 = inlined_call_operand.vmem [shape: bf16[3,112,224], index: 10, kind: input, shape index: {}]   ;;  %s15690_s11 = inlined_call_operand.vmem [shape: f32[2,448], index: 11, kind: input, shape index: {}]   ;;  %s15691_s12 = inlined_call_operand.hbm [shape: f32[2,448], index: 12, kind: input, shape index: {}]   ;;  %s15692_s13 = inlined_call_operand.vmem [shape: f32[2,224], index: 13, kind: input, shape index: {}]   ;;  %s15693_s14 = inlined_call_operand.vmem [shape: f32[2,224], index: 14, kind: input, shape index: {}]   ;;  %s15694_s15 = inlined_call_operand.hbm [shape: f32[2,224], index: 15, kind: input, shape index: {}]   ;;  %s15695_s16 = inlined_call_operand.vmem [shape: bf16[2,448,224], index: 16, kind: input, shape index: {}]   ;;  %s15696_s17 = inlined_call_operand.hbm [shape: bf16[2,224,112], index: 17, kind: input, shape index: {}]   ;;  %s15697_s18 = inlined_call_operand.vmem [shape: bf16[224,56], index: 18, kind: input, shape index: {}]   ;;  %s15698_s19 = inlined_call_operand.vmem [shape: f32[1,56], index: 19, kind: input, shape index: {}]   ;;  %s15699_s20 = inlined_call_operand.hbm [shape: bf16[56,70], index: 20, kind: input, shape index: {}]   ;;  %s15700_s21 = inlined_call_operand.hbm [shape: f32[1,10], index: 21, kind: input, shape index: {}]   ;;  %s15701_s22 = inlined_call_operand.vmem [shape: f32[14,70], index: 22, kind: input, shape index: {}]   ;;  %s15702_s23 = inlined_call_operand.vmem [shape: f32[70,10], index: 23, kind: input, shape index: {}]   ;;  %s15703_s24 = inlined_call_operand.vmem [shape: f32[2,14], index: 24, kind: input, shape index: {}]   ;;  %s15704_s25 = inlined_call_operand.hbm [shape: f32[2,10], index: 25, kind: output, shape index: {}]  }
   0x1   :  { %15751 = sst [smem:[#allocation65_spill]] %s15679_s0 }
   0x2   :  { %15752 = sst [smem:[#allocation66_spill]] %s15680_s1 }
   0x3   :  { %15753 = sst [smem:[#allocation67_spill]] %s15681_s2 }
   0x4   :  { %15754 = sst [smem:[#allocation68_spill]] %s15682_s3 }
   0x5   :  { %15755 = sst [smem:[#allocation69_spill]] %s15683_s4 }
   0x6   :  { %15756 = sst [smem:[#allocation70_spill]] %s15684_s5 }
   0x7   :  { %15757 = sst [smem:[#allocation71_spill]] %s15685_s6 }
   0x8   :  { %15758 = sst [smem:[#allocation72_spill]] %s15686_s7 }
   0x9   :  { %15759 = sst [smem:[#allocation73_spill]] %s15687_s8 }
   0xa   :  { %15760 = sst [smem:[#allocation74_spill]] %s15688_s9 }
   0xb   :  { %30 = vsyncpa [#allocation7], 0 }
   0xc   :  { %31 = vsyncpa [#allocation10], 0 }
   0xd   :  { %32 = vsyncpa [#allocation13], 0 }
   0xe   :  { %33 = vsyncpa [#allocation16], 0 }
   0xf   :  { %34 = vsyncpa [#allocation8], 0  ;;  %s11705_s29 = smov [#allocation9]  }
  0x10   :  { %s68_s2 = sshll.u32 %s11705_s29, 4  ;;  %s69_s2 = int_to_ptr.vmem [resolvable:$true] %s68_s2 }
  0x11   :  { %s11543_s6 = scalar_lea.vmem %s69_s2, 10752  ;;  %p11548_p1 = scmp.lt.s32.totalorder %s69_s2, %s69_s2 }
  0x12   :  { %p11544_p0 = scmp.ne.s32.totalorder %s69_s2, %s11543_s6  ;;  %p11549_p2 = scmp.lt.s32.totalorder %s11543_s6, %s11543_s6 }
  0x14   :  { %p11550_p3 = por %p11549_p2, %p11548_p1 }
  0x16   :  { %p11551_p4 = pnand %p11550_p3, %p11544_p0 }
  0x18   :  { %11554 = shalt.err (!%p11551_p4)
}
  0x19   :  { %s11706_s30 = smov 128   ;;  %s11707_s7 = smov 8  }
  0x1a   :  { %s15761_s1 = sld [smem:[#allocation74_spill]]  ;;  %s11708_s8 = smov [#allocation12]  }
  0x1b   :  { %s99_s27 = sshll.u32 %s11708_s8, 4  ;;  %s100_s27 = int_to_ptr.vmem [resolvable:$true] %s99_s27 }
  0x1c   :  { %s11563_s4 = scalar_lea.vmem %s100_s27, 64  ;;  %p11568_p6 = scmp.lt.s32.totalorder %s100_s27, %s100_s27 }
  0x1d   :  { %p11564_p5 = scmp.ne.s32.totalorder %s100_s27, %s11563_s4  ;;  %p11569_p7 = scmp.lt.s32.totalorder %s11563_s4, %s11563_s4 }
  0x1f   :  { %p11570_p8 = por %p11569_p7, %p11568_p6 }
  0x20   :  { %74 = dma.hbm_to_vmem [thread:$0]  %s15761_s1, 10752, %s69_s2, [#allocation10], %s11706_s30, %s11706_s30, %s11707_s7  }
  0x21   :  { %p11571_p9 = pnand %p11570_p8, %p11564_p5 }
  0x23   :  { %11574 = shalt.err (!%p11571_p9)
}
  0x24   :  { %102 = dma.hbm_to_vmem [thread:$0]  %s15694_s15, 64, %s100_s27, [#allocation13]  }
  0x25   :  { %s11709_s5 = smov [#allocation15]   ;;  %s11710_s29 = smov [#allocation6]  }
  0x26   :  { %s126_s0 = sshll.u32 %s11709_s5, 4  ;;  %s52_s6 = sshll.u32 %s11710_s29, 4  ;;  %s127_s0 = int_to_ptr.vmem [resolvable:$true] %s126_s0  ;;  %s53_s6 = int_to_ptr.vmem [resolvable:$true] %s52_s6 }
  0x27   :  { %s11583_s2 = scalar_lea.vmem %s127_s0, 448  ;;  %p11588_p11 = scmp.lt.s32.totalorder %s127_s0, %s127_s0 }
  0x28   :  { %p11584_p10 = scmp.ne.s32.totalorder %s127_s0, %s11583_s2  ;;  %p11589_p12 = scmp.lt.s32.totalorder %s11583_s2, %s11583_s2 }
  0x2a   :  { %p11590_p13 = por %p11589_p12, %p11588_p11 }
  0x2c   :  { %p11591_p0 = pnand %p11590_p13, %p11584_p10 }
  0x2e   :  { %11594 = shalt.err (!%p11591_p0)
}
  0x2f   :  { %s11711_s30 = smov 64   ;;  %s11712_s7 = smov 4  }
  0x30   :  { %132 = dma.hbm_to_vmem [thread:$0]  %s15699_s20, 448, %s127_s0, [#allocation16], %s11711_s30, %s11711_s30, %s11712_s7  }
  0x31   :  { %s11603_s26 = scalar_lea.vmem %s53_s6, 3072  ;;  %p11608_p2 = scmp.lt.s32.totalorder %s53_s6, %s53_s6 }
  0x32   :  { %p11604_p1 = scmp.ne.s32.totalorder %s53_s6, %s11603_s26  ;;  %p11609_p3 = scmp.lt.s32.totalorder %s11603_s26, %s11603_s26 }
  0x34   :  { %p11610_p4 = por %p11609_p3, %p11608_p2 }
  0x36   :  { %p11611_p5 = pnand %p11610_p4, %p11604_p1 }
  0x38   :  { %11614 = shalt.err (!%p11611_p5)
}
  0x39   :  { %s11713_s1 = smov 256   ;;  %s11714_s8 = smov 16  }
  0x3a   :  { %s15762_s28 = sld [smem:[#allocation71_spill]]  ;;  %s11715_s9 = smov [#allocation11]  }
  0x3b   :  { %s85_s5 = sshll.u32 %s11715_s9, 4  ;;  %s11716_s29 = smov [#allocation14]   ;;  %s86_s5 = int_to_ptr.vmem [resolvable:$true] %s85_s5 }
  0x3c   :  { %s110_s2 = sshll.u32 %s11716_s29, 4  ;;  %s11623_s20 = scalar_lea.vmem %s86_s5, 128  ;;  %s111_s2 = int_to_ptr.vmem [resolvable:$true] %s110_s2 }
  0x3d   :  { %p11624_p6 = scmp.ne.s32.totalorder %s86_s5, %s11623_s20  ;;  %p11628_p7 = scmp.lt.s32.totalorder %s86_s5, %s86_s5 }
  0x3e   :  { %p11629_p8 = scmp.lt.s32.totalorder %s11623_s20, %s11623_s20 }
  0x40   :  { %58 = dma.hbm_to_vmem [thread:$0]  %s15762_s28, 3072, %s53_s6, [#allocation7], %s11713_s1, %s11713_s1, %s11714_s8  }
  0x41   :  { %p11630_p9 = por %p11629_p8, %p11628_p7 }
  0x43   :  { %p11631_p10 = pnand %p11630_p9, %p11624_p6 }
  0x45   :  { %11634 = shalt.err (!%p11631_p10)
}
  0x46   :  { %88 = dma.hbm_to_vmem [thread:$0]  %s15691_s12, 128, %s86_s5, [#allocation10]  }
  0x47   :  { %s11643_s15 = scalar_lea.vmem %s111_s2, 3584  ;;  %p11648_p12 = scmp.lt.s32.totalorder %s111_s2, %s111_s2 }
  0x48   :  { %p11644_p11 = scmp.ne.s32.totalorder %s111_s2, %s11643_s15  ;;  %p11649_p13 = scmp.lt.s32.totalorder %s11643_s15, %s11643_s15 }
  0x4a   :  { %p11650_p0 = por %p11649_p13, %p11648_p12 }
  0x4c   :  { %p11651_p1 = pnand %p11650_p0, %p11644_p11 }
  0x4e   :  { %11654 = shalt.err (!%p11651_p1)
}
  0x4f   :  { %116 = dma.hbm_to_vmem [thread:$0]  %s15696_s17, 3584, %s111_s2, [#allocation13], %s11711_s30, %s11711_s30, %s11712_s7  }
  0x50   :  { %s11717_s1 = smov [#allocation17]  }
  0x51   :  { %s139_s8 = sshll.u32 %s11717_s1, 4  ;;  %s140_s8 = int_to_ptr.vmem [resolvable:$true] %s139_s8 }
  0x52   :  { %s11663_s27 = scalar_lea.vmem %s140_s8, 16  ;;  %s11667_s12 = scalar_lea.vmem %s140_s8, 32 }
  0x53   :  { %p11664_p2 = scmp.ne.s32.totalorder %s140_s8, %s11663_s27  ;;  %p11668_p3 = scmp.lt.s32.totalorder %s140_s8, %s140_s8 }
  0x54   :  { %p11669_p4 = scmp.lt.s32.totalorder %s11667_s12, %s11663_s27 }
  0x56   :  { %p11670_p5 = por %p11669_p4, %p11668_p3 }
  0x58   :  { %p11671_p6 = pnand %p11670_p5, %p11664_p2 }
  0x5a   :  { %11674 = shalt.err (!%p11671_p6)
}
  0x5b   :  { %142 = dma.hbm_to_vmem [thread:$0]  %s15700_s21, 16, %s140_s8, [#allocation16]  }
  0x5c   :  { %11695 = dma.done.wait [#allocation7], 3072  }
  0x5d   :  { %11696 = vsyncadd [#allocation7], 4294964224 }
  0x5e   :  { %11697 = dma.done.wait [#allocation10], 10880  }
  0x5f   :  { %11698 = vsyncadd [#allocation10], 4294956416 }
  0x60   :  { %11699 = dma.done.wait [#allocation13], 3648  }
  0x61   :  { %11700 = vsyncadd [#allocation13], 4294963648 }
  0x62   :  { %11701 = dma.done.wait [#allocation16], 464  }
  0x63   :  { %11702 = vsyncadd [#allocation16], 4294966832  ;;  %v15716_v0 = vmov 0   ;;  %vm186_vm0 = vcmask 221184   ;;  %v15712_v1 = vmov 0.0   ;;  %s15763_s30 = sld [smem:[#allocation66_spill]] }
  0x64   :  { %10439 = vset.pattern.permute.xlu1 %v15716_v0  ;;  %10438 = vset.pattern.permute.xlu0 %v15716_v0  ;;  %187 = vst.msk [vmem:[#allocation2 + $0x7] sm:$0x1] %vm186_vm0, %v15712_v1  ;;  %188 = vst.msk [vmem:[#allocation2 + $0x40] sm:$0x1] %vm186_vm0, %v15712_v1  ;;  %vm371_vm1 = vcmask 1045504   ;;  %vm178_vm2 = vcmask 228352  }
  0x65   :  { %487 = vmatprep.mubr.bf16.mxu1 %v15716_v0  ;;  %416 = vmatprep.mubr.bf16.mxu0 %v15716_v0  ;;  %v10458_v6 = vld [vmem:[#allocation6 + $0x6c] ss:$16 sps:$4 sm:$0x3f]   ;;  %v10460_v7 = vld [vmem:[#allocation6 + $0x68] ss:$16 sps:$4 sm:$0x3f]  }
  0x66   :  { %v10461_v10 = vld [vmem:[#allocation6 + $0x4c] ss:$16 sps:$4 sm:$0xff]   ;;  %v379_v11 = vsel %vm371_vm1, %v10460_v7, 0  ;;  %v10463_v12 = vld [vmem:[#allocation6 + $0x48] ss:$16 sps:$4 sm:$0xff]   ;;  %9171 = vmatprep.subr.msk.bf16.mxu1 %vm371_vm1, %v10458_v6  ;;  %s15764_s8 = sld [smem:[#allocation65_spill]] }
  0x67   :  { %v10464_v13 = vld [vmem:[#allocation6 + $0x64] ss:$16 sps:$4 sm:$0x3f]   ;;  %v10466_v14 = vld [vmem:[#allocation6 + $0x60] ss:$16 sps:$4 sm:$0x3f]   ;;  %468 = vmatpush1.bf16.msra.mxu1 %v379_v11 }
  0x68   :  { %469 = vmatprep.subr.bf16.mxu1 %v10461_v10  ;;  %9166 = vmatprep.subr.msk.bf16.mxu0 %vm371_vm1, %v10464_v13  ;;  %v373_v18 = vsel %vm371_vm1, %v10466_v14, 0  ;;  %v10467_v19 = vld [vmem:[#allocation6 + $0x44] ss:$16 sps:$4 sm:$0xff]   ;;  %v10469_v20 = vld [vmem:[#allocation6 + $0x40] ss:$16 sps:$4 sm:$0xff]   ;;  %v15714_v28 = vmov 1  }
  0x69   :  { %v11890_v2 = vld [vmem:[%s15763_s30 + $0x10] sm:$0xff]  ;;  %v11895_v3 = vld [vmem:[%s15763_s30] sm:$0xff]  ;;  %v11902_v4 = vld [vmem:[%s15763_s30 + $0x18] sm:$0xff]  ;;  %397 = vmatpush1.bf16.msra.mxu0 %v373_v18  ;;  %s15765_s6 = sld [smem:[#allocation72_spill]]  ;;  %vm1202_vm4 = vcmask 1046528   ;;  %vm1341_vm5 = vcmask 1040384  }
  0x6a   :  { %215 = vperm.xlu1 %10439, %v11890_v2   ;;  %205 = vperm.xlu0 %10438, %v11895_v3   ;;  %v11907_v5 = vld [vmem:[%s15763_s30 + $0x8] sm:$0xff]  ;;  %v11917_v9 = vld [vmem:[%s15763_s30 + $0x20] sm:$0xff]  ;;  %v11932_v17 = vld [vmem:[%s15763_s30 + $0x30] sm:$0xff]  ;;  %vm1099_vm6 = vcmask 523264   ;;  %vm2492_vm7 = vsmask.f32 4352 }
  0x6b   :  { %v11912_v8 = vld [vmem:[%s15763_s30 + $0x28] sm:$0xff]  ;;  %470 = vmatpush1.bf16.msra.mxu1 %v10463_v12  ;;  %398 = vmatprep.subr.bf16.mxu0 %v10467_v19  ;;  %v10470_v25 = vld [vmem:[#allocation6 + $0x2c] ss:$16 sps:$4 sm:$0x3f]   ;;  %v10479_v41 = vld [vmem:[#allocation6 + $0x8] ss:$16 sps:$4 sm:$0xff]  }
  0x6c   :  { %v171_v15 = vld [vmem:[%s15764_s8] sm:$0xff]  ;;  %v172_v16 = vld [vmem:[%s15764_s8 + $0x8] sm:$0xff]  ;;  %v173_v21 = vld [vmem:[%s15764_s8 + $0x10] sm:$0xff]  ;;  %9189 = vmatprep.subr.msk.bf16.mxu1 %vm371_vm1, %v10470_v25  ;;  %vm3614_vm8 = vsmask.f32 7424  ;;  %s15895_s2 = sld [smem:[#allocation67_spill]] }
  0x6d   :  { %179 = vst.msk [vmem:[#allocation2 + $0x8] sm:$0xff] %vm178_vm2, %v171_v15  ;;  %180 = vst.msk [vmem:[#allocation2 + $0x10] sm:$0xff] %vm178_vm2, %v172_v16  ;;  %v174_v22 = vld [vmem:[%s15764_s8 + $0x18] sm:$0xff]  ;;  %v175_v23 = vld [vmem:[%s15764_s8 + $0x20] sm:$0xff]  ;;  %399 = vmatpush1.bf16.msra.mxu0 %v10469_v20  ;;  %vm5860_vm10 = vcmask 1042432   ;;  %vm5861_vm11 = vcmask 1043456  }
  0x6e   :  { %220 = vperm.xlu1 %10439, %v11902_v4   ;;  %210 = vperm.xlu0 %10438, %v11907_v5   ;;  %181 = vst.msk [vmem:[#allocation2 + $0x18] sm:$0xff] %vm178_vm2, %v173_v21  ;;  %182 = vst.msk [vmem:[#allocation2 + $0x20] sm:$0xff] %vm178_vm2, %v174_v22  ;;  %v176_v24 = vld [vmem:[%s15764_s8 + $0x28] sm:$0xff]  ;;  %v10472_v26 = vld [vmem:[#allocation6 + $0x28] ss:$16 sps:$4 sm:$0x3f]  }
  0x6f   :  { %183 = vst.msk [vmem:[#allocation2 + $0x28] sm:$0xff] %vm178_vm2, %v175_v23  ;;  %184 = vst.msk [vmem:[#allocation2 + $0x30] sm:$0xff] %vm178_vm2, %v176_v24  ;;  %v177_v27 = vld [vmem:[%s15764_s8 + $0x30] sm:$0xff]  ;;  %v10473_v29 = vld [vmem:[#allocation6 + $0x24] ss:$16 sps:$4 sm:$0x3f]  }
  0x70   :  { %185 = vst.msk [vmem:[#allocation2 + $0x38] sm:$0xff] %vm178_vm2, %v177_v27  ;;  %v10475_v30 = vld [vmem:[#allocation6 + $0x20] ss:$16 sps:$4 sm:$0x3f]   ;;  %9184 = vmatprep.subr.msk.bf16.mxu0 %vm371_vm1, %v10473_v29  ;;  %v581_v34 = vsel %vm371_vm1, %v10472_v26, 0  ;;  %s15902_s4 = sld [smem:[#allocation69_spill]] }
  0x71   :  { %v575_v35 = vsel %vm371_vm1, %v10475_v30, 0  ;;  %v10478_v36 = vld [vmem:[#allocation6 + $0x4] ss:$16 sps:$4 sm:$0xff]   ;;  %v10481_v37 = vld [vmem:[#allocation6 + $0xc] ss:$16 sps:$4 sm:$0xff]   ;;  %vm5853_vm12 = vcmask 449536  }
  0x72   :  { %230 = vperm.xlu1 %10439, %v11912_v8   ;;  %225 = vperm.xlu0 %10438, %v11917_v9   ;;  %v10476_v40 = vld [vmem:[#allocation6] ss:$16 sps:$4 sm:$0xff]   ;;  %v10482_v43 = vld [vmem:[#allocation6 + $0xac] ss:$16 sps:$4 sm:$0x3f]   ;;  %vm5924_vm13 = vcmask 785408  }
  0x73   :  { %v10485_v46 = vld [vmem:[#allocation6 + $0xa4] ss:$16 sps:$4 sm:$0x3f]   ;;  %v10484_v53 = vld [vmem:[#allocation6 + $0xa8] ss:$16 sps:$4 sm:$0x3f]  }
  0x74   :  { %v249_v31 = vld [vmem:[#allocation2 + $0x8] sm:$0xff]  ;;  %v250_v32 = vld [vmem:[#allocation2 + $0x10] sm:$0xff]  ;;  %vm5931_vm14 = vcmask 781312   ;;  %vm11722_vm15 = vmmov 0   ;;  %s15904_s1 = sld [smem:[#allocation68_spill]]  ;;  %vm8180_vm0 = vcmask 1044480  }
  0x75   :  { %v256_v33 = vpack.c.bf16 %v250_v32, %v249_v31  ;;  %v251_v38 = vld [vmem:[#allocation2 + $0x18] sm:$0xff]  ;;  %v252_v39 = vld [vmem:[#allocation2 + $0x20] sm:$0xff]  ;;  %v197_v52 = vld [vmem:[#allocation2 + $0xf] sm:$0xff] }
  0x76   :  { %235 = vperm.xlu0 %10438, %v11932_v17   ;;  %10440 = vset.pattern.permute.xlu1 %v15714_v28  ;;  %v257_v42 = vpack.c.bf16 %v252_v39, %v251_v38  ;;  %v253_v44 = vld [vmem:[#allocation2 + $0x28] sm:$0xff]  ;;  %v254_v45 = vld [vmem:[#allocation2 + $0x30] sm:$0xff]  ;;  %v199_v60 = vld [vmem:[#allocation2 + $0x1f] sm:$0xff] }
  0x77   :  { %268 = vperm.xlu1 %10440, %v11895_v3   ;;  %9172 = vmatmul.mubr.msk.bf16.vlgmr.msra.gmra.mxu1 %vm178_vm2, %v256_v33  ;;  %v258_v47 = vpack.c.bf16 %v254_v45, %v253_v44  ;;  %v255_v48 = vld [vmem:[#allocation2 + $0x38] sm:$0xff]  ;;  %v196_v51 = vld [vmem:[#allocation2 + $0x7] sm:$0xff]  ;;  %v201_v10 = vld [vmem:[#allocation2 + $0x2f] sm:$0xff] }
  0x78   :  { %9167 = vmatmul.mubr.msk.bf16.vlgmr.msra.gmra.mxu0 %vm178_vm2, %v256_v33  ;;  %497 = vmatprep.mubr.bf16.mxu1 %v15716_v0  ;;  %v259_v49 = vpack.c.bf16 %v255_v48, %v255_v48  ;;  %v10487_v54 = vld [vmem:[#allocation6 + $0xa0] ss:$16 sps:$4 sm:$0x3f]   ;;  %v10490_v61 = vld [vmem:[#allocation6 + $0x84] ss:$16 sps:$4 sm:$0xff]  }
  0x79   :  { %426 = vmatprep.mubr.bf16.mxu0 %v15716_v0  ;;  %670 = vmatpush1.bf16.msra.mxu1 %v581_v34  ;;  %v198_v59 = vld [vmem:[#allocation2 + $0x17] sm:$0xff]  ;;  %v200_v11 = vld [vmem:[#allocation2 + $0x27] sm:$0xff]  ;;  %v10494_v31 = vld [vmem:[%s15765_s6 + $0x460] ss:$16 sps:$4 sm:$0xff]  }
  0x7a   :  { %10441 = vset.pattern.permute.xlu0 %v15714_v28  ;;  %599 = vmatpush1.bf16.msra.mxu0 %v575_v35  ;;  %v10493_v62 = vld [vmem:[#allocation6 + $0x8c] ss:$16 sps:$4 sm:$0xff]   ;;  %v260_v21 = vld [vmem:[#allocation2 + $0x9] sm:$0xff]  ;;  %v262_v32 = vld [vmem:[#allocation2 + $0x19] sm:$0xff] }
  0x7b   :  { %276 = vperm.xlu1 %10440, %v11890_v2   ;;  %272 = vperm.xlu0 %10441, %v11907_v5   ;;  %v10496_v7 = vld [vmem:[%s15765_s6 + $0x464] ss:$16 sps:$4 sm:$0xff]   ;;  %v10497_v35 = vld [vmem:[%s15765_s6 + $0x440] ss:$16 sps:$4 sm:$0xff]  }
  0x7c   :  { %600 = vmatprep.subr.bf16.mxu0 %v10478_v36  ;;  %671 = vmatprep.subr.bf16.mxu1 %v10481_v37  ;;  %v261_v22 = vld [vmem:[#allocation2 + $0x11] sm:$0xff]  ;;  %v263_v33 = vld [vmem:[#allocation2 + $0x21] sm:$0xff]  ;;  %v264_v39 = vld [vmem:[#allocation2 + $0x29] sm:$0xff] }
  0x7d   :  { %672 = vmatpush1.bf16.msra.mxu1 %v10479_v41  ;;  %v10499_v34 = vld [vmem:[%s15765_s6 + $0x444] ss:$16 sps:$4 sm:$0xff]  }
  0x7e   :  { %601 = vmatpush1.bf16.msra.mxu0 %v10476_v40  ;;  %9207 = vmatprep.subr.msk.bf16.mxu1 %vm371_vm1, %v10482_v43  ;;  %v265_v40 = vld [vmem:[#allocation2 + $0x31] sm:$0xff] }
  0x7f   :  { %280 = vperm.xlu1 %10440, %v11902_v4   ;;  %284 = vperm.xlu0 %10441, %v11917_v9  }
  0x80   :  { %9173 = vmatmul.mubr.msk.bf16.gmra.mxu1 %vm178_vm2, %v257_v42  ;;  %9168 = vmatmul.mubr.msk.bf16.gmra.mxu0 %vm178_vm2, %v257_v42 }
  0x81   :  { %507 = vmatprep.mubr.bf16.mxu1 %v15716_v0  ;;  %436 = vmatprep.mubr.bf16.mxu0 %v15716_v0 }
  0x82   :  { %9202 = vmatprep.subr.msk.bf16.mxu0 %vm371_vm1, %v10485_v46  ;;  %v266_v46 = vld [vmem:[#allocation2 + $0x39] sm:$0xff] }
  0x83   :  { %288 = vperm.xlu1 %10440, %v11912_v8   ;;  %292 = vperm.xlu0 %10441, %v11932_v17  }
  0x87   :  { %10442 = vset.pattern.permute.xlu1 %v15716_v0  ;;  %10443 = vset.pattern.permute.xlu0 %v15716_v0 }
  0x88   :  { %1176 = vperm.xlu1 %10442, %v11895_v3   ;;  %1180 = vperm.xlu0 %10443, %v11907_v5  }
  0x89   :  { %9174 = vmatmul.mubr.msk.bf16.gmra.mxu1 %vm178_vm2, %v258_v47  ;;  %9169 = vmatmul.mubr.msk.bf16.gmra.mxu0 %vm178_vm2, %v258_v47 }
  0x8a   :  { %517 = vmatprep.mubr.bf16.mxu1 %v15716_v0  ;;  %446 = vmatprep.mubr.bf16.mxu0 %v15716_v0 }
  0x8c   :  { %1184 = vperm.xlu1 %10442, %v11890_v2   ;;  %1192 = vperm.xlu0 %10443, %v11917_v9  }
  0x90   :  { %1188 = vperm.xlu1 %10442, %v11902_v4   ;;  %1200 = vperm.xlu0 %10443, %v11932_v17  }
  0x91   :  { %9175 = vmatmul.mubr.msk.bf16.gmra.mxu1 %vm178_vm2, %v259_v49  ;;  %9170 = vmatmul.mubr.msk.bf16.gmra.mxu0 %vm178_vm2, %v259_v49 }
  0x92   :  { %618 = vmatprep.mubr.bf16.mxu0 %v15716_v0  ;;  %689 = vmatprep.mubr.bf16.mxu1 %v15716_v0 }
  0x94   :  { %1196 = vperm.xlu1 %10442, %v11912_v8   ;;  %10445 = vset.pattern.permute.xlu0 %v15714_v28 }
  0x95   :  { %1324 = vperm.xlu0 %10445, %v11907_v5   ;;  %v10491_v5 = vld [vmem:[#allocation6 + $0x88] ss:$16 sps:$4 sm:$0xff]  }
  0x98   :  { %10444 = vset.pattern.permute.xlu1 %v15714_v28 }
  0x99   :  { %1321 = vperm.xlu1 %10444, %v11895_v3   ;;  %1333 = vperm.xlu0 %10445, %v11917_v9   ;;  %v786_v3 = vsel %vm371_vm1, %v10487_v54, 0  ;;  %v10503_v54 = vld [vmem:[%s15765_s6 + $0x400] ss:$16 sps:$4 sm:$0xff]  }
  0x9d   :  { %1327 = vperm.xlu1 %10444, %v11890_v2   ;;  %1339 = vperm.xlu0 %10445, %v11932_v17   ;;  %v792_v2 = vsel %vm371_vm1, %v10484_v53, 0  ;;  %v202_v17 = vld [vmem:[#allocation2 + $0x37] sm:$0xff] }
  0x9e   :  { %v10505_v53 = vld [vmem:[%s15765_s6 + $0x404] ss:$16 sps:$4 sm:$0xff]  }
  0xa1   :  { %1330 = vperm.xlu1 %10444, %v11902_v4   ;;  %10447 = vset.pattern.permute.xlu0 %v15716_v0  ;;  %v10488_v4 = vld [vmem:[#allocation6 + $0x80] ss:$16 sps:$4 sm:$0xff]  }
  0xa5   :  { %1336 = vperm.xlu1 %10444, %v11912_v8  }
  0xa9   :  { %10446 = vset.pattern.permute.xlu1 %v15716_v0 }
  0xe5   :  { %v206_v50 = vpop.permute.xlu0 %205  ;;  %v216_v55 = vpop.permute.xlu1 %215 }
  0xe6   :  { %v238_v57 = vmul.f32 %v206_v50, %v196_v51  ;;  %v240_v8 = vmul.f32 %v216_v55, %v198_v59  ;;  %v10502_v51 = vld [vmem:[%s15765_s6 + $0x424] ss:$16 sps:$4 sm:$0xff]  }
  0xe7   :  { %v10508_v55 = vld [vmem:[%s15765_s6 + $0x3e4] ss:$16 sps:$4 sm:$0xff]  }
  0xe8   :  { %v10511_v59 = vld [vmem:[%s15765_s6 + $0x664] ss:$16 sps:$4 sm:$0xff]  }
  0xe9   :  { %v211_v56 = vpop.permute.xlu0 %210  ;;  %v221_v6 = vpop.permute.xlu1 %220 }
  0xea   :  { %v239_v58 = vmul.f32 %v211_v56, %v197_v52  ;;  %v241_v9 = vmul.f32 %v221_v6, %v199_v60  ;;  %v10500_v52 = vld [vmem:[%s15765_s6 + $0x420] ss:$16 sps:$4 sm:$0xff]   ;;  %v10520_v60 = vld [vmem:[%s15765_s6 + $0x3a4] ss:$16 sps:$4 sm:$0xff]  }
  0xeb   :  { %v10506_v56 = vld [vmem:[%s15765_s6 + $0x3e0] ss:$16 sps:$4 sm:$0xff]  }
  0xec   :  { %v245_v63 = vpack.c.bf16 %v239_v58, %v238_v57  ;;  %v246_v12 = vpack.c.bf16 %v241_v9, %v240_v8  ;;  %v10514_v57 = vld [vmem:[%s15765_s6 + $0x3c4] ss:$16 sps:$4 sm:$0xff]   ;;  %v10512_v58 = vld [vmem:[%s15765_s6 + $0x3c0] ss:$16 sps:$4 sm:$0xff]  }
  0xed   :  { %v231_v13 = vpop.permute.xlu1 %230  ;;  %v226_v14 = vpop.permute.xlu0 %225  ;;  %v10532_v8 = vld [vmem:[%s15765_s6 + $0x564] ss:$16 sps:$4 sm:$0xff]  }
  0xee   :  { %9185 = vmatmul.mubr.msk.bf16.vlgmr.msra.gmra.mxu0 %vm178_vm2, %v245_v63  ;;  %9190 = vmatmul.mubr.msk.bf16.vlgmr.msra.gmra.mxu1 %vm178_vm2, %v245_v63  ;;  %v243_v15 = vmul.f32 %v231_v13, %v201_v10  ;;  %v242_v16 = vmul.f32 %v226_v14, %v200_v11  ;;  %v10517_v63 = vld [vmem:[%s15765_s6 + $0x644] ss:$16 sps:$4 sm:$0xff]   ;;  %v10521_v11 = vld [vmem:[%s15765_s6 + $0x620] ss:$16 sps:$4 sm:$0xff]  }
  0xef   :  { %628 = vmatprep.mubr.bf16.mxu0 %v15716_v0  ;;  %699 = vmatprep.mubr.bf16.mxu1 %v15716_v0 }
  0xf0   :  { %881 = vmatpush1.bf16.msra.mxu1 %v792_v2  ;;  %810 = vmatpush1.bf16.msra.mxu0 %v786_v3  ;;  %v247_v18 = vpack.c.bf16 %v243_v15, %v242_v16  ;;  %v10526_v2 = vld [vmem:[%s15765_s6 + $0x384] ss:$16 sps:$4 sm:$0xff]   ;;  %v10515_v3 = vld [vmem:[%s15765_s6 + $0x640] ss:$16 sps:$4 sm:$0xff]  }
  0xf1   :  { %811 = vmatprep.subr.bf16.mxu0 %v10490_v61  ;;  %882 = vmatprep.subr.bf16.mxu1 %v10493_v62  ;;  %v236_v19 = vpop.permute.xlu0 %235  ;;  %v10509_v61 = vld [vmem:[%s15765_s6 + $0x660] ss:$16 sps:$4 sm:$0xff]   ;;  %v10529_v15 = vld [vmem:[%s15765_s6 + $0x604] ss:$16 sps:$4 sm:$0xff]  }
  0xf2   :  { %v244_v20 = vmul.f32 %v236_v19, %v202_v17  ;;  %v269_v23 = vpop.permute.xlu1 %268  ;;  %v10518_v62 = vld [vmem:[%s15765_s6 + $0x3a0] ss:$16 sps:$4 sm:$0xff]   ;;  %v10538_v16 = vld [vmem:[%s15765_s6 + $0x544] ss:$16 sps:$4 sm:$0xff]  }
  0xf3   :  { %v295_v26 = vmul.f32 %v269_v23, %v260_v21  ;;  %v10527_v19 = vld [vmem:[%s15765_s6 + $0x600] ss:$16 sps:$4 sm:$0xff]   ;;  %v10535_v23 = vld [vmem:[%s15765_s6 + $0x5e4] ss:$16 sps:$4 sm:$0xff]  }
  0xf4   :  { %812 = vmatpush1.bf16.msra.mxu0 %v10488_v4  ;;  %883 = vmatpush1.bf16.msra.mxu1 %v10491_v5  ;;  %v248_v24 = vpack.c.bf16 %v244_v20, %v244_v20  ;;  %v10524_v4 = vld [vmem:[%s15765_s6 + $0x380] ss:$16 sps:$4 sm:$0xff]  }
  0xf5   :  { %2208 = vmatprep.subr.bf16.mxu0 %v10496_v7  ;;  %2279 = vmatprep.subr.bf16.mxu1 %v10511_v59  ;;  %v10523_v7 = vld [vmem:[%s15765_s6 + $0x624] ss:$16 sps:$4 sm:$0xff]   ;;  %v10536_v20 = vld [vmem:[%s15765_s6 + $0x540] ss:$16 sps:$4 sm:$0xff]  }
  0xf6   :  { %9186 = vmatmul.mubr.msk.bf16.gmra.mxu0 %vm178_vm2, %v246_v12  ;;  %9191 = vmatmul.mubr.msk.bf16.gmra.mxu1 %vm178_vm2, %v246_v12  ;;  %v273_v25 = vpop.permute.xlu0 %272  ;;  %v277_v29 = vpop.permute.xlu1 %276  ;;  %v10530_v12 = vld [vmem:[%s15765_s6 + $0x560] ss:$16 sps:$4 sm:$0xff]  }
  0xf7   :  { %638 = vmatprep.mubr.bf16.mxu0 %v15716_v0  ;;  %709 = vmatprep.mubr.bf16.mxu1 %v15716_v0  ;;  %v296_v27 = vmul.f32 %v273_v25, %v261_v22  ;;  %v297_v37 = vmul.f32 %v277_v29, %v262_v32  ;;  %v10542_v29 = vld [vmem:[%s15765_s6 + $0x520] ss:$16 sps:$4 sm:$0xff]   ;;  %v10541_v32 = vld [vmem:[%s15765_s6 + $0x5c4] ss:$16 sps:$4 sm:$0xff]  }
  0xf9   :  { %v302_v30 = vpack.c.bf16 %v296_v27, %v295_v26  ;;  %v10533_v27 = vld [vmem:[%s15765_s6 + $0x5e0] ss:$16 sps:$4 sm:$0xff]  }
  0xfa   :  { %v281_v36 = vpop.permute.xlu1 %280  ;;  %v285_v43 = vpop.permute.xlu0 %284 }
  0xfb   :  { %v298_v38 = vmul.f32 %v281_v36, %v263_v33  ;;  %v299_v44 = vmul.f32 %v285_v43, %v264_v39  ;;  %v15718_v33 = vlaneseq  ;;  %v10539_v36 = vld [vmem:[%s15765_s6 + $0x5c0] ss:$16 sps:$4 sm:$0xff]  }
  0xfd   :  { %v303_v41 = vpack.c.bf16 %v298_v38, %v297_v37  ;;  %v10550_v37 = vld [vmem:[%s15765_s6 + $0x504] ss:$16 sps:$4 sm:$0xff]   ;;  %vm1127_vm3 = vcmp.lt.s32.totalorder %v15718_v33, 448  ;;  %v10548_v38 = vld [vmem:[%s15765_s6 + $0x500] ss:$16 sps:$4 sm:$0xff]  }
  0xfe   :  { %9187 = vmatmul.mubr.msk.bf16.gmra.mxu0 %vm178_vm2, %v247_v18  ;;  %9192 = vmatmul.mubr.msk.bf16.gmra.mxu1 %vm178_vm2, %v247_v18  ;;  %v289_v42 = vpop.permute.xlu1 %288  ;;  %v293_v48 = vpop.permute.xlu0 %292  ;;  %1130 = vst.msk [vmem:[#allocation3 + $0x7] ss:$8 sm:$0xf] %vm1127_vm3, %v15712_v1  ;;  %1133 = vst.msk [vmem:[#allocation3 + $0x100] ss:$8 sm:$0xf] %vm1127_vm3, %v15712_v1 }
  0xff   :  { %648 = vmatprep.mubr.bf16.mxu0 %v15716_v0  ;;  %719 = vmatprep.mubr.bf16.mxu1 %v15716_v0  ;;  %v300_v45 = vmul.f32 %v289_v42, %v265_v40  ;;  %v301_v49 = vmul.f32 %v293_v48, %v266_v46  ;;  %v10554_v48 = vld [vmem:[%s15765_s6 + $0x4e0] ss:$16 sps:$4 sm:$0xff]   ;;  %vm8231_vm3 = vcmask 909312  }
 0x101   :  { %v304_v47 = vpack.c.bf16 %v300_v45, %v299_v44  ;;  %v305_v50 = vpack.c.bf16 %v301_v49, %v301_v49  ;;  %v10545_v44 = vld [vmem:[%s15765_s6 + $0x5a0] ss:$16 sps:$4 sm:$0xff]   ;;  %v10556_v45 = vld [vmem:[%s15765_s6 + $0x4e4] ss:$16 sps:$4 sm:$0xff]  }
 0x106   :  { %9188 = vmatmul.mubr.msk.bf16.gmra.mxu0 %vm178_vm2, %v248_v24  ;;  %9193 = vmatmul.mubr.msk.bf16.gmra.mxu1 %vm178_vm2, %v248_v24  ;;  %v10544_v24 = vld [vmem:[%s15765_s6 + $0x524] ss:$16 sps:$4 sm:$0xff]  }
 0x107   :  { %829 = vmatprep.mubr.bf16.mxu0 %v15716_v0  ;;  %900 = vmatprep.mubr.bf16.mxu1 %v15716_v0 }
 0x10e   :  { %9203 = vmatmul.mubr.msk.bf16.vlgmr.msra.gmra.mxu0 %vm178_vm2, %v302_v30  ;;  %9208 = vmatmul.mubr.msk.bf16.vlgmr.msra.gmra.mxu1 %vm178_vm2, %v302_v30 }
 0x10f   :  { %839 = vmatprep.mubr.bf16.mxu0 %v15716_v0  ;;  %910 = vmatprep.mubr.bf16.mxu1 %v15716_v0 }
 0x110   :  { %2209 = vmatpush1.bf16.msra.mxu0 %v10494_v31  ;;  %2280 = vmatpush1.bf16.msra.mxu1 %v10509_v61  ;;  %v10557_v61 = vld [vmem:[%s15765_s6 + $0x6e0] ss:$16 sps:$4 sm:$0xff]  }
 0x111   :  { %2210 = vmatprep.subr.bf16.mxu0 %v10499_v34  ;;  %2281 = vmatprep.subr.bf16.mxu1 %v10517_v63 }
 0x114   :  { %2211 = vmatpush1.bf16.msra.mxu0 %v10497_v35  ;;  %2282 = vmatpush1.bf16.msra.mxu1 %v10515_v3  ;;  %v10565_v3 = vld [vmem:[%s15765_s6 + $0x6c4] ss:$16 sps:$4 sm:$0xff]  }
 0x115   :  { %2212 = vmatprep.subr.bf16.mxu0 %v10502_v51  ;;  %2283 = vmatprep.subr.bf16.mxu1 %v10523_v7  ;;  %v10553_v51 = vld [vmem:[%s15765_s6 + $0x584] ss:$16 sps:$4 sm:$0xff]  }
 0x116   :  { %9204 = vmatmul.mubr.msk.bf16.gmra.mxu0 %vm178_vm2, %v303_v41  ;;  %9209 = vmatmul.mubr.msk.bf16.gmra.mxu1 %vm178_vm2, %v303_v41  ;;  %v10547_v41 = vld [vmem:[%s15765_s6 + $0x5a4] ss:$16 sps:$4 sm:$0xff]  }
 0x117   :  { %849 = vmatprep.mubr.bf16.mxu0 %v15716_v0  ;;  %920 = vmatprep.mubr.bf16.mxu1 %v15716_v0  ;;  %v10568_v7 = vld [vmem:[%s15765_s6 + $0x4a4] ss:$16 sps:$4 sm:$0xff]  }
 0x118   :  { %2213 = vmatpush1.bf16.msra.mxu0 %v10500_v52  ;;  %2284 = vmatpush1.bf16.msra.mxu1 %v10521_v11  ;;  %v10551_v52 = vld [vmem:[%s15765_s6 + $0x580] ss:$16 sps:$4 sm:$0xff]   ;;  %v10574_v11 = vld [vmem:[%s15765_s6 + $0x484] ss:$16 sps:$4 sm:$0xff]  }
 0x119   :  { %2214 = vmatprep.subr.bf16.mxu0 %v10505_v53  ;;  %2285 = vmatprep.subr.bf16.mxu1 %v10529_v15  ;;  %v10571_v15 = vld [vmem:[%s15765_s6 + $0x6a4] ss:$16 sps:$4 sm:$0xff]  }
 0x11c   :  { %2215 = vmatpush1.bf16.msra.mxu0 %v10503_v54  ;;  %2286 = vmatpush1.bf16.msra.mxu1 %v10527_v19  ;;  %v10577_v19 = vld [vmem:[%s15765_s6 + $0x684] ss:$16 sps:$4 sm:$0xff]  }
 0x11d   :  { %2216 = vmatprep.subr.bf16.mxu0 %v10508_v55  ;;  %2287 = vmatprep.subr.bf16.mxu1 %v10535_v23  ;;  %v10562_v55 = vld [vmem:[%s15765_s6 + $0x4c4] ss:$16 sps:$4 sm:$0xff]   ;;  %v10583_v23 = vld [vmem:[%s15765_s6 + $0x66c] ss:$16 sps:$4 sm:$0xff]  }
 0x11e   :  { %9205 = vmatmul.mubr.msk.bf16.gmra.mxu0 %vm178_vm2, %v304_v47  ;;  %9210 = vmatmul.mubr.msk.bf16.gmra.mxu1 %vm178_vm2, %v304_v47 }
 0x11f   :  { %859 = vmatprep.mubr.bf16.mxu0 %v15716_v0  ;;  %930 = vmatprep.mubr.bf16.mxu1 %v15716_v0 }
 0x120   :  { %2217 = vmatpush1.bf16.msra.mxu0 %v10506_v56  ;;  %2288 = vmatpush1.bf16.msra.mxu1 %v10533_v27  ;;  %v10560_v56 = vld [vmem:[%s15765_s6 + $0x4c0] ss:$16 sps:$4 sm:$0xff]   ;;  %v1177_v27 = vpop.permute.xlu1 %1176 }
 0x121   :  { %2218 = vmatprep.subr.bf16.mxu0 %v10514_v57  ;;  %2289 = vmatprep.subr.bf16.mxu1 %v10541_v32 }
 0x124   :  { %2219 = vmatpush1.bf16.msra.mxu0 %v10512_v58  ;;  %2290 = vmatpush1.bf16.msra.mxu1 %v10539_v36 }
 0x125   :  { %2220 = vmatprep.subr.bf16.mxu0 %v10520_v60  ;;  %2291 = vmatprep.subr.bf16.mxu1 %v10547_v41 }
 0x126   :  { %9206 = vmatmul.mubr.msk.bf16.gmra.mxu0 %vm178_vm2, %v305_v50  ;;  %9211 = vmatmul.mubr.msk.bf16.gmra.mxu1 %vm178_vm2, %v305_v50  ;;  %vm8176_vm2 = vcmask 220160  }
 0x128   :  { %2221 = vmatpush1.bf16.msra.mxu0 %v10518_v62  ;;  %2292 = vmatpush1.bf16.msra.mxu1 %v10545_v44  ;;  %v10559_v62 = vld [vmem:[%s15765_s6 + $0x6e4] ss:$16 sps:$4 sm:$0xff]  }
 0x129   :  { %2222 = vmatprep.subr.bf16.mxu0 %v10526_v2  ;;  %2293 = vmatprep.subr.bf16.mxu1 %v10553_v51 }
 0x12c   :  { %2223 = vmatpush1.bf16.msra.mxu0 %v10524_v4  ;;  %2294 = vmatpush1.bf16.msra.mxu1 %v10551_v52  ;;  %v10563_v4 = vld [vmem:[%s15765_s6 + $0x6c0] ss:$16 sps:$4 sm:$0xff]  }
 0x12d   :  { %2224 = vmatprep.subr.bf16.mxu0 %v10532_v8  ;;  %2303 = vmatprep.subr.bf16.mxu1 %v10559_v62  ;;  %v10566_v8 = vld [vmem:[%s15765_s6 + $0x4a0] ss:$16 sps:$4 sm:$0xff]  }
 0x130   :  { %2225 = vmatpush2.bf16.msra.mxu0 %v10530_v12  ;;  %2304 = vmatpush2.bf16.msra.mxu1 %v10557_v61  ;;  %v10572_v12 = vld [vmem:[%s15765_s6 + $0x480] ss:$16 sps:$4 sm:$0xff]  }
 0x131   :  { %2226 = vmatprep.subr.bf16.mxu0 %v10538_v16  ;;  %2305 = vmatprep.subr.bf16.mxu1 %v10565_v3  ;;  %v10569_v16 = vld [vmem:[%s15765_s6 + $0x6a0] ss:$16 sps:$4 sm:$0xff]  }
 0x134   :  { %2227 = vmatpush2.bf16.msra.mxu0 %v10536_v20  ;;  %2306 = vmatpush2.bf16.msra.mxu1 %v10563_v4  ;;  %v10575_v20 = vld [vmem:[%s15765_s6 + $0x680] ss:$16 sps:$4 sm:$0xff]  }
 0x135   :  { %2228 = vmatprep.subr.bf16.mxu0 %v10544_v24  ;;  %2307 = vmatprep.subr.bf16.mxu1 %v10571_v15  ;;  %v10580_v24 = vld [vmem:[%s15765_s6 + $0x46c] ss:$16 sps:$4 sm:$0xff]  }
 0x137   :  { %v12104_v5 = vpop.f32.mrf.mxu1 }
 0x138   :  { %v12106_v6 = vpop.f32.mrf.mxu0  ;;  %2229 = vmatpush2.bf16.msra.mxu0 %v10542_v29  ;;  %2308 = vmatpush2.bf16.msra.mxu1 %v10569_v16  ;;  %v12277_v29 = vpop.permute.xlu1 %1184 }
 0x139   :  { %v12114_v9 = vpop.f32.mrf.mxu1  ;;  %2230 = vmatprep.subr.bf16.mxu0 %v10550_v37  ;;  %2309 = vmatprep.subr.bf16.mxu1 %v10577_v19 }
 0x13a   :  { %v12116_v10 = vpop.f32.mrf.mxu0 }
 0x13b   :  { %v12124_v13 = vpop.f32.mrf.mxu1 }
 0x13c   :  { %v12126_v14 = vpop.f32.mrf.mxu0  ;;  %2231 = vmatpush2.bf16.msra.mxu0 %v10548_v38  ;;  %2310 = vmatpush2.bf16.msra.mxu1 %v10575_v20  ;;  %v12279_v32 = vpop.permute.xlu1 %1188 }
 0x13d   :  { %v12134_v17 = vpop.f32.mrf.mxu1  ;;  %2232 = vmatprep.subr.bf16.mxu0 %v10556_v45  ;;  %2350 = vmatprep.subr.bf16.mxu1 %v10580_v24  ;;  %v12285_v38 = vpop.permute.xlu0 %1180 }
 0x13e   :  { %v12136_v18 = vpop.f32.mrf.mxu0 }
 0x140   :  { %v12144_v21 = vpop.f32.mrf.mxu1  ;;  %v12146_v22 = vpop.f32.mrf.mxu0  ;;  %2233 = vmatpush2.bf16.msra.mxu0 %v10554_v48 }
 0x141   :  { %2234 = vmatprep.subr.bf16.mxu0 %v10562_v55  ;;  %v12295_v51 = vpop.permute.xlu1 %1196 }
 0x142   :  { %v12154_v25 = vpop.f32.mrf.mxu1  ;;  %v12156_v26 = vpop.f32.mrf.mxu0 }
 0x144   :  { %v12164_v30 = vpop.f32.mrf.mxu1  ;;  %v12166_v31 = vpop.f32.mrf.mxu0  ;;  %2235 = vmatpush2.bf16.msra.mxu0 %v10560_v56 }
 0x145   :  { %2236 = vmatprep.subr.bf16.mxu0 %v10568_v7  ;;  %v12301_v56 = vpop.permute.xlu0 %1192 }
 0x146   :  { %v12171_v34 = vpop.f32.mrf.mxu1  ;;  %v12173_v35 = vpop.f32.mrf.mxu0 }
 0x147   :  { %15766 = vst [vmem:[#allocation24_spill] sm:$0xff] %v12171_v34  ;;  %15767 = vst [vmem:[#allocation25_spill] sm:$0xff] %v12173_v35 }
 0x148   :  { %2237 = vmatpush2.bf16.msra.mxu0 %v10566_v8 }
 0x149   :  { %v12185_v39 = vpop.f32.mrf.mxu1  ;;  %v12187_v40 = vpop.f32.mrf.mxu0  ;;  %2238 = vmatprep.subr.bf16.mxu0 %v10574_v11  ;;  %v970_v11 = vshrl.u32 %v15718_v33, 7  ;;  %v967_v33 = vld [vmem:[%s15690_s11] ss:$2 sm:$0xf] }
 0x14a   :  { %15768 = vst [vmem:[#allocation26_spill] sm:$0xff] %v12185_v39  ;;  %15769 = vst [vmem:[#allocation27_spill] sm:$0xff] %v12187_v40  ;;  %v1201_v4 = vpop.permute.xlu0 %1200 }
 0x14b   :  { %v12194_v42 = vpop.f32.mrf.mxu1  ;;  %v12196_v43 = vpop.f32.mrf.mxu0  ;;  %v12332_v24 = vsub.s32 2, %v970_v11  ;;  %v12413_v35 = vrot.slane %v1201_v4, 1  ;;  %v1317_v4 = vld [vmem:[#allocation3 + $0x108] sm:$0x1] }
 0x14c   :  { %15770 = vst [vmem:[#allocation28_spill] sm:$0xff] %v12194_v42  ;;  %15771 = vst [vmem:[#allocation29_spill] sm:$0xff] %v12196_v43  ;;  %2239 = vmatpush2.bf16.msra.mxu0 %v10572_v12  ;;  %v1206_v43 = vrot.slane %v12277_v29, 1 }
 0x14d   :  { %v12204_v46 = vpop.f32.mrf.mxu1  ;;  %v12206_v47 = vpop.f32.mrf.mxu0  ;;  %2421 = vmatprep.subr.bf16.mxu0 %v10583_v23  ;;  %v12330_v23 = vsub.s32 0, %v970_v11  ;;  %15787 = vst [vmem:[#allocation45_spill] sm:$0xff] %v12332_v24  ;;  %15799 = vst [vmem:[#allocation57_spill] sm:$0xff] %v12413_v35 }
 0x14e   :  { %15772 = vst [vmem:[#allocation30_spill] sm:$0xff] %v12204_v46  ;;  %15773 = vst [vmem:[#allocation31_spill] sm:$0xff] %v12206_v47  ;;  %v12334_v1 = vpop.permute.xlu0 %1324 }
 0x14f   :  { %v12211_v49 = vpop.f32.mrf.mxu1  ;;  %v12213_v50 = vpop.f32.mrf.mxu0  ;;  %15786 = vst [vmem:[#allocation44_spill] sm:$0xff] %v12330_v23  ;;  %v12355_v46 = vrot.slane %v967_v33, %v12330_v23 }
 0x150   :  { %15774 = vst [vmem:[#allocation32_spill] sm:$0xff] %v12211_v49  ;;  %15775 = vst [vmem:[#allocation33_spill] sm:$0xff] %v12213_v50  ;;  %v1203_v50 = vrot.slane %v1177_v27, 1 }
 0x151   :  { %v12221_v53 = vpop.f32.mrf.mxu1  ;;  %v12223_v54 = vpop.f32.mrf.mxu0 }
 0x152   :  { %15776 = vst [vmem:[#allocation34_spill] sm:$0xff] %v12221_v53  ;;  %15777 = vst [vmem:[#allocation35_spill] sm:$0xff] %v12223_v54  ;;  %v12348_v53 = vsub.s32 3, %v970_v11  ;;  %v12360_v47 = vpop.permute.xlu0 %1333 }
 0x153   :  { %v12231_v57 = vpop.f32.mrf.mxu1  ;;  %v12233_v58 = vpop.f32.mrf.mxu0 }
 0x154   :  { %15778 = vst [vmem:[#allocation36_spill] sm:$0xff] %v12231_v57  ;;  %15779 = vst [vmem:[#allocation37_spill] sm:$0xff] %v12233_v58  ;;  %v12343_v57 = vsub.s32 1, %v970_v11  ;;  %v9212_v58 = vld [vmem:[%s15690_s11 + $0x1] ss:$2 sm:$0xf] }
 0x155   :  { %v523_v59 = vpop.f32.mrf.mxu1  ;;  %v452_v60 = vpop.f32.mrf.mxu0  ;;  %15791 = vst [vmem:[#allocation49_spill] sm:$0xff] %v12348_v53  ;;  %v1145_v11 = vld [vmem:[#allocation3 + $0x18] sm:$0x80]  ;;  %v12389_v39 = vrot.slane %v9212_v58, %v12348_v53 }
 0x156   :  { %15790 = vst [vmem:[#allocation48_spill] sm:$0xff] %v12343_v57  ;;  %v12373_v27 = vrot.slane %v967_v33, %v12343_v57  ;;  %v12394_v29 = vmul.f32 %v1203_v50, %v1145_v11 }
 0x157   :  { %v524_v63 = vpop.f32.mrf.mxu1  ;;  %v453_v2 = vpop.f32.mrf.mxu0 }
 0x158   :  { %v1322_v63 = vpop.permute.xlu1 %1321  ;;  %15798 = vst [vmem:[#allocation56_spill] sm:$0xff] %v12394_v29 }
 0x159   :  { %v12391_v40 = vrot.slane %v1322_v63, 7 }
 0x15c   :  { %v12324_v16 = vpop.permute.xlu1 %1327 }
 0x1ae   :  { %v12281_v36 = vpop.f32.mrf.mxu0  ;;  %v12283_v37 = vpop.f32.mrf.mxu1 }
 0x1b0   :  { %v12287_v41 = vpop.f32.mrf.mxu0  ;;  %v12289_v44 = vpop.f32.mrf.mxu1 }
 0x1b2   :  { %v12291_v45 = vpop.f32.mrf.mxu0  ;;  %v12293_v48 = vpop.f32.mrf.mxu1 }
 0x1b4   :  { %v12297_v52 = vpop.f32.mrf.mxu0  ;;  %v12299_v55 = vpop.f32.mrf.mxu1 }
 0x1b6   :  { %v12303_v59 = vpop.f32.mrf.mxu0  ;;  %v12305_v60 = vpop.f32.mrf.mxu1 }
 0x1b8   :  { %v12307_v61 = vpop.f32.mrf.mxu0  ;;  %v12309_v62 = vpop.f32.mrf.mxu1 }
 0x1ba   :  { %v12311_v2 = vpop.f32.mrf.mxu0  ;;  %v12313_v3 = vpop.f32.mrf.mxu1 }
 0x1bc   :  { %v12315_v7 = vpop.f32.mrf.mxu0  ;;  %v12317_v8 = vpop.f32.mrf.mxu1 }
 0x1bd   :  { %15780 = vst [vmem:[#allocation38_spill] sm:$0xff] %v12315_v7  ;;  %15781 = vst [vmem:[#allocation39_spill] sm:$0xff] %v12317_v8  ;;  %v1340_v8 = vpop.permute.xlu0 %1339  ;;  %v1349_v7 = vrot.slane %v12360_v47, 7 }
 0x1be   :  { %v12320_v12 = vpop.f32.mrf.mxu0  ;;  %v12322_v15 = vpop.f32.mrf.mxu1 }
 0x1bf   :  { %15782 = vst [vmem:[#allocation40_spill] sm:$0xff] %v12320_v12  ;;  %15783 = vst [vmem:[#allocation41_spill] sm:$0xff] %v12322_v15  ;;  %v12378_v15 = vrot.slane %v967_v33, %v12348_v53  ;;  %v1142_v12 = vld [vmem:[#allocation3] sm:$0x80]  ;;  %v1345_v53 = vrot.slane %v12324_v16, 7  ;;  %v621_v16 = vadd.f32 %v12281_v36, %v12106_v6  ;;  %v694_v36 = vadd.f32 %v12289_v44, %v12114_v9 }
 0x1c0   :  { %v12326_v19 = vpop.f32.mrf.mxu0  ;;  %v12328_v20 = vpop.f32.mrf.mxu1 }
 0x1c1   :  { %15784 = vst [vmem:[#allocation42_spill] sm:$0xff] %v12326_v19  ;;  %15785 = vst [vmem:[#allocation43_spill] sm:$0xff] %v12328_v20  ;;  %v12367_v19 = vrot.slane %v9212_v58, %v12330_v23 }
 0x1c2   :  { %v12336_v28 = vpop.f32.mrf.mxu0  ;;  %v12338_v0 = vpop.f32.mrf.mxu1 }
 0x1c3   :  { %15788 = vst [vmem:[#allocation46_spill] sm:$0xff] %v12336_v28  ;;  %15789 = vst [vmem:[#allocation47_spill] sm:$0xff] %v12338_v0  ;;  %v12358_v0 = vrot.slane %v967_v33, %v12332_v24  ;;  %v1331_v28 = vpop.permute.xlu1 %1330  ;;  %v1343_v33 = vrot.slane %v12334_v1, 7  ;;  %v12403_v1 = vmul.f32 %v1203_v50, %v1142_v12  ;;  %v12419_v12 = vrot.slane %v1340_v8, 7 }
 0x1c4   :  { %v12350_v54 = vpop.f32.mrf.mxu0  ;;  %v12352_v49 = vpop.f32.mrf.mxu1  ;;  %v1347_v63 = vrot.slane %v1331_v28, 7 }
 0x1c5   :  { %15792 = vst [vmem:[#allocation50_spill] sm:$0xff] %v12350_v54  ;;  %15793 = vst [vmem:[#allocation51_spill] sm:$0xff] %v12352_v49  ;;  %v12370_v49 = vrot.slane %v9212_v58, %v12332_v24  ;;  %v1204_v54 = vrot.slane %v12285_v38, 1  ;;  %v12386_v24 = vrot.slane %v9212_v58, %v12343_v57  ;;  %v1144_v38 = vld [vmem:[#allocation3 + $0x10] sm:$0x80]  ;;  %v12417_v28 = vsel %vm1341_vm5, %v12391_v40, %v1343_v33 }
 0x1c6   :  { %v12362_v20 = vpop.f32.mrf.mxu0  ;;  %v12364_v42 = vpop.f32.mrf.mxu1  ;;  %v12405_v11 = vmul.f32 %v1203_v50, %v1144_v38  ;;  %v12435_v8 = vsel %vm1341_vm5, %v1345_v53, %v1347_v63 }
 0x1c7   :  { %15794 = vst [vmem:[#allocation52_spill] sm:$0xff] %v12362_v20  ;;  %15795 = vst [vmem:[#allocation53_spill] sm:$0xff] %v12364_v42  ;;  %v1208_v42 = vrot.slane %v12279_v32, 1  ;;  %v1210_v32 = vrot.slane %v12301_v56, 1  ;;  %v12399_v58 = vsel %vm1202_vm4, %v1203_v50, %v1204_v54  ;;  %v12408_v56 = vsel %vm1202_vm4, %v1204_v54, %v1206_v43 }
 0x1c8   :  { %v12381_v20 = vpop.f32.mrf.mxu0  ;;  %v12383_v23 = vpop.f32.mrf.mxu1  ;;  %v692_v54 = vadd.f32 %v12283_v37, %v12104_v5  ;;  %v12440_v5 = vsel %vm1341_vm5, %v1347_v63, %v1349_v7 }
 0x1c9   :  { %15796 = vst [vmem:[#allocation54_spill] sm:$0xff] %v12381_v20  ;;  %15797 = vst [vmem:[#allocation55_spill] sm:$0xff] %v12383_v23  ;;  %v1212_v20 = vrot.slane %v12295_v51, 1  ;;  %v1337_v23 = vpop.permute.xlu1 %1336  ;;  %v12411_v51 = vsel %vm1202_vm4, %v1206_v43, %v1208_v42  ;;  %v12426_v43 = vsel %vm1202_vm4, %v1208_v42, %v1210_v32  ;;  %v623_v42 = vadd.f32 %v12287_v41, %v12116_v10 }
 0x1ca   :  { %v654_v57 = vpop.f32.mrf.mxu0  ;;  %v725_v34 = vpop.f32.mrf.mxu1  ;;  %v1351_v47 = vrot.slane %v1337_v23, 7  ;;  %15800 = vst [vmem:[#allocation58_spill] sm:$0xff] %v12426_v43  ;;  %v12432_v23 = vsel %vm1341_vm5, %v1343_v33, %v1345_v53  ;;  %15802 = vst [vmem:[#allocation60_spill] sm:$0xff] %v12440_v5  ;;  %v12458_v10 = vmul.f32 %v12419_v12, %v1317_v4  ;;  %v15838_v5 = vld [vmem:[#allocation36_spill] sm:$0xff] }
 0x1cb   :  { %v1143_v57 = vld [vmem:[#allocation3 + $0x8] sm:$0x80]  ;;  %v12429_v38 = vsel %vm1202_vm4, %v1210_v32, %v1212_v20 }
 0x1cc   :  { %v655_v34 = vpop.f32.mrf.mxu0  ;;  %v726_v29 = vpop.f32.mrf.mxu1  ;;  %15801 = vst [vmem:[#allocation59_spill] sm:$0xff] %v12429_v38  ;;  %v12437_v6 = vmul.f32 %v1203_v50, %v1143_v57  ;;  %v12447_v33 = vsel %vm1341_vm5, %v1349_v7, %v1351_v47  ;;  %v12451_v50 = vsel %vm1202_vm4, %v1212_v20, %v12413_v35  ;;  %v12455_v53 = vsel %vm1341_vm5, %v1351_v47, %v12419_v12 }
 0x1cd   :  { %15803 = vst [vmem:[#allocation61_spill] sm:$0xff] %v12447_v33  ;;  %15804 = vst [vmem:[#allocation62_spill] sm:$0xff] %v12451_v50  ;;  %v625_v7 = vadd.f32 %v12291_v45, %v12126_v14  ;;  %v696_v20 = vadd.f32 %v12293_v48, %v12124_v13  ;;  %v627_v57 = vadd.f32 %v12297_v52, %v12136_v18 }
 0x1ce   :  { %v831_v29 = vpop.f32.mrf.mxu0  ;;  %v902_v34 = vpop.f32.mrf.mxu1  ;;  %15805 = vst [vmem:[#allocation63_spill] sm:$0xff] %v12455_v53  ;;  %15806 = vst [vmem:[#allocation64_spill] sm:$0xff] %v12458_v10  ;;  %v698_v47 = vadd.f32 %v12299_v55, %v12134_v17  ;;  %v631_v14 = vadd.f32 %v12303_v59, %v12146_v22  ;;  %v702_v13 = vadd.f32 %v12305_v60, %v12144_v21  ;;  %v15832_v53 = vld [vmem:[#allocation35_spill] sm:$0xff]  ;;  %v15833_v33 = vld [vmem:[#allocation52_spill] sm:$0xff] }
 0x1cf   :  { %v939_v37 = vadd.f32 %v831_v29, %v621_v16  ;;  %v941_v32 = vadd.f32 %v902_v34, %v692_v54  ;;  %v633_v60 = vadd.f32 %v12307_v61, %v12156_v26  ;;  %v706_v61 = vadd.f32 %v12313_v3, %v12164_v30 }
 0x1d0   :  { %v833_v38 = vpop.f32.mrf.mxu0  ;;  %v904_v43 = vpop.f32.mrf.mxu1  ;;  %v651_v50 = vadd.f32 %v15833_v33, %v15832_v53  ;;  %v15837_v35 = vld [vmem:[#allocation54_spill] sm:$0xff] }
 0x1d1   :  { %v989_v9 = vmul.f32 %v12355_v46, %v939_v37  ;;  %v991_v41 = vmul.f32 %v12358_v0, %v941_v32  ;;  %v940_v44 = vadd.f32 %v833_v38, %v623_v42  ;;  %v942_v63 = vadd.f32 %v904_v43, %v694_v36 }
 0x1d2   :  { %v835_v16 = vpop.f32.mrf.mxu0  ;;  %v906_v54 = vpop.f32.mrf.mxu1 }
 0x1d3   :  { %v1040_v4 = vadd.f32 %v12367_v19, %v989_v9  ;;  %v1042_v29 = vadd.f32 %v12370_v49, %v991_v41  ;;  %v990_v43 = vmul.f32 %v12373_v27, %v940_v44  ;;  %v992_v38 = vmul.f32 %v12378_v15, %v942_v63 }
 0x1d4   :  { %v943_v18 = vadd.f32 %v835_v16, %v625_v7  ;;  %v945_v45 = vadd.f32 %v906_v54, %v696_v20  ;;  %v837_v48 = vpop.f32.mrf.mxu0  ;;  %v908_v17 = vpop.f32.mrf.mxu1  ;;  %v704_v9 = vadd.f32 %v12309_v62, %v12154_v25  ;;  %v635_v25 = vadd.f32 %v12311_v2, %v12166_v31 }
 0x1d5   :  { %v12478_v52 = vmax.f32 %v1040_v4, 0.0  ;;  %v12480_v55 = vmax.f32 %v1042_v29, 0.0  ;;  %v1041_v34 = vadd.f32 %v12386_v24, %v990_v43  ;;  %v1043_v42 = vadd.f32 %v12389_v39, %v992_v38 }
 0x1d6   :  { %v993_v36 = vmul.f32 %v12355_v46, %v943_v18  ;;  %v995_v37 = vmul.f32 %v12358_v0, %v945_v45  ;;  %v944_v22 = vadd.f32 %v837_v48, %v627_v57  ;;  %v946_v59 = vadd.f32 %v908_v17, %v698_v47  ;;  %v841_v32 = vpop.f32.mrf.mxu0  ;;  %v912_v21 = vpop.f32.mrf.mxu1  ;;  %v15807_v45 = vld [vmem:[#allocation25_spill] sm:$0xff]  ;;  %v15808_v48 = vld [vmem:[#allocation38_spill] sm:$0xff]  ;;  %v15810_v17 = vld [vmem:[#allocation39_spill] sm:$0xff] }
 0x1d7   :  { %1096 = vst [vmem:[#allocation3 + $0x20] sm:$0xff] %v12478_v52  ;;  %1098 = vst [vmem:[#allocation3 + $0x30] sm:$0xff] %v12480_v55  ;;  %v12492_v41 = vmax.f32 %v1041_v34, 0.0  ;;  %v1071_v44 = vmax.f32 %v1043_v42, 0.0  ;;  %v947_v62 = vadd.f32 %v841_v32, %v631_v14  ;;  %v949_v16 = vadd.f32 %v912_v21, %v702_v13  ;;  %v15809_v13 = vld [vmem:[#allocation24_spill] sm:$0xff]  ;;  %v15811_v42 = vld [vmem:[#allocation27_spill] sm:$0xff] }
 0x1d8   :  { %v1044_v63 = vadd.f32 %v12367_v19, %v993_v36  ;;  %v1046_v7 = vadd.f32 %v12370_v49, %v995_v37  ;;  %v994_v20 = vmul.f32 %v12373_v27, %v944_v22  ;;  %v996_v57 = vmul.f32 %v12378_v15, %v946_v59  ;;  %v843_v47 = vpop.f32.mrf.mxu0  ;;  %v914_v26 = vpop.f32.mrf.mxu1  ;;  %v15812_v36 = vld [vmem:[#allocation40_spill] sm:$0xff]  ;;  %v15813_v22 = vld [vmem:[#allocation26_spill] sm:$0xff]  ;;  %v15814_v59 = vld [vmem:[#allocation41_spill] sm:$0xff] }
 0x1d9   :  { %1097 = vst [vmem:[#allocation3 + $0x28] sm:$0xff] %v12492_v41  ;;  %1100 = vst.msk [vmem:[#allocation3 + $0x38] sm:$0xff] %vm1099_vm6, %v1071_v44  ;;  %v997_v31 = vmul.f32 %v12355_v46, %v947_v62  ;;  %v999_v30 = vmul.f32 %v12358_v0, %v949_v16  ;;  %v948_v2 = vadd.f32 %v843_v47, %v633_v60 }
 0x1da   :  { %v12504_v54 = vmax.f32 %v1044_v63, 0.0  ;;  %v12506_v4 = vmax.f32 %v1046_v7, 0.0  ;;  %v1045_v29 = vadd.f32 %v12386_v24, %v994_v20  ;;  %v1047_v43 = vadd.f32 %v12389_v39, %v996_v57  ;;  %v845_v38 = vpop.f32.mrf.mxu0  ;;  %v916_v18 = vpop.f32.mrf.mxu1 }
 0x1db   :  { %v950_v3 = vadd.f32 %v914_v26, %v704_v9  ;;  %v637_v14 = vadd.f32 %v15808_v48, %v15807_v45  ;;  %v708_v34 = vadd.f32 %v15810_v17, %v15809_v13  ;;  %v641_v37 = vadd.f32 %v15812_v36, %v15811_v42  ;;  %v1316_v42 = vld [vmem:[#allocation3 + $0x100] sm:$0x1] }
 0x1dc   :  { %v712_v32 = vadd.f32 %v15814_v59, %v15813_v22  ;;  %v847_v21 = vpop.f32.mrf.mxu0  ;;  %v918_v44 = vpop.f32.mrf.mxu1  ;;  %v12520_v63 = vmax.f32 %v1045_v29, 0.0  ;;  %v1075_v7 = vmax.f32 %v1047_v43, 0.0  ;;  %v1048_v60 = vadd.f32 %v12367_v19, %v997_v31 }
 0x1dd   :  { %v1050_v9 = vadd.f32 %v12370_v49, %v999_v30  ;;  %v998_v20 = vmul.f32 %v12373_v27, %v948_v2  ;;  %v1000_v57 = vmul.f32 %v12378_v15, %v950_v3  ;;  %v951_v47 = vadd.f32 %v845_v38, %v635_v25 }
 0x1de   :  { %v953_v26 = vadd.f32 %v916_v18, %v706_v61  ;;  %v851_v62 = vpop.f32.mrf.mxu0  ;;  %v922_v16 = vpop.f32.mrf.mxu1  ;;  %1104 = vst.msk [vmem:[#allocation3 + $0x58] sm:$0xff] %vm1099_vm6, %v1075_v7  ;;  %v12527_v45 = vmax.f32 %v1048_v60, 0.0  ;;  %v952_v29 = vadd.f32 %v847_v21, %v637_v14  ;;  %v954_v43 = vadd.f32 %v918_v44, %v708_v34 }
 0x1df   :  { %v12529_v48 = vmax.f32 %v1050_v9, 0.0  ;;  %v1049_v31 = vadd.f32 %v12386_v24, %v998_v20  ;;  %v1051_v30 = vadd.f32 %v12389_v39, %v1000_v57  ;;  %v1001_v2 = vmul.f32 %v12355_v46, %v951_v47  ;;  %v15815_v20 = vld [vmem:[#allocation29_spill] sm:$0xff]  ;;  %v15816_v57 = vld [vmem:[#allocation42_spill] sm:$0xff] }
 0x1e0   :  { %v1003_v3 = vmul.f32 %v12358_v0, %v953_v26  ;;  %v853_v25 = vpop.f32.mrf.mxu0  ;;  %v924_v61 = vpop.f32.mrf.mxu1  ;;  %v1002_v38 = vmul.f32 %v12373_v27, %v952_v29  ;;  %v1004_v18 = vmul.f32 %v12378_v15, %v954_v43  ;;  %v955_v13 = vadd.f32 %v851_v62, %v641_v37  ;;  %v1318_v37 = vld [vmem:[#allocation3 + $0x110] sm:$0x1] }
 0x1e1   :  { %v957_v17 = vadd.f32 %v922_v16, %v712_v32  ;;  %v12537_v36 = vmax.f32 %v1049_v31, 0.0  ;;  %v1079_v14 = vmax.f32 %v1051_v30, 0.0  ;;  %v1052_v34 = vadd.f32 %v12367_v19, %v1001_v2  ;;  %v1319_v32 = vld [vmem:[#allocation3 + $0x118] sm:$0x1] }
 0x1e2   :  { %v1054_v22 = vadd.f32 %v12370_v49, %v1003_v3  ;;  %v855_v59 = vpop.f32.mrf.mxu0  ;;  %v926_v21 = vpop.f32.mrf.mxu1  ;;  %v1053_v44 = vadd.f32 %v12386_v24, %v1002_v38  ;;  %v1055_v7 = vadd.f32 %v12389_v39, %v1004_v18  ;;  %v1005_v60 = vmul.f32 %v12355_v46, %v955_v13  ;;  %v15818_v38 = vld [vmem:[#allocation28_spill] sm:$0xff]  ;;  %v15819_v18 = vld [vmem:[#allocation43_spill] sm:$0xff] }
 0x1e3   :  { %v1007_v9 = vmul.f32 %v12358_v0, %v957_v17  ;;  %v643_v47 = vadd.f32 %v15816_v57, %v15815_v20  ;;  %1108 = vst.msk [vmem:[#allocation3 + $0x78] sm:$0xff] %vm1099_vm6, %v1079_v14  ;;  %v12548_v26 = vmax.f32 %v1052_v34, 0.0  ;;  %v12553_v43 = vmul.f32 %v12419_v12, %v1316_v42  ;;  %v15820_v17 = vld [vmem:[#allocation31_spill] sm:$0xff]  ;;  %v15821_v14 = vld [vmem:[#allocation46_spill] sm:$0xff] }
 0x1e4   :  { %v12550_v62 = vmax.f32 %v1054_v22, 0.0  ;;  %v857_v16 = vpop.f32.mrf.mxu0  ;;  %v928_v29 = vpop.f32.mrf.mxu1  ;;  %v12555_v31 = vmax.f32 %v1053_v44, 0.0  ;;  %v1083_v30 = vmax.f32 %v1055_v7, 0.0  ;;  %v1056_v2 = vadd.f32 %v12367_v19, %v1005_v60  ;;  %v15824_v44 = vld [vmem:[#allocation30_spill] sm:$0xff]  ;;  %v15825_v7 = vld [vmem:[#allocation47_spill] sm:$0xff] }
 0x1e5   :  { %15817 = vst [vmem:[#allocation25_spill] sm:$0xff] %v12553_v43  ;;  %v1058_v3 = vadd.f32 %v12370_v49, %v1007_v9  ;;  %v714_v13 = vadd.f32 %v15819_v18, %v15818_v38  ;;  %v645_v34 = vadd.f32 %v15821_v14, %v15820_v17  ;;  %v12564_v57 = vmul.f32 %v12419_v12, %v1318_v37 }
 0x1e6   :  { %v861_v22 = vpop.f32.mrf.mxu0  ;;  %v932_v20 = vpop.f32.mrf.mxu1  ;;  %v12567_v42 = vmul.f32 %v12419_v12, %v1319_v32  ;;  %v716_v43 = vadd.f32 %v15825_v7, %v15824_v44  ;;  %1112 = vst.msk [vmem:[#allocation3 + $0x98] sm:$0xff] %vm1099_vm6, %v1083_v30  ;;  %v12572_v60 = vmax.f32 %v1056_v2, 0.0  ;;  %v956_v38 = vadd.f32 %v853_v25, %v643_v47  ;;  %v15828_v44 = vld [vmem:[#allocation33_spill] sm:$0xff]  ;;  %v15829_v7 = vld [vmem:[#allocation50_spill] sm:$0xff]  ;;  %v15830_v2 = vld [vmem:[#allocation32_spill] sm:$0xff] }
 0x1e7   :  { %15822 = vst [vmem:[#allocation38_spill] sm:$0xff] %v12564_v57  ;;  %v12574_v9 = vmax.f32 %v1058_v3, 0.0  ;;  %v1228_v18 = vmul.f32 %v12399_v58, %v12478_v52  ;;  %v1230_v37 = vmul.f32 %v12399_v58, %v12480_v55  ;;  %v958_v17 = vadd.f32 %v924_v61, %v714_v13  ;;  %v1292_v57 = vld [vmem:[#allocation3 + $0x20] sm:$0xfe]  ;;  %v1294_v25 = vld [vmem:[#allocation3 + $0x30] sm:$0xfe] }
 0x1e8   :  { %15823 = vst [vmem:[#allocation24_spill] sm:$0xff] %v12567_v42  ;;  %15826 = vst [vmem:[#allocation39_spill] sm:$0xff] %v12572_v60  ;;  %v959_v14 = vadd.f32 %v855_v59, %v645_v34  ;;  %v12580_v12 = vpop.f32.mrf.mxu0  ;;  %v12582_v32 = vpop.f32.mrf.mxu1  ;;  %v647_v30 = vadd.f32 %v15829_v7, %v15828_v44  ;;  %v15831_v42 = vld [vmem:[#allocation51_spill] sm:$0xff]  ;;  %v1006_v47 = vmul.f32 %v12373_v27, %v956_v38  ;;  %v15834_v61 = vld [vmem:[#allocation34_spill] sm:$0xff] }
 0x1e9   :  { %15827 = vst [vmem:[#allocation27_spill] sm:$0xff] %v12574_v9  ;;  %v718_v3 = vadd.f32 %v15831_v42, %v15830_v2  ;;  %v961_v10 = vadd.f32 %v926_v21, %v716_v43  ;;  %v15835_v59 = vld [vmem:[#allocation53_spill] sm:$0xff]  ;;  %v15839_v60 = vld [vmem:[#allocation55_spill] sm:$0xff]  ;;  %v1008_v38 = vmul.f32 %v12378_v15, %v958_v17  ;;  %v12604_v53 = vpack.c.bf16 %v1228_v18, %v12403_v1 }
 0x1ea   :  { %v722_v13 = vadd.f32 %v15835_v59, %v15834_v61  ;;  %v15836_v34 = vld [vmem:[#allocation37_spill] sm:$0xff]  ;;  %v12597_v44 = vadd.f32 %v15839_v60, %v15838_v5  ;;  %v865_v7 = vpop.f32.mrf.mxu0  ;;  %v936_v42 = vpop.f32.mrf.mxu1  ;;  %v1057_v2 = vadd.f32 %v12386_v24, %v1006_v47  ;;  %v1009_v21 = vmul.f32 %v12355_v46, %v959_v14 }
 0x1eb   :  { %v653_v9 = vadd.f32 %v15837_v35, %v15836_v34  ;;  %v1011_v33 = vmul.f32 %v12358_v0, %v961_v10  ;;  %v12607_v43 = vpack.c.bf16 %v1230_v37, %v12405_v11  ;;  %v1363_v35 = vmul.f32 %v12391_v40, %v1292_v57  ;;  %v12622_v7 = vld [vmem:[#allocation3 + $0x58] sm:$0xff] }
 0x1ec   :  { %v1365_v5 = vmul.f32 %v12391_v40, %v1294_v25  ;;  %v866_v60 = vpop.f32.mrf.mxu0  ;;  %v937_v61 = vpop.f32.mrf.mxu1  ;;  %v12611_v59 = vmax.f32 %v1057_v2, 0.0  ;;  %v1059_v17 = vadd.f32 %v12389_v39, %v1008_v38  ;;  %v1060_v14 = vadd.f32 %v12367_v19, %v1009_v21 }
 0x1ed   :  { %v1062_v10 = vadd.f32 %v12370_v49, %v1011_v33  ;;  %v1371_v1 = vmul.f32 %v12432_v23, %v12527_v45  ;;  %v960_v18 = vadd.f32 %v857_v16, %v647_v30  ;;  %v962_v11 = vadd.f32 %v928_v29, %v718_v3 }
 0x1ee   :  { %v963_v37 = vadd.f32 %v861_v22, %v651_v50  ;;  %v1087_v47 = vmax.f32 %v1059_v17, 0.0  ;;  %v12618_v57 = vmax.f32 %v1060_v14, 0.0  ;;  %v965_v34 = vadd.f32 %v932_v20, %v722_v13  ;;  %v1295_v13 = vld [vmem:[#allocation3 + $0x38] sm:$0xfe] }
 0x1ef   :  { %v12620_v25 = vmax.f32 %v1062_v10, 0.0  ;;  %v1010_v42 = vmul.f32 %v12373_v27, %v960_v18  ;;  %v1012_v2 = vmul.f32 %v12378_v15, %v962_v11  ;;  %v1375_v21 = vmul.f32 %v12435_v8, %v12548_v26 }
 0x1f0   :  { %v1013_v38 = vmul.f32 %v12355_v46, %v963_v37  ;;  %v1367_v50 = vmul.f32 %v12417_v28, %v12504_v54  ;;  %1116 = vst.msk [vmem:[#allocation3 + $0xb8] sm:$0xff] %vm1099_vm6, %v1087_v47  ;;  %1117 = vst [vmem:[#allocation3 + $0xc0] sm:$0xff] %v12618_v57  ;;  %v1373_v16 = vmul.f32 %v12432_v23, %v12529_v48  ;;  %v12668_v37 = vld [vmem:[#allocation3 + $0x38] sm:$0xff] }
 0x1f1   :  { %v1015_v29 = vmul.f32 %v12358_v0, %v965_v34  ;;  %v1377_v22 = vmul.f32 %v12435_v8, %v12550_v62  ;;  %v1061_v46 = vadd.f32 %v12386_v24, %v1010_v42  ;;  %v1063_v20 = vadd.f32 %v12389_v39, %v1012_v2  ;;  %v10578_v42 = vld [vmem:[%s15765_s6 + $0x468] ss:$16 sps:$4 sm:$0xff]  }
 0x1f2   :  { %v1064_v30 = vadd.f32 %v12367_v19, %v1013_v38  ;;  %v12641_v3 = vpack.c.bf16 %v1375_v21, %v1371_v1  ;;  %v1369_v33 = vmul.f32 %v12417_v28, %v12506_v4  ;;  %v1370_v60 = vmul.f32 %v12417_v28, %v12622_v7 }
 0x1f3   :  { %v1066_v0 = vadd.f32 %v12370_v49, %v1015_v29  ;;  %v12648_v61 = vpack.c.bf16 %v1377_v22, %v1373_v16  ;;  %v12650_v17 = vpack.c.bf16 %v1367_v50, %v1363_v35  ;;  %v12652_v14 = vmax.f32 %v1061_v46, 0.0  ;;  %v10581_v35 = vld [vmem:[%s15765_s6 + $0x668] ss:$16 sps:$4 sm:$0xff]   ;;  %v1303_v16 = vld [vmem:[#allocation3 + $0x78] sm:$0xff] }
 0x1f4   :  { %v1091_v10 = vmax.f32 %v1063_v20, 0.0  ;;  %v12654_v18 = vmax.f32 %v1064_v30, 0.0  ;;  %v12658_v19 = vmul.f32 %v12408_v56, %v12504_v54  ;;  %v12660_v1 = vpack.c.bf16 %v1369_v33, %v1365_v5  ;;  %v1307_v29 = vld [vmem:[#allocation3 + $0x98] sm:$0xff] }
 0x1f5   :  { %v12662_v11 = vmax.f32 %v1066_v0, 0.0  ;;  %v12666_v49 = vpack.c.bf16 %v12520_v63, %v12492_v41  ;;  %v12675_v47 = vpack.c.bf16 %v12504_v54, %v12478_v52  ;;  %v1366_v34 = vmul.f32 %v12391_v40, %v1295_v13  ;;  %v10589_v52 = vld [vmem:[%s15765_s6 + $0x64c] ss:$16 sps:$4 sm:$0xff]  }
 0x1f6   :  { %1120 = vst.msk [vmem:[#allocation3 + $0xd8] sm:$0xff] %vm1099_vm6, %v1091_v10  ;;  %1121 = vst [vmem:[#allocation3 + $0xe0] sm:$0xff] %v12654_v18  ;;  %v12682_v5 = vpack.c.bf16 %v12622_v7, %v12668_v37  ;;  %v964_v2 = vadd.f32 %v12580_v12, %v653_v9  ;;  %v12693_v54 = vmul.f32 %v12408_v56, %v12506_v4  ;;  %v10586_v12 = vld [vmem:[%s15765_s6 + $0x44c] ss:$16 sps:$4 sm:$0xff]   ;;  %v3642_v20 = vshll.u32 %v12660_v1, 16 }
 0x1f7   :  { %15840 = vst [vmem:[#allocation40_spill] sm:$0xff] %v12675_v47  ;;  %v12697_v38 = vpack.c.bf16 %v12506_v4, %v12480_v55  ;;  %v12701_v21 = vmul.f32 %v12417_v28, %v12520_v63  ;;  %1123 = vst [vmem:[#allocation3 + $0xf0] sm:$0xff] %v12662_v11  ;;  %2240 = vmatprep.mubr.bf16.mxu0 %v12666_v49  ;;  %v966_v9 = vadd.f32 %v12582_v32, %v12597_v44  ;;  %v10592_v0 = vld [vmem:[%s15765_s6 + $0x42c] ss:$16 sps:$4 sm:$0xff]   ;;  %v10602_v32 = vld [vmem:[%s15765_s6 + $0x3e8] ss:$16 sps:$4 sm:$0xff]  }
 0x1f8   :  { %v12710_v50 = vpack.c.bf16 %v1370_v60, %v1366_v34  ;;  %v3618_v4 = vshll.u32 %v12650_v17, 16  ;;  %9437 = vmatprep.mubr.msk.bf16.mxu1 %vm1099_vm6, %v12682_v5  ;;  %v1014_v28 = vmul.f32 %v12373_v27, %v964_v2  ;;  %2241 = vmatmul.mubr.bf16.vlgmr.msra.gmra.mxu0 %v12675_v47  ;;  %v12721_v44 = vmul.f32 %v12432_v23, %v12537_v36  ;;  %v10587_v27 = vld [vmem:[%s15765_s6 + $0x648] ss:$16 sps:$4 sm:$0xff]   ;;  %v10595_v10 = vld [vmem:[%s15765_s6 + $0x62c] ss:$16 sps:$4 sm:$0xff]  }
 0x1f9   :  { %15841 = vst [vmem:[#allocation26_spill] sm:$0xff] %v12697_v38  ;;  %v1229_v22 = vmul.f32 %v12399_v58, %v12492_v41  ;;  %v1016_v46 = vmul.f32 %v12378_v15, %v966_v9  ;;  %2312 = vmatmul.mubr.bf16.vlgmr.msra.gmra.mxu1 %v12697_v38  ;;  %2422 = vmatpush1.bf16.msra.mxu0 %v10581_v35  ;;  %v10584_v41 = vld [vmem:[%s15765_s6 + $0x448] ss:$16 sps:$4 sm:$0xff]  }
 0x1fa   :  { %v1233_v30 = vmul.f32 %v12408_v56, %v12520_v63  ;;  %v1065_v13 = vadd.f32 %v12386_v24, %v1014_v28  ;;  %2351 = vmatpush1.bf16.msra.mxu1 %v10578_v42  ;;  %2423 = vmatprep.subr.bf16.mxu0 %v10589_v52  ;;  %v1237_v15 = vmul.f32 %v12411_v51, %v12537_v36  ;;  %v12774_v52 = vrot.slane %v3618_v4, 1  ;;  %v10601_v4 = vld [vmem:[%s15765_s6 + $0x60c] ss:$16 sps:$4 sm:$0xff]   ;;  %v15854_v55 = vld [vmem:[#allocation56_spill] sm:$0xff] }
 0x1fb   :  { %v1235_v33 = vmul.f32 %v12622_v7, %v12408_v56  ;;  %v1067_v60 = vadd.f32 %v12389_v39, %v1016_v46  ;;  %2352 = vmatprep.subr.bf16.mxu1 %v10586_v12  ;;  %v12744_v63 = vpack.c.bf16 %v12555_v31, %v12537_v36  ;;  %v1239_v24 = vmul.f32 %v1303_v16, %v12411_v51  ;;  %v12780_v12 = vld [vmem:[#allocation3 + $0xb8] sm:$0xff] }
 0x1fc   :  { %v12754_v35 = vmul.f32 %v12432_v23, %v1303_v16  ;;  %v12756_v56 = vmax.f32 %v1065_v13, 0.0  ;;  %v12758_v39 = vpack.c.bf16 %v1237_v15, %v1233_v30  ;;  %v12760_v7 = vpack.c.bf16 %v1307_v29, %v1303_v16  ;;  %v10593_v23 = vld [vmem:[%s15765_s6 + $0x628] ss:$16 sps:$4 sm:$0xff]  }
 0x1fd   :  { %15842 = vst [vmem:[#allocation41_spill] sm:$0xff] %v12744_v63  ;;  %v12764_v36 = vmul.f32 %v12435_v8, %v12555_v31  ;;  %v1095_v34 = vmax.f32 %v1067_v60, 0.0  ;;  %2424 = vmatpush1.bf16.msra.mxu0 %v10587_v27  ;;  %2250 = vmatprep.mubr.bf16.mxu0 %v12744_v63  ;;  %v12767_v42 = vpack.c.bf16 %v1239_v24, %v1235_v33  ;;  %v10590_v16 = vld [vmem:[%s15765_s6 + $0x428] ss:$16 sps:$4 sm:$0xff]   ;;  %v12802_v27 = vld [vmem:[#allocation3 + $0xd8] sm:$0xff]  ;;  %v15849_v24 = vld [vmem:[#allocation39_spill] sm:$0xff] }
 0x1fe   :  { %15843 = vst [vmem:[#allocation29_spill] sm:$0xff] %v12760_v7  ;;  %v1236_v2 = vmul.f32 %v12411_v51, %v12527_v45  ;;  %v12777_v9 = vpack.c.bf16 %v1229_v22, %v12437_v6  ;;  %1122 = vst [vmem:[#allocation3 + $0xe8] sm:$0xff] %v12756_v56  ;;  %2353 = vmatpush1.bf16.msra.mxu1 %v10584_v41  ;;  %9438 = vmatprep.mubr.msk.bf16.mxu1 %vm1099_vm6, %v12760_v7  ;;  %v12796_v22 = vrot.slane %v3642_v20, 1  ;;  %v10598_v20 = vld [vmem:[%s15765_s6 + $0x40c] ss:$16 sps:$4 sm:$0xff]  }
 0x1ff   :  { %v12789_v28 = vpack.c.bf16 %v12548_v26, %v12527_v45  ;;  %v1238_v6 = vmul.f32 %v12411_v51, %v12529_v48  ;;  %v12799_v46 = vmul.f32 %v12435_v8, %v1307_v29  ;;  %1124 = vst.msk [vmem:[#allocation3 + $0xf8] sm:$0xff] %vm1099_vm6, %v1095_v34  ;;  %2354 = vmatprep.subr.bf16.mxu1 %v10592_v0  ;;  %v15846_v8 = vld [vmem:[#allocation58_spill] sm:$0xff]  ;;  %v15847_v41 = vld [vmem:[#allocation59_spill] sm:$0xff]  ;;  %v15850_v0 = vld [vmem:[#allocation60_spill] sm:$0xff] }
 0x200   :  { %2425 = vmatprep.subr.bf16.mxu0 %v10595_v10  ;;  %v12805_v45 = vpack.c.bf16 %v1236_v2, %v12658_v19  ;;  %v12809_v51 = vpack.c.bf16 %v12550_v62, %v12529_v48  ;;  %v1241_v30 = vmul.f32 %v15846_v8, %v12555_v31  ;;  %v1245_v19 = vmul.f32 %v15847_v41, %v12611_v59  ;;  %v10599_v31 = vld [vmem:[%s15765_s6 + $0x608] ss:$16 sps:$4 sm:$0xff]   ;;  %v10607_v34 = vld [vmem:[%s15765_s6 + $0x5ec] ss:$16 sps:$4 sm:$0xff]  }
 0x201   :  { %15844 = vst [vmem:[#allocation42_spill] sm:$0xff] %v12789_v28  ;;  %2251 = vmatmul.mubr.bf16.gmra.mxu0 %v12789_v28  ;;  %v12818_v13 = vpack.c.bf16 %v1238_v6, %v12693_v54  ;;  %v12824_v15 = vpack.c.bf16 %v12652_v14, %v12611_v59  ;;  %v1231_v33 = vmul.f32 %v12399_v58, %v12668_v37  ;;  %v10596_v58 = vld [vmem:[%s15765_s6 + $0x408] ss:$16 sps:$4 sm:$0xff]   ;;  %v15853_v48 = vld [vmem:[#allocation27_spill] sm:$0xff] }
 0x202   :  { %15845 = vst [vmem:[#allocation28_spill] sm:$0xff] %v12809_v51  ;;  %v1243_v60 = vmul.f32 %v1307_v29, %v15846_v8  ;;  %2322 = vmatmul.mubr.bf16.gmra.mxu1 %v12809_v51  ;;  %2426 = vmatpush1.bf16.msra.mxu0 %v10593_v23  ;;  %v1247_v54 = vmul.f32 %v12780_v12, %v15847_v41  ;;  %v2511_v23 = vshrl.u32 %v12777_v9, 16 }
 0x203   :  { %15848 = vst [vmem:[#allocation43_spill] sm:$0xff] %v12824_v15  ;;  %v12838_v10 = vmul.f32 %v15850_v0, %v15849_v24  ;;  %2355 = vmatpush1.bf16.msra.mxu1 %v10590_v16  ;;  %2427 = vmatprep.subr.bf16.mxu0 %v10601_v4  ;;  %v12843_v37 = vpack.c.bf16 %v1245_v19, %v1241_v30  ;;  %v10604_v4 = vld [vmem:[%s15765_s6 + $0x3ec] ss:$16 sps:$4 sm:$0xff]   ;;  %v2502_v19 = vshrl.u32 %v12805_v45, 16 }
 0x204   :  { %v12847_v29 = vpack.c.bf16 %v12802_v27, %v12780_v12  ;;  %v1240_v16 = vmul.f32 %v15846_v8, %v12548_v26  ;;  %2356 = vmatprep.subr.bf16.mxu1 %v10598_v20  ;;  %2260 = vmatprep.mubr.bf16.mxu0 %v12824_v15  ;;  %v12857_v6 = vpack.c.bf16 %v1247_v54, %v1243_v60  ;;  %v2514_v26 = vshll.u32 %v12777_v9, 16 }
 0x205   :  { %15851 = vst [vmem:[#allocation31_spill] sm:$0xff] %v12838_v10  ;;  %v1244_v30 = vmul.f32 %v15847_v41, %v15849_v24  ;;  %v1242_v2 = vmul.f32 %v15846_v8, %v12550_v62  ;;  %v2519_v20 = vshrl.u32 %v12758_v39, 16  ;;  %v2505_v60 = vshll.u32 %v12805_v45, 16  ;;  %v10605_v62 = vld [vmem:[%s15765_s6 + $0x5e8] ss:$16 sps:$4 sm:$0xff]  }
 0x206   :  { %15852 = vst [vmem:[#allocation46_spill] sm:$0xff] %v12847_v29  ;;  %9439 = vmatprep.mubr.msk.bf16.mxu1 %vm1099_vm6, %v12847_v29  ;;  %v2536_v54 = vshrl.u32 %v12818_v13, 16  ;;  %2428 = vmatpush1.bf16.msra.mxu0 %v10599_v31  ;;  %v1246_v9 = vmul.f32 %v15847_v41, %v15853_v48  ;;  %v1259_v15 = vpack.c.bf16 %v1231_v33, %v15854_v55  ;;  %v2539_v45 = vshll.u32 %v12818_v13, 16  ;;  %v1173_v28 = vld [vmem:[#allocation3 + $0xf8] sm:$0x7f] }
 0x207   :  { %v12879_v8 = vpack.c.bf16 %v1244_v30, %v1240_v16  ;;  %2357 = vmatpush1.bf16.msra.mxu1 %v10596_v58  ;;  %2429 = vmatprep.subr.bf16.mxu0 %v10607_v34  ;;  %v12887_v31 = vpack.c.bf16 %v12618_v57, %v15849_v24  ;;  %v12889_v63 = vld [vmem:[#allocation3 + $0xf8] sm:$0xff]  ;;  %v2513_v47 = vrot.slane %v2511_v23, 3  ;;  %v1172_v29 = vld [vmem:[#allocation3 + $0xf0] sm:$0x7f]  ;;  %v12896_v55 = vpack.c.bf16 %v12620_v25, %v15853_v48 }
 0x208   :  { %v15856_v16 = vld [vmem:[#allocation57_spill] sm:$0xff]  ;;  %2358 = vmatprep.subr.bf16.mxu1 %v10604_v4  ;;  %v12892_v41 = vpack.c.bf16 %v1246_v9, %v1242_v2  ;;  %v12900_v13 = vpack.c.bf16 %v12756_v56, %v12756_v56  ;;  %v2504_v24 = vrot.slane %v2502_v19, 3  ;;  %v15858_v58 = vld [vmem:[#allocation62_spill] sm:$0xff]  ;;  %v12910_v34 = vpack.c.bf16 %v12889_v63, %v12889_v63 }
 0x209   :  { %15855 = vst [vmem:[#allocation30_spill] sm:$0xff] %v12887_v31  ;;  %v1255_v30 = vmul.f32 %v15856_v16, %v1173_v28  ;;  %v10610_v33 = vld [vmem:[%s15765_s6 + $0x3cc] ss:$16 sps:$4 sm:$0xff]   ;;  %v1251_v28 = vmul.f32 %v12802_v27, %v15858_v58  ;;  %2261 = vmatmul.mubr.bf16.gmra.mxu0 %v12887_v31  ;;  %v2516_v2 = vrot.slane %v2514_v26, 4  ;;  %v2507_v4 = vrot.slane %v2505_v60, 4 }
 0x20a   :  { %15857 = vst [vmem:[#allocation47_spill] sm:$0xff] %v12900_v13  ;;  %15859 = vst [vmem:[#allocation33_spill] sm:$0xff] %v12910_v34  ;;  %v10613_v23 = vld [vmem:[%s15765_s6 + $0x5cc] ss:$16 sps:$4 sm:$0xff]   ;;  %v2538_v9 = vrot.slane %v2536_v54, 3  ;;  %2332 = vmatmul.mubr.bf16.gmra.mxu1 %v12896_v55  ;;  %2430 = vmatpush1.bf16.msra.mxu0 %v10605_v62  ;;  %v2521_v51 = vrot.slane %v2519_v20, 3  ;;  %v12922_v38 = vmul.f32 %v15858_v58, %v12620_v25 }
 0x20b   :  { %v10611_v19 = vld [vmem:[%s15765_s6 + $0x5c8] ss:$16 sps:$4 sm:$0xff]   ;;  %v2522_v31 = vshll.u32 %v12758_v39, 16  ;;  %v2541_v7 = vrot.slane %v2539_v45, 4  ;;  %v12925_v10 = vmul.f32 %v15856_v16, %v1172_v29  ;;  %2359 = vmatpush1.bf16.msra.mxu1 %v10602_v32  ;;  %2270 = vmatprep.mubr.bf16.mxu0 %v12900_v13  ;;  %v10619_v20 = vld [vmem:[%s15765_s6 + $0x5ac] ss:$16 sps:$4 sm:$0xff]   ;;  %v12934_v60 = vpack.c.bf16 %v1255_v30, %v1251_v28 }
 0x20c   :  { %v10608_v26 = vld [vmem:[%s15765_s6 + $0x3c8] ss:$16 sps:$4 sm:$0xff]   ;;  %v2545_v39 = vshrl.u32 %v1259_v15, 16  ;;  %9440 = vmatprep.mubr.msk.bf16.mxu1 %vm1099_vm6, %v12910_v34  ;;  %2360 = vmatprep.subr.bf16.mxu1 %v10610_v33  ;;  %v10616_v32 = vld [vmem:[%s15765_s6 + $0x3ac] ss:$16 sps:$4 sm:$0xff]   ;;  %v12943_v29 = vpack.c.bf16 %v12654_v18, %v12654_v18  ;;  %v2548_v62 = vshll.u32 %v1259_v15, 16  ;;  %v12947_v45 = vpack.c.bf16 %v12662_v11, %v12662_v11 }
 0x20d   :  { %v2524_v54 = vrot.slane %v2522_v31, 4  ;;  %2431 = vmatprep.subr.bf16.mxu0 %v10613_v23  ;;  %v2553_v28 = vshrl.u32 %v12767_v42, 16  ;;  %v2556_v33 = vshll.u32 %v12767_v42, 16  ;;  %v10617_v58 = vld [vmem:[%s15765_s6 + $0x5a8] ss:$16 sps:$4 sm:$0xff]   ;;  %v2517_v16 = vor.u32 %v2516_v2, %v2513_v47 }
 0x20e   :  { %v2547_v30 = vrot.slane %v2545_v39, 3  ;;  %2432 = vmatpush1.bf16.msra.mxu0 %v10611_v19  ;;  %v2550_v31 = vrot.slane %v2548_v62, 4  ;;  %v2494_v15 = vshrl.u32 %v12604_v53, 16  ;;  %v10614_v23 = vld [vmem:[%s15765_s6 + $0x3a8] ss:$16 sps:$4 sm:$0xff]   ;;  %v2497_v42 = vshll.u32 %v12604_v53, 16 }
 0x20f   :  { %v12954_v13 = vor.u32 %v2524_v54, %v2521_v51  ;;  %2361 = vmatpush1.bf16.msra.mxu1 %v10608_v26  ;;  %2433 = vmatprep.subr.bf16.mxu0 %v10619_v20  ;;  %v2555_v39 = vrot.slane %v2553_v28, 3  ;;  %v2558_v34 = vrot.slane %v2556_v33, 4  ;;  %v12961_v19 = vor.u32 %v2507_v4, %v2504_v24  ;;  %v10622_v47 = vld [vmem:[%s15765_s6 + $0x38c] ss:$16 sps:$4 sm:$0xff]  }
 0x210   :  { %2362 = vmatprep.subr.bf16.mxu1 %v10616_v32  ;;  %v2551_v2 = vor.u32 %v2550_v31, %v2547_v30  ;;  %v2496_v26 = vrot.slane %v2494_v15, 3  ;;  %v2528_v54 = vshrl.u32 %v12607_v43, 16  ;;  %v10625_v53 = vld [vmem:[%s15765_s6 + $0x58c] ss:$16 sps:$4 sm:$0xff]   ;;  %v2499_v4 = vrot.slane %v2497_v42, 4 }
 0x211   :  { %v12968_v51 = vsel %vm2492_vm7, %v2517_v16, %v12954_v13  ;;  %2271 = vmatmul.mubr.bf16.gmra.mxu0 %v12943_v29  ;;  %v2559_v24 = vor.u32 %v2558_v34, %v2555_v39  ;;  %v2531_v20 = vshll.u32 %v12607_v43, 16  ;;  %v12976_v32 = vor.u32 %v2541_v7, %v2538_v9  ;;  %v10623_v16 = vld [vmem:[%s15765_s6 + $0x588] ss:$16 sps:$4 sm:$0xff]   ;;  %v10631_v7 = vld [vmem:[%s15765_s6 + $0x6ec] ss:$16 sps:$4 sm:$0xff]  }
 0x212   :  { %2342 = vmatmul.mubr.bf16.gmra.mxu1 %v12947_v45  ;;  %2434 = vmatpush1.bf16.msra.mxu0 %v10617_v58  ;;  %v2530_v62 = vrot.slane %v2528_v54, 3  ;;  %v2571_v30 = vshrl.u32 %v12843_v37, 16  ;;  %v2574_v28 = vshll.u32 %v12843_v37, 16  ;;  %v2589_v33 = vshrl.u32 %v12857_v6, 16  ;;  %v10620_v43 = vld [vmem:[%s15765_s6 + $0x388] ss:$16 sps:$4 sm:$0xff]  }
 0x213   :  { %2363 = vmatpush1.bf16.msra.mxu1 %v10614_v23  ;;  %2382 = vmatprep.mubr.bf16.mxu1 %v12666_v49  ;;  %v12993_v58 = vsel %vm2492_vm7, %v2551_v2, %v2559_v24  ;;  %v2500_v34 = vor.u32 %v2499_v4, %v2496_v26  ;;  %v2533_v9 = vrot.slane %v2531_v20, 4  ;;  %v2592_v37 = vshll.u32 %v12857_v6, 16  ;;  %v10628_v49 = vld [vmem:[%s15765_s6 + $0x56c] ss:$16 sps:$4 sm:$0xff]  }
 0x214   :  { %9441 = vmatprep.mubr.msk.bf16.mxu0 %vm1099_vm6, %v12682_v5  ;;  %2364 = vmatprep.subr.bf16.mxu1 %v10622_v47  ;;  %v2573_v31 = vrot.slane %v2571_v30, 3  ;;  %v2576_v15 = vrot.slane %v2574_v28, 4  ;;  %v2591_v23 = vrot.slane %v2589_v33, 3  ;;  %v2562_v39 = vshrl.u32 %v12879_v8, 16  ;;  %v10629_v5 = vld [vmem:[%s15765_s6 + $0x6e8] ss:$16 sps:$4 sm:$0xff]  }
 0x215   :  { %2435 = vmatprep.subr.bf16.mxu0 %v10625_v53  ;;  %v13004_v42 = vsel %vm2492_vm7, %v2500_v34, %v12961_v19  ;;  %v2534_v2 = vor.u32 %v2533_v9, %v2530_v62  ;;  %v2594_v6 = vrot.slane %v2592_v37, 4  ;;  %v2565_v26 = vshll.u32 %v12879_v8, 16  ;;  %v10626_v8 = vld [vmem:[%s15765_s6 + $0x568] ss:$16 sps:$4 sm:$0xff]  }
 0x216   :  { %2436 = vmatpush1.bf16.msra.mxu0 %v10623_v16  ;;  %v13010_v47 = vor.u32 %v2576_v15, %v2573_v31  ;;  %v2564_v54 = vrot.slane %v2562_v39, 3  ;;  %v2580_v4 = vshrl.u32 %v12892_v41, 16  ;;  %v2583_v53 = vshll.u32 %v12892_v41, 16  ;;  %v10637_v16 = vld [vmem:[%s15765_s6 + $0x6cc] ss:$16 sps:$4 sm:$0xff]  }
 0x217   :  { %v1270_v20 = vpack.c.bf16 %v12925_v10, %v12922_v38  ;;  %2365 = vmatpush1.bf16.msra.mxu1 %v10620_v43  ;;  %2445 = vmatprep.subr.bf16.mxu0 %v10631_v7  ;;  %v13024_v62 = vsel %vm2492_vm7, %v2534_v2, %v12976_v32  ;;  %v2595_v30 = vor.u32 %v2594_v6, %v2591_v23  ;;  %v2567_v28 = vrot.slane %v2565_v26, 4  ;;  %v10634_v38 = vld [vmem:[%s15765_s6 + $0x54c] ss:$16 sps:$4 sm:$0xff]   ;;  %v1293_v15 = vld [vmem:[#allocation3 + $0x28] sm:$0xfe] }
 0x218   :  { %v13028_v41 = vmul.f32 %v15850_v0, %v12611_v59  ;;  %2366 = vmatprep.subr.bf16.mxu1 %v10628_v49  ;;  %v13036_v10 = vsel %vm2492_vm7, %v12954_v13, %v13010_v47  ;;  %v2582_v33 = vrot.slane %v2580_v4, 3  ;;  %v2585_v43 = vrot.slane %v2583_v53, 4  ;;  %v15860_v13 = vld [vmem:[#allocation61_spill] sm:$0xff]  ;;  %v15861_v23 = vld [vmem:[#allocation63_spill] sm:$0xff] }
 0x219   :  { %v13040_v7 = vmul.f32 %v15850_v0, %v15853_v48  ;;  %v13043_v34 = vsel %vm2492_vm7, %v2559_v24, %v2595_v30  ;;  %v13045_v59 = vor.u32 %v2567_v28, %v2564_v54  ;;  %v2625_v9 = vshrl.u32 %v12934_v60, 16  ;;  %v10635_v48 = vld [vmem:[%s15765_s6 + $0x6c8] ss:$16 sps:$4 sm:$0xff]   ;;  %v10640_v26 = vld [vmem:[%s15765_s6 + $0x52c] ss:$16 sps:$4 sm:$0xff]  }
 0x21a   :  { %v13050_v37 = vmul.f32 %v15850_v0, %v12780_v12  ;;  %v13054_v49 = vmul.f32 %v15860_v13, %v12618_v57  ;;  %2446 = vmatpush2.bf16.msra.mxu0 %v10629_v5  ;;  %v2586_v31 = vor.u32 %v2585_v43, %v2582_v33  ;;  %v2628_v24 = vshll.u32 %v12934_v60, 16  ;;  %v10632_v12 = vld [vmem:[%s15765_s6 + $0x548] ss:$16 sps:$4 sm:$0xff]   ;;  %v10643_v57 = vld [vmem:[%s15765_s6 + $0x6ac] ss:$16 sps:$4 sm:$0xff]  }
 0x21b   :  { %v1388_v39 = vmul.f32 %v15861_v23, %v12756_v56  ;;  %2367 = vmatpush2.bf16.msra.mxu1 %v10626_v8  ;;  %2447 = vmatprep.subr.bf16.mxu0 %v10637_v16  ;;  %v13071_v0 = vsel %vm2492_vm7, %v12961_v19, %v13045_v59  ;;  %v2627_v60 = vrot.slane %v2625_v9, 3  ;;  %v2616_v2 = vshrl.u32 %v1270_v20, 16  ;;  %v10641_v16 = vld [vmem:[%s15765_s6 + $0x6a8] ss:$16 sps:$4 sm:$0xff]  }
 0x21c   :  { %v1384_v56 = vmul.f32 %v15860_v13, %v12652_v14  ;;  %v13077_v6 = vmul.f32 %v15860_v13, %v12620_v25  ;;  %2368 = vmatprep.subr.bf16.mxu1 %v10634_v38  ;;  %v13084_v5 = vsel %vm2492_vm7, %v12976_v32, %v2586_v31  ;;  %v2630_v19 = vrot.slane %v2628_v24, 4 }
 0x21d   :  { %v1386_v54 = vmul.f32 %v15860_v13, %v12802_v27  ;;  %v2618_v4 = vrot.slane %v2616_v2, 3  ;;  %v2619_v53 = vshll.u32 %v1270_v20, 16  ;;  %v1364_v8 = vmul.f32 %v12391_v40, %v1293_v15  ;;  %v15862_v20 = vld [vmem:[#allocation64_spill] sm:$0xff] }
 0x21e   :  { %v13091_v25 = vmul.f32 %v15861_v23, %v12889_v63  ;;  %2448 = vmatpush2.bf16.msra.mxu0 %v10635_v48  ;;  %v13096_v28 = vor.u32 %v2630_v19, %v2627_v60  ;;  %v1400_v32 = vpack.c.bf16 %v12764_v36, %v12721_v44  ;;  %v1402_v27 = vpack.c.bf16 %v12799_v46, %v12754_v35  ;;  %v10638_v63 = vld [vmem:[%s15765_s6 + $0x528] ss:$16 sps:$4 sm:$0xff]   ;;  %v10649_v44 = vld [vmem:[%s15765_s6 + $0x68c] ss:$16 sps:$4 sm:$0xff]  }
 0x21f   :  { %v13103_v38 = vpack.c.bf16 %v15862_v20, %v1388_v39  ;;  %v13107_v40 = vmul.f32 %v15861_v23, %v12654_v18  ;;  %2369 = vmatpush2.bf16.msra.mxu1 %v10632_v12  ;;  %2449 = vmatprep.subr.bf16.mxu0 %v10643_v57  ;;  %v2621_v36 = vrot.slane %v2619_v53, 4  ;;  %v1396_v35 = vpack.c.bf16 %v12701_v21, %v1364_v8  ;;  %v10646_v46 = vld [vmem:[%s15765_s6 + $0x50c] ss:$16 sps:$4 sm:$0xff]   ;;  %v10647_v15 = vld [vmem:[%s15765_s6 + $0x688] ss:$16 sps:$4 sm:$0xff]  }
 0x220   :  { %2370 = vmatprep.subr.bf16.mxu1 %v10640_v26  ;;  %v13121_v18 = vsel %vm2492_vm7, %v2595_v30, %v13096_v28  ;;  %v3635_v33 = vshll.u32 %v1400_v32, 16  ;;  %v3654_v43 = vshll.u32 %v12710_v50, 16  ;;  %v3659_v9 = vshll.u32 %v1402_v27, 16  ;;  %v10652_v53 = vld [vmem:[%s15765_s6 + $0x4ec] ss:$16 sps:$4 sm:$0xff]  }
 0x221   :  { %v13126_v13 = vmul.f32 %v15861_v23, %v12662_v11  ;;  %v13128_v48 = vor.u32 %v2621_v36, %v2618_v4  ;;  %v3630_v21 = vshll.u32 %v1396_v35, 16  ;;  %v3652_v24 = vshrl.u32 %v12710_v50, 16  ;;  %v10644_v11 = vld [vmem:[%s15765_s6 + $0x508] ss:$16 sps:$4 sm:$0xff]   ;;  %v10655_v23 = vld [vmem:[%s15765_s6 + $0xe4] ss:$16 sps:$4 sm:$0xff]  }
 0x222   :  { %2450 = vmatpush2.bf16.msra.mxu0 %v10641_v16  ;;  %v3628_v30 = vshrl.u32 %v1396_v35, 16  ;;  %v3637_v39 = vrot.slane %v3635_v33, 1  ;;  %v3656_v12 = vrot.slane %v3654_v43, 1  ;;  %v3661_v57 = vrot.slane %v3659_v9, 1  ;;  %v15867_v9 = vld [vmem:[#allocation31_spill] sm:$0xff] }
 0x223   :  { %2371 = vmatpush2.bf16.msra.mxu1 %v10638_v63  ;;  %2451 = vmatprep.subr.bf16.mxu0 %v10649_v44  ;;  %v13142_v50 = vsel %vm2492_vm7, %v2586_v31, %v13128_v48  ;;  %v3632_v60 = vrot.slane %v3630_v21, 1  ;;  %v15863_v2 = vshrl.u32 %v12650_v17, 16  ;;  %v15864_v19 = vshll.u32 %v12641_v3, 16 }
 0x224   :  { %2372 = vmatprep.subr.bf16.mxu1 %v10646_v46  ;;  %v3657_v8 = vor.u32 %v3656_v12, %v3652_v24  ;;  %v15865_v16 = vshrl.u32 %v12660_v1, 16  ;;  %v15866_v31 = vshll.u32 %v12648_v61, 16  ;;  %v1404_v17 = vpack.c.bf16 %v1384_v56, %v13028_v41  ;;  %v10653_v1 = vld [vmem:[%s15765_s6 + $0xe0] ss:$16 sps:$4 sm:$0xff]  }
 0x225   :  { %v3621_v26 = vor.u32 %v12774_v52, %v15863_v2  ;;  %v3625_v4 = vrot.slane %v15864_v19, 1  ;;  %v3633_v44 = vor.u32 %v3632_v60, %v3628_v30  ;;  %v3671_v36 = vshrl.u32 %v1400_v32, 16  ;;  %v10650_v32 = vld [vmem:[%s15765_s6 + $0x4e8] ss:$16 sps:$4 sm:$0xff]  }
 0x226   :  { %v3645_v20 = vor.u32 %v12796_v22, %v15865_v16  ;;  %v3649_v63 = vrot.slane %v15866_v31, 1  ;;  %v13162_v35 = vpack.c.bf16 %v1386_v54, %v13050_v37  ;;  %2452 = vmatpush2.bf16.msra.mxu0 %v10647_v15  ;;  %v13168_v22 = vsel %vm3614_vm8, %v3657_v8, %v3661_v57  ;;  %v10661_v37 = vld [vmem:[%s15765_s6 + $0xc4] ss:$16 sps:$4 sm:$0xff]   ;;  %v10656_v19 = vld [vmem:[%s15765_s6 + $0x4c8] ss:$16 sps:$4 sm:$0xff]  }
 0x227   :  { %v13159_v52 = vsel %vm3614_vm8, %v3621_v26, %v3625_v4  ;;  %v3675_v41 = vshll.u32 %v1404_v17, 16  ;;  %v3687_v56 = vshrl.u32 %v1402_v27, 16  ;;  %2373 = vmatpush2.bf16.msra.mxu1 %v10644_v11  ;;  %3217 = vmatprep.subr.bf16.mxu0 %v10655_v23  ;;  %v13180_v54 = vsel %vm3614_vm8, %v3633_v44, %v3637_v39  ;;  %v10658_v27 = vld [vmem:[%s15765_s6 + $0x4cc] ss:$16 sps:$4 sm:$0xff]   ;;  %v15868_v11 = vld [vmem:[#allocation26_spill] sm:$0xff] }
 0x228   :  { %v13171_v46 = vsel %vm3614_vm8, %v3645_v20, %v3649_v63  ;;  %v3673_v33 = vor.u32 %v3671_v36, %v3637_v39  ;;  %v3691_v43 = vshll.u32 %v13162_v35, 16  ;;  %v1403_v21 = vpack.c.bf16 %v13054_v49, %v15867_v9  ;;  %2374 = vmatprep.subr.bf16.mxu1 %v10652_v53  ;;  %v15869_v49 = vld [vmem:[#allocation29_spill] sm:$0xff]  ;;  %v10667_v53 = vld [vmem:[%s15765_s6 + $0xa4] ss:$16 sps:$4 sm:$0xff]  }
 0x229   :  { %v3677_v24 = vrot.slane %v3675_v41, 1  ;;  %v3689_v15 = vor.u32 %v3687_v56, %v3661_v57  ;;  %v3663_v30 = vshrl.u32 %v12641_v3, 16  ;;  %v1405_v12 = vpack.c.bf16 %v13077_v6, %v13040_v7  ;;  %2454 = vmatmul.mubr.bf16.vlgmr.msra.gmra.mxu0 %v15868_v11  ;;  %v10659_v57 = vld [vmem:[%s15765_s6 + $0xc0] ss:$16 sps:$4 sm:$0xff]   ;;  %v10664_v36 = vld [vmem:[%s15765_s6 + $0x4ac] ss:$16 sps:$4 sm:$0xff]  }
 0x22a   :  { %v3693_v39 = vrot.slane %v3691_v43, 1  ;;  %v3667_v23 = vshll.u32 %v1403_v21, 16  ;;  %v3703_v60 = vshrl.u32 %v1404_v17, 16  ;;  %v3707_v2 = vshll.u32 %v13103_v38, 16  ;;  %9442 = vmatprep.mubr.msk.bf16.mxu0 %vm1099_vm6, %v15869_v49  ;;  %3218 = vmatpush1.bf16.msra.mxu0 %v10653_v1  ;;  %v15871_v17 = vld [vmem:[#allocation38_spill] sm:$0xff]  ;;  %v15872_v1 = vld [vmem:[#allocation24_spill] sm:$0xff] }
 0x22b   :  { %v13199_v3 = vsel %vm3614_vm8, %v3673_v33, %v3677_v24  ;;  %v3665_v26 = vor.u32 %v3663_v30, %v3625_v4  ;;  %v3679_v7 = vshrl.u32 %v12648_v61, 16  ;;  %v3683_v6 = vshll.u32 %v1405_v12, 16  ;;  %2375 = vmatpush2.bf16.msra.mxu1 %v10650_v32  ;;  %3219 = vmatprep.subr.bf16.mxu0 %v10661_v37  ;;  %v15870_v61 = vld [vmem:[#allocation25_spill] sm:$0xff]  ;;  %v15874_v49 = vld [vmem:[#allocation46_spill] sm:$0xff] }
 0x22c   :  { %v13209_v8 = vsel %vm3614_vm8, %v3689_v15, %v3693_v39  ;;  %v3669_v16 = vrot.slane %v3667_v23, 1  ;;  %v3705_v20 = vor.u32 %v3703_v60, %v3677_v24  ;;  %v13211_v31 = vrot.slane %v3707_v2, 1  ;;  %2376 = vmatprep.subr.bf16.mxu1 %v10658_v27  ;;  %v10670_v27 = vld [vmem:[%s15765_s6 + $0x48c] ss:$16 sps:$4 sm:$0xff]   ;;  %v15873_v23 = vld [vmem:[#allocation28_spill] sm:$0xff] }
 0x22d   :  { %v13215_v4 = vpack.c.bf16 %v15870_v61, %v13107_v40  ;;  %v13219_v44 = vpack.c.bf16 %v15871_v17, %v13126_v13  ;;  %v13226_v41 = vpack.c.bf16 %v15872_v1, %v13091_v25  ;;  %v3681_v32 = vor.u32 %v3679_v7, %v3649_v63  ;;  %v10665_v13 = vld [vmem:[%s15765_s6 + $0xa0] ss:$16 sps:$4 sm:$0xff]   ;;  %v10662_v25 = vld [vmem:[%s15765_s6 + $0x4a8] ss:$16 sps:$4 sm:$0xff]   ;;  %v10673_v63 = vld [vmem:[%s15765_s6 + $0x84] ss:$16 sps:$4 sm:$0xff]  }
 0x22e   :  { %v13229_v56 = vsel %vm3614_vm8, %v3665_v26, %v3669_v16  ;;  %v3685_v37 = vrot.slane %v3683_v6, 1  ;;  %v13233_v40 = vsel %vm3614_vm8, %v3705_v20, %v13211_v31  ;;  %3220 = vmatpush1.bf16.msra.mxu0 %v10659_v57  ;;  %v3719_v43 = vshrl.u32 %v13162_v35, 16  ;;  %v10671_v35 = vld [vmem:[%s15765_s6 + $0x80] ss:$16 sps:$4 sm:$0xff]   ;;  %v10676_v7 = vld [vmem:[%s15765_s6 + $0x64] ss:$16 sps:$4 sm:$0xff]  }
 0x22f   :  { %2377 = vmatpush2.bf16.msra.mxu1 %v10656_v19  ;;  %3221 = vmatprep.subr.bf16.mxu0 %v10667_v53  ;;  %v3723_v9 = vshll.u32 %v13226_v41, 16  ;;  %v3695_v24 = vshrl.u32 %v1403_v21, 16  ;;  %v3699_v15 = vshll.u32 %v13215_v4, 16  ;;  %v3711_v30 = vshrl.u32 %v1405_v12, 16  ;;  %v10679_v19 = vld [vmem:[%s15765_s6 + $0x2e4] ss:$16 sps:$4 sm:$0xff]  }
 0x230   :  { %v13245_v33 = vsel %vm3614_vm8, %v3681_v32, %v3685_v37  ;;  %2378 = vmatprep.subr.bf16.mxu1 %v10664_v36  ;;  %v3715_v11 = vshll.u32 %v13219_v44, 16  ;;  %v3721_v60 = vor.u32 %v3719_v43, %v3693_v39  ;;  %v10668_v39 = vld [vmem:[%s15765_s6 + $0x488] ss:$16 sps:$4 sm:$0xff]   ;;  %v10674_v20 = vld [vmem:[%s15765_s6 + $0x60] ss:$16 sps:$4 sm:$0xff]  }
 0x231   :  { %2464 = vmatmul.mubr.bf16.gmra.mxu0 %v15873_v23  ;;  %v13255_v2 = vrot.slane %v3723_v9, 1  ;;  %v3697_v57 = vor.u32 %v3695_v24, %v3669_v16  ;;  %v13262_v21 = vrot.slane %v3699_v15, 1  ;;  %v3713_v26 = vor.u32 %v3711_v30, %v3685_v37  ;;  %v10677_v61 = vld [vmem:[%s15765_s6 + $0x2e0] ss:$16 sps:$4 sm:$0xff]   ;;  %v10682_v17 = vld [vmem:[%s15765_s6 + $0x44] ss:$16 sps:$4 sm:$0xff]  }
 0x232   :  { %9443 = vmatprep.mubr.msk.bf16.mxu0 %vm1099_vm6, %v15874_v49  ;;  %3222 = vmatpush1.bf16.msra.mxu0 %v10665_v13  ;;  %v13264_v12 = vrot.slane %v3715_v11, 1  ;;  %v10685_v36 = vld [vmem:[%s15765_s6 + $0x2c4] ss:$16 sps:$4 sm:$0xff]   ;;  %v15876_v32 = vld [vmem:[#allocation33_spill] sm:$0xff]  ;;  %v15879_v30 = vld [vmem:[#allocation43_spill] sm:$0xff] }
 0x233   :  { %2379 = vmatpush2.bf16.msra.mxu1 %v10662_v25  ;;  %3223 = vmatprep.subr.bf16.mxu0 %v10673_v63  ;;  %v13274_v6 = vsel %vm3614_vm8, %v3721_v60, %v13255_v2  ;;  %v13281_v53 = vsel %vm3614_vm8, %v3697_v57, %v13262_v21  ;;  %v15875_v1 = vld [vmem:[#allocation40_spill] sm:$0xff]  ;;  %v15877_v37 = vld [vmem:[#allocation41_spill] sm:$0xff]  ;;  %v15878_v15 = vld [vmem:[#allocation42_spill] sm:$0xff] }
 0x234   :  { %2380 = vmatprep.subr.bf16.mxu1 %v10670_v27  ;;  %v13285_v16 = vsel %vm3614_vm8, %v3713_v26, %v13264_v12  ;;  %v10680_v13 = vld [vmem:[%s15765_s6 + $0x40] ss:$16 sps:$4 sm:$0xff]   ;;  %v10688_v25 = vld [vmem:[%s15765_s6 + $0x24] ss:$16 sps:$4 sm:$0xff]  }
 0x235   :  { %v10691_v63 = vld [vmem:[%s15765_s6 + $0x2a4] ss:$16 sps:$4 sm:$0xff]   ;;  %v10686_v43 = vld [vmem:[%s15765_s6 + $0x20] ss:$16 sps:$4 sm:$0xff]  }
 0x236   :  { %3224 = vmatpush1.bf16.msra.mxu0 %v10671_v35  ;;  %v10689_v9 = vld [vmem:[%s15765_s6 + $0x2a0] ss:$16 sps:$4 sm:$0xff]   ;;  %v10694_v27 = vld [vmem:[%s15765_s6 + $0x4] ss:$16 sps:$4 sm:$0xff]  }
 0x237   :  { %2381 = vmatpush2.bf16.msra.mxu1 %v10668_v39  ;;  %3225 = vmatprep.subr.bf16.mxu0 %v10676_v7  ;;  %v10697_v24 = vld [vmem:[%s15765_s6 + $0x284] ss:$16 sps:$4 sm:$0xff]   ;;  %v10692_v11 = vld [vmem:[%s15765_s6] ss:$16 sps:$4 sm:$0xff]  }
 0x238   :  { %3288 = vmatprep.subr.bf16.mxu1 %v10679_v19  ;;  %v10700_v23 = vld [vmem:[%s15765_s6 + $0x1e4] ss:$16 sps:$4 sm:$0xff]   ;;  %v10698_v49 = vld [vmem:[%s15765_s6 + $0x1e0] ss:$16 sps:$4 sm:$0xff]  }
 0x239   :  { %2474 = vmatmul.mubr.bf16.gmra.mxu0 %v12896_v55  ;;  %v10683_v55 = vld [vmem:[%s15765_s6 + $0x2c0] ss:$16 sps:$4 sm:$0xff]   ;;  %v10703_v60 = vld [vmem:[%s15765_s6 + $0x264] ss:$16 sps:$4 sm:$0xff]  }
 0x23a   :  { %2383 = vmatmul.mubr.bf16.vlgmr.msra.gmra.mxu1 %v15875_v1  ;;  %9444 = vmatprep.mubr.msk.bf16.mxu0 %vm1099_vm6, %v15876_v32  ;;  %v10701_v35 = vld [vmem:[%s15765_s6 + $0x260] ss:$16 sps:$4 sm:$0xff]   ;;  %v10706_v57 = vld [vmem:[%s15765_s6 + $0x1c4] ss:$16 sps:$4 sm:$0xff]  }
 0x23b   :  { %2392 = vmatprep.mubr.bf16.mxu1 %v15877_v37  ;;  %3226 = vmatpush1.bf16.msra.mxu0 %v10674_v20  ;;  %v10709_v26 = vld [vmem:[%s15765_s6 + $0x244] ss:$16 sps:$4 sm:$0xff]   ;;  %v15881_v7 = vld [vmem:[#allocation47_spill] sm:$0xff] }
 0x23c   :  { %3289 = vmatpush1.bf16.msra.mxu1 %v10677_v61  ;;  %3227 = vmatprep.subr.bf16.mxu0 %v10682_v17  ;;  %v15880_v39 = vld [vmem:[#allocation30_spill] sm:$0xff]  ;;  %v10704_v19 = vld [vmem:[%s15765_s6 + $0x1c0] ss:$16 sps:$4 sm:$0xff]  }
 0x23d   :  { %3290 = vmatprep.subr.bf16.mxu1 %v10685_v36  ;;  %v10707_v20 = vld [vmem:[%s15765_s6 + $0x240] ss:$16 sps:$4 sm:$0xff]   ;;  %v10712_v61 = vld [vmem:[%s15765_s6 + $0x1a4] ss:$16 sps:$4 sm:$0xff]  }
 0x23e   :  { %v10715_v17 = vld [vmem:[%s15765_s6 + $0x224] ss:$16 sps:$4 sm:$0xff]   ;;  %v10710_v36 = vld [vmem:[%s15765_s6 + $0x1a0] ss:$16 sps:$4 sm:$0xff]  }
 0x23f   :  { %3228 = vmatpush1.bf16.msra.mxu0 %v10680_v13  ;;  %v10713_v1 = vld [vmem:[%s15765_s6 + $0x220] ss:$16 sps:$4 sm:$0xff]   ;;  %v10718_v32 = vld [vmem:[%s15765_s6 + $0x184] ss:$16 sps:$4 sm:$0xff]  }
 0x240   :  { %3291 = vmatpush1.bf16.msra.mxu1 %v10683_v55  ;;  %3229 = vmatprep.subr.bf16.mxu0 %v10688_v25  ;;  %v10721_v37 = vld [vmem:[%s15765_s6 + $0x204] ss:$16 sps:$4 sm:$0xff]   ;;  %v10716_v13 = vld [vmem:[%s15765_s6 + $0x180] ss:$16 sps:$4 sm:$0xff]  }
 0x241   :  { %2484 = vmatmul.mubr.bf16.gmra.mxu0 %v12947_v45  ;;  %3292 = vmatprep.subr.bf16.mxu1 %v10691_v63  ;;  %v10695_v45 = vld [vmem:[%s15765_s6 + $0x280] ss:$16 sps:$4 sm:$0xff]   ;;  %v10724_v25 = vld [vmem:[%s15765_s6 + $0x164] ss:$16 sps:$4 sm:$0xff]  }
 0x242   :  { %2393 = vmatmul.mubr.bf16.gmra.mxu1 %v15878_v15  ;;  %3249 = vmatprep.mubr.bf16.mxu0 %v12968_v51  ;;  %v10719_v55 = vld [vmem:[%s15765_s6 + $0x200] ss:$16 sps:$4 sm:$0xff]  }
 0x243   :  { %2402 = vmatprep.mubr.bf16.mxu1 %v15879_v30  ;;  %3230 = vmatpush1.bf16.msra.mxu0 %v10686_v43  ;;  %v10722_v63 = vld [vmem:[%s15765_s6 + $0x160] ss:$16 sps:$4 sm:$0xff]  }
 0x244   :  { %3293 = vmatpush1.bf16.msra.mxu1 %v10689_v9  ;;  %3231 = vmatprep.subr.bf16.mxu0 %v10694_v27  ;;  %v10725_v43 = vld [vmem:[%s15765_s6 + $0x360] ss:$16 sps:$4 sm:$0xff]   ;;  %v10730_v9 = vld [vmem:[%s15765_s6 + $0x144] ss:$16 sps:$4 sm:$0xff]  }
 0x245   :  { %3294 = vmatprep.subr.bf16.mxu1 %v10697_v24  ;;  %v10733_v27 = vld [vmem:[%s15765_s6 + $0x344] ss:$16 sps:$4 sm:$0xff]   ;;  %v10728_v15 = vld [vmem:[%s15765_s6 + $0x140] ss:$16 sps:$4 sm:$0xff]  }
 0x246   :  { %v1171_v24 = vld [vmem:[#allocation3 + $0xe8] sm:$0x7f] }
 0x247   :  { %3232 = vmatpush1.bf16.msra.mxu0 %v10692_v11  ;;  %v10731_v30 = vld [vmem:[%s15765_s6 + $0x340] ss:$16 sps:$4 sm:$0xff]   ;;  %v10736_v11 = vld [vmem:[%s15765_s6 + $0x124] ss:$16 sps:$4 sm:$0xff]  }
 0x248   :  { %3295 = vmatpush1.bf16.msra.mxu1 %v10695_v45  ;;  %3233 = vmatprep.subr.bf16.mxu0 %v10700_v23  ;;  %v10739_v45 = vld [vmem:[%s15765_s6 + $0x324] ss:$16 sps:$4 sm:$0xff]   ;;  %v15882_v23 = vld [vmem:[#allocation57_spill] sm:$0xff] }
 0x249   :  { %3296 = vmatprep.subr.bf16.mxu1 %v10703_v60  ;;  %v1253_v60 = vmul.f32 %v15882_v23, %v1171_v24 }
 0x24a   :  { %2403 = vmatmul.mubr.bf16.gmra.mxu1 %v15880_v39  ;;  %v10742_v39 = vld [vmem:[%s15765_s6 + $0x104] ss:$16 sps:$4 sm:$0xff]  }
 0x24b   :  { %2412 = vmatprep.mubr.bf16.mxu1 %v15881_v7  ;;  %3234 = vmatpush2.bf16.msra.mxu0 %v10698_v49  ;;  %v10734_v49 = vld [vmem:[%s15765_s6 + $0x120] ss:$16 sps:$4 sm:$0xff]   ;;  %v10745_v7 = vld [vmem:[%s15765_s6 + $0x304] ss:$16 sps:$4 sm:$0xff]  }
 0x24c   :  { %3297 = vmatpush1.bf16.msra.mxu1 %v10701_v35  ;;  %3235 = vmatprep.subr.bf16.mxu0 %v10706_v57  ;;  %v15883_v35 = vld [vmem:[#allocation62_spill] sm:$0xff] }
 0x24d   :  { %3298 = vmatprep.subr.bf16.mxu1 %v10709_v26  ;;  %v1249_v57 = vmul.f32 %v15883_v35, %v12652_v14  ;;  %v10737_v26 = vld [vmem:[%s15765_s6 + $0x320] ss:$16 sps:$4 sm:$0xff]  }
 0x24e   :  { %v10740_v14 = vld [vmem:[%s15765_s6 + $0x100] ss:$16 sps:$4 sm:$0xff]  }
 0x24f   :  { %3236 = vmatpush2.bf16.msra.mxu0 %v10704_v19  ;;  %v1269_v19 = vpack.c.bf16 %v1253_v60, %v1249_v57  ;;  %v10763_v60 = vld [vmem:[%s15765_s6 + $0x2ac] ss:$16 sps:$4 sm:$0xff]   ;;  %v10761_v57 = vld [vmem:[%s15765_s6 + $0x2a8] ss:$16 sps:$4 sm:$0xff]  }
 0x250   :  { %3299 = vmatpush1.bf16.msra.mxu1 %v10707_v20  ;;  %3237 = vmatprep.subr.bf16.mxu0 %v10712_v61  ;;  %v1170_v20 = vld [vmem:[#allocation3 + $0xe0] sm:$0x7f]  ;;  %v10743_v61 = vld [vmem:[%s15765_s6 + $0x300] ss:$16 sps:$4 sm:$0xff]  }
 0x251   :  { %3300 = vmatprep.subr.bf16.mxu1 %v10715_v17  ;;  %v10751_v17 = vld [vmem:[%s15765_s6 + $0x2ec] ss:$16 sps:$4 sm:$0xff]  }
 0x252   :  { %2413 = vmatmul.mubr.bf16.gmra.mxu1 %v12943_v29  ;;  %v10727_v29 = vld [vmem:[%s15765_s6 + $0x364] ss:$16 sps:$4 sm:$0xff]  }
 0x253   :  { %3238 = vmatpush2.bf16.msra.mxu0 %v10710_v36  ;;  %9557 = vmatprep.mubr.msk.bf16.mxu1 %vm1099_vm6, %v12993_v58  ;;  %v1252_v36 = vmul.f32 %v15882_v23, %v1170_v20  ;;  %v10769_v20 = vld [vmem:[%s15765_s6 + $0x28c] ss:$16 sps:$4 sm:$0xff]  }
 0x254   :  { %3301 = vmatpush1.bf16.msra.mxu1 %v10713_v1  ;;  %3239 = vmatprep.subr.bf16.mxu0 %v10718_v32  ;;  %v10748_v1 = vld [vmem:[%s15765_s6 + $0xec] ss:$16 sps:$4 sm:$0xff]   ;;  %v2607_v32 = vshrl.u32 %v1269_v19, 16 }
 0x255   :  { %3302 = vmatprep.subr.bf16.mxu1 %v10721_v37  ;;  %v2610_v37 = vshll.u32 %v1269_v19, 16 }
 0x257   :  { %3240 = vmatpush2.bf16.msra.mxu0 %v10716_v13  ;;  %v11534_v13 = vld [vmem:[#allocation3 + $0xc0] sm:$0xff]  ;;  %v2612_v24 = vrot.slane %v2610_v37, 4 }
 0x258   :  { %3303 = vmatpush1.bf16.msra.mxu1 %v10719_v55  ;;  %3241 = vmatprep.subr.bf16.mxu0 %v10724_v25  ;;  %v1248_v55 = vmul.f32 %v11534_v13, %v15883_v35  ;;  %v10746_v25 = vld [vmem:[%s15765_s6 + $0xe8] ss:$16 sps:$4 sm:$0xff]   ;;  %v10778_v13 = vld [vmem:[%s15765_s6 + $0x4c] ss:$16 sps:$4 sm:$0xff]  }
 0x259   :  { %3312 = vmatprep.subr.bf16.mxu1 %v10727_v29  ;;  %v10758_v35 = vld [vmem:[%s15765_s6 + $0xa8] ss:$16 sps:$4 sm:$0xff]  }
 0x25a   :  { %v1268_v29 = vpack.c.bf16 %v1252_v36, %v1248_v55  ;;  %v10775_v36 = vld [vmem:[%s15765_s6 + $0x26c] ss:$16 sps:$4 sm:$0xff]   ;;  %v10773_v37 = vld [vmem:[%s15765_s6 + $0x268] ss:$16 sps:$4 sm:$0xff]  }
 0x25b   :  { %3242 = vmatpush2.bf16.msra.mxu0 %v10722_v63  ;;  %v10749_v63 = vld [vmem:[%s15765_s6 + $0x2e8] ss:$16 sps:$4 sm:$0xff]   ;;  %v10781_v55 = vld [vmem:[%s15765_s6 + $0x24c] ss:$16 sps:$4 sm:$0xff]  }
 0x25c   :  { %3313 = vmatpush2.bf16.msra.mxu1 %v10725_v43  ;;  %3243 = vmatprep.subr.bf16.mxu0 %v10730_v9  ;;  %v10754_v43 = vld [vmem:[%s15765_s6 + $0xcc] ss:$16 sps:$4 sm:$0xff]   ;;  %v2601_v23 = vshll.u32 %v1268_v29, 16 }
 0x25d   :  { %3314 = vmatprep.subr.bf16.mxu1 %v10733_v27  ;;  %v10757_v9 = vld [vmem:[%s15765_s6 + $0x2cc] ss:$16 sps:$4 sm:$0xff]   ;;  %v2609_v27 = vrot.slane %v2607_v32, 3 }
 0x25f   :  { %3244 = vmatpush2.bf16.msra.mxu0 %v10728_v15  ;;  %v10752_v15 = vld [vmem:[%s15765_s6 + $0xc8] ss:$16 sps:$4 sm:$0xff]  }
 0x260   :  { %3315 = vmatpush2.bf16.msra.mxu1 %v10731_v30  ;;  %3245 = vmatprep.subr.bf16.mxu0 %v10736_v11  ;;  %v10755_v30 = vld [vmem:[%s15765_s6 + $0x2c8] ss:$16 sps:$4 sm:$0xff]   ;;  %v10760_v11 = vld [vmem:[%s15765_s6 + $0xac] ss:$16 sps:$4 sm:$0xff]  }
 0x261   :  { %3316 = vmatprep.subr.bf16.mxu1 %v10739_v45  ;;  %v2598_v45 = vshrl.u32 %v1268_v29, 16  ;;  %v10784_v29 = vld [vmem:[%s15765_s6 + $0x2c] ss:$16 sps:$4 sm:$0xff]  }
 0x263   :  { %3246 = vmatpush2.bf16.msra.mxu0 %v10734_v49  ;;  %v13479_v49 = vor.u32 %v2612_v24, %v2609_v27  ;;  %v10790_v27 = vld [vmem:[%s15765_s6 + $0xc] ss:$16 sps:$4 sm:$0xff]  }
 0x264   :  { %3317 = vmatpush2.bf16.msra.mxu1 %v10737_v26  ;;  %3247 = vmatprep.subr.bf16.mxu0 %v10742_v39  ;;  %v10766_v26 = vld [vmem:[%s15765_s6 + $0x8c] ss:$16 sps:$4 sm:$0xff]   ;;  %v2600_v39 = vrot.slane %v2598_v45, 3  ;;  %v10797_v45 = vld [vmem:[%s15765_s6 + $0x368] ss:$16 sps:$4 sm:$0xff]  }
 0x265   :  { %3318 = vmatprep.subr.bf16.mxu1 %v10745_v7  ;;  %v2603_v7 = vrot.slane %v2601_v23, 4  ;;  %v13494_v19 = vsel %vm2492_vm7, %v13010_v47, %v13479_v49  ;;  %v10767_v47 = vld [vmem:[%s15765_s6 + $0x288] ss:$16 sps:$4 sm:$0xff]   ;;  %v10793_v24 = vld [vmem:[%s15765_s6 + $0x20c] ss:$16 sps:$4 sm:$0xff]  }
 0x266   :  { %v10802_v23 = vld [vmem:[%s15765_s6 + $0x1cc] ss:$16 sps:$4 sm:$0xff]  }
 0x267   :  { %3248 = vmatpush2.bf16.msra.mxu0 %v10740_v14  ;;  %v10764_v14 = vld [vmem:[%s15765_s6 + $0x88] ss:$16 sps:$4 sm:$0xff]  }
 0x268   :  { %3319 = vmatpush2.bf16.msra.mxu1 %v10743_v61  ;;  %3430 = vmatprep.subr.bf16.mxu0 %v10751_v17  ;;  %v13509_v61 = vor.u32 %v2603_v7, %v2600_v39  ;;  %v10772_v17 = vld [vmem:[%s15765_s6 + $0x6c] ss:$16 sps:$4 sm:$0xff]   ;;  %v10806_v7 = vld [vmem:[%s15765_s6 + $0x1a8] ss:$16 sps:$4 sm:$0xff]  }
 0x269   :  { %3359 = vmatprep.subr.bf16.mxu1 %v10748_v1  ;;  %v10770_v1 = vld [vmem:[%s15765_s6 + $0x68] ss:$16 sps:$4 sm:$0xff]   ;;  %v10811_v39 = vld [vmem:[%s15765_s6 + $0x32c] ss:$16 sps:$4 sm:$0xff]  }
 0x26a   :  { %3250 = vmatmul.mubr.bf16.vlgmr.msra.gmra.mxu0 %v13004_v42  ;;  %v13523_v32 = vsel %vm2492_vm7, %v13045_v59, %v13509_v61  ;;  %v10776_v59 = vld [vmem:[%s15765_s6 + $0x48] ss:$16 sps:$4 sm:$0xff]  }
 0x26b   :  { %3321 = vmatmul.mubr.bf16.vlgmr.msra.gmra.mxu1 %v13024_v62  ;;  %3259 = vmatprep.mubr.bf16.mxu0 %v13036_v10 }
 0x26c   :  { %9558 = vmatprep.mubr.msk.bf16.mxu1 %vm1099_vm6, %v13043_v34  ;;  %3360 = vmatpush1.bf16.msra.mxu1 %v10746_v25  ;;  %v10779_v25 = vld [vmem:[%s15765_s6 + $0x248] ss:$16 sps:$4 sm:$0xff]  }
 0x26d   :  { %3431 = vmatpush1.bf16.msra.mxu0 %v10749_v63  ;;  %3361 = vmatprep.subr.bf16.mxu1 %v10754_v43  ;;  %v10787_v63 = vld [vmem:[%s15765_s6 + $0x22c] ss:$16 sps:$4 sm:$0xff]   ;;  %v10782_v43 = vld [vmem:[%s15765_s6 + $0x28] ss:$16 sps:$4 sm:$0xff]  }
 0x26e   :  { %3432 = vmatprep.subr.bf16.mxu0 %v10757_v9  ;;  %v10785_v9 = vld [vmem:[%s15765_s6 + $0x228] ss:$16 sps:$4 sm:$0xff]  }
 0x270   :  { %3362 = vmatpush1.bf16.msra.mxu1 %v10752_v15  ;;  %v10788_v15 = vld [vmem:[%s15765_s6 + $0x8] ss:$16 sps:$4 sm:$0xff]  }
 0x271   :  { %3433 = vmatpush1.bf16.msra.mxu0 %v10755_v30  ;;  %3363 = vmatprep.subr.bf16.mxu1 %v10760_v11  ;;  %v10791_v30 = vld [vmem:[%s15765_s6 + $0x208] ss:$16 sps:$4 sm:$0xff]   ;;  %v10796_v11 = vld [vmem:[%s15765_s6 + $0x1ec] ss:$16 sps:$4 sm:$0xff]  }
 0x272   :  { %3260 = vmatmul.mubr.bf16.gmra.mxu0 %v13071_v0  ;;  %3434 = vmatprep.subr.bf16.mxu0 %v10763_v60  ;;  %v10805_v60 = vld [vmem:[%s15765_s6 + $0x34c] ss:$16 sps:$4 sm:$0xff]  }
 0x273   :  { %3331 = vmatmul.mubr.bf16.gmra.mxu1 %v13084_v5  ;;  %3269 = vmatprep.mubr.bf16.mxu0 %v13494_v19 }
 0x274   :  { %9559 = vmatprep.mubr.msk.bf16.mxu1 %vm1099_vm6, %v13121_v18  ;;  %3364 = vmatpush1.bf16.msra.mxu1 %v10758_v35  ;;  %v10800_v35 = vld [vmem:[%s15765_s6 + $0x1c8] ss:$16 sps:$4 sm:$0xff]  }
 0x275   :  { %3435 = vmatpush1.bf16.msra.mxu0 %v10761_v57  ;;  %3365 = vmatprep.subr.bf16.mxu1 %v10766_v26  ;;  %v10803_v57 = vld [vmem:[%s15765_s6 + $0x348] ss:$16 sps:$4 sm:$0xff]   ;;  %v10808_v26 = vld [vmem:[%s15765_s6 + $0x1ac] ss:$16 sps:$4 sm:$0xff]  }
 0x276   :  { %3436 = vmatprep.subr.bf16.mxu0 %v10769_v20  ;;  %v10809_v20 = vld [vmem:[%s15765_s6 + $0x328] ss:$16 sps:$4 sm:$0xff]  }
 0x278   :  { %3366 = vmatpush1.bf16.msra.mxu1 %v10764_v14  ;;  %v10814_v14 = vld [vmem:[%s15765_s6 + $0x18c] ss:$16 sps:$4 sm:$0xff]  }
 0x279   :  { %3437 = vmatpush1.bf16.msra.mxu0 %v10767_v47  ;;  %3367 = vmatprep.subr.bf16.mxu1 %v10772_v17  ;;  %v10817_v47 = vld [vmem:[%s15765_s6 + $0x30c] ss:$16 sps:$4 sm:$0xff]   ;;  %v10812_v17 = vld [vmem:[%s15765_s6 + $0x188] ss:$16 sps:$4 sm:$0xff]  }
 0x27a   :  { %3270 = vmatmul.mubr.bf16.gmra.mxu0 %v13523_v32  ;;  %3438 = vmatprep.subr.bf16.mxu0 %v10775_v36  ;;  %v10815_v36 = vld [vmem:[%s15765_s6 + $0x308] ss:$16 sps:$4 sm:$0xff]  }
 0x27b   :  { %3341 = vmatmul.mubr.bf16.gmra.mxu1 %v13142_v50  ;;  %3279 = vmatprep.mubr.bf16.mxu0 %v13479_v49 }
 0x27c   :  { %9560 = vmatprep.mubr.msk.bf16.mxu1 %vm1099_vm6, %v13096_v28  ;;  %3368 = vmatpush1.bf16.msra.mxu1 %v10770_v1  ;;  %v10820_v1 = vld [vmem:[%s15765_s6 + $0x16c] ss:$16 sps:$4 sm:$0xff]  }
 0x27d   :  { %3439 = vmatpush1.bf16.msra.mxu0 %v10773_v37  ;;  %3369 = vmatprep.subr.bf16.mxu1 %v10778_v13  ;;  %v10823_v37 = vld [vmem:[%s15765_s6 + $0x7e4] ss:$16 sps:$4 sm:$0xff]   ;;  %v10818_v13 = vld [vmem:[%s15765_s6 + $0x168] ss:$16 sps:$4 sm:$0xff]  }
 0x27e   :  { %3440 = vmatprep.subr.bf16.mxu0 %v10781_v55  ;;  %v10821_v55 = vld [vmem:[%s15765_s6 + $0x7e0] ss:$16 sps:$4 sm:$0xff]  }
 0x280   :  { %3370 = vmatpush1.bf16.msra.mxu1 %v10776_v59  ;;  %v10826_v59 = vld [vmem:[%s15765_s6 + $0x14c] ss:$16 sps:$4 sm:$0xff]  }
 0x281   :  { %3441 = vmatpush1.bf16.msra.mxu0 %v10779_v25  ;;  %3371 = vmatprep.subr.bf16.mxu1 %v10784_v29  ;;  %v10829_v25 = vld [vmem:[%s15765_s6 + $0x7c4] ss:$16 sps:$4 sm:$0xff]   ;;  %v10824_v29 = vld [vmem:[%s15765_s6 + $0x148] ss:$16 sps:$4 sm:$0xff]  }
 0x282   :  { %3280 = vmatmul.mubr.bf16.gmra.mxu0 %v13509_v61  ;;  %3442 = vmatprep.subr.bf16.mxu0 %v10787_v63  ;;  %v10827_v63 = vld [vmem:[%s15765_s6 + $0x7c0] ss:$16 sps:$4 sm:$0xff]  }
 0x283   :  { %3351 = vmatmul.mubr.bf16.gmra.mxu1 %v13128_v48  ;;  %9561 = vmatprep.mubr.msk.bf16.mxu0 %vm1099_vm6, %v12993_v58  ;;  %v10799_v58 = vld [vmem:[%s15765_s6 + $0x36c] ss:$16 sps:$4 sm:$0xff]  }
 0x284   :  { %3372 = vmatpush1.bf16.msra.mxu1 %v10782_v43  ;;  %3391 = vmatprep.mubr.bf16.mxu1 %v12968_v51  ;;  %v10794_v51 = vld [vmem:[%s15765_s6 + $0x1e8] ss:$16 sps:$4 sm:$0xff]   ;;  %v10832_v43 = vld [vmem:[%s15765_s6 + $0x12c] ss:$16 sps:$4 sm:$0xff]  }
 0x285   :  { %3443 = vmatpush1.bf16.msra.mxu0 %v10785_v9  ;;  %3373 = vmatprep.subr.bf16.mxu1 %v10790_v27  ;;  %v10833_v9 = vld [vmem:[%s15765_s6 + $0x7a0] ss:$16 sps:$4 sm:$0xff]   ;;  %v10838_v27 = vld [vmem:[%s15765_s6 + $0x10c] ss:$16 sps:$4 sm:$0xff]  }
 0x286   :  { %3444 = vmatprep.subr.bf16.mxu0 %v10793_v24  ;;  %v10841_v24 = vld [vmem:[%s15765_s6 + $0x784] ss:$16 sps:$4 sm:$0xff]  }
 0x288   :  { %3374 = vmatpush1.bf16.msra.mxu1 %v10788_v15  ;;  %v10836_v15 = vld [vmem:[%s15765_s6 + $0x108] ss:$16 sps:$4 sm:$0xff]  }
 0x289   :  { %3445 = vmatpush1.bf16.msra.mxu0 %v10791_v30  ;;  %3375 = vmatprep.subr.bf16.mxu1 %v10796_v11  ;;  %v10839_v30 = vld [vmem:[%s15765_s6 + $0x780] ss:$16 sps:$4 sm:$0xff]   ;;  %v10847_v11 = vld [vmem:[%s15765_s6 + $0x9e4] ss:$16 sps:$4 sm:$0xff]  }
 0x28a   :  { %3454 = vmatprep.subr.bf16.mxu0 %v10799_v58  ;;  %v10845_v58 = vld [vmem:[%s15765_s6 + $0x9e0] ss:$16 sps:$4 sm:$0xff]  }
 0x28c   :  { %3376 = vmatpush2.bf16.msra.mxu1 %v10794_v51  ;;  %v10850_v51 = vld [vmem:[%s15765_s6 + $0x744] ss:$16 sps:$4 sm:$0xff]  }
 0x28d   :  { %3455 = vmatpush2.bf16.msra.mxu0 %v10797_v45  ;;  %3377 = vmatprep.subr.bf16.mxu1 %v10802_v23  ;;  %v10853_v45 = vld [vmem:[%s15765_s6 + $0x9c4] ss:$16 sps:$4 sm:$0xff]   ;;  %v10848_v23 = vld [vmem:[%s15765_s6 + $0x740] ss:$16 sps:$4 sm:$0xff]  }
 0x28e   :  { %3456 = vmatprep.subr.bf16.mxu0 %v10805_v60  ;;  %v10857_v60 = vld [vmem:[%s15765_s6 + $0x9a0] ss:$16 sps:$4 sm:$0xff]  }
 0x290   :  { %3378 = vmatpush2.bf16.msra.mxu1 %v10800_v35  ;;  %v10862_v35 = vld [vmem:[%s15765_s6 + $0x704] ss:$16 sps:$4 sm:$0xff]  }
 0x291   :  { %3457 = vmatpush2.bf16.msra.mxu0 %v10803_v57  ;;  %3379 = vmatprep.subr.bf16.mxu1 %v10808_v26  ;;  %v10865_v57 = vld [vmem:[%s15765_s6 + $0x984] ss:$16 sps:$4 sm:$0xff]   ;;  %v10860_v26 = vld [vmem:[%s15765_s6 + $0x700] ss:$16 sps:$4 sm:$0xff]  }
 0x292   :  { %3458 = vmatprep.subr.bf16.mxu0 %v10811_v39  ;;  %v10868_v39 = vld [vmem:[%s15765_s6 + $0x8e4] ss:$16 sps:$4 sm:$0xff]  }
 0x294   :  { %3380 = vmatpush2.bf16.msra.mxu1 %v10806_v7 }
 0x295   :  { %3459 = vmatpush2.bf16.msra.mxu0 %v10809_v20  ;;  %3381 = vmatprep.subr.bf16.mxu1 %v10814_v14  ;;  %v10869_v20 = vld [vmem:[%s15765_s6 + $0x960] ss:$16 sps:$4 sm:$0xff]  }
 0x296   :  { %3460 = vmatprep.subr.bf16.mxu0 %v10817_v47  ;;  %v10874_v47 = vld [vmem:[%s15765_s6 + $0x8c4] ss:$16 sps:$4 sm:$0xff]  }
 0x298   :  { %3382 = vmatpush2.bf16.msra.mxu1 %v10812_v17 }
 0x299   :  { %3461 = vmatpush2.bf16.msra.mxu0 %v10815_v36  ;;  %3383 = vmatprep.subr.bf16.mxu1 %v10820_v1  ;;  %v10877_v1 = vld [vmem:[%s15765_s6 + $0x944] ss:$16 sps:$4 sm:$0xff]  }
 0x29a   :  { %4323 = vmatprep.subr.bf16.mxu0 %v10823_v37 }
 0x29c   :  { %3463 = vmatmul.mubr.bf16.vlgmr.msra.gmra.mxu0 %v13024_v62  ;;  %3384 = vmatpush2.bf16.msra.mxu1 %v10818_v13  ;;  %v10835_v62 = vld [vmem:[%s15765_s6 + $0x7a4] ss:$16 sps:$4 sm:$0xff]  }
 0x29d   :  { %9562 = vmatprep.mubr.msk.bf16.mxu0 %vm1099_vm6, %v13043_v34  ;;  %4324 = vmatpush1.bf16.msra.mxu0 %v10821_v55  ;;  %v10830_v34 = vld [vmem:[%s15765_s6 + $0x128] ss:$16 sps:$4 sm:$0xff]   ;;  %v10872_v55 = vld [vmem:[%s15765_s6 + $0x8c0] ss:$16 sps:$4 sm:$0xff]  }
 0x29e   :  { %3385 = vmatprep.subr.bf16.mxu1 %v10826_v59  ;;  %4325 = vmatprep.subr.bf16.mxu0 %v10829_v25 }
 0x2a0   :  { %3386 = vmatpush2.bf16.msra.mxu1 %v10824_v29 }
 0x2a1   :  { %4326 = vmatpush1.bf16.msra.mxu0 %v10827_v63  ;;  %3387 = vmatprep.subr.bf16.mxu1 %v10832_v43  ;;  %v10883_v43 = vld [vmem:[%s15765_s6 + $0x924] ss:$16 sps:$4 sm:$0xff]  }
 0x2a2   :  { %4327 = vmatprep.subr.bf16.mxu0 %v10835_v62 }
 0x2a4   :  { %3473 = vmatmul.mubr.bf16.gmra.mxu0 %v13084_v5  ;;  %3388 = vmatpush2.bf16.msra.mxu1 %v10830_v34  ;;  %v10844_v5 = vld [vmem:[%s15765_s6 + $0x764] ss:$16 sps:$4 sm:$0xff]   ;;  %v10878_v34 = vld [vmem:[%s15765_s6 + $0x8a0] ss:$16 sps:$4 sm:$0xff]  }
 0x2a5   :  { %9563 = vmatprep.mubr.msk.bf16.mxu0 %vm1099_vm6, %v13121_v18  ;;  %4328 = vmatpush1.bf16.msra.mxu0 %v10833_v9  ;;  %v10842_v18 = vld [vmem:[%s15765_s6 + $0x760] ss:$16 sps:$4 sm:$0xff]  }
 0x2a6   :  { %3389 = vmatprep.subr.bf16.mxu1 %v10838_v27  ;;  %4329 = vmatprep.subr.bf16.mxu0 %v10841_v24  ;;  %v10881_v27 = vld [vmem:[%s15765_s6 + $0x920] ss:$16 sps:$4 sm:$0xff]  }
 0x2a8   :  { %3390 = vmatpush2.bf16.msra.mxu1 %v10836_v15  ;;  %v10886_v15 = vld [vmem:[%s15765_s6 + $0x884] ss:$16 sps:$4 sm:$0xff]  }
 0x2a9   :  { %4330 = vmatpush1.bf16.msra.mxu0 %v10839_v30  ;;  %4394 = vmatprep.subr.bf16.mxu1 %v10847_v11 }
 0x2aa   :  { %4331 = vmatprep.subr.bf16.mxu0 %v10844_v5  ;;  %v10889_v5 = vld [vmem:[%s15765_s6 + $0x904] ss:$16 sps:$4 sm:$0xff]  }
 0x2ab   :  { %3392 = vmatmul.mubr.bf16.vlgmr.msra.gmra.mxu1 %v13004_v42  ;;  %v10851_v42 = vld [vmem:[%s15765_s6 + $0x9c0] ss:$16 sps:$4 sm:$0xff]  }
 0x2ac   :  { %3483 = vmatmul.mubr.bf16.gmra.mxu0 %v13142_v50  ;;  %3401 = vmatprep.mubr.bf16.mxu1 %v13036_v10  ;;  %v10856_v50 = vld [vmem:[%s15765_s6 + $0x724] ss:$16 sps:$4 sm:$0xff]  }
 0x2ad   :  { %9564 = vmatprep.mubr.msk.bf16.mxu0 %vm1099_vm6, %v13096_v28  ;;  %4332 = vmatpush1.bf16.msra.mxu0 %v10842_v18  ;;  %v10859_v10 = vld [vmem:[%s15765_s6 + $0x9a4] ss:$16 sps:$4 sm:$0xff]   ;;  %v10854_v28 = vld [vmem:[%s15765_s6 + $0x720] ss:$16 sps:$4 sm:$0xff]  }
 0x2ae   :  { %4395 = vmatpush1.bf16.msra.mxu1 %v10845_v58  ;;  %4333 = vmatprep.subr.bf16.mxu0 %v10850_v51  ;;  %v10884_v51 = vld [vmem:[%s15765_s6 + $0x880] ss:$16 sps:$4 sm:$0xff]  }
 0x2af   :  { %4396 = vmatprep.subr.bf16.mxu1 %v10853_v45  ;;  %v10887_v45 = vld [vmem:[%s15765_s6 + $0x900] ss:$16 sps:$4 sm:$0xff]  }
 0x2b1   :  { %4334 = vmatpush1.bf16.msra.mxu0 %v10848_v23 }
 0x2b2   :  { %4397 = vmatpush1.bf16.msra.mxu1 %v10851_v42  ;;  %4335 = vmatprep.subr.bf16.mxu0 %v10856_v50  ;;  %v10892_v42 = vld [vmem:[%s15765_s6 + $0x864] ss:$16 sps:$4 sm:$0xff]  }
 0x2b3   :  { %3402 = vmatmul.mubr.bf16.gmra.mxu1 %v13071_v0  ;;  %4398 = vmatprep.subr.bf16.mxu1 %v10859_v10  ;;  %v10863_v0 = vld [vmem:[%s15765_s6 + $0x980] ss:$16 sps:$4 sm:$0xff]  }
 0x2b4   :  { %3493 = vmatmul.mubr.bf16.gmra.mxu0 %v13128_v48  ;;  %3411 = vmatprep.mubr.bf16.mxu1 %v13494_v19  ;;  %v10871_v48 = vld [vmem:[%s15765_s6 + $0x964] ss:$16 sps:$4 sm:$0xff]   ;;  %v10866_v19 = vld [vmem:[%s15765_s6 + $0x8e0] ss:$16 sps:$4 sm:$0xff]  }
 0x2b5   :  { %4336 = vmatpush1.bf16.msra.mxu0 %v10854_v28  ;;  %4355 = vmatprep.mubr.bf16.mxu0 %v13180_v54  ;;  %v10895_v28 = vld [vmem:[%s15765_s6 + $0xa64] ss:$16 sps:$4 sm:$0xff]  }
 0x2b6   :  { %4399 = vmatpush1.bf16.msra.mxu1 %v10857_v60  ;;  %4337 = vmatprep.subr.bf16.mxu0 %v10862_v35  ;;  %v10890_v35 = vld [vmem:[%s15765_s6 + $0x860] ss:$16 sps:$4 sm:$0xff]  }
 0x2b7   :  { %4400 = vmatprep.subr.bf16.mxu1 %v10865_v57 }
 0x2b8   :  { %v2242_v7 = vpop.f32.mrf.mxu0 }
 0x2b9   :  { %4338 = vmatpush1.bf16.msra.mxu0 %v10860_v26  ;;  %v2313_v14 = vpop.f32.mrf.mxu1  ;;  %v10893_v26 = vld [vmem:[%s15765_s6 + $0xa60] ss:$16 sps:$4 sm:$0xff]  }
 0x2ba   :  { %4401 = vmatpush1.bf16.msra.mxu1 %v10863_v0  ;;  %4339 = vmatprep.subr.bf16.mxu0 %v10868_v39  ;;  %v13749_v17 = vadd.f32 %v2313_v14, %v2242_v7  ;;  %v2244_v36 = vpop.f32.mrf.mxu0  ;;  %v10898_v39 = vld [vmem:[%s15765_s6 + $0x844] ss:$16 sps:$4 sm:$0xff]  }
 0x2bb   :  { %3412 = vmatmul.mubr.bf16.gmra.mxu1 %v13523_v32  ;;  %4402 = vmatprep.subr.bf16.mxu1 %v10871_v48  ;;  %v2315_v37 = vpop.f32.mrf.mxu1  ;;  %v10875_v32 = vld [vmem:[%s15765_s6 + $0x940] ss:$16 sps:$4 sm:$0xff]   ;;  %v10901_v7 = vld [vmem:[%s15765_s6 + $0xa44] ss:$16 sps:$4 sm:$0xff]  }
 0x2bc   :  { %3421 = vmatprep.mubr.bf16.mxu1 %v13479_v49  ;;  %v13755_v13 = vadd.f32 %v2315_v37, %v2244_v36  ;;  %v2246_v59 = vpop.f32.mrf.mxu0  ;;  %v10880_v49 = vld [vmem:[%s15765_s6 + $0x8a4] ss:$16 sps:$4 sm:$0xff]  }
 0x2bd   :  { %4340 = vmatpush2.bf16.msra.mxu0 %v10866_v19  ;;  %v2317_v25 = vpop.f32.mrf.mxu1 }
 0x2be   :  { %4403 = vmatpush1.bf16.msra.mxu1 %v10869_v20  ;;  %4341 = vmatprep.subr.bf16.mxu0 %v10874_v47  ;;  %v13766_v29 = vadd.f32 %v2317_v25, %v2246_v59  ;;  %v13768_v63 = vpop.f32.mrf.mxu0  ;;  %v10896_v47 = vld [vmem:[%s15765_s6 + $0x840] ss:$16 sps:$4 sm:$0xff]   ;;  %v10907_v25 = vld [vmem:[%s15765_s6 + $0xa24] ss:$16 sps:$4 sm:$0xff]  }
 0x2bf   :  { %4404 = vmatprep.subr.bf16.mxu1 %v10877_v1  ;;  %v13773_v62 = vpop.f32.mrf.mxu1  ;;  %v10899_v1 = vld [vmem:[%s15765_s6 + $0xa40] ss:$16 sps:$4 sm:$0xff]  }
 0x2c1   :  { %4342 = vmatpush2.bf16.msra.mxu0 %v10872_v55  ;;  %v2252_v9 = vpop.f32.mrf.mxu0  ;;  %v10904_v55 = vld [vmem:[%s15765_s6 + $0x824] ss:$16 sps:$4 sm:$0xff]  }
 0x2c2   :  { %4405 = vmatpush1.bf16.msra.mxu1 %v10875_v32  ;;  %4343 = vmatprep.subr.bf16.mxu0 %v10880_v49  ;;  %v2323_v24 = vpop.f32.mrf.mxu1 }
 0x2c3   :  { %3422 = vmatmul.mubr.bf16.gmra.mxu1 %v13509_v61  ;;  %4406 = vmatprep.subr.bf16.mxu1 %v10883_v43  ;;  %v13785_v30 = vadd.f32 %v2323_v24, %v2252_v9  ;;  %v2254_v11 = vpop.f32.mrf.mxu0  ;;  %v10902_v43 = vld [vmem:[%s15765_s6 + $0x820] ss:$16 sps:$4 sm:$0xff]   ;;  %v10910_v24 = vld [vmem:[%s15765_s6 + $0x804] ss:$16 sps:$4 sm:$0xff]  }
 0x2c4   :  { %9789 = vmatprep.mubr.msk.bf16.mxu1 %vm1099_vm6, %v13168_v22  ;;  %v2325_v18 = vpop.f32.mrf.mxu1  ;;  %v10905_v9 = vld [vmem:[%s15765_s6 + $0xa20] ss:$16 sps:$4 sm:$0xff]  }
 0x2c5   :  { %4344 = vmatpush2.bf16.msra.mxu0 %v10878_v34  ;;  %v13792_v58 = vadd.f32 %v2325_v18, %v2254_v11  ;;  %v2256_v61 = vpop.f32.mrf.mxu0 }
 0x2c6   :  { %4407 = vmatpush1.bf16.msra.mxu1 %v10881_v27  ;;  %4345 = vmatprep.subr.bf16.mxu0 %v10886_v15  ;;  %v2327_v23 = vpop.f32.mrf.mxu1 }
 0x2c7   :  { %4408 = vmatprep.subr.bf16.mxu1 %v10889_v5  ;;  %v13803_v50 = vadd.f32 %v2327_v23, %v2256_v61  ;;  %v13805_v10 = vpop.f32.mrf.mxu0  ;;  %v10913_v5 = vld [vmem:[%s15765_s6 + $0xa04] ss:$16 sps:$4 sm:$0xff]   ;;  %v10908_v61 = vld [vmem:[%s15765_s6 + $0x800] ss:$16 sps:$4 sm:$0xff]  }
 0x2c8   :  { %v13810_v60 = vpop.f32.mrf.mxu1  ;;  %v10911_v23 = vld [vmem:[%s15765_s6 + $0xa00] ss:$16 sps:$4 sm:$0xff]  }
 0x2c9   :  { %4346 = vmatpush2.bf16.msra.mxu0 %v10884_v51  ;;  %v2262_v57 = vpop.f32.mrf.mxu0 }
 0x2ca   :  { %4409 = vmatpush1.bf16.msra.mxu1 %v10887_v45  ;;  %4347 = vmatprep.subr.bf16.mxu0 %v10892_v42  ;;  %v2333_v0 = vpop.f32.mrf.mxu1 }
 0x2cb   :  { %4418 = vmatprep.subr.bf16.mxu1 %v10895_v28  ;;  %v13821_v48 = vadd.f32 %v2333_v0, %v2262_v57  ;;  %v2264_v19 = vpop.f32.mrf.mxu0  ;;  %v10919_v28 = vld [vmem:[%s15765_s6 + $0x9ec] ss:$16 sps:$4 sm:$0xff]   ;;  %v10914_v0 = vld [vmem:[%s15765_s6 + $0x7e8] ss:$16 sps:$4 sm:$0xff]  }
 0x2cc   :  { %v2335_v20 = vpop.f32.mrf.mxu1  ;;  %v10916_v57 = vld [vmem:[%s15765_s6 + $0x7ec] ss:$16 sps:$4 sm:$0xff]  }
 0x2cd   :  { %4348 = vmatpush2.bf16.msra.mxu0 %v10890_v35  ;;  %v13826_v14 = vadd.f32 %v2335_v20, %v2264_v19  ;;  %v2266_v36 = vpop.f32.mrf.mxu0  ;;  %v10922_v19 = vld [vmem:[%s15765_s6 + $0x7cc] ss:$16 sps:$4 sm:$0xff]   ;;  %v10920_v20 = vld [vmem:[%s15765_s6 + $0x7c8] ss:$16 sps:$4 sm:$0xff]  }
 0x2ce   :  { %4419 = vmatpush2.bf16.msra.mxu1 %v10893_v26  ;;  %4349 = vmatprep.subr.bf16.mxu0 %v10898_v39  ;;  %v2337_v37 = vpop.f32.mrf.mxu1  ;;  %v10917_v39 = vld [vmem:[%s15765_s6 + $0x9e8] ss:$16 sps:$4 sm:$0xff]  }
 0x2cf   :  { %4420 = vmatprep.subr.bf16.mxu1 %v10901_v7  ;;  %v13837_v59 = vadd.f32 %v2337_v37, %v2266_v36  ;;  %v13839_v32 = vpop.f32.mrf.mxu0  ;;  %v10925_v7 = vld [vmem:[%s15765_s6 + $0x9cc] ss:$16 sps:$4 sm:$0xff]   ;;  %v10926_v37 = vld [vmem:[%s15765_s6 + $0x7a8] ss:$16 sps:$4 sm:$0xff]  }
 0x2d0   :  { %v13844_v49 = vpop.f32.mrf.mxu1  ;;  %v10928_v36 = vld [vmem:[%s15765_s6 + $0x7ac] ss:$16 sps:$4 sm:$0xff]  }
 0x2d1   :  { %4350 = vmatpush2.bf16.msra.mxu0 %v10896_v47  ;;  %v2272_v34 = vpop.f32.mrf.mxu0  ;;  %v10923_v47 = vld [vmem:[%s15765_s6 + $0x9c8] ss:$16 sps:$4 sm:$0xff]  }
 0x2d2   :  { %4421 = vmatpush2.bf16.msra.mxu1 %v10899_v1  ;;  %4351 = vmatprep.subr.bf16.mxu0 %v10904_v55  ;;  %v2343_v27 = vpop.f32.mrf.mxu1  ;;  %v10931_v1 = vld [vmem:[%s15765_s6 + $0x9ac] ss:$16 sps:$4 sm:$0xff]   ;;  %v10929_v55 = vld [vmem:[%s15765_s6 + $0x9a8] ss:$16 sps:$4 sm:$0xff]  }
 0x2d3   :  { %4422 = vmatprep.subr.bf16.mxu1 %v10907_v25  ;;  %v13855_v15 = vadd.f32 %v2343_v27, %v2272_v34  ;;  %v2274_v11 = vpop.f32.mrf.mxu0  ;;  %v10934_v25 = vld [vmem:[%s15765_s6 + $0x78c] ss:$16 sps:$4 sm:$0xff]   ;;  %v10932_v34 = vld [vmem:[%s15765_s6 + $0x788] ss:$16 sps:$4 sm:$0xff]  }
 0x2d4   :  { %v2345_v18 = vpop.f32.mrf.mxu1  ;;  %v10940_v27 = vld [vmem:[%s15765_s6 + $0x76c] ss:$16 sps:$4 sm:$0xff]  }
 0x2d5   :  { %4352 = vmatpush2.bf16.msra.mxu0 %v10902_v43  ;;  %v13860_v51 = vadd.f32 %v2345_v18, %v2274_v11  ;;  %v2276_v45 = vpop.f32.mrf.mxu0  ;;  %v10937_v43 = vld [vmem:[%s15765_s6 + $0x98c] ss:$16 sps:$4 sm:$0xff]   ;;  %v10938_v18 = vld [vmem:[%s15765_s6 + $0x768] ss:$16 sps:$4 sm:$0xff]  }
 0x2d6   :  { %4423 = vmatpush2.bf16.msra.mxu1 %v10905_v9  ;;  %4353 = vmatprep.subr.bf16.mxu0 %v10910_v24  ;;  %v2347_v42 = vpop.f32.mrf.mxu1  ;;  %v10935_v9 = vld [vmem:[%s15765_s6 + $0x988] ss:$16 sps:$4 sm:$0xff]   ;;  %v10943_v24 = vld [vmem:[%s15765_s6 + $0x96c] ss:$16 sps:$4 sm:$0xff]  }
 0x2d7   :  { %4424 = vmatprep.subr.bf16.mxu1 %v10913_v5  ;;  %v2277_v35 = vpop.f32.mrf.mxu0  ;;  %v3730_v5 = vshrl.u32 %v13103_v38, 16  ;;  %v10941_v45 = vld [vmem:[%s15765_s6 + $0x968] ss:$16 sps:$4 sm:$0xff]   ;;  %v10946_v38 = vld [vmem:[%s15765_s6 + $0x74c] ss:$16 sps:$4 sm:$0xff]  }
 0x2d8   :  { %v2348_v26 = vpop.f32.mrf.mxu1  ;;  %v10944_v35 = vld [vmem:[%s15765_s6 + $0x748] ss:$16 sps:$4 sm:$0xff]  }
 0x2d9   :  { %4354 = vmatpush2.bf16.msra.mxu0 %v10908_v61  ;;  %v3736_v61 = vshrl.u32 %v13226_v41, 16  ;;  %v10949_v41 = vld [vmem:[%s15765_s6 + $0x94c] ss:$16 sps:$4 sm:$0xff]  }
 0x2da   :  { %4425 = vmatpush2.bf16.msra.mxu1 %v10911_v23  ;;  %4536 = vmatprep.subr.bf16.mxu0 %v10919_v28  ;;  %v13941_v23 = vor.u32 %v3730_v5, %v13211_v31  ;;  %v10952_v26 = vld [vmem:[%s15765_s6 + $0x72c] ss:$16 sps:$4 sm:$0xff]  }
 0x2db   :  { %4465 = vmatprep.subr.bf16.mxu1 %v10916_v57  ;;  %v13948_v28 = vor.u32 %v3736_v61, %v13255_v2  ;;  %v10947_v2 = vld [vmem:[%s15765_s6 + $0x948] ss:$16 sps:$4 sm:$0xff]  }
 0x2dc   :  { %4356 = vmatmul.mubr.bf16.vlgmr.msra.gmra.mxu0 %v13159_v52 }
 0x2dd   :  { %4427 = vmatmul.mubr.bf16.vlgmr.msra.gmra.mxu1 %v13171_v46  ;;  %4365 = vmatprep.mubr.bf16.mxu0 %v13199_v3 }
 0x2de   :  { %9790 = vmatprep.mubr.msk.bf16.mxu1 %vm1099_vm6, %v13209_v8  ;;  %4466 = vmatpush1.bf16.msra.mxu1 %v10914_v0  ;;  %v3727_v0 = vshrl.u32 %v13215_v4, 16  ;;  %v10953_v4 = vld [vmem:[%s15765_s6 + $0x928] ss:$16 sps:$4 sm:$0xff]  }
 0x2df   :  { %4537 = vmatpush1.bf16.msra.mxu0 %v10917_v39  ;;  %4467 = vmatprep.subr.bf16.mxu1 %v10922_v19  ;;  %v10955_v39 = vld [vmem:[%s15765_s6 + $0x92c] ss:$16 sps:$4 sm:$0xff]  }
 0x2e0   :  { %4538 = vmatprep.subr.bf16.mxu0 %v10925_v7  ;;  %v3733_v7 = vshrl.u32 %v13219_v44, 16  ;;  %v10958_v44 = vld [vmem:[%s15765_s6 + $0x70c] ss:$16 sps:$4 sm:$0xff]  }
 0x2e2   :  { %4468 = vmatpush1.bf16.msra.mxu1 %v10920_v20  ;;  %v13974_v20 = vor.u32 %v3727_v0, %v13262_v21  ;;  %v10961_v21 = vld [vmem:[%s15765_s6 + $0x90c] ss:$16 sps:$4 sm:$0xff]  }
 0x2e3   :  { %4539 = vmatpush1.bf16.msra.mxu0 %v10923_v47  ;;  %4469 = vmatprep.subr.bf16.mxu1 %v10928_v36  ;;  %v10950_v47 = vld [vmem:[%s15765_s6 + $0x728] ss:$16 sps:$4 sm:$0xff]   ;;  %v13980_v36 = vor.u32 %v3733_v7, %v13264_v12  ;;  %v10979_v7 = vld [vmem:[%s15765_s6 + $0xa2c] ss:$16 sps:$4 sm:$0xff]  }
 0x2e4   :  { %4366 = vmatmul.mubr.bf16.gmra.mxu0 %v13229_v56  ;;  %4540 = vmatprep.subr.bf16.mxu0 %v10931_v1 }
 0x2e5   :  { %4437 = vmatmul.mubr.bf16.gmra.mxu1 %v13245_v33  ;;  %4375 = vmatprep.mubr.bf16.mxu0 %v13233_v40 }
 0x2e6   :  { %9791 = vmatprep.mubr.msk.bf16.mxu1 %vm1099_vm6, %v13274_v6  ;;  %4470 = vmatpush1.bf16.msra.mxu1 %v10926_v37  ;;  %v10956_v37 = vld [vmem:[%s15765_s6 + $0x708] ss:$16 sps:$4 sm:$0xff]  }
 0x2e7   :  { %4541 = vmatpush1.bf16.msra.mxu0 %v10929_v55  ;;  %4471 = vmatprep.subr.bf16.mxu1 %v10934_v25  ;;  %v10959_v55 = vld [vmem:[%s15765_s6 + $0x908] ss:$16 sps:$4 sm:$0xff]  }
 0x2e8   :  { %4542 = vmatprep.subr.bf16.mxu0 %v10937_v43 }
 0x2e9   :  { %v2455_v11 = vpop.f32.mrf.mxu0 }
 0x2ea   :  { %4472 = vmatpush1.bf16.msra.mxu1 %v10932_v34 }
 0x2eb   :  { %4543 = vmatpush1.bf16.msra.mxu0 %v10935_v9  ;;  %4473 = vmatprep.subr.bf16.mxu1 %v10940_v27  ;;  %v2457_v42 = vpop.f32.mrf.mxu0  ;;  %v10962_v9 = vld [vmem:[%s15765_s6 + $0x8e8] ss:$16 sps:$4 sm:$0xff]  }
 0x2ec   :  { %4376 = vmatmul.mubr.bf16.gmra.mxu0 %v13281_v53  ;;  %4544 = vmatprep.subr.bf16.mxu0 %v10943_v24  ;;  %v10965_v24 = vld [vmem:[%s15765_s6 + $0xa68] ss:$16 sps:$4 sm:$0xff]  }
 0x2ed   :  { %4447 = vmatmul.mubr.bf16.gmra.mxu1 %v13285_v16  ;;  %4385 = vmatprep.mubr.bf16.mxu0 %v13941_v23  ;;  %v2459_v31 = vpop.f32.mrf.mxu0 }
 0x2ee   :  { %9792 = vmatprep.mubr.msk.bf16.mxu1 %vm1099_vm6, %v13948_v28  ;;  %4474 = vmatpush1.bf16.msra.mxu1 %v10938_v18  ;;  %v10970_v18 = vld [vmem:[%s15765_s6 + $0x8cc] ss:$16 sps:$4 sm:$0xff]  }
 0x2ef   :  { %4545 = vmatpush1.bf16.msra.mxu0 %v10941_v45  ;;  %4475 = vmatprep.subr.bf16.mxu1 %v10946_v38  ;;  %v13963_v57 = vpop.f32.mrf.mxu0  ;;  %v10973_v45 = vld [vmem:[%s15765_s6 + $0xa4c] ss:$16 sps:$4 sm:$0xff]  }
 0x2f0   :  { %4546 = vmatprep.subr.bf16.mxu0 %v10949_v41 }
 0x2f1   :  { %v2465_v19 = vpop.f32.mrf.mxu0 }
 0x2f2   :  { %4476 = vmatpush1.bf16.msra.mxu1 %v10944_v35  ;;  %v10968_v35 = vld [vmem:[%s15765_s6 + $0x8c8] ss:$16 sps:$4 sm:$0xff]  }
 0x2f3   :  { %4547 = vmatpush1.bf16.msra.mxu0 %v10947_v2  ;;  %4477 = vmatprep.subr.bf16.mxu1 %v10952_v26  ;;  %v2467_v1 = vpop.f32.mrf.mxu0  ;;  %v10971_v26 = vld [vmem:[%s15765_s6 + $0xa48] ss:$16 sps:$4 sm:$0xff]  }
 0x2f4   :  { %4386 = vmatmul.mubr.bf16.gmra.mxu0 %v13974_v20  ;;  %4548 = vmatprep.subr.bf16.mxu0 %v10955_v39 }
 0x2f5   :  { %4457 = vmatmul.mubr.bf16.gmra.mxu1 %v13980_v36  ;;  %9793 = vmatprep.mubr.msk.bf16.mxu0 %vm1099_vm6, %v13168_v22  ;;  %v2469_v12 = vpop.f32.mrf.mxu0  ;;  %v10964_v22 = vld [vmem:[%s15765_s6 + $0x8ec] ss:$16 sps:$4 sm:$0xff]  }
 0x2f6   :  { %4478 = vmatpush1.bf16.msra.mxu1 %v10950_v47  ;;  %4497 = vmatprep.mubr.bf16.mxu1 %v13180_v54  ;;  %v10967_v54 = vld [vmem:[%s15765_s6 + $0xa6c] ss:$16 sps:$4 sm:$0xff]  }
 0x2f7   :  { %4549 = vmatpush1.bf16.msra.mxu0 %v10953_v4  ;;  %4479 = vmatprep.subr.bf16.mxu1 %v10958_v44  ;;  %v14002_v25 = vpop.f32.mrf.mxu0  ;;  %v10974_v4 = vld [vmem:[%s15765_s6 + $0x8a8] ss:$16 sps:$4 sm:$0xff]  }
 0x2f8   :  { %4550 = vmatprep.subr.bf16.mxu0 %v10961_v21  ;;  %v10977_v21 = vld [vmem:[%s15765_s6 + $0xa28] ss:$16 sps:$4 sm:$0xff]  }
 0x2f9   :  { %v2475_v43 = vpop.f32.mrf.mxu0 }
 0x2fa   :  { %4480 = vmatpush1.bf16.msra.mxu1 %v10956_v37  ;;  %v2384_v34 = vpop.f32.mrf.mxu1 }
 0x2fb   :  { %4551 = vmatpush1.bf16.msra.mxu0 %v10959_v55  ;;  %v14013_v27 = vadd.f32 %v2455_v11, %v2384_v34  ;;  %4481 = vmatprep.subr.bf16.mxu1 %v10964_v22  ;;  %v2477_v5 = vpop.f32.mrf.mxu0  ;;  %v10982_v55 = vld [vmem:[%s15765_s6 + $0x88c] ss:$16 sps:$4 sm:$0xff]  }
 0x2fc   :  { %4560 = vmatprep.subr.bf16.mxu0 %v10967_v54  ;;  %v2386_v61 = vpop.f32.mrf.mxu1  ;;  %v10985_v54 = vld [vmem:[%s15765_s6 + $0xa0c] ss:$16 sps:$4 sm:$0xff]  }
 0x2fd   :  { %v14024_v38 = vadd.f32 %v2457_v42, %v2386_v61  ;;  %v2479_v11 = vpop.f32.mrf.mxu0  ;;  %v10976_v42 = vld [vmem:[%s15765_s6 + $0x8ac] ss:$16 sps:$4 sm:$0xff]   ;;  %v10983_v61 = vld [vmem:[%s15765_s6 + $0xa08] ss:$16 sps:$4 sm:$0xff]  }
 0x2fe   :  { %4482 = vmatpush2.bf16.msra.mxu1 %v10962_v9  ;;  %v2388_v41 = vpop.f32.mrf.mxu1 }
 0x2ff   :  { %4561 = vmatpush2.bf16.msra.mxu0 %v10965_v24  ;;  %v14029_v2 = vadd.f32 %v2459_v31, %v2388_v41  ;;  %4483 = vmatprep.subr.bf16.mxu1 %v10970_v18  ;;  %v14034_v0 = vpop.f32.mrf.mxu0  ;;  %v10980_v24 = vld [vmem:[%s15765_s6 + $0x888] ss:$16 sps:$4 sm:$0xff]  }
 0x300   :  { %4562 = vmatprep.subr.bf16.mxu0 %v10973_v45  ;;  %v14039_v39 = vpop.f32.mrf.mxu1 }
 0x301   :  { %v2485_v31 = vpop.f32.mrf.mxu0 }
 0x302   :  { %4484 = vmatpush2.bf16.msra.mxu1 %v10968_v35  ;;  %v2394_v47 = vpop.f32.mrf.mxu1  ;;  %v11000_v35 = vld [vmem:[%s15695_s16 + $0x74] ss:$8 sps:$4 sm:$0xff]  }
 0x303   :  { %4563 = vmatpush2.bf16.msra.mxu0 %v10971_v26  ;;  %v14047_v44 = vadd.f32 %v2465_v19, %v2394_v47  ;;  %4485 = vmatprep.subr.bf16.mxu1 %v10976_v42  ;;  %v2487_v37 = vpop.f32.mrf.mxu0  ;;  %v10986_v26 = vld [vmem:[%s15765_s6 + $0x868] ss:$16 sps:$4 sm:$0xff]  }
 0x304   :  { %4564 = vmatprep.subr.bf16.mxu0 %v10979_v7  ;;  %v2396_v22 = vpop.f32.mrf.mxu1  ;;  %v10991_v7 = vld [vmem:[%s15765_s6 + $0x84c] ss:$16 sps:$4 sm:$0xff]  }
 0x305   :  { %v14058_v34 = vadd.f32 %v2467_v1, %v2396_v22  ;;  %v2489_v19 = vpop.f32.mrf.mxu0  ;;  %v10988_v1 = vld [vmem:[%s15765_s6 + $0x86c] ss:$16 sps:$4 sm:$0xff]   ;;  %v10989_v22 = vld [vmem:[%s15765_s6 + $0x848] ss:$16 sps:$4 sm:$0xff]  }
 0x306   :  { %4486 = vmatpush2.bf16.msra.mxu1 %v10974_v4  ;;  %v2398_v9 = vpop.f32.mrf.mxu1  ;;  %v10998_v4 = vld [vmem:[%s15695_s16 + $0x70] ss:$8 sps:$4 sm:$0xff]  }
 0x307   :  { %4565 = vmatpush2.bf16.msra.mxu0 %v10977_v21  ;;  %v14063_v18 = vadd.f32 %v2469_v12, %v2398_v9  ;;  %4487 = vmatprep.subr.bf16.mxu1 %v10982_v55  ;;  %v2490_v45 = vpop.f32.mrf.mxu0  ;;  %v11003_v55 = vld [vmem:[%s15695_s16 + $0x64] ss:$8 sps:$4 sm:$0xff]   ;;  %v11006_v9 = vld [vmem:[%s15695_s16 + $0x54] ss:$8 sps:$4 sm:$0xff]  }
 0x308   :  { %4566 = vmatprep.subr.bf16.mxu0 %v10985_v54  ;;  %v14071_v41 = vpop.f32.mrf.mxu1 }
 0x30a   :  { %4488 = vmatpush2.bf16.msra.mxu1 %v10980_v24  ;;  %v2404_v12 = vpop.f32.mrf.mxu1 }
 0x30b   :  { %4567 = vmatpush2.bf16.msra.mxu0 %v10983_v61  ;;  %v14079_v42 = vadd.f32 %v2475_v43, %v2404_v12  ;;  %4489 = vmatprep.subr.bf16.mxu1 %v10988_v1  ;;  %v10997_v61 = vld [vmem:[%s15765_s6 + $0x80c] ss:$16 sps:$4 sm:$0xff]   ;;  %v11004_v1 = vld [vmem:[%s15695_s16 + $0x50] ss:$8 sps:$4 sm:$0xff]  }
 0x30c   :  { %v2406_v47 = vpop.f32.mrf.mxu1  ;;  %5128 = vmatprep.subr.bf16.mxu0 %v11000_v35  ;;  %v11009_v12 = vld [vmem:[%s15695_s16 + $0x44] ss:$8 sps:$4 sm:$0xff]  }
 0x30d   :  { %v14087_v21 = vadd.f32 %v2477_v5, %v2406_v47  ;;  %v10994_v5 = vld [vmem:[%s15765_s6 + $0x82c] ss:$16 sps:$4 sm:$0xff]   ;;  %v11010_v47 = vld [vmem:[%s15695_s16 + $0x30] ss:$8 sps:$4 sm:$0xff]  }
 0x30e   :  { %4569 = vmatmul.mubr.bf16.vlgmr.msra.gmra.mxu0 %v13171_v46  ;;  %4490 = vmatpush2.bf16.msra.mxu1 %v10986_v26  ;;  %v2408_v43 = vpop.f32.mrf.mxu1  ;;  %v11001_v46 = vld [vmem:[%s15695_s16 + $0x60] ss:$8 sps:$4 sm:$0xff]  }
 0x30f   :  { %9794 = vmatprep.mubr.msk.bf16.mxu0 %vm1099_vm6, %v13209_v8  ;;  %v14098_v54 = vadd.f32 %v2479_v11, %v2408_v43  ;;  %4491 = vmatprep.subr.bf16.mxu1 %v10991_v7  ;;  %v10992_v11 = vld [vmem:[%s15765_s6 + $0x828] ss:$16 sps:$4 sm:$0xff]  }
 0x310   :  { %v14103_v19 = vpop.f32.mrf.mxu1  ;;  %5129 = vmatpush1.bf16.msra.mxu0 %v10998_v4  ;;  %v10995_v26 = vld [vmem:[%s15765_s6 + $0x808] ss:$16 sps:$4 sm:$0xff]   ;;  %s15896_s6 = sld [smem:[#allocation73_spill]] }
 0x311   :  { %5130 = vmatprep.subr.bf16.mxu0 %v11003_v55  ;;  %v11013_v4 = vld [vmem:[%s15695_s16 + $0x20] ss:$8 sps:$4 sm:$0xff]   ;;  %v11024_v55 = vld [vmem:[%s15695_s16 + $0xf4] ss:$8 sps:$4 sm:$0xff]  }
 0x312   :  { %4492 = vmatpush2.bf16.msra.mxu1 %v10989_v22  ;;  %v2414_v8 = vpop.f32.mrf.mxu1 }
 0x313   :  { %v14114_v24 = vadd.f32 %v2485_v31, %v2414_v8  ;;  %4493 = vmatprep.subr.bf16.mxu1 %v10994_v5  ;;  %v11027_v8 = vld [vmem:[%s15695_s16 + $0xe4] ss:$8 sps:$4 sm:$0xff]  }
 0x314   :  { %v2416_v45 = vpop.f32.mrf.mxu1  ;;  %5131 = vmatpush1.bf16.msra.mxu0 %v11001_v46 }
 0x315   :  { %v14122_v35 = vadd.f32 %v2487_v37, %v2416_v45  ;;  %5132 = vmatprep.subr.bf16.mxu0 %v11006_v9  ;;  %v11007_v37 = vld [vmem:[%s15695_s16 + $0x40] ss:$8 sps:$4 sm:$0xff]  }
 0x316   :  { %4579 = vmatmul.mubr.bf16.gmra.mxu0 %v13245_v33  ;;  %4494 = vmatpush2.bf16.msra.mxu1 %v10992_v11  ;;  %v2418_v31 = vpop.f32.mrf.mxu1  ;;  %v11012_v33 = vld [vmem:[%s15695_s16 + $0x34] ss:$8 sps:$4 sm:$0xff]  }
 0x317   :  { %9795 = vmatprep.mubr.msk.bf16.mxu0 %vm1099_vm6, %v13274_v6  ;;  %4495 = vmatprep.subr.bf16.mxu1 %v10997_v61  ;;  %v11015_v6 = vld [vmem:[%s15695_s16 + $0x24] ss:$8 sps:$4 sm:$0xff]  }
 0x318   :  { %v2419_v7 = vpop.f32.mrf.mxu1  ;;  %5133 = vmatpush1.bf16.msra.mxu0 %v11004_v1 }
 0x319   :  { %5134 = vmatprep.subr.bf16.mxu0 %v11009_v12 }
 0x31a   :  { %4496 = vmatpush2.bf16.msra.mxu1 %v10995_v26 }
 0x31c   :  { %5135 = vmatpush1.bf16.msra.mxu0 %v11007_v37  ;;  %v11028_v37 = vld [vmem:[%s15695_s16 + $0xd0] ss:$8 sps:$4 sm:$0xff]  }
 0x31d   :  { %4498 = vmatmul.mubr.bf16.vlgmr.msra.gmra.mxu1 %v13159_v52  ;;  %5136 = vmatprep.subr.bf16.mxu0 %v11012_v33  ;;  %v11018_v52 = vld [vmem:[%s15695_s16 + $0x14] ss:$8 sps:$4 sm:$0xff]  }
 0x31e   :  { %4589 = vmatmul.mubr.bf16.gmra.mxu0 %v13285_v16  ;;  %4507 = vmatprep.mubr.bf16.mxu1 %v13199_v3  ;;  %v11016_v16 = vld [vmem:[%s15695_s16 + $0x10] ss:$8 sps:$4 sm:$0xff]   ;;  %v11021_v3 = vld [vmem:[%s15695_s16 + $0x4] ss:$8 sps:$4 sm:$0xff]  }
 0x31f   :  { %9796 = vmatprep.mubr.msk.bf16.mxu0 %vm1099_vm6, %v13948_v28  ;;  %v11019_v28 = vld [vmem:[%s15695_s16] ss:$8 sps:$4 sm:$0xff]  }
 0x320   :  { %5137 = vmatpush1.bf16.msra.mxu0 %v11010_v47 }
 0x321   :  { %5138 = vmatprep.subr.bf16.mxu0 %v11015_v6 }
 0x324   :  { %5139 = vmatpush1.bf16.msra.mxu0 %v11013_v4  ;;  %v11033_v4 = vld [vmem:[%s15695_s16 + $0xc4] ss:$8 sps:$4 sm:$0xff]  }
 0x325   :  { %4508 = vmatmul.mubr.bf16.gmra.mxu1 %v13229_v56  ;;  %5140 = vmatprep.subr.bf16.mxu0 %v11018_v52 }
 0x326   :  { %4599 = vmatmul.mubr.bf16.gmra.mxu0 %v13980_v36  ;;  %4517 = vmatprep.mubr.bf16.mxu1 %v13233_v40  ;;  %v11022_v40 = vld [vmem:[%s15695_s16 + $0xf0] ss:$8 sps:$4 sm:$0xff]  }
 0x328   :  { %5141 = vmatpush1.bf16.msra.mxu0 %v11016_v16 }
 0x329   :  { %5142 = vmatprep.subr.bf16.mxu0 %v11021_v3 }
 0x32a   :  { %v3251_v56 = vpop.f32.mrf.mxu0 }
 0x32b   :  { %v3252_v43 = vadd.f32 %v3251_v56, %v13749_v17  ;;  %v3322_v22 = vpop.f32.mrf.mxu1  ;;  %v11036_v56 = vld [vmem:[%s15695_s16 + $0xb4] ss:$8 sps:$4 sm:$0xff]  }
 0x32c   :  { %v3253_v5 = vpop.f32.mrf.mxu0  ;;  %5143 = vmatpush1.bf16.msra.mxu0 %v11019_v28 }
 0x32d   :  { %v14175_v36 = vadd.f32 %v3322_v22, %v3252_v43  ;;  %4518 = vmatmul.mubr.bf16.gmra.mxu1 %v13281_v53  ;;  %v3254_v46 = vadd.f32 %v3253_v5, %v13755_v13  ;;  %v3324_v9 = vpop.f32.mrf.mxu1  ;;  %5144 = vmatprep.subr.bf16.mxu0 %v11024_v55  ;;  %v11025_v53 = vld [vmem:[%s15695_s16 + $0xe0] ss:$8 sps:$4 sm:$0xff]  }
 0x32e   :  { %4527 = vmatprep.mubr.bf16.mxu1 %v13941_v23  ;;  %v3255_v17 = vpop.f32.mrf.mxu0  ;;  %v11030_v23 = vld [vmem:[%s15695_s16 + $0xd4] ss:$8 sps:$4 sm:$0xff]  }
 0x32f   :  { %v14183_v11 = vadd.f32 %v3324_v9, %v3254_v46  ;;  %v3256_v61 = vadd.f32 %v3255_v17, %v13766_v29  ;;  %v3326_v45 = vpop.f32.mrf.mxu1  ;;  %v11039_v17 = vld [vmem:[%s15695_s16 + $0xa4] ss:$8 sps:$4 sm:$0xff]  }
 0x330   :  { %v14186_v1 = vpop.f32.mrf.mxu0  ;;  %5145 = vmatpush2.bf16.msra.mxu0 %v11022_v40  ;;  %v11034_v40 = vld [vmem:[%s15695_s16 + $0xb0] ss:$8 sps:$4 sm:$0xff]  }
 0x331   :  { %v14191_v13 = vadd.f32 %v3326_v45, %v3256_v61  ;;  %v14193_v12 = vpop.f32.mrf.mxu1  ;;  %5146 = vmatprep.subr.bf16.mxu0 %v11027_v8 }
 0x332   :  { %v3261_v31 = vpop.f32.mrf.mxu0 }
 0x333   :  { %v3262_v29 = vadd.f32 %v3261_v31, %v13785_v30  ;;  %v3332_v26 = vpop.f32.mrf.mxu1  ;;  %v11037_v31 = vld [vmem:[%s15695_s16 + $0xa0] ss:$8 sps:$4 sm:$0xff]  }
 0x334   :  { %v3263_v7 = vpop.f32.mrf.mxu0  ;;  %5147 = vmatpush2.bf16.msra.mxu0 %v11025_v53 }
 0x335   :  { %v14202_v33 = vadd.f32 %v3332_v26, %v3262_v29  ;;  %4528 = vmatmul.mubr.bf16.gmra.mxu1 %v13974_v20  ;;  %v3264_v47 = vadd.f32 %v3263_v7, %v13792_v58  ;;  %v3334_v6 = vpop.f32.mrf.mxu1  ;;  %5148 = vmatprep.subr.bf16.mxu0 %v11030_v23  ;;  %v11031_v20 = vld [vmem:[%s15695_s16 + $0xc0] ss:$8 sps:$4 sm:$0xff]   ;;  %v11048_v29 = vld [vmem:[%s15695_s16 + $0x174] ss:$8 sps:$4 sm:$0xff]  }
 0x336   :  { %v3265_v30 = vpop.f32.mrf.mxu0  ;;  %5199 = vmatprep.subr.bf16.mxu1 %v11048_v29  ;;  %v11076_v29 = vld [vmem:[%s15695_s16 + $0x120] ss:$8 sps:$4 sm:$0xff]  }
 0x337   :  { %v14209_v52 = vadd.f32 %v3334_v6, %v3264_v47  ;;  %v3266_v16 = vadd.f32 %v3265_v30, %v13803_v50  ;;  %v3336_v3 = vpop.f32.mrf.mxu1  ;;  %v11040_v30 = vld [vmem:[%s15695_s16 + $0x90] ss:$8 sps:$4 sm:$0xff]  }
 0x338   :  { %v14212_v28 = vpop.f32.mrf.mxu0  ;;  %5149 = vmatpush2.bf16.msra.mxu0 %v11028_v37 }
 0x339   :  { %v14217_v58 = vadd.f32 %v3336_v3, %v3266_v16  ;;  %v14219_v55 = vpop.f32.mrf.mxu1  ;;  %5150 = vmatprep.subr.bf16.mxu0 %v11033_v4  ;;  %v11052_v16 = vld [vmem:[%s15695_s16 + $0x160] ss:$8 sps:$4 sm:$0xff]   ;;  %v11054_v3 = vld [vmem:[%s15695_s16 + $0x164] ss:$8 sps:$4 sm:$0xff]  }
 0x33a   :  { %v3271_v43 = vpop.f32.mrf.mxu0 }
 0x33b   :  { %v3272_v50 = vadd.f32 %v3271_v43, %v13821_v48  ;;  %v3342_v22 = vpop.f32.mrf.mxu1  ;;  %v11045_v43 = vld [vmem:[%s15695_s16 + $0x84] ss:$8 sps:$4 sm:$0xff]  }
 0x33c   :  { %v3273_v5 = vpop.f32.mrf.mxu0  ;;  %5151 = vmatpush2.bf16.msra.mxu0 %v11031_v20 }
 0x33d   :  { %v14228_v46 = vadd.f32 %v3342_v22, %v3272_v50  ;;  %v3274_v9 = vadd.f32 %v3273_v5, %v13826_v14  ;;  %v3344_v8 = vpop.f32.mrf.mxu1  ;;  %5152 = vmatprep.subr.bf16.mxu0 %v11036_v56  ;;  %v11046_v14 = vld [vmem:[%s15695_s16 + $0x170] ss:$8 sps:$4 sm:$0xff]   ;;  %v11060_v50 = vld [vmem:[%s15695_s16 + $0x154] ss:$8 sps:$4 sm:$0xff]  }
 0x33e   :  { %v3275_v61 = vpop.f32.mrf.mxu0  ;;  %5200 = vmatpush1.bf16.msra.mxu1 %v11046_v14  ;;  %v11072_v14 = vld [vmem:[%s15695_s16 + $0x134] ss:$8 sps:$4 sm:$0xff]  }
 0x33f   :  { %v14234_v45 = vadd.f32 %v3344_v8, %v3274_v9  ;;  %v3276_v48 = vadd.f32 %v3275_v61, %v13837_v59  ;;  %v3346_v53 = vpop.f32.mrf.mxu1  ;;  %v11042_v59 = vld [vmem:[%s15695_s16 + $0x94] ss:$8 sps:$4 sm:$0xff]   ;;  %5201 = vmatprep.subr.bf16.mxu1 %v11054_v3  ;;  %v11043_v8 = vld [vmem:[%s15695_s16 + $0x80] ss:$8 sps:$4 sm:$0xff]  }
 0x340   :  { %v14237_v23 = vpop.f32.mrf.mxu0  ;;  %5153 = vmatpush2.bf16.msra.mxu0 %v11034_v40  ;;  %v11051_v61 = vld [vmem:[%s15695_s16 + $0x334] ss:$8 sps:$4 sm:$0xff]  }
 0x341   :  { %v14248_v26 = vadd.f32 %v3346_v53, %v3276_v48  ;;  %v14250_v7 = vpop.f32.mrf.mxu1  ;;  %5154 = vmatprep.subr.bf16.mxu0 %v11039_v17  ;;  %v11064_v48 = vld [vmem:[%s15695_s16 + $0x140] ss:$8 sps:$4 sm:$0xff]   ;;  %v11066_v53 = vld [vmem:[%s15695_s16 + $0x144] ss:$8 sps:$4 sm:$0xff]  }
 0x342   :  { %v3281_v37 = vpop.f32.mrf.mxu0  ;;  %5202 = vmatpush1.bf16.msra.mxu1 %v11052_v16 }
 0x343   :  { %v3282_v47 = vadd.f32 %v3281_v37, %v13855_v15  ;;  %v3352_v6 = vpop.f32.mrf.mxu1  ;;  %5203 = vmatprep.subr.bf16.mxu1 %v11060_v50  ;;  %v11082_v37 = vld [vmem:[%s15695_s16 + $0x110] ss:$8 sps:$4 sm:$0xff]  }
 0x344   :  { %v3283_v4 = vpop.f32.mrf.mxu0  ;;  %5155 = vmatpush2.bf16.msra.mxu0 %v11037_v31  ;;  %v11070_v31 = vld [vmem:[%s15695_s16 + $0x130] ss:$8 sps:$4 sm:$0xff]  }
 0x345   :  { %v14265_v20 = vadd.f32 %v3352_v6, %v3282_v47  ;;  %v3284_v15 = vadd.f32 %v3283_v4, %v13860_v51  ;;  %v3354_v56 = vpop.f32.mrf.mxu1  ;;  %5156 = vmatprep.subr.bf16.mxu0 %v11042_v59  ;;  %v11058_v51 = vld [vmem:[%s15695_s16 + $0x150] ss:$8 sps:$4 sm:$0xff]   ;;  %v11078_v59 = vld [vmem:[%s15695_s16 + $0x124] ss:$8 sps:$4 sm:$0xff]   ;;  %v11084_v47 = vld [vmem:[%s15695_s16 + $0x114] ss:$8 sps:$4 sm:$0xff]  }
 0x346   :  { %v3285_v22 = vpop.f32.mrf.mxu0  ;;  %5204 = vmatpush1.bf16.msra.mxu1 %v11058_v51  ;;  %v11088_v4 = vld [vmem:[%s15695_s16 + $0x100] ss:$8 sps:$4 sm:$0xff]  }
 0x347   :  { %v14274_v5 = vadd.f32 %v3354_v56, %v3284_v15  ;;  %v3356_v40 = vpop.f32.mrf.mxu1  ;;  %5205 = vmatprep.subr.bf16.mxu1 %v11066_v53  ;;  %v11094_v22 = vld [vmem:[%s15695_s16 + $0x1b0] ss:$8 sps:$4 sm:$0xff]   ;;  %v11102_v53 = vld [vmem:[%s15695_s16 + $0x1a4] ss:$8 sps:$4 sm:$0xff]  }
 0x348   :  { %v3286_v9 = vpop.f32.mrf.mxu0  ;;  %5157 = vmatpush2.bf16.msra.mxu0 %v11040_v30  ;;  %v11090_v30 = vld [vmem:[%s15695_s16 + $0x104] ss:$8 sps:$4 sm:$0xff]   ;;  %v11096_v40 = vld [vmem:[%s15695_s16 + $0x1b4] ss:$8 sps:$4 sm:$0xff]  }
 0x349   :  { %v3357_v17 = vpop.f32.mrf.mxu1  ;;  %5158 = vmatprep.subr.bf16.mxu0 %v11045_v43 }
 0x34a   :  { %5206 = vmatpush1.bf16.msra.mxu1 %v11064_v48 }
 0x34b   :  { %5207 = vmatprep.subr.bf16.mxu1 %v11072_v14 }
 0x34c   :  { %5159 = vmatpush2.bf16.msra.mxu0 %v11043_v8 }
 0x34d   :  { %5678 = vmatprep.subr.bf16.mxu0 %v11051_v61  ;;  %v11100_v61 = vld [vmem:[%s15695_s16 + $0x1a0] ss:$8 sps:$4 sm:$0xff]  }
 0x34e   :  { %5208 = vmatpush1.bf16.msra.mxu1 %v11070_v31 }
 0x34f   :  { %5209 = vmatprep.subr.bf16.mxu1 %v11078_v59 }
 0x352   :  { %5210 = vmatpush1.bf16.msra.mxu1 %v11076_v29 }
 0x353   :  { %5211 = vmatprep.subr.bf16.mxu1 %v11084_v47 }
 0x356   :  { %5212 = vmatpush1.bf16.msra.mxu1 %v11082_v37 }
 0x357   :  { %5213 = vmatprep.subr.bf16.mxu1 %v11090_v30 }
 0x35a   :  { %5214 = vmatpush1.bf16.msra.mxu1 %v11088_v4  ;;  %v11106_v4 = vld [vmem:[%s15695_s16 + $0x190] ss:$8 sps:$4 sm:$0xff]  }
 0x35b   :  { %5223 = vmatprep.subr.bf16.mxu1 %v11096_v40 }
 0x35c   :  { %v3464_v6 = vpop.f32.mrf.mxu0 }
 0x35e   :  { %v3466_v16 = vpop.f32.mrf.mxu0  ;;  %5224 = vmatpush2.bf16.msra.mxu1 %v11094_v22 }
 0x35f   :  { %5225 = vmatprep.subr.bf16.mxu1 %v11102_v53 }
 0x360   :  { %v3468_v3 = vpop.f32.mrf.mxu0 }
 0x362   :  { %v14315_v15 = vpop.f32.mrf.mxu0  ;;  %5226 = vmatpush2.bf16.msra.mxu1 %v11100_v61  ;;  %v11114_v61 = vld [vmem:[%s15695_s16 + $0x184] ss:$8 sps:$4 sm:$0xff]  }
 0x364   :  { %v3474_v56 = vpop.f32.mrf.mxu0 }
 0x366   :  { %v3476_v43 = vpop.f32.mrf.mxu0 }
 0x368   :  { %v3478_v50 = vpop.f32.mrf.mxu0 }
 0x36a   :  { %v14323_v51 = vpop.f32.mrf.mxu0 }
 0x36b   :  { %v3393_v9 = vpop.f32.mrf.mxu1 }
 0x36c   :  { %v3394_v8 = vadd.f32 %v3393_v9, %v14013_v27  ;;  %v3484_v17 = vpop.f32.mrf.mxu0 }
 0x36d   :  { %v3395_v48 = vpop.f32.mrf.mxu1 }
 0x36e   :  { %v14332_v31 = vadd.f32 %v3464_v6, %v3394_v8  ;;  %v3396_v14 = vadd.f32 %v3395_v48, %v14024_v38  ;;  %v3486_v29 = vpop.f32.mrf.mxu0  ;;  %v11108_v6 = vld [vmem:[%s15695_s16 + $0x194] ss:$8 sps:$4 sm:$0xff]   ;;  %v11112_v8 = vld [vmem:[%s15695_s16 + $0x180] ss:$8 sps:$4 sm:$0xff]  }
 0x36f   :  { %v3397_v59 = vpop.f32.mrf.mxu1  ;;  %5227 = vmatprep.subr.bf16.mxu1 %v11108_v6 }
 0x370   :  { %v14335_v37 = vadd.f32 %v3466_v16, %v3396_v14  ;;  %v3398_v27 = vadd.f32 %v3397_v59, %v14029_v2  ;;  %v3488_v47 = vpop.f32.mrf.mxu0  ;;  %5228 = vmatpush2.bf16.msra.mxu1 %v11106_v4  ;;  %v11120_v4 = vld [vmem:[%s15695_s16 + $0x234] ss:$8 sps:$4 sm:$0xff]  }
 0x371   :  { %v14344_v30 = vpop.f32.mrf.mxu1  ;;  %5229 = vmatprep.subr.bf16.mxu1 %v11114_v61 }
 0x372   :  { %v14346_v38 = vadd.f32 %v3468_v3, %v3398_v27  ;;  %v14348_v22 = vpop.f32.mrf.mxu0 }
 0x373   :  { %v3403_v16 = vpop.f32.mrf.mxu1 }
 0x374   :  { %v3404_v2 = vadd.f32 %v3403_v16, %v14047_v44  ;;  %v3494_v40 = vpop.f32.mrf.mxu0  ;;  %5230 = vmatpush2.bf16.msra.mxu1 %v11112_v8 }
 0x375   :  { %v3405_v9 = vpop.f32.mrf.mxu1  ;;  %5607 = vmatprep.subr.bf16.mxu1 %v11120_v4 }
 0x376   :  { %v14357_v48 = vadd.f32 %v3474_v56, %v3404_v2  ;;  %v3406_v3 = vadd.f32 %v3405_v9, %v14058_v34  ;;  %v3496_v53 = vpop.f32.mrf.mxu0 }
 0x377   :  { %v3407_v14 = vpop.f32.mrf.mxu1 }
 0x378   :  { %v14360_v59 = vadd.f32 %v3476_v43, %v3406_v3  ;;  %v3408_v44 = vadd.f32 %v3407_v14, %v14063_v18  ;;  %v3498_v27 = vpop.f32.mrf.mxu0 }
 0x379   :  { %v14366_v6 = vpop.f32.mrf.mxu1 }
 0x37a   :  { %v14368_v16 = vadd.f32 %v3478_v50, %v3408_v44  ;;  %v3499_v56 = vpop.f32.mrf.mxu0 }
 0x37b   :  { %v3413_v34 = vpop.f32.mrf.mxu1 }
 0x37c   :  { %v3414_v2 = vadd.f32 %v3413_v34, %v14079_v42 }
 0x37d   :  { %v3415_v9 = vpop.f32.mrf.mxu1 }
 0x37e   :  { %v14371_v43 = vadd.f32 %v3484_v17, %v3414_v2  ;;  %v3416_v18 = vadd.f32 %v3415_v9, %v14087_v21 }
 0x37f   :  { %v3417_v61 = vpop.f32.mrf.mxu1 }
 0x380   :  { %v14374_v8 = vadd.f32 %v3486_v29, %v3416_v18  ;;  %v3418_v3 = vadd.f32 %v3417_v61, %v14098_v54  ;;  %v14387_v29 = vld [vmem:[#allocation11] ss:$2 sm:$0xf]  ;;  %v15887_v18 = vld [vmem:[#allocation44_spill] sm:$0xff] }
 0x381   :  { %v14377_v14 = vpop.f32.mrf.mxu1  ;;  %v14393_v61 = vld [vmem:[#allocation11 + $0x1] ss:$2 sm:$0xf] }
 0x382   :  { %v14379_v27 = vadd.f32 %v3488_v47, %v3418_v3  ;;  %v14391_v47 = vrot.slane %v14387_v29, %v15887_v18 }
 0x383   :  { %v3423_v50 = vpop.f32.mrf.mxu1 }
 0x384   :  { %15884 = vst [vmem:[#allocation50_spill] sm:$0xff] %v14379_v27  ;;  %v3424_v44 = vadd.f32 %v3423_v50, %v14114_v24 }
 0x385   :  { %v3425_v4 = vpop.f32.mrf.mxu1 }
 0x386   :  { %v14382_v56 = vadd.f32 %v3494_v40, %v3424_v44  ;;  %v3426_v42 = vadd.f32 %v3425_v4, %v14122_v35  ;;  %v2320_v35 = vadd.f32 %v13773_v62, %v13768_v63  ;;  %v14400_v44 = vrot.slane %v14393_v61, %v15887_v18  ;;  %v15888_v4 = vld [vmem:[#allocation48_spill] sm:$0xff] }
 0x387   :  { %v3427_v17 = vpop.f32.mrf.mxu1  ;;  %v14414_v27 = vrot.slane %v14393_v61, %v15888_v4 }
 0x388   :  { %15885 = vst [vmem:[#allocation32_spill] sm:$0xff] %v14382_v56  ;;  %v14385_v34 = vadd.f32 %v3496_v53, %v3426_v42  ;;  %v14404_v42 = vrot.slane %v14387_v29, %v15888_v4 }
 0x389   :  { %v3428_v21 = vpop.f32.mrf.mxu1 }
 0x38a   :  { %15886 = vst [vmem:[#allocation51_spill] sm:$0xff] %v14385_v34  ;;  %v3258_v21 = vadd.f32 %v14186_v1, %v2320_v35 }
 0x39c   :  { %v4357_v2 = vpop.f32.mrf.mxu0 }
 0x39d   :  { %v4428_v54 = vpop.f32.mrf.mxu1 }
 0x39e   :  { %v4429_v9 = vadd.f32 %v4428_v54, %v4357_v2  ;;  %v4359_v24 = vpop.f32.mrf.mxu0 }
 0x39f   :  { %v4430_v40 = vpop.f32.mrf.mxu1 }
 0x3a0   :  { %v4607_v53 = vadd.f32 %v4429_v9, %v14175_v36  ;;  %v4431_v3 = vadd.f32 %v4430_v40, %v4359_v24  ;;  %v4361_v50 = vpop.f32.mrf.mxu0  ;;  %v3329_v9 = vadd.f32 %v14193_v12, %v3258_v21  ;;  %v2330_v12 = vadd.f32 %v13810_v60, %v13805_v10 }
 0x3a1   :  { %v4432_v17 = vpop.f32.mrf.mxu1 }
 0x3a2   :  { %v4657_v2 = vmul.f32 %v14391_v47, %v4607_v53  ;;  %v4608_v54 = vadd.f32 %v4431_v3, %v14183_v11  ;;  %v4433_v63 = vadd.f32 %v4432_v17, %v4361_v50  ;;  %v4363_v62 = vpop.f32.mrf.mxu0 }
 0x3a3   :  { %v4434_v36 = vpop.f32.mrf.mxu1 }
 0x3a4   :  { %v4611_v24 = vadd.f32 %v4433_v63, %v14191_v13  ;;  %v4435_v40 = vadd.f32 %v4434_v36, %v4363_v62  ;;  %v4367_v18 = vpop.f32.mrf.mxu0  ;;  %v4658_v34 = vmul.f32 %v14404_v42, %v4608_v54  ;;  %v4708_v1 = vadd.f32 %v14400_v44, %v4657_v2 }
 0x3a5   :  { %v4438_v56 = vpop.f32.mrf.mxu1  ;;  %v3268_v62 = vadd.f32 %v14212_v28, %v2330_v12 }
 0x3a6   :  { %v4661_v11 = vmul.f32 %v14391_v47, %v4611_v24  ;;  %v4612_v35 = vadd.f32 %v4435_v40, %v3329_v9  ;;  %v4439_v53 = vadd.f32 %v4438_v56, %v4367_v18  ;;  %v4369_v3 = vpop.f32.mrf.mxu0  ;;  %v4709_v36 = vadd.f32 %v14414_v27, %v4658_v34 }
 0x3a7   :  { %v4440_v13 = vpop.f32.mrf.mxu1  ;;  %v4736_v9 = vmax.f32 %v4708_v1, 0.0 }
 0x3a8   :  { %v4712_v50 = vadd.f32 %v14400_v44, %v4661_v11  ;;  %v4662_v17 = vmul.f32 %v14404_v42, %v4612_v35  ;;  %v4615_v21 = vadd.f32 %v4439_v53, %v14202_v33  ;;  %v4441_v54 = vadd.f32 %v4440_v13, %v4369_v3  ;;  %v4371_v63 = vpop.f32.mrf.mxu0 }
 0x3a9   :  { %v4442_v2 = vpop.f32.mrf.mxu1  ;;  %v3339_v33 = vadd.f32 %v14219_v55, %v3268_v62  ;;  %v4737_v12 = vmax.f32 %v4709_v36, 0.0 }
 0x3aa   :  { %v4740_v56 = vmax.f32 %v4712_v50, 0.0  ;;  %v4616_v18 = vadd.f32 %v4441_v54, %v14209_v52  ;;  %v4443_v24 = vadd.f32 %v4442_v2, %v4371_v63  ;;  %v4373_v10 = vpop.f32.mrf.mxu0  ;;  %v4665_v60 = vmul.f32 %v14391_v47, %v4615_v21 }
 0x3ab   :  { %v4444_v40 = vpop.f32.mrf.mxu1  ;;  %v4713_v11 = vadd.f32 %v14414_v27, %v4662_v17  ;;  %v2340_v17 = vadd.f32 %v13844_v49, %v13839_v32  ;;  %v11057_v32 = vld [vmem:[%s15695_s16 + $0x324] ss:$8 sps:$4 sm:$0xff]  }
 0x3ac   :  { %v14429_v35 = vpack.c.bf16 %v4740_v56, %v4736_v9  ;;  %v4619_v28 = vadd.f32 %v4443_v24, %v14217_v58  ;;  %v4377_v53 = vpop.f32.mrf.mxu0  ;;  %v4666_v34 = vmul.f32 %v14404_v42, %v4616_v18  ;;  %v4445_v1 = vadd.f32 %v4444_v40, %v4373_v10  ;;  %v11049_v58 = vld [vmem:[%s15695_s16 + $0x330] ss:$8 sps:$4 sm:$0xff]  }
 0x3ad   :  { %v4448_v3 = vpop.f32.mrf.mxu1  ;;  %v4741_v52 = vmax.f32 %v4713_v11, 0.0  ;;  %v4716_v55 = vadd.f32 %v14400_v44, %v4665_v60  ;;  %v3278_v49 = vadd.f32 %v14237_v23, %v2340_v17 }
 0x3ae   :  { %v4669_v13 = vmul.f32 %v14391_v47, %v4619_v28  ;;  %v4449_v50 = vadd.f32 %v4448_v3, %v4377_v53  ;;  %v4379_v21 = vpop.f32.mrf.mxu0  ;;  %v4620_v54 = vadd.f32 %v4445_v1, %v3339_v33  ;;  %v4717_v10 = vadd.f32 %v14414_v27, %v4666_v34  ;;  %v11055_v1 = vld [vmem:[%s15695_s16 + $0x320] ss:$8 sps:$4 sm:$0xff]  }
 0x3af   :  { %v4450_v63 = vpop.f32.mrf.mxu1  ;;  %v14437_v62 = vpack.c.bf16 %v4741_v52, %v4737_v12  ;;  %v4744_v28 = vmax.f32 %v4716_v55, 0.0  ;;  %v3349_v34 = vadd.f32 %v14250_v7, %v3278_v49 }
 0x3b0   :  { %v4720_v2 = vadd.f32 %v14400_v44, %v4669_v13  ;;  %v4623_v36 = vadd.f32 %v4449_v50, %v14228_v46  ;;  %v4451_v9 = vadd.f32 %v4450_v63, %v4379_v21  ;;  %v4381_v56 = vpop.f32.mrf.mxu0  ;;  %v4670_v18 = vmul.f32 %v14404_v42, %v4620_v54  ;;  %v11063_v13 = vld [vmem:[%s15695_s16 + $0x314] ss:$8 sps:$4 sm:$0xff]  }
 0x3b1   :  { %5160 = vmatprep.mubr.bf16.mxu0 %v14437_v62  ;;  %v4452_v24 = vpop.f32.mrf.mxu1  ;;  %v4745_v21 = vmax.f32 %v4717_v10, 0.0 }
 0x3b2   :  { %v4748_v60 = vmax.f32 %v4720_v2, 0.0  ;;  %v4673_v40 = vmul.f32 %v14391_v47, %v4623_v36  ;;  %v4624_v46 = vadd.f32 %v4451_v9, %v14234_v45  ;;  %v4453_v11 = vadd.f32 %v4452_v24, %v4381_v56  ;;  %5161 = vmatmul.mubr.bf16.vlgmr.msra.gmra.mxu0 %v14429_v35  ;;  %v4383_v33 = vpop.f32.mrf.mxu0  ;;  %v11061_v56 = vld [vmem:[%s15695_s16 + $0x310] ss:$8 sps:$4 sm:$0xff]  }
 0x3b3   :  { %v4454_v53 = vpop.f32.mrf.mxu1  ;;  %v4721_v23 = vadd.f32 %v14414_v27, %v4670_v18  ;;  %5679 = vmatpush1.bf16.msra.mxu0 %v11049_v58 }
 0x3b4   :  { %v4674_v3 = vmul.f32 %v14404_v42, %v4624_v46  ;;  %v4627_v12 = vadd.f32 %v4453_v11, %v14248_v26  ;;  %v4455_v45 = vadd.f32 %v4454_v53, %v4383_v33  ;;  %v4387_v52 = vpop.f32.mrf.mxu0  ;;  %5680 = vmatprep.subr.bf16.mxu0 %v11057_v32  ;;  %v14464_v55 = vpack.c.bf16 %v4748_v60, %v4744_v28  ;;  %v11069_v60 = vld [vmem:[%s15695_s16 + $0x304] ss:$8 sps:$4 sm:$0xff]  }
 0x3b5   :  { %v4458_v50 = vpop.f32.mrf.mxu1  ;;  %v4749_v17 = vmax.f32 %v4721_v23, 0.0  ;;  %v4724_v54 = vadd.f32 %v14400_v44, %v4673_v40 }
 0x3b6   :  { %v4677_v7 = vmul.f32 %v14391_v47, %v4627_v12  ;;  %v4628_v63 = vadd.f32 %v4455_v45, %v3349_v34  ;;  %v4459_v58 = vadd.f32 %v4458_v50, %v4387_v52  ;;  %v4389_v2 = vpop.f32.mrf.mxu0  ;;  %v4725_v9 = vadd.f32 %v14414_v27, %v4674_v3  ;;  %v11073_v50 = vld [vmem:[%s15695_s16 + $0x2f0] ss:$8 sps:$4 sm:$0xff]  }
 0x3b7   :  { %v4460_v26 = vpop.f32.mrf.mxu1  ;;  %v14468_v36 = vpack.c.bf16 %v4749_v17, %v4745_v21  ;;  %5681 = vmatpush1.bf16.msra.mxu0 %v11055_v1  ;;  %v4752_v46 = vmax.f32 %v4724_v54, 0.0  ;;  %v11067_v1 = vld [vmem:[%s15695_s16 + $0x300] ss:$8 sps:$4 sm:$0xff]   ;;  %v11081_v21 = vld [vmem:[%s15695_s16 + $0x2e4] ss:$8 sps:$4 sm:$0xff]  }
 0x3b8   :  { %v4728_v32 = vadd.f32 %v14400_v44, %v4677_v7  ;;  %v4678_v49 = vmul.f32 %v14404_v42, %v4628_v63  ;;  %v4631_v18 = vadd.f32 %v4459_v58, %v14265_v20  ;;  %v4461_v24 = vadd.f32 %v4460_v26, %v4389_v2  ;;  %v4391_v10 = vpop.f32.mrf.mxu0  ;;  %5682 = vmatprep.subr.bf16.mxu0 %v11063_v13  ;;  %v11085_v7 = vld [vmem:[%s15695_s16 + $0x2d0] ss:$8 sps:$4 sm:$0xff]   ;;  %v11093_v58 = vld [vmem:[%s15695_s16 + $0x2c4] ss:$8 sps:$4 sm:$0xff]   ;;  %v11091_v2 = vld [vmem:[%s15695_s16 + $0x2c0] ss:$8 sps:$4 sm:$0xff]  }
 0x3b9   :  { %5170 = vmatprep.mubr.bf16.mxu0 %v14468_v36  ;;  %v4462_v40 = vpop.f32.mrf.mxu1  ;;  %v4753_v23 = vmax.f32 %v4725_v9, 0.0  ;;  %v11099_v26 = vld [vmem:[%s15695_s16 + $0x374] ss:$8 sps:$4 sm:$0xff]  }
 0x3ba   :  { %v4756_v11 = vmax.f32 %v4728_v32, 0.0  ;;  %v4632_v33 = vadd.f32 %v4461_v24, %v14274_v5  ;;  %5171 = vmatmul.mubr.bf16.gmra.mxu0 %v14464_v55  ;;  %v4392_v28 = vpop.f32.mrf.mxu0  ;;  %v4729_v53 = vadd.f32 %v14414_v27, %v4678_v49  ;;  %v4681_v34 = vmul.f32 %v14391_v47, %v4631_v18  ;;  %v11075_v5 = vld [vmem:[%s15695_s16 + $0x2f4] ss:$8 sps:$4 sm:$0xff]   ;;  %v11105_v49 = vld [vmem:[%s15695_s16 + $0x364] ss:$8 sps:$4 sm:$0xff]  }
 0x3bb   :  { %v4463_v20 = vpop.f32.mrf.mxu1  ;;  %5683 = vmatpush1.bf16.msra.mxu0 %v11061_v56  ;;  %v11097_v56 = vld [vmem:[%s15695_s16 + $0x370] ss:$8 sps:$4 sm:$0xff]   ;;  %v11103_v24 = vld [vmem:[%s15695_s16 + $0x360] ss:$8 sps:$4 sm:$0xff]  }
 0x3bc   :  { %v4682_v3 = vmul.f32 %v14404_v42, %v4632_v33  ;;  %v4757_v12 = vmax.f32 %v4729_v53, 0.0  ;;  %v14489_v45 = vpack.c.bf16 %v4756_v11, %v4752_v46  ;;  %5684 = vmatprep.subr.bf16.mxu0 %v11069_v60  ;;  %v4732_v47 = vadd.f32 %v14400_v44, %v4681_v34  ;;  %v11087_v44 = vld [vmem:[%s15695_s16 + $0x2d4] ss:$8 sps:$4 sm:$0xff]   ;;  %v11109_v46 = vld [vmem:[%s15695_s16 + $0x350] ss:$8 sps:$4 sm:$0xff]  }
 0x3bd   :  { %v11111_v60 = vld [vmem:[%s15695_s16 + $0x354] ss:$8 sps:$4 sm:$0xff]   ;;  %v11117_v33 = vld [vmem:[%s15695_s16 + $0x344] ss:$8 sps:$4 sm:$0xff]   ;;  %v11115_v53 = vld [vmem:[%s15695_s16 + $0x340] ss:$8 sps:$4 sm:$0xff]  }
 0x3be   :  { %v14494_v52 = vpack.c.bf16 %v4757_v12, %v4753_v23  ;;  %v4733_v13 = vadd.f32 %v14414_v27, %v4682_v3  ;;  %v11079_v27 = vld [vmem:[%s15695_s16 + $0x2e0] ss:$8 sps:$4 sm:$0xff]   ;;  %v4760_v54 = vmax.f32 %v4732_v47, 0.0  ;;  %v2462_v23 = vadd.f32 %v13963_v57, %v14039_v39 }
 0x3bf   :  { %5685 = vmatpush1.bf16.msra.mxu0 %v11067_v1  ;;  %v15889_v3 = vld [vmem:[#allocation45_spill] sm:$0xff] }
 0x3c0   :  { %5180 = vmatprep.mubr.bf16.mxu0 %v14494_v52  ;;  %v4761_v42 = vmax.f32 %v4733_v13, 0.0  ;;  %5686 = vmatprep.subr.bf16.mxu0 %v11075_v5  ;;  %v14518_v63 = vpack.c.bf16 %v4760_v54, %v4760_v54  ;;  %v14555_v12 = vrot.slane %v14387_v29, %v15889_v3  ;;  %v3400_v13 = vadd.f32 %v14344_v30, %v2462_v23 }
 0x3c2   :  { %5181 = vmatmul.mubr.bf16.gmra.mxu0 %v14489_v45  ;;  %v14506_v17 = vpack.c.bf16 %v4761_v42, %v4761_v42  ;;  %v14561_v42 = vrot.slane %v14393_v61, %v15889_v3 }
 0x3c3   :  { %5687 = vmatpush1.bf16.msra.mxu0 %v11073_v50 }
 0x3c4   :  { %5190 = vmatprep.mubr.bf16.mxu0 %v14506_v17  ;;  %5688 = vmatprep.subr.bf16.mxu0 %v11081_v21 }
 0x3c7   :  { %5689 = vmatpush1.bf16.msra.mxu0 %v11079_v27  ;;  %v15890_v27 = vld [vmem:[#allocation49_spill] sm:$0xff] }
 0x3c8   :  { %5690 = vmatprep.subr.bf16.mxu0 %v11087_v44  ;;  %v14565_v57 = vrot.slane %v14387_v29, %v15890_v27 }
 0x3ca   :  { %5191 = vmatmul.mubr.bf16.gmra.mxu0 %v14518_v63 }
 0x3cb   :  { %5691 = vmatpush1.bf16.msra.mxu0 %v11085_v7 }
 0x3cc   :  { %5692 = vmatprep.subr.bf16.mxu0 %v11093_v58 }
 0x3ce   :  { %v4570_v9 = vpop.f32.mrf.mxu0 }
 0x3cf   :  { %5693 = vmatpush1.bf16.msra.mxu0 %v11091_v2  ;;  %v14574_v2 = vrot.slane %v14393_v61, %v15890_v27 }
 0x3d0   :  { %v4572_v32 = vpop.f32.mrf.mxu0  ;;  %5702 = vmatprep.subr.bf16.mxu0 %v11099_v26 }
 0x3d2   :  { %v4574_v18 = vpop.f32.mrf.mxu0 }
 0x3d3   :  { %5703 = vmatpush2.bf16.msra.mxu0 %v11097_v56 }
 0x3d4   :  { %v4576_v10 = vpop.f32.mrf.mxu0  ;;  %5704 = vmatprep.subr.bf16.mxu0 %v11105_v49 }
 0x3d6   :  { %v4580_v40 = vpop.f32.mrf.mxu0 }
 0x3d7   :  { %5705 = vmatpush2.bf16.msra.mxu0 %v11103_v24 }
 0x3d8   :  { %v4582_v11 = vpop.f32.mrf.mxu0  ;;  %5706 = vmatprep.subr.bf16.mxu0 %v11111_v60 }
 0x3da   :  { %v4584_v28 = vpop.f32.mrf.mxu0 }
 0x3db   :  { %5707 = vmatpush2.bf16.msra.mxu0 %v11109_v46 }
 0x3dc   :  { %v4586_v20 = vpop.f32.mrf.mxu0  ;;  %5708 = vmatprep.subr.bf16.mxu0 %v11117_v33 }
 0x3dd   :  { %v4499_v1 = vpop.f32.mrf.mxu1 }
 0x3de   :  { %v4571_v34 = vadd.f32 %v4570_v9, %v4499_v1  ;;  %v4590_v5 = vpop.f32.mrf.mxu0 }
 0x3df   :  { %v4501_v50 = vpop.f32.mrf.mxu1  ;;  %5709 = vmatpush2.bf16.msra.mxu0 %v11115_v53 }
 0x3e0   :  { %v4609_v47 = vadd.f32 %v4571_v34, %v14332_v31  ;;  %v4573_v21 = vadd.f32 %v4572_v32, %v4501_v50  ;;  %v4592_v39 = vpop.f32.mrf.mxu0  ;;  %v3471_v31 = vadd.f32 %v14315_v15, %v3400_v13  ;;  %v2472_v15 = vadd.f32 %v14002_v25, %v14071_v41 }
 0x3e1   :  { %v4503_v54 = vpop.f32.mrf.mxu1 }
 0x3e2   :  { %v4659_v44 = vmul.f32 %v14555_v12, %v4609_v47  ;;  %v4610_v7 = vadd.f32 %v4573_v21, %v14335_v37  ;;  %v4575_v30 = vadd.f32 %v4574_v18, %v4503_v54  ;;  %v14569_v58 = vpop.f32.mrf.mxu0  ;;  %v3410_v1 = vadd.f32 %v14366_v6, %v2472_v15 }
 0x3e3   :  { %v4505_v26 = vpop.f32.mrf.mxu1  ;;  %v2482_v21 = vadd.f32 %v14034_v0, %v14103_v19 }
 0x3e4   :  { %v4710_v9 = vadd.f32 %v14561_v42, %v4659_v44  ;;  %v4660_v29 = vmul.f32 %v14565_v57, %v4610_v7  ;;  %v4613_v56 = vadd.f32 %v4575_v30, %v14346_v38  ;;  %v4577_v32 = vadd.f32 %v4576_v10, %v4505_v26  ;;  %v14579_v49 = vpop.f32.mrf.mxu0 }
 0x3e5   :  { %v4509_v37 = vpop.f32.mrf.mxu1  ;;  %v3481_v30 = vadd.f32 %v14323_v51, %v3410_v1  ;;  %v11123_v51 = vld [vmem:[%s15695_s16 + $0x224] ss:$8 sps:$4 sm:$0xff]   ;;  %v11126_v1 = vld [vmem:[%s15695_s16 + $0x214] ss:$8 sps:$4 sm:$0xff]  }
 0x3e6   :  { %v4663_v18 = vmul.f32 %v14555_v12, %v4613_v56  ;;  %v4614_v24 = vadd.f32 %v4577_v32, %v3471_v31  ;;  %v14582_v60 = vpop.f32.mrf.mxu0  ;;  %v4581_v61 = vadd.f32 %v4580_v40, %v4509_v37  ;;  %v4711_v33 = vadd.f32 %v14574_v2, %v4660_v29  ;;  %v11118_v29 = vld [vmem:[%s15695_s16 + $0x230] ss:$8 sps:$4 sm:$0xff]  }
 0x3e7   :  { %v4511_v46 = vpop.f32.mrf.mxu1  ;;  %v4738_v34 = vmax.f32 %v4710_v9, 0.0  ;;  %v3420_v56 = vadd.f32 %v14377_v14, %v2482_v21 }
 0x3e8   :  { %v4714_v53 = vadd.f32 %v14561_v42, %v4663_v18  ;;  %v4664_v38 = vmul.f32 %v14565_v57, %v4614_v24  ;;  %v4583_v10 = vadd.f32 %v4582_v11, %v4511_v46  ;;  %v14589_v23 = vpop.f32.mrf.mxu0  ;;  %v4617_v3 = vadd.f32 %v4581_v61, %v14357_v48 }
 0x3e9   :  { %v4513_v13 = vpop.f32.mrf.mxu1  ;;  %v4739_v54 = vmax.f32 %v4711_v33, 0.0 }
 0x3ea   :  { %v4742_v50 = vmax.f32 %v4714_v53, 0.0  ;;  %v4715_v25 = vadd.f32 %v14574_v2, %v4664_v38  ;;  %v4618_v41 = vadd.f32 %v4583_v10, %v14360_v59  ;;  %v4585_v40 = vadd.f32 %v4584_v28, %v4513_v13  ;;  %v4604_v47 = vpop.f32.mrf.mxu0 }
 0x3eb   :  { %v4667_v11 = vmul.f32 %v14555_v12, %v4617_v3  ;;  %v4515_v27 = vpop.f32.mrf.mxu1 }
 0x3ec   :  { %v4766_v44 = vpack.c.bf16 %v4742_v50, %v4738_v34  ;;  %v4743_v6 = vmax.f32 %v4715_v25, 0.0  ;;  %v4621_v7 = vadd.f32 %v4585_v40, %v14368_v16  ;;  %v4605_v48 = vpop.f32.mrf.mxu0  ;;  %v4668_v59 = vmul.f32 %v14565_v57, %v4618_v41  ;;  %v15891_v34 = vld [vmem:[#allocation50_spill] sm:$0xff] }
 0x3ed   :  { %v4718_v31 = vadd.f32 %v14561_v42, %v4667_v11  ;;  %v4587_v28 = vadd.f32 %v4586_v20, %v4515_v27  ;;  %v4519_v26 = vpop.f32.mrf.mxu1  ;;  %v11129_v48 = vld [vmem:[%s15695_s16 + $0x204] ss:$8 sps:$4 sm:$0xff]  }
 0x3ee   :  { %v4671_v9 = vmul.f32 %v14555_v12, %v4621_v7  ;;  %v4591_v0 = vadd.f32 %v4590_v5, %v4519_v26  ;;  %v4767_v19 = vpack.c.bf16 %v4743_v6, %v4739_v54  ;;  %v4719_v5 = vadd.f32 %v14574_v2, %v4668_v59  ;;  %v11124_v54 = vld [vmem:[%s15695_s16 + $0x210] ss:$8 sps:$4 sm:$0xff]  }
 0x3ef   :  { %v4622_v16 = vadd.f32 %v4587_v28, %v3481_v30  ;;  %v4521_v32 = vpop.f32.mrf.mxu1  ;;  %v4746_v53 = vmax.f32 %v4718_v31, 0.0 }
 0x3f0   :  { %v4722_v37 = vadd.f32 %v14561_v42, %v4671_v9  ;;  %v4625_v20 = vadd.f32 %v4591_v0, %v14371_v43  ;;  %v4593_v18 = vadd.f32 %v4592_v39, %v4521_v32  ;;  %9853 = vmatprep.mubr.msk.bf16.mxu1 %vm1099_vm6, %v4767_v19  ;;  %9969 = vmatprep.mubr.msk.bf16.mxu0 %vm1099_vm6, %v4767_v19  ;;  %v11121_v43 = vld [vmem:[%s15695_s16 + $0x220] ss:$8 sps:$4 sm:$0xff]   ;;  %v4747_v50 = vmax.f32 %v4719_v5, 0.0  ;;  %v15893_v9 = vld [vmem:[#allocation51_spill] sm:$0xff] }
 0x3f1   :  { %v4672_v24 = vmul.f32 %v14565_v57, %v4622_v16  ;;  %v4523_v14 = vpop.f32.mrf.mxu1  ;;  %5232 = vmatmul.mubr.bf16.vlgmr.msra.gmra.mxu1 %v4766_v44  ;;  %5711 = vmatmul.mubr.bf16.vlgmr.msra.gmra.mxu0 %v4766_v44  ;;  %v3491_v39 = vadd.f32 %v14348_v22, %v3420_v56  ;;  %v11130_v5 = vld [vmem:[%s15695_s16 + $0x1f0] ss:$8 sps:$4 sm:$0xff]  }
 0x3f2   :  { %v4750_v15 = vmax.f32 %v4722_v37, 0.0  ;;  %v4675_v61 = vmul.f32 %v14555_v12, %v4625_v20  ;;  %v4626_v46 = vadd.f32 %v4593_v18, %v14374_v8  ;;  %v4595_v33 = vadd.f32 %v14569_v58, %v4523_v14  ;;  %5608 = vmatpush1.bf16.msra.mxu1 %v11118_v29  ;;  %v11127_v29 = vld [vmem:[%s15695_s16 + $0x200] ss:$8 sps:$4 sm:$0xff]  }
 0x3f3   :  { %v4723_v38 = vadd.f32 %v14574_v2, %v4672_v24  ;;  %v4525_v10 = vpop.f32.mrf.mxu1  ;;  %5609 = vmatprep.subr.bf16.mxu1 %v11123_v51  ;;  %v11132_v51 = vld [vmem:[%s15695_s16 + $0x1f4] ss:$8 sps:$4 sm:$0xff]  }
 0x3f4   :  { %v4726_v8 = vadd.f32 %v14561_v42, %v4675_v61  ;;  %v4676_v58 = vmul.f32 %v14565_v57, %v4626_v46  ;;  %v4629_v3 = vadd.f32 %v4595_v33, %v15891_v34  ;;  %v4597_v13 = vadd.f32 %v14579_v49, %v4525_v10  ;;  %v11136_v61 = vld [vmem:[%s15695_s16 + $0x1d0] ss:$8 sps:$4 sm:$0xff]   ;;  %v11141_v33 = vld [vmem:[%s15695_s16 + $0x1c4] ss:$8 sps:$4 sm:$0xff]   ;;  %v11145_v10 = vld [vmem:[%s15695_s16 + $0x2a0] ss:$8 sps:$4 sm:$0xff]  }
 0x3f5   :  { %v4751_v25 = vmax.f32 %v4723_v38, 0.0  ;;  %v4529_v22 = vpop.f32.mrf.mxu1  ;;  %v4770_v41 = vpack.c.bf16 %v4750_v15, %v4746_v53  ;;  %v11138_v15 = vld [vmem:[%s15695_s16 + $0x1d4] ss:$8 sps:$4 sm:$0xff]   ;;  %v15894_v53 = vmov 0   ;;  %v11142_v38 = vld [vmem:[%s15695_s16 + $0x2b0] ss:$8 sps:$4 sm:$0xff]  }
 0x3f6   :  { %v4679_v40 = vmul.f32 %v14555_v12, %v4629_v3  ;;  %v4630_v47 = vadd.f32 %v4597_v13, %v3491_v39  ;;  %5610 = vmatpush1.bf16.msra.mxu1 %v11121_v43  ;;  %v4601_v21 = vadd.f32 %v14582_v60, %v4529_v22  ;;  %v4727_v44 = vadd.f32 %v14574_v2, %v4676_v58  ;;  %v15892_v60 = vld [vmem:[#allocation32_spill] sm:$0xff]  ;;  %v11139_v43 = vld [vmem:[%s15695_s16 + $0x1c0] ss:$8 sps:$4 sm:$0xff]   ;;  %v11153_v58 = vld [vmem:[%s15695_s16 + $0x284] ss:$8 sps:$4 sm:$0xff]  }
 0x3f7   :  { %v4531_v11 = vpop.f32.mrf.mxu1  ;;  %v4771_v27 = vpack.c.bf16 %v4751_v25, %v4747_v50  ;;  %5611 = vmatprep.subr.bf16.mxu1 %v11126_v1  ;;  %v4754_v59 = vmax.f32 %v4726_v8, 0.0  ;;  %v11144_v39 = vld [vmem:[%s15695_s16 + $0x2b4] ss:$8 sps:$4 sm:$0xff]   ;;  %v11148_v8 = vld [vmem:[%s15695_s16 + $0x290] ss:$8 sps:$4 sm:$0xff]  }
 0x3f8   :  { %v4730_v49 = vadd.f32 %v14561_v42, %v4679_v40  ;;  %v4680_v6 = vmul.f32 %v14565_v57, %v4630_v47  ;;  %v4603_v7 = vadd.f32 %v14589_v23, %v4531_v11  ;;  %v4633_v30 = vadd.f32 %v4601_v21, %v15892_v60  ;;  %v11150_v1 = vld [vmem:[%s15695_s16 + $0x294] ss:$8 sps:$4 sm:$0xff]   ;;  %v11151_v34 = vld [vmem:[%s15695_s16 + $0x280] ss:$8 sps:$4 sm:$0xff]   ;;  %v11154_v13 = vld [vmem:[%s15695_s16 + $0x270] ss:$8 sps:$4 sm:$0xff]  }
 0x3f9   :  { %9854 = vmatprep.mubr.msk.bf16.mxu1 %vm1099_vm6, %v4771_v27  ;;  %9970 = vmatprep.mubr.msk.bf16.mxu0 %vm1099_vm6, %v4771_v27  ;;  %v4533_v31 = vpop.f32.mrf.mxu1  ;;  %v4755_v56 = vmax.f32 %v4727_v44, 0.0  ;;  %v11156_v3 = vld [vmem:[%s15695_s16 + $0x274] ss:$8 sps:$4 sm:$0xff]   ;;  %v11159_v50 = vld [vmem:[%s15695_s16 + $0x264] ss:$8 sps:$4 sm:$0xff]  }
 0x3fa   :  { %v4758_v28 = vmax.f32 %v4730_v49, 0.0  ;;  %v4731_v26 = vadd.f32 %v14574_v2, %v4680_v6  ;;  %v4634_v0 = vadd.f32 %v4603_v7, %v15893_v9  ;;  %5242 = vmatmul.mubr.bf16.gmra.mxu1 %v4770_v41  ;;  %5721 = vmatmul.mubr.bf16.gmra.mxu0 %v4770_v41  ;;  %v4683_v23 = vmul.f32 %v14555_v12, %v4633_v30  ;;  %v11157_v25 = vld [vmem:[%s15695_s16 + $0x260] ss:$8 sps:$4 sm:$0xff]   ;;  %v11162_v22 = vld [vmem:[%s15695_s16 + $0x254] ss:$8 sps:$4 sm:$0xff]  }
 0x3fb   :  { %5612 = vmatpush1.bf16.msra.mxu1 %v11124_v54  ;;  %v4534_v19 = vpop.f32.mrf.mxu1  ;;  %v11160_v41 = vld [vmem:[%s15695_s16 + $0x250] ss:$8 sps:$4 sm:$0xff]   ;;  %v11165_v40 = vld [vmem:[%s15695_s16 + $0x244] ss:$8 sps:$4 sm:$0xff]   ;;  %v11163_v47 = vld [vmem:[%s15695_s16 + $0x240] ss:$8 sps:$4 sm:$0xff]  }
 0x3fc   :  { %v4759_v16 = vmax.f32 %v4731_v26, 0.0  ;;  %v4684_v32 = vmul.f32 %v14565_v57, %v4634_v0  ;;  %5613 = vmatprep.subr.bf16.mxu1 %v11129_v48  ;;  %v4774_v37 = vpack.c.bf16 %v4758_v28, %v4754_v59  ;;  %v4734_v20 = vadd.f32 %v14561_v42, %v4683_v23  ;;  %v11135_v57 = vld [vmem:[%s15695_s16 + $0x1e4] ss:$8 sps:$4 sm:$0xff]   ;;  %v11168_v26 = vld [vmem:[%s15896_s6 + $0x150] ss:$8 sps:$4 sm:$0xff]  }
 0x3fd   :  { %v14759_v31 = vld [vmem:[%s15895_s2] sm:$0xff]  ;;  %v14767_v28 = vld [vmem:[%s15895_s2 + $0x8] sm:$0xff]  ;;  %v11170_v9 = vld [vmem:[%s15896_s6 + $0x154] ss:$8 sps:$4 sm:$0xff]  }
 0x3fe   :  { %v4735_v12 = vadd.f32 %v14574_v2, %v4684_v32  ;;  %v4775_v18 = vpack.c.bf16 %v4759_v16, %v4755_v56  ;;  %v11133_v2 = vld [vmem:[%s15695_s16 + $0x1e0] ss:$8 sps:$4 sm:$0xff]   ;;  %v4762_v14 = vmax.f32 %v4734_v20, 0.0  ;;  %5957 = vperm.xlu1 %10446, %v14759_v31   ;;  %v14780_v19 = vld [vmem:[%s15895_s2 + $0x10] sm:$0xff]  ;;  %5961 = vperm.xlu0 %10447, %v14767_v28  }
 0x3ff   :  { %5614 = vmatpush1.bf16.msra.mxu1 %v11127_v29  ;;  %v11173_v29 = vld [vmem:[%s15896_s6 + $0x144] ss:$8 sps:$4 sm:$0xff]   ;;  %v11176_v20 = vld [vmem:[%s15896_s6 + $0x134] ss:$8 sps:$4 sm:$0xff]  }
 0x400   :  { %v4763_v24 = vmax.f32 %v4735_v12, 0.0  ;;  %9855 = vmatprep.mubr.msk.bf16.mxu1 %vm1099_vm6, %v4775_v18  ;;  %5615 = vmatprep.subr.bf16.mxu1 %v11132_v51  ;;  %v4778_v46 = vpack.c.bf16 %v4762_v14, %v4762_v14  ;;  %v11171_v51 = vld [vmem:[%s15896_s6 + $0x140] ss:$8 sps:$4 sm:$0xff]  }
 0x401   :  { %9971 = vmatprep.mubr.msk.bf16.mxu0 %vm1099_vm6, %v4775_v18 }
 0x402   :  { %5252 = vmatmul.mubr.bf16.gmra.mxu1 %v4774_v37  ;;  %5731 = vmatmul.mubr.bf16.gmra.mxu0 %v4774_v37  ;;  %v4779_v42 = vpack.c.bf16 %v4763_v24, %v4763_v24  ;;  %v15897_v24 = vmov 1  }
 0x403   :  { %5616 = vmatpush1.bf16.msra.mxu1 %v11130_v5  ;;  %5965 = vperm.xlu1 %10446, %v14780_v19   ;;  %v5944_v5 = vld [vmem:[%s15895_s2 + $0x18] sm:$0xf] }
 0x404   :  { %9856 = vmatprep.mubr.msk.bf16.mxu1 %vm1099_vm6, %v4779_v42  ;;  %5617 = vmatprep.subr.bf16.mxu1 %v11135_v57 }
 0x405   :  { %9972 = vmatprep.mubr.msk.bf16.mxu0 %vm1099_vm6, %v4779_v42  ;;  %10448 = vset.pattern.permute.xlu0 %v15897_v24  ;;  %v11174_v42 = vld [vmem:[%s15896_s6 + $0x130] ss:$8 sps:$4 sm:$0xff]   ;;  %vm8894_vm6 = vcmask 457728  }
 0x406   :  { %6010 = vperm.xlu0 %10448, %v14759_v31  }
 0x407   :  { %5618 = vmatpush1.bf16.msra.mxu1 %v11133_v2  ;;  %5969 = vperm.xlu1 %10446, %v5944_v5  }
 0x408   :  { %5619 = vmatprep.subr.bf16.mxu1 %v11138_v15  ;;  %v11179_v15 = vld [vmem:[%s15896_s6 + $0x124] ss:$8 sps:$4 sm:$0xff]  }
 0x40a   :  { %5262 = vmatmul.mubr.bf16.gmra.mxu1 %v4778_v46  ;;  %5741 = vmatmul.mubr.bf16.gmra.mxu0 %v4778_v46 }
 0x40b   :  { %5620 = vmatpush1.bf16.msra.mxu1 %v11136_v61  ;;  %5639 = vmatprep.mubr.bf16.mxu1 %v14437_v62  ;;  %v11147_v62 = vld [vmem:[%s15695_s16 + $0x2a4] ss:$8 sps:$4 sm:$0xff]   ;;  %s15905_s16 = sld [smem:[#allocation70_spill]] }
 0x40c   :  { %5621 = vmatprep.subr.bf16.mxu1 %v11141_v33  ;;  %5902 = vmatprep.mubr.bf16.mxu0 %v15894_v53 }
 0x40d   :  { %6019 = vperm.xlu0 %10448, %v5944_v5   ;;  %10449 = vset.pattern.permute.xlu1 %v15897_v24 }
 0x40e   :  { %6013 = vperm.xlu1 %10449, %v14767_v28  }
 0x40f   :  { %5622 = vmatpush1.bf16.msra.mxu1 %v11139_v43 }
 0x410   :  { %5623 = vmatprep.subr.bf16.mxu1 %v11144_v39  ;;  %v11177_v39 = vld [vmem:[%s15896_s6 + $0x120] ss:$8 sps:$4 sm:$0xff]  }
 0x411   :  { %10451 = vset.pattern.permute.xlu0 %v15894_v53 }
 0x412   :  { %6902 = vperm.xlu0 %10451, %v14767_v28   ;;  %6016 = vperm.xlu1 %10449, %v14780_v19  }
 0x413   :  { %5624 = vmatpush2.bf16.msra.mxu1 %v11142_v38 }
 0x414   :  { %5625 = vmatprep.subr.bf16.mxu1 %v11147_v62 }
 0x416   :  { %10452 = vset.pattern.permute.xlu0 %v15897_v24  ;;  %10450 = vset.pattern.permute.xlu1 %v15894_v53 }
 0x417   :  { %5626 = vmatpush2.bf16.msra.mxu1 %v11145_v10  ;;  %v11185_v10 = vld [vmem:[%s15896_s6 + $0x114] ss:$8 sps:$4 sm:$0xff]   ;;  %6951 = vperm.xlu0 %10452, %v14759_v31  }
 0x418   :  { %5627 = vmatprep.subr.bf16.mxu1 %v11150_v1  ;;  %v15898_v1 = vlaneseq  ;;  %6898 = vperm.xlu1 %10450, %v14759_v31  }
 0x41a   :  { %vm14832_vm9 = vcmp.lt.s32.totalorder %v15898_v1, 224 }
 0x41b   :  { %5628 = vmatpush2.bf16.msra.mxu1 %v11148_v8  ;;  %v11263_v8 = vld [vmem:[%s15896_s6 + $0x204] ss:$8 sps:$4 sm:$0xff]  }
 0x41c   :  { %5629 = vmatprep.subr.bf16.mxu1 %v11153_v58  ;;  %6906 = vperm.xlu1 %10450, %v14780_v19  }
 0x41f   :  { %5630 = vmatpush2.bf16.msra.mxu1 %v11151_v34  ;;  %v15901_v34 = vmov 0.0  }
 0x420   :  { %5631 = vmatprep.subr.bf16.mxu1 %v11156_v3  ;;  %5936 = vst.msk [vmem:[#allocation4 + $0x7] ss:$8 sm:$0x3] %vm14832_vm9, %v15901_v34  ;;  %5939 = vst.msk [vmem:[#allocation4 + $0x44] ss:$8 sm:$0x3] %vm14832_vm9, %v15901_v34 }
 0x421   :  { %8232 = vst.msk [vmem:[#allocation5 + $0x7] sm:$0x1] %vm8231_vm3, %v15901_v34  ;;  %8233 = vst.msk [vmem:[#allocation5 + $0x16] sm:$0x1] %vm8231_vm3, %v15901_v34 }
 0x423   :  { %5632 = vmatpush2.bf16.msra.mxu1 %v11154_v13 }
 0x424   :  { %5633 = vmatprep.subr.bf16.mxu1 %v11159_v50 }
 0x427   :  { %5634 = vmatpush2.bf16.msra.mxu1 %v11157_v25  ;;  %v11183_v25 = vld [vmem:[%s15896_s6 + $0x110] ss:$8 sps:$4 sm:$0xff]  }
 0x428   :  { %5635 = vmatprep.subr.bf16.mxu1 %v11162_v22 }
 0x42b   :  { %5636 = vmatpush2.bf16.msra.mxu1 %v11160_v41 }
 0x42c   :  { %5637 = vmatprep.subr.bf16.mxu1 %v11165_v40  ;;  %v11191_v40 = vld [vmem:[%s15896_s6 + $0x104] ss:$8 sps:$4 sm:$0xff]  }
 0x42f   :  { %5638 = vmatpush2.bf16.msra.mxu1 %v11163_v47 }
 0x430   :  { %6247 = vmatprep.subr.bf16.mxu1 %v11170_v9 }
 0x432   :  { %5640 = vmatmul.mubr.bf16.vlgmr.msra.gmra.mxu1 %v14429_v35 }
 0x433   :  { %5649 = vmatprep.mubr.bf16.mxu1 %v14468_v36  ;;  %6248 = vmatpush1.bf16.msra.mxu1 %v11168_v26 }
 0x434   :  { %6249 = vmatprep.subr.bf16.mxu1 %v11173_v29 }
 0x437   :  { %6250 = vmatpush1.bf16.msra.mxu1 %v11171_v51  ;;  %v11201_v51 = vld [vmem:[%s15896_s6 + $0xe0] ss:$8 sps:$4 sm:$0xff]  }
 0x438   :  { %6251 = vmatprep.subr.bf16.mxu1 %v11176_v20 }
 0x43a   :  { %5650 = vmatmul.mubr.bf16.gmra.mxu1 %v14464_v55 }
 0x43b   :  { %5659 = vmatprep.mubr.bf16.mxu1 %v14494_v52  ;;  %6252 = vmatpush1.bf16.msra.mxu1 %v11174_v42 }
 0x43c   :  { %6253 = vmatprep.subr.bf16.mxu1 %v11179_v15  ;;  %v11213_v15 = vld [vmem:[%s15896_s6 + $0x1a0] ss:$8 sps:$4 sm:$0xff]  }
 0x43f   :  { %6254 = vmatpush1.bf16.msra.mxu1 %v11177_v39 }
 0x440   :  { %6255 = vmatprep.subr.bf16.mxu1 %v11185_v10 }
 0x442   :  { %5660 = vmatmul.mubr.bf16.gmra.mxu1 %v14489_v45 }
 0x443   :  { %5669 = vmatprep.mubr.bf16.mxu1 %v14506_v17  ;;  %6256 = vmatpush1.bf16.msra.mxu1 %v11183_v25 }
 0x444   :  { %6257 = vmatprep.subr.bf16.mxu1 %v11191_v40 }
 0x44a   :  { %5670 = vmatmul.mubr.bf16.gmra.mxu1 %v14518_v63 }
 0x472   :  { %v5162_v21 = vpop.f32.mrf.mxu0 }
 0x474   :  { %v5164_v11 = vpop.f32.mrf.mxu0 }
 0x476   :  { %v5166_v27 = vpop.f32.mrf.mxu0 }
 0x478   :  { %v5168_v54 = vpop.f32.mrf.mxu0 }
 0x47a   :  { %v5172_v44 = vpop.f32.mrf.mxu0 }
 0x47c   :  { %v5174_v49 = vpop.f32.mrf.mxu0 }
 0x47e   :  { %v5176_v6 = vpop.f32.mrf.mxu0 }
 0x480   :  { %v14740_v35 = vpop.f32.mrf.mxu0 }
 0x482   :  { %v14742_v36 = vpop.f32.mrf.mxu0 }
 0x484   :  { %v14744_v55 = vpop.f32.mrf.mxu0 }
 0x486   :  { %v14746_v52 = vpop.f32.mrf.mxu0 }
 0x488   :  { %v14748_v45 = vpop.f32.mrf.mxu0 }
 0x48a   :  { %v14750_v17 = vpop.f32.mrf.mxu0 }
 0x48c   :  { %v14752_v63 = vpop.f32.mrf.mxu0 }
 0x48e   :  { %v5196_v7 = vpop.f32.mrf.mxu0 }
 0x490   :  { %v5197_v48 = vpop.f32.mrf.mxu0 }
 0x4b1   :  { %v5233_v60 = vpop.f32.mrf.mxu1  ;;  %v14754_v30 = vpop.f32.mrf.mxu0 }
 0x4b2   :  { %v14761_v59 = vadd.f32 %v5233_v60, %v5162_v21 }
 0x4b3   :  { %v5235_v0 = vpop.f32.mrf.mxu1  ;;  %v14775_v23 = vpop.f32.mrf.mxu0 }
 0x4b4   :  { %v14786_v56 = vadd.f32 %v5235_v0, %v5164_v11  ;;  %v11203_v0 = vld [vmem:[%s15896_s6 + $0xe4] ss:$8 sps:$4 sm:$0xff]  }
 0x4b5   :  { %v5237_v16 = vpop.f32.mrf.mxu1  ;;  %v14788_v32 = vpop.f32.mrf.mxu0 }
 0x4b6   :  { %v14793_v37 = vadd.f32 %v5237_v16, %v5166_v27 }
 0x4b7   :  { %v5239_v12 = vpop.f32.mrf.mxu1  ;;  %v14799_v18 = vpop.f32.mrf.mxu0 }
 0x4b8   :  { %v14805_v57 = vadd.f32 %v5239_v12, %v5168_v54  ;;  %v11189_v54 = vld [vmem:[%s15896_s6 + $0x100] ss:$8 sps:$4 sm:$0xff]  }
 0x4b9   :  { %6258 = vmatpush1.bf16.msra.mxu1 %v11189_v54 }
 0x4ba   :  { %v5243_v2 = vpop.f32.mrf.mxu1  ;;  %v14811_v14 = vpop.f32.mrf.mxu0 }
 0x4bb   :  { %v14816_v61 = vadd.f32 %v5243_v2, %v5172_v44  ;;  %v11215_v2 = vld [vmem:[%s15896_s6 + $0x1a4] ss:$8 sps:$4 sm:$0xff]  }
 0x4bc   :  { %v5245_v46 = vpop.f32.mrf.mxu1  ;;  %v14818_v33 = vpop.f32.mrf.mxu0 }
 0x4bd   :  { %v14820_v43 = vadd.f32 %v5245_v46, %v5174_v49 }
 0x4be   :  { %v5247_v38 = vpop.f32.mrf.mxu1  ;;  %v14825_v62 = vpop.f32.mrf.mxu0 }
 0x4bf   :  { %v14836_v58 = vadd.f32 %v5247_v38, %v5176_v6  ;;  %v11197_v6 = vld [vmem:[%s15896_s6 + $0xf4] ss:$8 sps:$4 sm:$0xff]  }
 0x4c0   :  { %v5249_v3 = vpop.f32.mrf.mxu1  ;;  %v14845_v13 = vpop.f32.mrf.mxu0  ;;  %6259 = vmatprep.subr.bf16.mxu1 %v11197_v6 }
 0x4c1   :  { %v14849_v50 = vadd.f32 %v5249_v3, %v14740_v35  ;;  %v14878_v35 = vld [vmem:[#allocation4] sm:$0x80] }
 0x4c2   :  { %v5253_v22 = vpop.f32.mrf.mxu1  ;;  %v14855_v41 = vpop.f32.mrf.mxu0 }
 0x4c3   :  { %v14861_v47 = vadd.f32 %v5253_v22, %v14742_v36  ;;  %v14880_v36 = vld [vmem:[#allocation4 + $0x8] sm:$0x80] }
 0x4c4   :  { %v5255_v21 = vpop.f32.mrf.mxu1  ;;  %v14864_v11 = vpop.f32.mrf.mxu0  ;;  %6878 = vst.msk [vmem:[#allocation4 + $0x7] ss:$8 sm:$0x3] %vm14832_vm9, %v15901_v34 }
 0x4c5   :  { %v14867_v27 = vadd.f32 %v5255_v21, %v14744_v55 }
 0x4c6   :  { %v5257_v44 = vpop.f32.mrf.mxu1  ;;  %v14873_v49 = vpop.f32.mrf.mxu0 }
 0x4c7   :  { %v14884_v55 = vadd.f32 %v5257_v44, %v14746_v52  ;;  %v11195_v52 = vld [vmem:[%s15896_s6 + $0xf0] ss:$8 sps:$4 sm:$0xff]  }
 0x4c8   :  { %v5259_v7 = vpop.f32.mrf.mxu1  ;;  %v14890_v48 = vpop.f32.mrf.mxu0  ;;  %6260 = vmatpush1.bf16.msra.mxu1 %v11195_v52 }
 0x4c9   :  { %v14894_v60 = vadd.f32 %v5259_v7, %v14748_v45  ;;  %6261 = vmatprep.subr.bf16.mxu1 %v11203_v0 }
 0x4ca   :  { %v5263_v26 = vpop.f32.mrf.mxu1  ;;  %v14899_v9 = vpop.f32.mrf.mxu0 }
 0x4cb   :  { %v14905_v29 = vadd.f32 %v5263_v26, %v14750_v17  ;;  %v11209_v17 = vld [vmem:[%s15896_s6 + $0x1b4] ss:$8 sps:$4 sm:$0xff]  }
 0x4cc   :  { %v5265_v31 = vpop.f32.mrf.mxu1  ;;  %v14907_v16 = vpop.f32.mrf.mxu0  ;;  %6262 = vmatpush1.bf16.msra.mxu1 %v11201_v51 }
 0x4cd   :  { %v14911_v45 = vadd.f32 %v5265_v31, %v14752_v63  ;;  %v11207_v63 = vld [vmem:[%s15896_s6 + $0x1b0] ss:$8 sps:$4 sm:$0xff]   ;;  %6267 = vmatprep.subr.bf16.mxu1 %v11209_v17 }
 0x4ce   :  { %v5267_v20 = vpop.f32.mrf.mxu1  ;;  %v5746_v12 = vpop.f32.mrf.mxu0 }
 0x4d0   :  { %v5268_v5 = vpop.f32.mrf.mxu1  ;;  %v5747_v42 = vpop.f32.mrf.mxu0  ;;  %6268 = vmatpush2.bf16.msra.mxu1 %v11207_v63 }
 0x4d1   :  { %6269 = vmatprep.subr.bf16.mxu1 %v11215_v2 }
 0x4d4   :  { %6270 = vmatpush2.bf16.msra.mxu1 %v11213_v15 }
 0x4f2   :  { %v5641_v46 = vpop.f32.mrf.mxu1 }
 0x4f3   :  { %v5713_v39 = vadd.f32 %v14754_v30, %v5641_v46 }
 0x4f4   :  { %v5643_v38 = vpop.f32.mrf.mxu1 }
 0x4f5   :  { %v5749_v10 = vmax.f32 %v14761_v59, %v5713_v39  ;;  %v5715_v1 = vadd.f32 %v14775_v23, %v5643_v38 }
 0x4f6   :  { %v5645_v3 = vpop.f32.mrf.mxu1 }
 0x4f7   :  { %v5750_v25 = vmax.f32 %v14786_v56, %v5715_v1  ;;  %v5717_v22 = vadd.f32 %v14788_v32, %v5645_v3  ;;  %v5777_v6 = vrot.slane %v5749_v10, 1 }
 0x4f8   :  { %v5647_v40 = vpop.f32.mrf.mxu1 }
 0x4f9   :  { %v5751_v21 = vmax.f32 %v14793_v37, %v5717_v22  ;;  %v5719_v54 = vadd.f32 %v14799_v18, %v5647_v40  ;;  %v5780_v59 = vrot.slane %v5750_v25, 1 }
 0x4fa   :  { %v5651_v44 = vpop.f32.mrf.mxu1 }
 0x4fb   :  { %v5778_v7 = vrot.slane %v5751_v21, 1  ;;  %v5752_v30 = vmax.f32 %v14805_v57, %v5719_v54  ;;  %v5723_v52 = vadd.f32 %v14811_v14, %v5651_v44 }
 0x4fc   :  { %v5653_v26 = vpop.f32.mrf.mxu1 }
 0x4fd   :  { %v5779_v23 = vsel %vm1202_vm4, %v5777_v6, %v5778_v7  ;;  %v5781_v0 = vrot.slane %v5752_v30, 1  ;;  %v5753_v56 = vmax.f32 %v14816_v61, %v5723_v52  ;;  %v5725_v32 = vadd.f32 %v14818_v33, %v5653_v26 }
 0x4fe   :  { %v5655_v31 = vpop.f32.mrf.mxu1  ;;  %v5817_v37 = vmax.f32 %v5749_v10, %v5779_v23 }
 0x4ff   :  { %v5783_v51 = vrot.slane %v5753_v56, 1  ;;  %v5754_v18 = vmax.f32 %v14820_v43, %v5725_v32  ;;  %v5727_v20 = vadd.f32 %v14825_v62, %v5655_v31  ;;  %v5782_v57 = vsel %vm1202_vm4, %v5780_v59, %v5781_v0 }
 0x500   :  { %v5657_v12 = vpop.f32.mrf.mxu1  ;;  %v5818_v14 = vmax.f32 %v5750_v25, %v5782_v57 }
 0x501   :  { %v5784_v17 = vsel %vm1202_vm4, %v5778_v7, %v5783_v51  ;;  %v5785_v5 = vrot.slane %v5754_v18, 1  ;;  %v5755_v42 = vmax.f32 %v14836_v58, %v5727_v20  ;;  %v5729_v61 = vadd.f32 %v14845_v13, %v5657_v12 }
 0x502   :  { %v5661_v63 = vpop.f32.mrf.mxu1  ;;  %v5819_v33 = vmax.f32 %v5751_v21, %v5784_v17 }
 0x503   :  { %v5787_v2 = vrot.slane %v5755_v42, 1  ;;  %v5756_v15 = vmax.f32 %v14849_v50, %v5729_v61  ;;  %v5733_v43 = vadd.f32 %v14855_v41, %v5661_v63  ;;  %v5786_v62 = vsel %vm1202_vm4, %v5781_v0, %v5785_v5 }
 0x504   :  { %v5663_v46 = vpop.f32.mrf.mxu1  ;;  %v5820_v39 = vmax.f32 %v5752_v30, %v5786_v62  ;;  %v14949_v38 = vpack.c.bf16 %v5819_v33, %v5817_v37 }
 0x505   :  { %v5788_v10 = vsel %vm1202_vm4, %v5783_v51, %v5787_v2  ;;  %v5789_v1 = vrot.slane %v5756_v15, 1  ;;  %v5757_v58 = vmax.f32 %v14861_v47, %v5733_v43  ;;  %v5735_v13 = vadd.f32 %v14864_v11, %v5663_v46 }
 0x506   :  { %v5665_v3 = vpop.f32.mrf.mxu1  ;;  %v5821_v25 = vmax.f32 %v5753_v56, %v5788_v10  ;;  %v5836_v22 = vpack.c.bf16 %v5820_v39, %v5818_v14  ;;  %v11182_v10 = vld [vmem:[%s15896_s6 + $0x74] ss:$8 sps:$4 sm:$0xff]  }
 0x507   :  { %v5791_v40 = vrot.slane %v5757_v58, 1  ;;  %v5758_v50 = vmax.f32 %v14867_v27, %v5735_v13  ;;  %v5737_v41 = vadd.f32 %v14873_v49, %v5665_v3  ;;  %v5790_v21 = vsel %vm1202_vm4, %v5785_v5, %v5789_v1  ;;  %v11188_v13 = vld [vmem:[%s15896_s6 + $0x64] ss:$8 sps:$4 sm:$0xff]   ;;  %v11186_v3 = vld [vmem:[%s15896_s6 + $0x60] ss:$8 sps:$4 sm:$0xff]  }
 0x508   :  { %v5667_v54 = vpop.f32.mrf.mxu1  ;;  %v5822_v44 = vmax.f32 %v5754_v18, %v5790_v21  ;;  %v11204_v21 = vld [vmem:[%s15896_s6 + $0x30] ss:$8 sps:$4 sm:$0xff]  }
 0x509   :  { %v5792_v6 = vsel %vm1202_vm4, %v5787_v2, %v5791_v40  ;;  %v5793_v7 = vrot.slane %v5758_v50, 1  ;;  %v5759_v30 = vmax.f32 %v14884_v55, %v5737_v41  ;;  %v5739_v47 = vadd.f32 %v14890_v48, %v5667_v54  ;;  %v11206_v41 = vld [vmem:[%s15896_s6 + $0x34] ss:$8 sps:$4 sm:$0xff]   ;;  %v11212_v54 = vld [vmem:[%s15896_s6 + $0x24] ss:$8 sps:$4 sm:$0xff]  }
 0x50a   :  { %v5671_v11 = vpop.f32.mrf.mxu1  ;;  %v5823_v52 = vmax.f32 %v5755_v42, %v5792_v6  ;;  %v11721_v42 = vmov 65535   ;;  %v11218_v6 = vld [vmem:[%s15896_s6 + $0x14] ss:$8 sps:$4 sm:$0xff]  }
 0x50b   :  { %v5795_v59 = vrot.slane %v5759_v30, 1  ;;  %v5760_v26 = vmax.f32 %v14894_v60, %v5739_v47  ;;  %v5743_v27 = vadd.f32 %v14899_v9, %v5671_v11  ;;  %v5794_v49 = vsel %vm1202_vm4, %v5789_v1, %v5793_v7  ;;  %v11166_v1 = vld [vmem:[%s15902_s4] sm:$0xff]   ;;  %v11221_v47 = vld [vmem:[%s15896_s6 + $0x194] ss:$8 sps:$4 sm:$0xff]  }
 0x50c   :  { %v5673_v23 = vpop.f32.mrf.mxu1  ;;  %v5824_v0 = vmax.f32 %v5756_v15, %v5794_v49  ;;  %v5837_v56 = vpack.c.bf16 %v5823_v52, %v5821_v25  ;;  %v11167_v25 = vld [vmem:[%s15902_s4 + $0x8] sm:$0x3f]   ;;  %6271 = vmatprep.subr.bf16.mxu1 %v11221_v47  ;;  %v11230_v49 = vld [vmem:[%s15896_s6 + $0xd4] ss:$8 sps:$4 sm:$0xff]  }
 0x50d   :  { %v5796_v32 = vsel %vm1202_vm4, %v5791_v40, %v5795_v59  ;;  %v5797_v31 = vrot.slane %v5760_v26, 1  ;;  %v5761_v37 = vmax.f32 %v14905_v29, %v5743_v27  ;;  %v5745_v55 = vadd.f32 %v14907_v16, %v5673_v23  ;;  %v11200_v40 = vld [vmem:[%s15896_s6 + $0x44] ss:$8 sps:$4 sm:$0xff]   ;;  %v11222_v11 = vld [vmem:[%s15896_s6] ss:$8 sps:$4 sm:$0xff]  }
 0x50e   :  { %v5675_v48 = vpop.f32.mrf.mxu1  ;;  %v5825_v51 = vmax.f32 %v5757_v58, %v5796_v32  ;;  %v5838_v18 = vpack.c.bf16 %v5824_v0, %v5822_v44  ;;  %v5862_v29 = vsel %vm5860_vm10, 4294967295, %v11721_v42  ;;  %v11180_v58 = vld [vmem:[%s15896_s6 + $0x70] ss:$8 sps:$4 sm:$0xff]   ;;  %v11210_v44 = vld [vmem:[%s15896_s6 + $0x20] ss:$8 sps:$4 sm:$0xff]  }
 0x50f   :  { %v5799_v20 = vrot.slane %v5761_v37, 1  ;;  %v5762_v60 = vmax.f32 %v14911_v45, %v5745_v55  ;;  %v5798_v9 = vsel %vm1202_vm4, %v5793_v7, %v5797_v31  ;;  %v5863_v43 = vsel %vm5861_vm11, %v5862_v29, 0  ;;  %v11216_v7 = vld [vmem:[%s15896_s6 + $0x10] ss:$8 sps:$4 sm:$0xff]   ;;  %v11224_v52 = vld [vmem:[%s15896_s6 + $0x4] ss:$8 sps:$4 sm:$0xff]   ;;  %v5962_v29 = vpop.permute.xlu0 %5961 }
 0x510   :  { %v5676_v57 = vpop.f32.mrf.mxu1  ;;  %v5826_v12 = vmax.f32 %v5758_v50, %v5798_v9  ;;  %v11198_v50 = vld [vmem:[%s15896_s6 + $0x40] ss:$8 sps:$4 sm:$0xff]   ;;  %v11228_v27 = vld [vmem:[%s15896_s6 + $0xd0] ss:$8 sps:$4 sm:$0xff]   ;;  %v11233_v0 = vld [vmem:[%s15896_s6 + $0x174] ss:$8 sps:$4 sm:$0xff]  }
 0x511   :  { %v5800_v14 = vsel %vm1202_vm4, %v5795_v59, %v5799_v20  ;;  %v5829_v17 = vmax.f32 %v5761_v37, %v5799_v20  ;;  %v5801_v5 = vrot.slane %v5762_v60, 1  ;;  %v11225_v59 = vld [vmem:[%s15896_s6 + $0x180] ss:$8 sps:$4 sm:$0xff]   ;;  %v11231_v23 = vld [vmem:[%s15896_s6 + $0x170] ss:$8 sps:$4 sm:$0xff]  }
 0x512   :  { %v5827_v16 = vmax.f32 %v5759_v30, %v5800_v14  ;;  %v11219_v30 = vld [vmem:[%s15896_s6 + $0x190] ss:$8 sps:$4 sm:$0xff]   ;;  %v11236_v32 = vld [vmem:[%s15896_s6 + $0xc4] ss:$8 sps:$4 sm:$0xff]   ;;  %v11242_v55 = vld [vmem:[%s15896_s6 + $0xb4] ss:$8 sps:$4 sm:$0xff]  }
 0x513   :  { %v5830_v61 = vmax.f32 %v5762_v60, %v5801_v5  ;;  %v5802_v63 = vsel %vm1202_vm4, %v5797_v31, %v5801_v5  ;;  %v5841_v33 = vpack.c.bf16 %v5829_v17, %v5829_v17  ;;  %6272 = vmatpush2.bf16.msra.mxu1 %v11219_v30  ;;  %v11237_v31 = vld [vmem:[%s15896_s6 + $0x160] ss:$8 sps:$4 sm:$0xff]   ;;  %v11239_v37 = vld [vmem:[%s15896_s6 + $0x164] ss:$8 sps:$4 sm:$0xff]   ;;  %v11240_v48 = vld [vmem:[%s15896_s6 + $0xb0] ss:$8 sps:$4 sm:$0xff]   ;;  %v5958_v17 = vpop.permute.xlu1 %5957 }
 0x514   :  { %v5828_v2 = vmax.f32 %v5760_v26, %v5802_v63  ;;  %v5839_v15 = vpack.c.bf16 %v5827_v16, %v5825_v51  ;;  %v11227_v26 = vld [vmem:[%s15896_s6 + $0x184] ss:$8 sps:$4 sm:$0xff]   ;;  %v11245_v51 = vld [vmem:[%s15896_s6 + $0x234] ss:$8 sps:$4 sm:$0xff]   ;;  %v11252_v9 = vld [vmem:[%s15896_s6 + $0x90] ss:$8 sps:$4 sm:$0xff]  }
 0x515   :  { %v5842_v45 = vpack.c.bf16 %v5830_v61, %v5830_v61  ;;  %v5865_v39 = vand.u32 %v5863_v43, %v5841_v33  ;;  %6273 = vmatprep.subr.bf16.mxu1 %v11227_v26  ;;  %v11248_v20 = vld [vmem:[%s15896_s6 + $0xa4] ss:$8 sps:$4 sm:$0xff]   ;;  %v11254_v60 = vld [vmem:[%s15896_s6 + $0x94] ss:$8 sps:$4 sm:$0xff]   ;;  %v6885_v14 = vld [vmem:[%s15895_s2 + $0x18] sm:$0xf] }
 0x516   :  { %v5840_v62 = vpack.c.bf16 %v5828_v2, %v5826_v12  ;;  %v11260_v57 = vld [vmem:[%s15896_s6 + $0x84] ss:$8 sps:$4 sm:$0xff]   ;;  %v11258_v12 = vld [vmem:[%s15896_s6 + $0x80] ss:$8 sps:$4 sm:$0xff]   ;;  %6910 = vperm.xlu1 %10450, %v6885_v14   ;;  %6960 = vperm.xlu0 %10452, %v6885_v14   ;;  %v5971_v16 = vrot.slane %v5958_v17, 1  ;;  %v5972_v63 = vrot.slane %v5962_v29, 1 }
 0x517   :  { %v5868_v46 = vand.u32 %v5863_v43, %v5842_v45  ;;  %6274 = vmatpush2.bf16.msra.mxu1 %v11225_v59  ;;  %v5966_v5 = vpop.permute.xlu1 %5965  ;;  %v11249_v14 = vld [vmem:[%s15896_s6 + $0x220] ss:$8 sps:$4 sm:$0xff]  }
 0x518   :  { %6275 = vmatprep.subr.bf16.mxu1 %v11233_v0  ;;  %v5974_v45 = vrot.slane %v5966_v5, 1  ;;  %v11243_v0 = vld [vmem:[%s15896_s6 + $0x230] ss:$8 sps:$4 sm:$0xff]  }
 0x519   :  { %5878 = vmatprep.subr.bf16.mxu0 %v5868_v46  ;;  %v5983_v46 = vmul.f32 %v5971_v16, %v14878_v35 }
 0x51a   :  { %5879 = vmatpush1.bf16.msra.mxu0 %v5865_v39  ;;  %10453 = vset.pattern.permute.xlu1 %v15897_v24  ;;  %v5975_v39 = vsel %vm1202_vm4, %v5972_v63, %v5974_v45 }
 0x51b   :  { %5880 = vmatprep.subr.bf16.mxu0 %v5840_v62  ;;  %6276 = vmatpush2.bf16.msra.mxu1 %v11231_v23  ;;  %v5970_v33 = vpop.permute.xlu1 %5969 }
 0x51c   :  { %6277 = vmatprep.subr.bf16.mxu1 %v11239_v37  ;;  %10455 = vset.pattern.permute.xlu0 %v15894_v53 }
 0x51d   :  { %6954 = vperm.xlu1 %10453, %v14767_v28  }
 0x51e   :  { %5881 = vmatpush1.bf16.msra.mxu0 %v5839_v15  ;;  %v15099_v15 = vrot.slane %v5970_v33, 1 }
 0x51f   :  { %5882 = vmatprep.subr.bf16.mxu0 %v5838_v18  ;;  %6278 = vmatpush2.bf16.msra.mxu1 %v11237_v31  ;;  %v11246_v18 = vld [vmem:[%s15896_s6 + $0xa0] ss:$8 sps:$4 sm:$0xff]  }
 0x520   :  { %6760 = vmatprep.subr.bf16.mxu1 %v11245_v51  ;;  %v5977_v62 = vsel %vm1202_vm4, %v5974_v45, %v15099_v15  ;;  %v11257_v45 = vld [vmem:[%s15896_s6 + $0x214] ss:$8 sps:$4 sm:$0xff]  }
 0x521   :  { %6957 = vperm.xlu1 %10453, %v14780_v19   ;;  %v5973_v19 = vsel %vm1202_vm4, %v5971_v16, %v5972_v63 }
 0x522   :  { %5883 = vmatpush1.bf16.msra.mxu0 %v5837_v56  ;;  %v11234_v56 = vld [vmem:[%s15896_s6 + $0xc0] ss:$8 sps:$4 sm:$0xff]  }
 0x523   :  { %5884 = vmatprep.subr.bf16.mxu0 %v5836_v22  ;;  %v11192_v22 = vld [vmem:[%s15896_s6 + $0x50] ss:$8 sps:$4 sm:$0xff]  }
 0x525   :  { %10454 = vset.pattern.permute.xlu1 %v15894_v53 }
 0x526   :  { %5885 = vmatpush1.bf16.msra.mxu0 %v14949_v38  ;;  %v11194_v38 = vld [vmem:[%s15896_s6 + $0x54] ss:$8 sps:$4 sm:$0xff]  }
 0x527   :  { %6500 = vmatprep.subr.bf16.mxu0 %v11182_v10 }
 0x529   :  { %9975 = vmatmul.mubr.msk.bf16.vlgmr.msra.gmra.mxu0 %vm5853_vm12, %v11166_v1  ;;  %v6014_v1 = vpop.permute.xlu1 %6013 }
 0x52a   :  { %5912 = vmatprep.mubr.bf16.mxu0 %v15894_v53  ;;  %6501 = vmatpush1.bf16.msra.mxu0 %v11180_v58  ;;  %v6011_v58 = vpop.permute.xlu0 %6010 }
 0x52b   :  { %6502 = vmatprep.subr.bf16.mxu0 %v11188_v13 }
 0x52e   :  { %6503 = vmatpush1.bf16.msra.mxu0 %v11186_v3  ;;  %v5984_v3 = vmul.f32 %v5971_v16, %v14880_v36  ;;  %v6017_v36 = vpop.permute.xlu1 %6016 }
 0x52f   :  { %6504 = vmatprep.subr.bf16.mxu0 %v11194_v38 }
 0x531   :  { %9976 = vmatmul.mubr.msk.bf16.gmra.mxu0 %vm5853_vm12, %v11167_v25 }
 0x532   :  { %6505 = vmatpush1.bf16.msra.mxu0 %v11192_v22 }
 0x533   :  { %6506 = vmatprep.subr.bf16.mxu0 %v11200_v40 }
 0x536   :  { %6507 = vmatpush1.bf16.msra.mxu0 %v11198_v50  ;;  %v6022_v50 = vrot.slane %v6014_v1, 7 }
 0x537   :  { %6508 = vmatprep.subr.bf16.mxu0 %v11206_v41  ;;  %v15115_v41 = vrot.slane %v6011_v58, 7 }
 0x539   :  { %v15122_v47 = vsel %vm1341_vm5, %v15115_v41, %v6022_v50 }
 0x53a   :  { %6509 = vmatpush1.bf16.msra.mxu0 %v11204_v21 }
 0x53b   :  { %6510 = vmatprep.subr.bf16.mxu0 %v11212_v54 }
 0x53e   :  { %6511 = vmatpush1.bf16.msra.mxu0 %v11210_v44 }
 0x53f   :  { %6512 = vmatprep.subr.bf16.mxu0 %v11218_v6 }
 0x542   :  { %6513 = vmatpush1.bf16.msra.mxu0 %v11216_v7 }
 0x543   :  { %6514 = vmatprep.subr.bf16.mxu0 %v11224_v52 }
 0x546   :  { %6515 = vmatpush1.bf16.msra.mxu0 %v11222_v11 }
 0x547   :  { %6520 = vmatprep.subr.bf16.mxu0 %v11230_v49  ;;  %v6024_v49 = vrot.slane %v6017_v36, 7 }
 0x549   :  { %v15145_v17 = vsel %vm1341_vm5, %v6022_v50, %v6024_v49 }
 0x54a   :  { %6521 = vmatpush2.bf16.msra.mxu0 %v11228_v27  ;;  %v6020_v27 = vpop.permute.xlu0 %6019 }
 0x54b   :  { %6522 = vmatprep.subr.bf16.mxu0 %v11236_v32 }
 0x54e   :  { %6523 = vmatpush2.bf16.msra.mxu0 %v11234_v56 }
 0x54f   :  { %6524 = vmatprep.subr.bf16.mxu0 %v11242_v55 }
 0x552   :  { %6525 = vmatpush2.bf16.msra.mxu0 %v11240_v48  ;;  %v11251_v48 = vld [vmem:[%s15896_s6 + $0x224] ss:$8 sps:$4 sm:$0xff]  }
 0x553   :  { %6526 = vmatprep.subr.bf16.mxu0 %v11248_v20  ;;  %v6026_v20 = vrot.slane %v6020_v27, 7  ;;  %v11261_v27 = vld [vmem:[%s15896_s6 + $0x200] ss:$8 sps:$4 sm:$0xff]  }
 0x556   :  { %6527 = vmatpush2.bf16.msra.mxu0 %v11246_v18 }
 0x557   :  { %6528 = vmatprep.subr.bf16.mxu0 %v11254_v60 }
 0x55a   :  { %6529 = vmatpush2.bf16.msra.mxu0 %v11252_v9 }
 0x55b   :  { %6530 = vmatprep.subr.bf16.mxu0 %v11260_v57 }
 0x55e   :  { %6531 = vmatpush2.bf16.msra.mxu0 %v11258_v12 }
 0x5e9   :  { %v5904_v61 = vpop.f32.mrf.mxu0 }
 0x5ea   :  { %5923 = vst [vmem:[#allocation4 + $0x10] sm:$0xff] %v5904_v61  ;;  %v5985_v10 = vmul.f32 %v5973_v19, %v5904_v61 }
 0x5eb   :  { %v5906_v2 = vpop.f32.mrf.mxu0 }
 0x5ec   :  { %5925 = vst.msk [vmem:[#allocation4 + $0x18] sm:$0xff] %vm5924_vm13, %v5906_v2  ;;  %v15117_v21 = vpack.c.bf16 %v5985_v10, %v5983_v46  ;;  %v15155_v46 = vsel %vm1341_vm5, %v6024_v49, %v6026_v20 }
 0x5ed   :  { %v15102_v28 = vpop.f32.mrf.mxu0 }
 0x5ee   :  { %v5987_v22 = vmul.f32 %v5975_v39, %v15102_v28  ;;  %v6301_v52 = vshrl.u32 %v15117_v21, 16  ;;  %v6001_v31 = vpack.c.bf16 %v15102_v28, %v5904_v61  ;;  %v6304_v51 = vshll.u32 %v15117_v21, 16 }
 0x5ef   :  { %v5910_v43 = vpop.f32.mrf.mxu0 }
 0x5f0   :  { %5927 = vst.msk [vmem:[#allocation4 + $0x28] sm:$0xff] %vm5924_vm13, %v5910_v43  ;;  %v15139_v9 = vrot.slane %v6301_v52, 3 }
 0x5f1   :  { %v15110_v13 = vpop.f32.mrf.mxu0 }
 0x5f2   :  { %v5989_v38 = vmul.f32 %v5977_v62, %v15110_v13 }
 0x5f3   :  { %v5948_v25 = vld [vmem:[#allocation4 + $0x18] sm:$0xff]  ;;  %v5916_v40 = vpop.f32.mrf.mxu0 }
 0x5f4   :  { %v5986_v35 = vmul.f32 %v5973_v19, %v5948_v25  ;;  %5929 = vst.msk [vmem:[#allocation4 + $0x38] sm:$0xff] %vm5924_vm13, %v5916_v40  ;;  %v6006_v54 = vld [vmem:[#allocation4 + $0x18] sm:$0xfe]  ;;  %v5995_v6 = vpack.c.bf16 %v5989_v38, %v5987_v22  ;;  %v11255_v22 = vld [vmem:[%s15896_s6 + $0x210] ss:$8 sps:$4 sm:$0xff]  }
 0x5f5   :  { %v5918_v44 = vpop.f32.mrf.mxu0  ;;  %v6033_v59 = vmul.f32 %v15115_v41, %v6006_v54  ;;  %v6306_v54 = vrot.slane %v6304_v51, 4 }
 0x5f6   :  { %v5994_v7 = vpack.c.bf16 %v5986_v35, %v5984_v3  ;;  %5930 = vst [vmem:[#allocation4 + $0x40] sm:$0xf] %v5918_v44  ;;  %v6309_v56 = vshrl.u32 %v5995_v6, 16  ;;  %v6312_v32 = vshll.u32 %v5995_v6, 16 }
 0x5f7   :  { %v5950_v30 = vld [vmem:[#allocation4 + $0x28] sm:$0xff]  ;;  %v5920_v11 = vpop.f32.mrf.mxu0 }
 0x5f8   :  { %v6035_v26 = vmul.f32 %v15122_v47, %v5950_v30  ;;  %5932 = vst.msk [vmem:[#allocation4 + $0x48] sm:$0xf] %vm5931_vm14, %v5920_v11  ;;  %v6002_v23 = vpack.c.bf16 %v5950_v30, %v5948_v25  ;;  %v6318_v37 = vshrl.u32 %v5994_v7, 16  ;;  %v5988_v60 = vmul.f32 %v5975_v39, %v5950_v30 }
 0x5f9   :  { %v6321_v57 = vshll.u32 %v5994_v7, 16  ;;  %v6311_v29 = vrot.slane %v6309_v56, 3  ;;  %v6314_v16 = vrot.slane %v6312_v32, 4  ;;  %v6307_v32 = vor.u32 %v6306_v54, %v15139_v9  ;;  %v11290_v54 = vld [vmem:[%s15896_s6 + $0x254] ss:$8 sps:$4 sm:$0xff]  }
 0x5fa   :  { %v15132_v55 = vpack.c.bf16 %v6035_v26, %v6033_v59  ;;  %10033 = vmatprep.mubr.msk.bf16.mxu1 %vm5924_vm13, %v6002_v23  ;;  %v6320_v43 = vrot.slane %v6318_v37, 3 }
 0x5fb   :  { %v5952_v18 = vld [vmem:[#allocation4 + $0x38] sm:$0xff]  ;;  %6280 = vmatmul.mubr.bf16.vlgmr.msra.gmra.mxu1 %v6001_v31  ;;  %v6323_v40 = vrot.slane %v6321_v57, 4  ;;  %v6315_v30 = vor.u32 %v6314_v16, %v6311_v29 }
 0x5fc   :  { %v5990_v12 = vmul.f32 %v5977_v62, %v5952_v18  ;;  %6761 = vmatpush1.bf16.msra.mxu1 %v11243_v0  ;;  %v6597_v63 = vshll.u32 %v15132_v55, 16  ;;  %v6037_v33 = vmul.f32 %v15145_v17, %v5952_v18  ;;  %v6595_v52 = vshrl.u32 %v15132_v55, 16  ;;  %v11266_v55 = vld [vmem:[%s15896_s6 + $0x1f4] ss:$8 sps:$4 sm:$0xff]  }
 0x5fd   :  { %v5999_v5 = vld [vmem:[#allocation4 + $0x40] sm:$0xf]  ;;  %6762 = vmatprep.subr.bf16.mxu1 %v11251_v48  ;;  %v6324_v49 = vor.u32 %v6323_v40, %v6320_v43  ;;  %v6316_v20 = vsel %vm2492_vm7, %v6307_v32, %v6315_v30  ;;  %v6034_v40 = vmul.f32 %v15122_v47, %v15102_v28  ;;  %v11288_v28 = vld [vmem:[%s15896_s6 + $0x250] ss:$8 sps:$4 sm:$0xff]  }
 0x5fe   :  { %v5953_v61 = vld [vmem:[#allocation4 + $0x40] sm:$0x7]  ;;  %v5996_v19 = vpack.c.bf16 %v5990_v12, %v5988_v60  ;;  %v6003_v25 = vpack.c.bf16 %v5999_v5, %v15110_v13  ;;  %v6599_v44 = vrot.slane %v6597_v63, 1  ;;  %v11264_v12 = vld [vmem:[%s15896_s6 + $0x1f0] ss:$8 sps:$4 sm:$0xff]  }
 0x5ff   :  { %v15149_v2 = vld [vmem:[#allocation4 + $0x40] sm:$0x1f]  ;;  %v6008_v62 = vld [vmem:[#allocation4 + $0x48] sm:$0x1f]  ;;  %v5991_v1 = vmul.f32 %v15099_v15, %v5953_v61  ;;  %v11300_v32 = vld [vmem:[#allocation9 + $0x130] ss:$8 sps:$4 sm:$0xff]  }
 0x600   :  { %v6000_v39 = vld [vmem:[#allocation4 + $0x48] sm:$0xf]  ;;  %v6039_v58 = vmul.f32 %v15155_v46, %v6008_v62  ;;  %6880 = vst.msk [vmem:[#allocation4 + $0x44] ss:$8 sm:$0x3] %vm14832_vm9, %v15901_v34  ;;  %v6326_v38 = vshrl.u32 %v5996_v19, 16  ;;  %6763 = vmatpush1.bf16.msra.mxu1 %v11249_v14  ;;  %v6600_v31 = vor.u32 %v6599_v44, %v6595_v52 }
 0x601   :  { %v5954_v10 = vld [vmem:[#allocation4 + $0x48] sm:$0x7]  ;;  %v6004_v3 = vpack.c.bf16 %v6000_v39, %v5952_v18  ;;  %v6329_v50 = vshll.u32 %v5996_v19, 16  ;;  %v5997_v21 = vpack.c.bf16 %v5991_v1, %v5991_v1  ;;  %6764 = vmatprep.subr.bf16.mxu1 %v11257_v45  ;;  %v11269_v5 = vld [vmem:[%s15896_s6 + $0x1e4] ss:$8 sps:$4 sm:$0xff]   ;;  %vm9125_vm9 = vcmask 74752  }
 0x602   :  { %v5992_v35 = vmul.f32 %v15099_v15, %v5954_v10  ;;  %v15167_v6 = vpack.c.bf16 %v6039_v58, %v6037_v33  ;;  %v6328_v7 = vrot.slane %v6326_v38, 3  ;;  %v11267_v61 = vld [vmem:[%s15896_s6 + $0x1e0] ss:$8 sps:$4 sm:$0xff]   ;;  %v11272_v63 = vld [vmem:[%s15896_s6 + $0x1d4] ss:$8 sps:$4 sm:$0xff]  }
 0x603   :  { %10034 = vmatprep.mubr.msk.bf16.mxu1 %vm5924_vm13, %v6004_v3  ;;  %v6331_v36 = vrot.slane %v6329_v50, 4  ;;  %v6335_v59 = vshrl.u32 %v5997_v21, 16  ;;  %v6338_v26 = vshll.u32 %v5997_v21, 16  ;;  %v11270_v45 = vld [vmem:[%s15896_s6 + $0x1d0] ss:$8 sps:$4 sm:$0xff]   ;;  %v6036_v50 = vmul.f32 %v15145_v17, %v15110_v13 }
 0x604   :  { %v5998_v11 = vpack.c.bf16 %v5992_v35, %v5992_v35  ;;  %6290 = vmatmul.mubr.bf16.gmra.mxu1 %v6003_v25  ;;  %v6602_v15 = vshll.u32 %v15167_v6, 16  ;;  %v11275_v19 = vld [vmem:[%s15896_s6 + $0x1c4] ss:$8 sps:$4 sm:$0xff]   ;;  %v11273_v43 = vld [vmem:[%s15896_s6 + $0x1c0] ss:$8 sps:$4 sm:$0xff]   ;;  %v6038_v35 = vmul.f32 %v15155_v46, %v15149_v2 }
 0x605   :  { %6765 = vmatpush1.bf16.msra.mxu1 %v11255_v22  ;;  %v6332_v23 = vor.u32 %v6331_v36, %v6328_v7  ;;  %v6337_v9 = vrot.slane %v6335_v59, 3  ;;  %v6340_v57 = vrot.slane %v6338_v26, 4  ;;  %v11278_v62 = vld [vmem:[%s15896_s6 + $0x294] ss:$8 sps:$4 sm:$0xff]   ;;  %v11276_v39 = vld [vmem:[%s15896_s6 + $0x290] ss:$8 sps:$4 sm:$0xff]  }
 0x606   :  { %v6344_v0 = vshrl.u32 %v5998_v11, 16  ;;  %v6347_v56 = vshll.u32 %v5998_v11, 16  ;;  %6766 = vmatprep.subr.bf16.mxu1 %v11263_v8  ;;  %v15179_v37 = vrot.slane %v6602_v15, 1  ;;  %v11281_v10 = vld [vmem:[%s15896_s6 + $0x284] ss:$8 sps:$4 sm:$0xff]   ;;  %v6042_v44 = vpack.c.bf16 %v6038_v35, %v6036_v50 }
 0x607   :  { %v6333_v48 = vsel %vm2492_vm7, %v6324_v49, %v6332_v23  ;;  %v6341_v16 = vor.u32 %v6340_v57, %v6337_v9  ;;  %v11279_v1 = vld [vmem:[%s15896_s6 + $0x280] ss:$8 sps:$4 sm:$0xff]   ;;  %v6005_v58 = vld [vmem:[#allocation4 + $0x10] sm:$0xfe]  ;;  %v11287_v22 = vld [vmem:[%s15896_s6 + $0x264] ss:$8 sps:$4 sm:$0xff]  }
 0x608   :  { %v6346_v51 = vrot.slane %v6344_v0, 3  ;;  %v6349_v18 = vrot.slane %v6347_v56, 4  ;;  %10063 = vmatprep.mubr.msk.bf16.mxu0 %vm5924_vm13, %v6333_v48  ;;  %v6605_v60 = vsel %vm3614_vm8, %v6600_v31, %v15179_v37  ;;  %v11284_v3 = vld [vmem:[%s15896_s6 + $0x274] ss:$8 sps:$4 sm:$0xff]   ;;  %v6032_v38 = vmul.f32 %v15115_v41, %v6005_v58  ;;  %v11282_v25 = vld [vmem:[%s15896_s6 + $0x270] ss:$8 sps:$4 sm:$0xff]  }
 0x609   :  { %6767 = vmatpush1.bf16.msra.mxu1 %v11261_v27  ;;  %6533 = vmatmul.mubr.bf16.vlgmr.msra.gmra.mxu0 %v6316_v20  ;;  %v6342_v33 = vsel %vm2492_vm7, %v6315_v30, %v6341_v16  ;;  %v11285_v21 = vld [vmem:[%s15896_s6 + $0x260] ss:$8 sps:$4 sm:$0xff]   ;;  %v11293_v13 = vld [vmem:[%s15896_s6 + $0x244] ss:$8 sps:$4 sm:$0xff]   ;;  %v6590_v47 = vshll.u32 %v6042_v44, 16  ;;  %v6609_v36 = vshrl.u32 %v15167_v6, 16 }
 0x60a   :  { %v6350_v14 = vor.u32 %v6349_v18, %v6346_v51  ;;  %10121 = vmatprep.mubr.msk.bf16.mxu1 %vm5924_vm13, %v6605_v60  ;;  %6768 = vmatprep.subr.bf16.mxu1 %v11266_v55  ;;  %v6040_v41 = vpack.c.bf16 %v6034_v40, %v6032_v38  ;;  %v11291_v2 = vld [vmem:[%s15896_s6 + $0x240] ss:$8 sps:$4 sm:$0xff]   ;;  %v6606_v15 = vshrl.u32 %v6042_v44, 16  ;;  %v11296_v27 = vld [vmem:[#allocation9 + $0x154] ss:$8 sps:$4 sm:$0xff]  }
 0x60b   :  { %v6592_v7 = vrot.slane %v6590_v47, 1  ;;  %v6611_v52 = vor.u32 %v6609_v36, %v15179_v37  ;;  %v11294_v26 = vld [vmem:[#allocation9 + $0x150] ss:$8 sps:$4 sm:$0xff]   ;;  %7188 = vmatprep.subr.bf16.mxu0 %v11296_v27  ;;  %v11297_v49 = vld [vmem:[#allocation9 + $0x140] ss:$8 sps:$4 sm:$0xff]  }
 0x60c   :  { %v6351_v29 = vsel %vm2492_vm7, %v6332_v23, %v6350_v14  ;;  %v6585_v8 = vshll.u32 %v6040_v41, 16  ;;  %v6583_v46 = vshrl.u32 %v6040_v41, 16  ;;  %7189 = vmatpush1.bf16.msra.mxu0 %v11294_v26  ;;  %v11299_v23 = vld [vmem:[#allocation9 + $0x144] ss:$8 sps:$4 sm:$0xff]   ;;  %v11302_v0 = vld [vmem:[#allocation9 + $0x134] ss:$8 sps:$4 sm:$0xff]  }
 0x60d   :  { %10064 = vmatprep.mubr.msk.bf16.mxu0 %vm5924_vm13, %v6351_v29  ;;  %6769 = vmatpush1.bf16.msra.mxu1 %v11264_v12  ;;  %v6608_v59 = vor.u32 %v6606_v15, %v6592_v7  ;;  %v11306_v6 = vld [vmem:[#allocation9 + $0x70] ss:$8 sps:$4 sm:$0xff]   ;;  %v11308_v56 = vld [vmem:[#allocation9 + $0x74] ss:$8 sps:$4 sm:$0xff]   ;;  %v11314_v31 = vld [vmem:[#allocation9 + $0x64] ss:$8 sps:$4 sm:$0xff]  }
 0x60e   :  { %6770 = vmatprep.subr.bf16.mxu1 %v11269_v5  ;;  %v6587_v17 = vrot.slane %v6585_v8, 1  ;;  %7190 = vmatprep.subr.bf16.mxu0 %v11299_v23  ;;  %v11305_v37 = vld [vmem:[#allocation9 + $0x124] ss:$8 sps:$4 sm:$0xff]   ;;  %v11312_v55 = vld [vmem:[#allocation9 + $0x60] ss:$8 sps:$4 sm:$0xff]  }
 0x60f   :  { %v11320_v48 = vld [vmem:[#allocation9 + $0x54] ss:$8 sps:$4 sm:$0xff]   ;;  %v11303_v51 = vld [vmem:[#allocation9 + $0x120] ss:$8 sps:$4 sm:$0xff]   ;;  %v11318_v20 = vld [vmem:[#allocation9 + $0x50] ss:$8 sps:$4 sm:$0xff]  }
 0x610   :  { %v6588_v30 = vor.u32 %v6587_v17, %v6583_v46  ;;  %7191 = vmatpush1.bf16.msra.mxu0 %v11297_v49  ;;  %v11311_v18 = vld [vmem:[#allocation9 + $0x114] ss:$8 sps:$4 sm:$0xff]   ;;  %v11326_v60 = vld [vmem:[#allocation9 + $0x44] ss:$8 sps:$4 sm:$0xff]   ;;  %v11309_v9 = vld [vmem:[#allocation9 + $0x110] ss:$8 sps:$4 sm:$0xff]  }
 0x611   :  { %6771 = vmatpush1.bf16.msra.mxu1 %v11267_v61  ;;  %6543 = vmatmul.mubr.bf16.gmra.mxu0 %v6342_v33  ;;  %v11317_v57 = vld [vmem:[#allocation9 + $0x104] ss:$8 sps:$4 sm:$0xff]   ;;  %v11324_v12 = vld [vmem:[#allocation9 + $0x40] ss:$8 sps:$4 sm:$0xff]   ;;  %v11332_v14 = vld [vmem:[#allocation9 + $0x34] ss:$8 sps:$4 sm:$0xff]  }
 0x612   :  { %6772 = vmatprep.subr.bf16.mxu1 %v11272_v63  ;;  %v6593_v11 = vsel %vm3614_vm8, %v6588_v30, %v6592_v7  ;;  %7192 = vmatprep.subr.bf16.mxu0 %v11302_v0  ;;  %v11315_v5 = vld [vmem:[#allocation9 + $0x100] ss:$8 sps:$4 sm:$0xff]   ;;  %v11323_v29 = vld [vmem:[#allocation9 + $0xf4] ss:$8 sps:$4 sm:$0xff]   ;;  %v11330_v16 = vld [vmem:[#allocation9 + $0x30] ss:$8 sps:$4 sm:$0xff]  }
 0x613   :  { %v11321_v61 = vld [vmem:[#allocation9 + $0xf0] ss:$8 sps:$4 sm:$0xff]   ;;  %v11329_v63 = vld [vmem:[#allocation9 + $0xe4] ss:$8 sps:$4 sm:$0xff]   ;;  %v11327_v33 = vld [vmem:[#allocation9 + $0xe0] ss:$8 sps:$4 sm:$0xff]  }
 0x614   :  { %7193 = vmatpush1.bf16.msra.mxu0 %v11300_v32  ;;  %v11344_v58 = vld [vmem:[#allocation9 + $0x14] ss:$8 sps:$4 sm:$0xff]   ;;  %v11351_v40 = vld [vmem:[#allocation9 + $0x180] ss:$8 sps:$4 sm:$0xff]   ;;  %v11353_v50 = vld [vmem:[#allocation9 + $0x184] ss:$8 sps:$4 sm:$0xff]  }
 0x615   :  { %6773 = vmatpush1.bf16.msra.mxu1 %v11270_v45  ;;  %7194 = vmatprep.subr.bf16.mxu0 %v11305_v37  ;;  %v11333_v45 = vld [vmem:[#allocation9 + $0x1b0] ss:$8 sps:$4 sm:$0xff]   ;;  %v11347_v38 = vld [vmem:[#allocation9 + $0x194] ss:$8 sps:$4 sm:$0xff]   ;;  %v11360_v8 = vld [vmem:[#allocation9 + $0xc0] ss:$8 sps:$4 sm:$0xff]  }
 0x616   :  { %6774 = vmatprep.subr.bf16.mxu1 %v11275_v19  ;;  %v11335_v19 = vld [vmem:[#allocation9 + $0x1b4] ss:$8 sps:$4 sm:$0xff]   ;;  %v11354_v35 = vld [vmem:[#allocation9 + $0xd0] ss:$8 sps:$4 sm:$0xff]   ;;  %v11363_v47 = vld [vmem:[#allocation9 + $0x160] ss:$8 sps:$4 sm:$0xff]  }
 0x617   :  { %v11356_v41 = vld [vmem:[#allocation9 + $0xd4] ss:$8 sps:$4 sm:$0xff]   ;;  %v11357_v44 = vld [vmem:[#allocation9 + $0x170] ss:$8 sps:$4 sm:$0xff]   ;;  %v11374_v46 = vld [vmem:[#allocation9 + $0xa4] ss:$8 sps:$4 sm:$0xff]  }
 0x618   :  { %7195 = vmatpush1.bf16.msra.mxu0 %v11303_v51  ;;  %v11366_v17 = vld [vmem:[#allocation9 + $0xb0] ss:$8 sps:$4 sm:$0xff]   ;;  %v11372_v7 = vld [vmem:[#allocation9 + $0xa0] ss:$8 sps:$4 sm:$0xff]   ;;  %v11380_v36 = vld [vmem:[#allocation9 + $0x94] ss:$8 sps:$4 sm:$0xff]  }
 0x619   :  { %6775 = vmatpush1.bf16.msra.mxu1 %v11273_v43  ;;  %7196 = vmatprep.subr.bf16.mxu0 %v11311_v18  ;;  %v11336_v43 = vld [vmem:[#allocation9 + $0x20] ss:$8 sps:$4 sm:$0xff]   ;;  %v11378_v30 = vld [vmem:[#allocation9 + $0x90] ss:$8 sps:$4 sm:$0xff]  }
 0x61a   :  { %6780 = vmatprep.subr.bf16.mxu1 %v11278_v62  ;;  %v11338_v62 = vld [vmem:[#allocation9 + $0x24] ss:$8 sps:$4 sm:$0xff]   ;;  %v6821_v37 = vld [vmem:[%s15692_s13] ss:$2 sm:$0x3] }
 0x61b   :  { %v10123_v18 = vld [vmem:[%s15692_s13 + $0x1] ss:$2 sm:$0x3] }
 0x61c   :  { %7197 = vmatpush1.bf16.msra.mxu0 %v11309_v9 }
 0x61d   :  { %6781 = vmatpush2.bf16.msra.mxu1 %v11276_v39  ;;  %7198 = vmatprep.subr.bf16.mxu0 %v11317_v57  ;;  %v11339_v39 = vld [vmem:[#allocation9 + $0x1a0] ss:$8 sps:$4 sm:$0xff]  }
 0x61e   :  { %6782 = vmatprep.subr.bf16.mxu1 %v11281_v10  ;;  %v11341_v10 = vld [vmem:[#allocation9 + $0x1a4] ss:$8 sps:$4 sm:$0xff]  }
 0x620   :  { %7199 = vmatpush1.bf16.msra.mxu0 %v11315_v5 }
 0x621   :  { %6783 = vmatpush2.bf16.msra.mxu1 %v11279_v1  ;;  %7200 = vmatprep.subr.bf16.mxu0 %v11323_v29  ;;  %v11342_v1 = vld [vmem:[#allocation9 + $0x10] ss:$8 sps:$4 sm:$0xff]   ;;  %v15275_v29 = vrot.slane %v6821_v37, %v15888_v4 }
 0x622   :  { %6784 = vmatprep.subr.bf16.mxu1 %v11284_v3  ;;  %v11345_v3 = vld [vmem:[#allocation9 + $0x190] ss:$8 sps:$4 sm:$0xff]  }
 0x624   :  { %7201 = vmatpush1.bf16.msra.mxu0 %v11321_v61 }
 0x625   :  { %6785 = vmatpush2.bf16.msra.mxu1 %v11282_v25  ;;  %7202 = vmatprep.subr.bf16.mxu0 %v11329_v63  ;;  %v11348_v25 = vld [vmem:[#allocation9] ss:$8 sps:$4 sm:$0xff]  }
 0x626   :  { %6786 = vmatprep.subr.bf16.mxu1 %v11287_v22  ;;  %v11350_v22 = vld [vmem:[#allocation9 + $0x4] ss:$8 sps:$4 sm:$0xff]  }
 0x628   :  { %7203 = vmatpush1.bf16.msra.mxu0 %v11327_v33 }
 0x629   :  { %6787 = vmatpush2.bf16.msra.mxu1 %v11285_v21  ;;  %7208 = vmatprep.subr.bf16.mxu0 %v11335_v19  ;;  %v11359_v21 = vld [vmem:[#allocation9 + $0x174] ss:$8 sps:$4 sm:$0xff]   ;;  %v15279_v19 = vrot.slane %v10123_v18, %v15888_v4 }
 0x62a   :  { %6788 = vmatprep.subr.bf16.mxu1 %v11290_v54  ;;  %v11362_v54 = vld [vmem:[#allocation9 + $0xc4] ss:$8 sps:$4 sm:$0xff]  }
 0x62c   :  { %7209 = vmatpush2.bf16.msra.mxu0 %v11333_v45 }
 0x62d   :  { %6789 = vmatpush2.bf16.msra.mxu1 %v11288_v28  ;;  %7210 = vmatprep.subr.bf16.mxu0 %v11341_v10  ;;  %v11365_v28 = vld [vmem:[#allocation9 + $0x164] ss:$8 sps:$4 sm:$0xff]  }
 0x62e   :  { %6790 = vmatprep.subr.bf16.mxu1 %v11293_v13  ;;  %v11368_v13 = vld [vmem:[#allocation9 + $0xb4] ss:$8 sps:$4 sm:$0xff]  }
 0x630   :  { %7211 = vmatpush2.bf16.msra.mxu0 %v11339_v39 }
 0x631   :  { %6791 = vmatpush2.bf16.msra.mxu1 %v11291_v2  ;;  %7212 = vmatprep.subr.bf16.mxu0 %v11347_v38  ;;  %v11371_v2 = vld [vmem:[#allocation9 + $0x234] ss:$8 sps:$4 sm:$0xff]  }
 0x632   :  { %7441 = vmatprep.subr.bf16.mxu1 %v11308_v56 }
 0x634   :  { %6793 = vmatmul.mubr.bf16.vlgmr.msra.gmra.mxu1 %v6593_v11  ;;  %7213 = vmatpush2.bf16.msra.mxu0 %v11345_v3  ;;  %v11386_v11 = vld [vmem:[#allocation9 + $0x84] ss:$8 sps:$4 sm:$0xff]  }
 0x635   :  { %10122 = vmatprep.mubr.msk.bf16.mxu1 %vm5924_vm13, %v6611_v52  ;;  %7442 = vmatpush1.bf16.msra.mxu1 %v11306_v6  ;;  %v11384_v52 = vld [vmem:[#allocation9 + $0x80] ss:$8 sps:$4 sm:$0xff]  }
 0x636   :  { %7443 = vmatprep.subr.bf16.mxu1 %v11314_v31  ;;  %7214 = vmatprep.subr.bf16.mxu0 %v11353_v50 }
 0x638   :  { %7215 = vmatpush2.bf16.msra.mxu0 %v11351_v40 }
 0x639   :  { %7444 = vmatpush1.bf16.msra.mxu1 %v11312_v55  ;;  %7216 = vmatprep.subr.bf16.mxu0 %v11359_v21  ;;  %v6899_v55 = vpop.permute.xlu1 %6898 }
 0x63a   :  { %7445 = vmatprep.subr.bf16.mxu1 %v11320_v48 }
 0x63c   :  { %6803 = vmatmul.mubr.bf16.gmra.mxu1 %v6608_v59  ;;  %7217 = vmatpush2.bf16.msra.mxu0 %v11357_v44 }
 0x63d   :  { %7446 = vmatpush1.bf16.msra.mxu1 %v11318_v20  ;;  %7218 = vmatprep.subr.bf16.mxu0 %v11365_v28 }
 0x63e   :  { %7447 = vmatprep.subr.bf16.mxu1 %v11326_v60  ;;  %v15903_v60 = vld [vmem:[#allocation44_spill] sm:$0xff] }
 0x63f   :  { %v15269_v9 = vrot.slane %v6821_v37, %v15903_v60  ;;  %v15272_v5 = vrot.slane %v10123_v18, %v15903_v60 }
 0x640   :  { %7219 = vmatpush2.bf16.msra.mxu0 %v11363_v47 }
 0x641   :  { %7448 = vmatpush1.bf16.msra.mxu1 %v11324_v12  ;;  %7701 = vmatprep.subr.bf16.mxu0 %v11371_v2 }
 0x642   :  { %7449 = vmatprep.subr.bf16.mxu1 %v11332_v14 }
 0x645   :  { %7450 = vmatpush1.bf16.msra.mxu1 %v11330_v16 }
 0x646   :  { %7451 = vmatprep.subr.bf16.mxu1 %v11338_v62 }
 0x649   :  { %7452 = vmatpush1.bf16.msra.mxu1 %v11336_v43  ;;  %v6907_v43 = vpop.permute.xlu1 %6906 }
 0x64a   :  { %7453 = vmatprep.subr.bf16.mxu1 %v11344_v58  ;;  %v6915_v2 = vrot.slane %v6907_v43, 1 }
 0x64d   :  { %7454 = vmatpush1.bf16.msra.mxu1 %v11342_v1  ;;  %v6911_v47 = vpop.permute.xlu1 %6910 }
 0x64e   :  { %7455 = vmatprep.subr.bf16.mxu1 %v11350_v22 }
 0x651   :  { %7456 = vmatpush1.bf16.msra.mxu1 %v11348_v25 }
 0x652   :  { %7461 = vmatprep.subr.bf16.mxu1 %v11356_v41 }
 0x655   :  { %7462 = vmatpush2.bf16.msra.mxu1 %v11354_v35 }
 0x656   :  { %7463 = vmatprep.subr.bf16.mxu1 %v11362_v54 }
 0x659   :  { %7464 = vmatpush2.bf16.msra.mxu1 %v11360_v8 }
 0x65a   :  { %7465 = vmatprep.subr.bf16.mxu1 %v11368_v13  ;;  %v6903_v13 = vpop.permute.xlu0 %6902 }
 0x65d   :  { %7466 = vmatpush2.bf16.msra.mxu1 %v11366_v17 }
 0x65e   :  { %7467 = vmatprep.subr.bf16.mxu1 %v11374_v46 }
 0x661   :  { %7468 = vmatpush2.bf16.msra.mxu1 %v11372_v7  ;;  %v15290_v7 = vrot.slane %v6911_v47, 1  ;;  %v11369_v47 = vld [vmem:[#allocation9 + $0x230] ss:$8 sps:$4 sm:$0xff]  }
 0x662   :  { %7469 = vmatprep.subr.bf16.mxu1 %v11380_v36 }
 0x665   :  { %7470 = vmatpush2.bf16.msra.mxu1 %v11378_v30 }
 0x666   :  { %7471 = vmatprep.subr.bf16.mxu1 %v11386_v11 }
 0x669   :  { %7472 = vmatpush2.bf16.msra.mxu1 %v11384_v52 }
 0x66a   :  { %7933 = vmatprep.subr.bf16.mxu1 %v15894_v53 }
 0x6bb   :  { %v6281_v15 = vpop.f32.mrf.mxu1 }
 0x6bd   :  { %v6283_v59 = vpop.f32.mrf.mxu1 }
 0x6bf   :  { %v6285_v26 = vpop.f32.mrf.mxu1 }
 0x6c1   :  { %v6287_v49 = vpop.f32.mrf.mxu1 }
 0x6c4   :  { %v6291_v0 = vpop.f32.mrf.mxu1 }
 0x6c6   :  { %v6293_v56 = vpop.f32.mrf.mxu1 }
 0x6c8   :  { %v6295_v31 = vpop.f32.mrf.mxu1 }
 0x6c9   :  { %v6534_v27 = vpop.f32.mrf.mxu0 }
 0x6ca   :  { %v6297_v51 = vpop.f32.mrf.mxu1  ;;  %v6535_v20 = vadd.f32 %v6534_v27, %v6281_v15 }
 0x6cb   :  { %v6536_v23 = vpop.f32.mrf.mxu0 }
 0x6cc   :  { %v6537_v12 = vadd.f32 %v6536_v23, %v6283_v59  ;;  %v6912_v59 = vrot.slane %v6899_v55, 1  ;;  %v6952_v55 = vpop.permute.xlu0 %6951 }
 0x6cd   :  { %v6538_v6 = vpop.f32.mrf.mxu0 }
 0x6ce   :  { %v6539_v63 = vadd.f32 %v6538_v6, %v6285_v26  ;;  %v6913_v26 = vrot.slane %v6903_v13, 1  ;;  %v6886_v6 = vld [vmem:[#allocation4] sm:$0x80] }
 0x6cf   :  { %v6540_v32 = vpop.f32.mrf.mxu0 }
 0x6d0   :  { %v6541_v39 = vadd.f32 %v6540_v32, %v6287_v49 }
 0x6d1   :  { %v6544_v48 = vpop.f32.mrf.mxu0 }
 0x6d2   :  { %v6545_v3 = vadd.f32 %v6544_v48, %v6291_v0  ;;  %v6918_v48 = vsel %vm1202_vm4, %v6915_v2, %v15290_v7 }
 0x6d3   :  { %v6546_v16 = vpop.f32.mrf.mxu0 }
 0x6d4   :  { %v6547_v41 = vadd.f32 %v6546_v16, %v6293_v56  ;;  %v6887_v56 = vld [vmem:[#allocation4 + $0x8] sm:$0x80]  ;;  %v6955_v16 = vpop.permute.xlu1 %6954 }
 0x6d5   :  { %v6548_v38 = vpop.f32.mrf.mxu0 }
 0x6d6   :  { %v6549_v15 = vadd.f32 %v6548_v38, %v6295_v31  ;;  %v6916_v31 = vsel %vm1202_vm4, %v6913_v26, %v6915_v2  ;;  %v6963_v38 = vrot.slane %v6955_v16, 7 }
 0x6d7   :  { %v6550_v17 = vpop.f32.mrf.mxu0 }
 0x6d8   :  { %v6551_v49 = vadd.f32 %v6550_v17, %v6297_v51 }
 0x6f4   :  { %v6794_v57 = vpop.f32.mrf.mxu1 }
 0x6f5   :  { %v6813_v14 = vadd.f32 %v6794_v57, %v6535_v20  ;;  %v6914_v57 = vsel %vm1202_vm4, %v6912_v59, %v6913_v26 }
 0x6f6   :  { %v6796_v61 = vpop.f32.mrf.mxu1 }
 0x6f7   :  { %v6833_v33 = vmul.f32 %v15269_v9, %v6813_v14  ;;  %v6814_v45 = vadd.f32 %v6796_v61, %v6537_v12  ;;  %v6924_v61 = vmul.f32 %v6912_v59, %v6886_v6 }
 0x6f8   :  { %v6798_v62 = vpop.f32.mrf.mxu1 }
 0x6f9   :  { %v6854_v10 = vadd.f32 %v15272_v5, %v6833_v33  ;;  %v6834_v1 = vmul.f32 %v15275_v29, %v6814_v45  ;;  %v6815_v58 = vadd.f32 %v6798_v62, %v6539_v63  ;;  %v6925_v63 = vmul.f32 %v6912_v59, %v6887_v56 }
 0x6fa   :  { %v6800_v25 = vpop.f32.mrf.mxu1 }
 0x6fb   :  { %v15283_v22 = vmax.f32 %v6854_v10, 0.0  ;;  %v6855_v40 = vadd.f32 %v15279_v19, %v6834_v1  ;;  %v6835_v50 = vmul.f32 %v15269_v9, %v6815_v58  ;;  %v6816_v35 = vadd.f32 %v6800_v25, %v6541_v39 }
 0x6fc   :  { %v6804_v21 = vpop.f32.mrf.mxu1  ;;  %v15312_v1 = vrot.slane %v6952_v55, 7 }
 0x6fd   :  { %6870 = vst [vmem:[#allocation4 + $0x10] sm:$0xff] %v15283_v22  ;;  %v6863_v54 = vmax.f32 %v6855_v40, 0.0  ;;  %v6856_v44 = vadd.f32 %v15272_v5, %v6835_v50  ;;  %v6836_v8 = vmul.f32 %v15275_v29, %v6816_v35  ;;  %v6817_v28 = vadd.f32 %v6804_v21, %v6545_v3 }
 0x6fe   :  { %v6806_v46 = vpop.f32.mrf.mxu1  ;;  %v6926_v58 = vmul.f32 %v6914_v57, %v15283_v22 }
 0x6ff   :  { %6871 = vst.msk [vmem:[#allocation4 + $0x18] sm:$0xff] %vm5924_vm13, %v6863_v54  ;;  %v15293_v36 = vmax.f32 %v6856_v44, 0.0  ;;  %v6857_v30 = vadd.f32 %v15279_v19, %v6836_v8  ;;  %v6837_v11 = vmul.f32 %v15269_v9, %v6817_v28  ;;  %v6818_v52 = vadd.f32 %v6806_v46, %v6547_v41  ;;  %v6958_v54 = vpop.permute.xlu1 %6957  ;;  %v6961_v44 = vpop.permute.xlu0 %6960 }
 0x700   :  { %v6808_v27 = vpop.f32.mrf.mxu1  ;;  %v6934_v21 = vpack.c.bf16 %v6926_v58, %v6924_v61  ;;  %v11381_v58 = vld [vmem:[#allocation9 + $0x210] ss:$8 sps:$4 sm:$0xff]  }
 0x701   :  { %v6865_v23 = vmax.f32 %v6857_v30, 0.0  ;;  %v6858_v0 = vadd.f32 %v15272_v5, %v6837_v11  ;;  %v6838_v32 = vmul.f32 %v15275_v29, %v6818_v52  ;;  %v6819_v37 = vadd.f32 %v6808_v27, %v6549_v15  ;;  %v11377_v30 = vld [vmem:[#allocation9 + $0x224] ss:$8 sps:$4 sm:$0xff]  }
 0x702   :  { %v6810_v18 = vpop.f32.mrf.mxu1  ;;  %v6928_v62 = vmul.f32 %v6916_v31, %v15293_v36  ;;  %v6942_v17 = vpack.c.bf16 %v15293_v36, %v15283_v22  ;;  %v6965_v52 = vrot.slane %v6958_v54, 7  ;;  %v6967_v15 = vrot.slane %v6961_v44, 7  ;;  %v11383_v22 = vld [vmem:[#allocation9 + $0x214] ss:$8 sps:$4 sm:$0xff]  }
 0x703   :  { %6873 = vst.msk [vmem:[#allocation4 + $0x28] sm:$0xff] %vm5924_vm13, %v6865_v23  ;;  %v15302_v20 = vmax.f32 %v6858_v0, 0.0  ;;  %v6820_v51 = vadd.f32 %v6810_v18, %v6551_v49  ;;  %v6859_v12 = vadd.f32 %v15279_v19, %v6838_v32  ;;  %v6839_v14 = vmul.f32 %v15269_v9, %v6819_v37  ;;  %v11375_v32 = vld [vmem:[#allocation9 + $0x220] ss:$8 sps:$4 sm:$0xff]  }
 0x704   :  { %v7242_v59 = vshrl.u32 %v6934_v21, 16  ;;  %v7245_v26 = vshll.u32 %v6934_v21, 16 }
 0x705   :  { %v6930_v33 = vmul.f32 %v6918_v48, %v15302_v20  ;;  %v6840_v45 = vmul.f32 %v15275_v29, %v6820_v51  ;;  %v6867_v39 = vmax.f32 %v6859_v12, 0.0  ;;  %v6860_v10 = vadd.f32 %v15272_v5, %v6839_v14 }
 0x706   :  { %v6889_v43 = vld [vmem:[#allocation4 + $0x18] sm:$0xff]  ;;  %v15320_v5 = vsel %vm1341_vm5, %v15312_v1, %v6963_v38  ;;  %v15329_v14 = vsel %vm1341_vm5, %v6963_v38, %v6965_v52 }
 0x707   :  { %v6927_v3 = vmul.f32 %v6914_v57, %v6889_v43  ;;  %v6861_v9 = vadd.f32 %v15279_v19, %v6840_v45  ;;  %6875 = vst.msk [vmem:[#allocation4 + $0x38] sm:$0xff] %vm5924_vm13, %v6867_v39  ;;  %v6868_v25 = vmax.f32 %v6860_v10, 0.0  ;;  %v6936_v40 = vpack.c.bf16 %v6930_v33, %v6928_v62  ;;  %v6947_v29 = vld [vmem:[#allocation4 + $0x18] sm:$0xfe] }
 0x708   :  { %v6974_v8 = vmul.f32 %v15312_v1, %v6947_v29  ;;  %v7247_v29 = vrot.slane %v7245_v26, 4 }
 0x709   :  { %v6935_v50 = vpack.c.bf16 %v6927_v3, %v6925_v63  ;;  %v6869_v35 = vmax.f32 %v6861_v9, 0.0  ;;  %6876 = vst [vmem:[#allocation4 + $0x40] sm:$0xf] %v6868_v25  ;;  %v7250_v19 = vshrl.u32 %v6936_v40, 16  ;;  %v7253_v46 = vshll.u32 %v6936_v40, 16 }
 0x70a   :  { %v6891_v41 = vld [vmem:[#allocation4 + $0x28] sm:$0xff] }
 0x70b   :  { %6877 = vst.msk [vmem:[#allocation4 + $0x48] sm:$0xf] %vm5931_vm14, %v6869_v35  ;;  %v6976_v28 = vmul.f32 %v15320_v5, %v6891_v41  ;;  %v6943_v13 = vpack.c.bf16 %v6891_v41, %v6889_v43  ;;  %v7259_v2 = vshrl.u32 %v6935_v50, 16  ;;  %v7262_v27 = vshll.u32 %v6935_v50, 16  ;;  %v11389_v25 = vld [vmem:[#allocation9 + $0x204] ss:$8 sps:$4 sm:$0xff]  }
 0x70c   :  { %v6929_v23 = vmul.f32 %v6916_v31, %v6891_v41  ;;  %v7252_v6 = vrot.slane %v7250_v19, 3  ;;  %v7255_v18 = vrot.slane %v7253_v46, 4  ;;  %v15332_v31 = vsel %vm1341_vm5, %v6965_v52, %v6967_v15 }
 0x70d   :  { %v6982_v11 = vpack.c.bf16 %v6976_v28, %v6974_v8  ;;  %10152 = vmatprep.mubr.msk.bf16.mxu0 %vm5924_vm13, %v6943_v13  ;;  %v7261_v51 = vrot.slane %v7259_v2, 3  ;;  %v7264_v43 = vrot.slane %v7262_v27, 4  ;;  %v7244_v50 = vrot.slane %v7242_v59, 3  ;;  %v11387_v13 = vld [vmem:[#allocation9 + $0x200] ss:$8 sps:$4 sm:$0xff]  }
 0x70e   :  { %v6893_v49 = vld [vmem:[#allocation4 + $0x38] sm:$0xff]  ;;  %7221 = vmatmul.mubr.bf16.vlgmr.msra.gmra.mxu0 %v6942_v17  ;;  %v7256_v21 = vor.u32 %v7255_v18, %v7252_v6  ;;  %vm8229_vm5 = vcmask 914432  }
 0x70f   :  { %v6931_v0 = vmul.f32 %v6918_v48, %v6893_v49  ;;  %v7538_v56 = vshll.u32 %v6982_v11, 16  ;;  %7702 = vmatpush1.bf16.msra.mxu0 %v11369_v47  ;;  %v6978_v63 = vmul.f32 %v15329_v14, %v6893_v49  ;;  %v7536_v41 = vshrl.u32 %v6982_v11, 16  ;;  %v11392_v11 = vld [vmem:[#allocation9 + $0x1f4] ss:$8 sps:$4 sm:$0xff]   ;;  %v11390_v6 = vld [vmem:[#allocation9 + $0x1f0] ss:$8 sps:$4 sm:$0xff]  }
 0x710   :  { %v6894_v37 = vld [vmem:[#allocation4 + $0x40] sm:$0x7]  ;;  %7703 = vmatprep.subr.bf16.mxu0 %v11377_v30  ;;  %v7265_v47 = vor.u32 %v7264_v43, %v7261_v51  ;;  %v7248_v52 = vor.u32 %v7247_v29, %v7244_v50  ;;  %v11410_v43 = vld [vmem:[#allocation9 + $0x274] ss:$8 sps:$4 sm:$0xff]  }
 0x711   :  { %v6940_v55 = vld [vmem:[#allocation4 + $0x40] sm:$0xf]  ;;  %v6932_v57 = vmul.f32 %v15290_v7, %v6894_v37  ;;  %v6937_v12 = vpack.c.bf16 %v6931_v0, %v6929_v23  ;;  %v7540_v3 = vrot.slane %v7538_v56, 1  ;;  %v11416_v29 = vld [vmem:[#allocation9 + $0x254] ss:$8 sps:$4 sm:$0xff]  }
 0x712   :  { %v6949_v16 = vld [vmem:[#allocation4 + $0x48] sm:$0x1f]  ;;  %v6944_v38 = vpack.c.bf16 %v6940_v55, %v15302_v20  ;;  %v7257_v0 = vsel %vm2492_vm7, %v7248_v52, %v7256_v21  ;;  %v11398_v55 = vld [vmem:[#allocation9 + $0x1d4] ss:$8 sps:$4 sm:$0xff]  }
 0x713   :  { %v6941_v48 = vld [vmem:[#allocation4 + $0x48] sm:$0xf]  ;;  %v6980_v33 = vmul.f32 %v15332_v31, %v6949_v16  ;;  %v6938_v62 = vpack.c.bf16 %v6932_v57, %v6932_v57  ;;  %v7267_v39 = vshrl.u32 %v6937_v12, 16  ;;  %v7270_v10 = vshll.u32 %v6937_v12, 16  ;;  %7704 = vmatpush1.bf16.msra.mxu0 %v11375_v32  ;;  %v11395_v32 = vld [vmem:[#allocation9 + $0x1e4] ss:$8 sps:$4 sm:$0xff]  }
 0x714   :  { %v6895_v61 = vld [vmem:[#allocation4 + $0x48] sm:$0x7]  ;;  %v6945_v45 = vpack.c.bf16 %v6941_v48, %v6893_v49  ;;  %7705 = vmatprep.subr.bf16.mxu0 %v11383_v22  ;;  %v7541_v17 = vor.u32 %v7540_v3, %v7536_v41  ;;  %v11396_v57 = vld [vmem:[#allocation9 + $0x1d0] ss:$8 sps:$4 sm:$0xff]   ;;  %v11401_v12 = vld [vmem:[#allocation9 + $0x1c4] ss:$8 sps:$4 sm:$0xff]   ;;  %v6975_v3 = vmul.f32 %v15320_v5, %v15293_v36 }
 0x715   :  { %v15336_v9 = vpack.c.bf16 %v6980_v33, %v6978_v63  ;;  %v6933_v40 = vmul.f32 %v15290_v7, %v6895_v61  ;;  %v7269_v35 = vrot.slane %v7267_v39, 3  ;;  %v7272_v54 = vrot.slane %v7270_v10, 4  ;;  %v11393_v37 = vld [vmem:[#allocation9 + $0x1e0] ss:$8 sps:$4 sm:$0xff]   ;;  %v11404_v48 = vld [vmem:[#allocation9 + $0x294] ss:$8 sps:$4 sm:$0xff]  }
 0x716   :  { %10153 = vmatprep.mubr.msk.bf16.mxu0 %vm5924_vm13, %v6945_v45  ;;  %v7276_v8 = vshrl.u32 %v6938_v62, 16  ;;  %v7279_v28 = vshll.u32 %v6938_v62, 16  ;;  %v11399_v16 = vld [vmem:[#allocation9 + $0x1c0] ss:$8 sps:$4 sm:$0xff]   ;;  %v11402_v61 = vld [vmem:[#allocation9 + $0x290] ss:$8 sps:$4 sm:$0xff]  }
 0x717   :  { %7231 = vmatmul.mubr.bf16.gmra.mxu0 %v6944_v38  ;;  %v7543_v44 = vshll.u32 %v15336_v9, 16  ;;  %v6939_v19 = vpack.c.bf16 %v6933_v40, %v6933_v40  ;;  %v7273_v2 = vor.u32 %v7272_v54, %v7269_v35  ;;  %v11407_v63 = vld [vmem:[#allocation9 + $0x284] ss:$8 sps:$4 sm:$0xff]   ;;  %v11405_v33 = vld [vmem:[#allocation9 + $0x280] ss:$8 sps:$4 sm:$0xff]   ;;  %v6977_v40 = vmul.f32 %v15329_v14, %v15302_v20 }
 0x718   :  { %7706 = vmatpush1.bf16.msra.mxu0 %v11381_v58  ;;  %v7278_v49 = vrot.slane %v7276_v8, 3  ;;  %v7281_v23 = vrot.slane %v7279_v28, 4  ;;  %v6946_v45 = vld [vmem:[#allocation4 + $0x10] sm:$0xfe]  ;;  %v6948_v62 = vld [vmem:[#allocation4 + $0x40] sm:$0x1f] }
 0x719   :  { %7707 = vmatprep.subr.bf16.mxu0 %v11389_v25  ;;  %v15342_v46 = vrot.slane %v7543_v44, 1  ;;  %v7285_v7 = vshrl.u32 %v6939_v19, 16  ;;  %v7288_v30 = vshll.u32 %v6939_v19, 16  ;;  %v7274_v15 = vsel %vm2492_vm7, %v7265_v47, %v7273_v2  ;;  %v11408_v10 = vld [vmem:[#allocation9 + $0x270] ss:$8 sps:$4 sm:$0xff]   ;;  %v11420_v47 = vld [vmem:[#allocation14 + $0x38] sm:$0xff]  }
 0x71a   :  { %10182 = vmatprep.mubr.msk.bf16.mxu1 %vm5924_vm13, %v7274_v15  ;;  %v7282_v18 = vor.u32 %v7281_v23, %v7278_v49  ;;  %v6973_v39 = vmul.f32 %v15312_v1, %v6946_v45  ;;  %v11413_v58 = vld [vmem:[#allocation9 + $0x264] ss:$8 sps:$4 sm:$0xff]   ;;  %v6979_v38 = vmul.f32 %v15332_v31, %v6948_v62  ;;  %v11411_v50 = vld [vmem:[#allocation9 + $0x260] ss:$8 sps:$4 sm:$0xff]   ;;  %v11414_v1 = vld [vmem:[#allocation9 + $0x250] ss:$8 sps:$4 sm:$0xff]  }
 0x71b   :  { %v7546_v59 = vsel %vm3614_vm8, %v7541_v17, %v15342_v46  ;;  %v7287_v26 = vrot.slane %v7285_v7, 3  ;;  %v7290_v27 = vrot.slane %v7288_v30, 4  ;;  %7474 = vmatmul.mubr.bf16.vlgmr.msra.gmra.mxu1 %v7257_v0  ;;  %v11417_v36 = vld [vmem:[#allocation9 + $0x240] ss:$8 sps:$4 sm:$0xff]   ;;  %v7550_v20 = vshrl.u32 %v15336_v9, 16  ;;  %v11421_v17 = vld [vmem:[#allocation14 + $0xa8] sm:$0xff]  }
 0x71c   :  { %7708 = vmatpush1.bf16.msra.mxu0 %v11387_v13  ;;  %10212 = vmatprep.mubr.msk.bf16.mxu0 %vm5924_vm13, %v7546_v59  ;;  %v7283_v51 = vsel %vm2492_vm7, %v7256_v21, %v7282_v18  ;;  %v6981_v25 = vpack.c.bf16 %v6975_v3, %v6973_v39  ;;  %v6983_v35 = vpack.c.bf16 %v6979_v38, %v6977_v40  ;;  %v11419_v21 = vld [vmem:[#allocation9 + $0x244] ss:$8 sps:$4 sm:$0xff]   ;;  %v11422_v9 = vld [vmem:[#allocation14 + $0x30] sm:$0xff]   ;;  %v11429_v15 = vld [vmem:[#allocation14 + $0x88] sm:$0xff]  }
 0x71d   :  { %v7291_v56 = vor.u32 %v7290_v27, %v7287_v26  ;;  %7709 = vmatprep.subr.bf16.mxu0 %v11392_v11  ;;  %v7552_v8 = vor.u32 %v7550_v20, %v15342_v46  ;;  %7934 = vmatpush1.bf16.msra.mxu1 %v11420_v47  ;;  %v11424_v46 = vld [vmem:[#allocation14 + $0x28] sm:$0xff]   ;;  %v11425_v7 = vld [vmem:[#allocation14 + $0x98] sm:$0xff]   ;;  %v11426_v30 = vld [vmem:[#allocation14 + $0x20] sm:$0xff]  }
 0x71e   :  { %v7526_v41 = vshll.u32 %v6981_v25, 16  ;;  %v7531_v54 = vshll.u32 %v6983_v35, 16  ;;  %v7524_v5 = vshrl.u32 %v6981_v25, 16  ;;  %v7547_v28 = vshrl.u32 %v6983_v35, 16  ;;  %7935 = vmatprep.subr.bf16.mxu1 %v15894_v53  ;;  %v11427_v52 = vld [vmem:[#allocation14 + $0x90] sm:$0xff]   ;;  %v11428_v11 = vld [vmem:[#allocation14 + $0x18] sm:$0xff]  }
 0x71f   :  { %v7292_v22 = vsel %vm2492_vm7, %v7273_v2, %v7291_v56  ;;  %v11423_v2 = vld [vmem:[#allocation14 + $0xa0] sm:$0xff]   ;;  %v11430_v59 = vld [vmem:[#allocation14 + $0x10] sm:$0xff]   ;;  %v11432_v27 = vld [vmem:[#allocation14 + $0x8] sm:$0xff]   ;;  %vm8955_vm7 = vcmask 572416  }
 0x720   :  { %10183 = vmatprep.mubr.msk.bf16.mxu1 %vm5924_vm13, %v7292_v22  ;;  %7710 = vmatpush1.bf16.msra.mxu0 %v11390_v6  ;;  %v7528_v44 = vrot.slane %v7526_v41, 1  ;;  %v7533_v31 = vrot.slane %v7531_v54, 1  ;;  %v11431_v26 = vld [vmem:[#allocation14 + $0x80] sm:$0xff]   ;;  %v11433_v49 = vld [vmem:[#allocation14 + $0x78] sm:$0xff]   ;;  %v11435_v0 = vld [vmem:[#allocation14 + $0x70] sm:$0xff]  }
 0x721   :  { %7711 = vmatprep.subr.bf16.mxu0 %v11395_v32  ;;  %7936 = vmatpush1.bf16.msra.mxu1 %v11422_v9  ;;  %v11434_v23 = vld [vmem:[#allocation14] sm:$0xff]   ;;  %v11436_v6 = vld [vmem:[#allocation14 + $0x68] sm:$0xff]   ;;  %v11437_v56 = vld [vmem:[#allocation14 + $0xd8] sm:$0xff]  }
 0x722   :  { %v7529_v19 = vor.u32 %v7528_v44, %v7524_v5  ;;  %v7549_v13 = vor.u32 %v7547_v28, %v7533_v31  ;;  %7937 = vmatprep.subr.bf16.mxu1 %v15894_v53  ;;  %v11438_v32 = vld [vmem:[#allocation14 + $0x60] sm:$0xff]   ;;  %v11439_v22 = vld [vmem:[#allocation14 + $0xd0] sm:$0xff]   ;;  %v11441_v18 = vld [vmem:[#allocation14 + $0xc8] sm:$0xff]  }
 0x723   :  { %7484 = vmatmul.mubr.bf16.gmra.mxu1 %v7283_v51  ;;  %v11443_v51 = vld [vmem:[#allocation14 + $0xc0] sm:$0xff]  }
 0x724   :  { %7712 = vmatpush1.bf16.msra.mxu0 %v11393_v37  ;;  %v7534_v14 = vsel %vm3614_vm8, %v7529_v19, %v7533_v31  ;;  %v11440_v37 = vld [vmem:[#allocation14 + $0x58] sm:$0xff]   ;;  %v10214_v31 = vld [vmem:[%s15693_s14 + $0x1] ss:$2 sm:$0x3]  ;;  %vm9048_vm8 = vcmask 113664  }
 0x725   :  { %7713 = vmatprep.subr.bf16.mxu0 %v11398_v55  ;;  %7938 = vmatpush1.bf16.msra.mxu1 %v11424_v46  ;;  %v11442_v55 = vld [vmem:[#allocation14 + $0x50] sm:$0xff]   ;;  %v7792_v28 = vrot.slane %v10214_v31, %v15888_v4  ;;  %v7788_v9 = vrot.slane %v10214_v31, %v15903_v60 }
 0x726   :  { %7939 = vmatprep.subr.bf16.mxu1 %v15894_v53 }
 0x728   :  { %7714 = vmatpush1.bf16.msra.mxu0 %v11396_v57  ;;  %v11444_v57 = vld [vmem:[#allocation14 + $0x48] sm:$0xff]  }
 0x729   :  { %7715 = vmatprep.subr.bf16.mxu0 %v11401_v12  ;;  %7940 = vmatpush1.bf16.msra.mxu1 %v11426_v30  ;;  %v11445_v12 = vld [vmem:[#allocation14 + $0xb8] sm:$0xff]  }
 0x72a   :  { %7941 = vmatprep.subr.bf16.mxu1 %v15894_v53 }
 0x72c   :  { %7716 = vmatpush1.bf16.msra.mxu0 %v11399_v16  ;;  %v11446_v16 = vld [vmem:[#allocation14 + $0x40] sm:$0xff]  }
 0x72d   :  { %7721 = vmatprep.subr.bf16.mxu0 %v11404_v48  ;;  %7942 = vmatpush1.bf16.msra.mxu1 %v11428_v11  ;;  %v11447_v48 = vld [vmem:[#allocation14 + $0xb0] sm:$0xff]  }
 0x72e   :  { %7943 = vmatprep.subr.bf16.mxu1 %v15894_v53 }
 0x730   :  { %7722 = vmatpush2.bf16.msra.mxu0 %v11402_v61 }
 0x731   :  { %7723 = vmatprep.subr.bf16.mxu0 %v11407_v63  ;;  %7944 = vmatpush1.bf16.msra.mxu1 %v11430_v59 }
 0x732   :  { %7945 = vmatprep.subr.bf16.mxu1 %v15894_v53 }
 0x734   :  { %7724 = vmatpush2.bf16.msra.mxu0 %v11405_v33 }
 0x735   :  { %7725 = vmatprep.subr.bf16.mxu0 %v11410_v43  ;;  %7946 = vmatpush1.bf16.msra.mxu1 %v11432_v27 }
 0x736   :  { %7947 = vmatprep.subr.bf16.mxu1 %v15894_v53 }
 0x738   :  { %7726 = vmatpush2.bf16.msra.mxu0 %v11408_v10 }
 0x739   :  { %7727 = vmatprep.subr.bf16.mxu0 %v11413_v58  ;;  %7948 = vmatpush1.bf16.msra.mxu1 %v11434_v23 }
 0x73a   :  { %7953 = vmatprep.subr.bf16.mxu1 %v15894_v53 }
 0x73c   :  { %7728 = vmatpush2.bf16.msra.mxu0 %v11411_v50  ;;  %v7762_v50 = vld [vmem:[%s15693_s14] ss:$2 sm:$0x3] }
 0x73d   :  { %7729 = vmatprep.subr.bf16.mxu0 %v11416_v29  ;;  %7954 = vmatpush2.bf16.msra.mxu1 %v11436_v6  ;;  %v7767_v44 = vrot.slane %v7762_v50, %v15903_v60 }
 0x73e   :  { %7955 = vmatprep.subr.bf16.mxu1 %v15894_v53 }
 0x740   :  { %7730 = vmatpush2.bf16.msra.mxu0 %v11414_v1  ;;  %v7771_v1 = vrot.slane %v7762_v50, %v15888_v4 }
 0x741   :  { %7731 = vmatprep.subr.bf16.mxu0 %v11419_v21  ;;  %7956 = vmatpush2.bf16.msra.mxu1 %v11438_v32 }
 0x742   :  { %7957 = vmatprep.subr.bf16.mxu1 %v15894_v53 }
 0x744   :  { %7732 = vmatpush2.bf16.msra.mxu0 %v11417_v36 }
 0x745   :  { %8095 = vmatprep.subr.bf16.mxu0 %v15894_v53  ;;  %7958 = vmatpush2.bf16.msra.mxu1 %v11440_v37 }
 0x746   :  { %7959 = vmatprep.subr.bf16.mxu1 %v15894_v53 }
 0x747   :  { %7734 = vmatmul.mubr.bf16.vlgmr.msra.gmra.mxu0 %v7534_v14 }
 0x748   :  { %10213 = vmatprep.mubr.msk.bf16.mxu0 %vm5924_vm13, %v7552_v8  ;;  %8096 = vmatpush1.bf16.msra.mxu0 %v11421_v17 }
 0x749   :  { %8097 = vmatprep.subr.bf16.mxu0 %v15894_v53  ;;  %7960 = vmatpush2.bf16.msra.mxu1 %v11442_v55 }
 0x74a   :  { %7961 = vmatprep.subr.bf16.mxu1 %v15894_v53 }
 0x74c   :  { %8098 = vmatpush1.bf16.msra.mxu0 %v11423_v2 }
 0x74d   :  { %8099 = vmatprep.subr.bf16.mxu0 %v15894_v53  ;;  %7962 = vmatpush2.bf16.msra.mxu1 %v11444_v57 }
 0x74e   :  { %7963 = vmatprep.subr.bf16.mxu1 %v15894_v53 }
 0x74f   :  { %7744 = vmatmul.mubr.bf16.gmra.mxu0 %v7549_v13 }
 0x750   :  { %8100 = vmatpush1.bf16.msra.mxu0 %v11425_v7 }
 0x751   :  { %8101 = vmatprep.subr.bf16.mxu0 %v15894_v53  ;;  %7964 = vmatpush2.bf16.msra.mxu1 %v11446_v16 }
 0x752   :  { %10371 = vmatprep.subr.bf16.mxu1 %v15901_v34 }
 0x754   :  { %8102 = vmatpush1.bf16.msra.mxu0 %v11427_v52 }
 0x755   :  { %8103 = vmatprep.subr.bf16.mxu0 %v15894_v53 }
 0x758   :  { %8104 = vmatpush1.bf16.msra.mxu0 %v11429_v15 }
 0x759   :  { %8105 = vmatprep.subr.bf16.mxu0 %v15894_v53 }
 0x75c   :  { %8106 = vmatpush1.bf16.msra.mxu0 %v11431_v26 }
 0x75d   :  { %8107 = vmatprep.subr.bf16.mxu0 %v15894_v53 }
 0x760   :  { %8108 = vmatpush1.bf16.msra.mxu0 %v11433_v49 }
 0x761   :  { %8109 = vmatprep.subr.bf16.mxu0 %v15894_v53 }
 0x764   :  { %8110 = vmatpush1.bf16.msra.mxu0 %v11435_v0 }
 0x765   :  { %8115 = vmatprep.subr.bf16.mxu0 %v15894_v53 }
 0x768   :  { %8116 = vmatpush2.bf16.msra.mxu0 %v11437_v56 }
 0x769   :  { %8117 = vmatprep.subr.bf16.mxu0 %v15894_v53 }
 0x76c   :  { %8118 = vmatpush2.bf16.msra.mxu0 %v11439_v22 }
 0x76d   :  { %8119 = vmatprep.subr.bf16.mxu0 %v15894_v53 }
 0x770   :  { %8120 = vmatpush2.bf16.msra.mxu0 %v11441_v18 }
 0x771   :  { %8121 = vmatprep.subr.bf16.mxu0 %v15894_v53 }
 0x774   :  { %8122 = vmatpush2.bf16.msra.mxu0 %v11443_v51 }
 0x775   :  { %8123 = vmatprep.subr.bf16.mxu0 %v15894_v53 }
 0x778   :  { %8124 = vmatpush2.bf16.msra.mxu0 %v11445_v12 }
 0x779   :  { %8125 = vmatprep.subr.bf16.mxu0 %v15894_v53 }
 0x77c   :  { %8126 = vmatpush2.bf16.msra.mxu0 %v11447_v48 }
 0x7ce   :  { %v7222_v61 = vpop.f32.mrf.mxu0 }
 0x7d0   :  { %v7224_v63 = vpop.f32.mrf.mxu0 }
 0x7d2   :  { %v7226_v33 = vpop.f32.mrf.mxu0 }
 0x7d4   :  { %v7228_v45 = vpop.f32.mrf.mxu0 }
 0x7d7   :  { %v7232_v62 = vpop.f32.mrf.mxu0 }
 0x7d9   :  { %v7234_v10 = vpop.f32.mrf.mxu0 }
 0x7db   :  { %v7475_v43 = vpop.f32.mrf.mxu1  ;;  %v7236_v3 = vpop.f32.mrf.mxu0 }
 0x7dc   :  { %v7476_v29 = vadd.f32 %v7475_v43, %v7222_v61 }
 0x7dd   :  { %v7477_v39 = vpop.f32.mrf.mxu1  ;;  %v7238_v25 = vpop.f32.mrf.mxu0 }
 0x7de   :  { %v7478_v41 = vadd.f32 %v7477_v39, %v7224_v63 }
 0x7df   :  { %v7479_v58 = vpop.f32.mrf.mxu1 }
 0x7e0   :  { %v7480_v5 = vadd.f32 %v7479_v58, %v7226_v33 }
 0x7e1   :  { %v7481_v38 = vpop.f32.mrf.mxu1 }
 0x7e2   :  { %v7482_v14 = vadd.f32 %v7481_v38, %v7228_v45 }
 0x7e3   :  { %v7485_v40 = vpop.f32.mrf.mxu1 }
 0x7e4   :  { %v7486_v30 = vadd.f32 %v7485_v40, %v7232_v62 }
 0x7e5   :  { %v7487_v21 = vpop.f32.mrf.mxu1 }
 0x7e6   :  { %v7488_v11 = vadd.f32 %v7487_v21, %v7234_v10  ;;  %v11455_v21 = vld [vmem:[%s15689_s10 + $0x60] ss:$8 sps:$4 sm:$0xff]  }
 0x7e7   :  { %v7489_v47 = vpop.f32.mrf.mxu1 }
 0x7e8   :  { %v7490_v32 = vadd.f32 %v7489_v47, %v7236_v3 }
 0x7e9   :  { %v7491_v27 = vpop.f32.mrf.mxu1 }
 0x7ea   :  { %v7492_v18 = vadd.f32 %v7491_v27, %v7238_v25 }
 0x807   :  { %v7735_v35 = vpop.f32.mrf.mxu0 }
 0x808   :  { %v7754_v54 = vadd.f32 %v7735_v35, %v7476_v29 }
 0x809   :  { %v7737_v36 = vpop.f32.mrf.mxu0 }
 0x80a   :  { %v7755_v19 = vadd.f32 %v7737_v36, %v7478_v41  ;;  %v7774_v17 = vmul.f32 %v7767_v44, %v7754_v54  ;;  %v8234_v41 = vld [vmem:[%s15904_s1] sm:$0xff]  ;;  %v11463_v36 = vld [vmem:[%s15689_s10 + $0x54] ss:$8 sps:$4 sm:$0xff]  }
 0x80b   :  { %v7739_v20 = vpop.f32.mrf.mxu0  ;;  %8240 = vperm.xlu1 %10454, %v8234_v41   ;;  %v11457_v54 = vld [vmem:[%s15689_s10 + $0x64] ss:$8 sps:$4 sm:$0xff]  }
 0x80c   :  { %v7775_v8 = vmul.f32 %v7771_v1, %v7755_v19  ;;  %v7756_v13 = vadd.f32 %v7739_v20, %v7480_v5  ;;  %v7795_v49 = vadd.f32 %v7788_v9, %v7774_v17  ;;  %8487 = vmatprep.subr.bf16.mxu0 %v11457_v54  ;;  %v11487_v54 = vld [vmem:[%s15689_s10 + $0x14] ss:$8 sps:$4 sm:$0xff]  }
 0x80d   :  { %v7741_v2 = vpop.f32.mrf.mxu0 }
 0x80e   :  { %v7776_v46 = vmul.f32 %v7767_v44, %v7756_v13  ;;  %v7757_v7 = vadd.f32 %v7741_v2, %v7482_v14  ;;  %v7796_v15 = vadd.f32 %v7792_v28, %v7775_v8  ;;  %v7803_v12 = vmax.f32 %v7795_v49, 0.0 }
 0x80f   :  { %v7745_v52 = vpop.f32.mrf.mxu0  ;;  %10456 = vset.pattern.permute.xlu1 %v15897_v24  ;;  %v8181_v49 = vsel %vm8180_vm0, 4294967295, %v11721_v42  ;;  %v11451_v42 = vld [vmem:[%s15689_s10 + $0xd4] ss:$8 sps:$4 sm:$0xff]  }
 0x810   :  { %v7797_v59 = vadd.f32 %v7788_v9, %v7776_v46  ;;  %v7777_v26 = vmul.f32 %v7771_v1, %v7757_v7  ;;  %v7758_v23 = vadd.f32 %v7745_v52, %v7486_v30  ;;  %v7804_v55 = vmax.f32 %v7796_v15, 0.0  ;;  %8257 = vperm.xlu1 %10456, %v8234_v41   ;;  %v11484_v41 = vld [vmem:[%s15689_s10 + $0x74] ss:$8 sps:$4 sm:$0xff]  }
 0x811   :  { %v7747_v0 = vpop.f32.mrf.mxu0 }
 0x812   :  { %v7798_v6 = vadd.f32 %v7792_v28, %v7777_v26  ;;  %v7759_v56 = vadd.f32 %v7747_v0, %v7488_v11  ;;  %v7805_v22 = vmax.f32 %v7797_v59, 0.0  ;;  %v7778_v16 = vmul.f32 %v7767_v44, %v7758_v23 }
 0x813   :  { %v7749_v37 = vpop.f32.mrf.mxu0 }
 0x814   :  { %v7806_v51 = vmax.f32 %v7798_v6, 0.0  ;;  %v7779_v57 = vmul.f32 %v7771_v1, %v7759_v56  ;;  %v7760_v48 = vadd.f32 %v7749_v37, %v7490_v32  ;;  %v7811_v45 = vpack.c.bf16 %v7805_v22, %v7803_v12 }
 0x815   :  { %v7751_v61 = vpop.f32.mrf.mxu0  ;;  %v7799_v10 = vadd.f32 %v7788_v9, %v7778_v16  ;;  %v8182_v37 = vsel %vm371_vm1, %v8181_v49, 0  ;;  %v11497_v49 = vld [vmem:[%s15689_s10 + $0x120] ss:$8 sps:$4 sm:$0xff]  }
 0x816   :  { %v7812_v63 = vpack.c.bf16 %v7806_v51, %v7804_v55  ;;  %v7761_v33 = vadd.f32 %v7751_v61, %v7492_v18  ;;  %v7780_v43 = vmul.f32 %v7767_v44, %v7760_v48  ;;  %v7800_v62 = vadd.f32 %v7792_v28, %v7779_v57  ;;  %v11461_v44 = vld [vmem:[%s15689_s10 + $0x50] ss:$8 sps:$4 sm:$0xff]   ;;  %v11448_v48 = vld [vmem:[%s15905_s16] sm:$0x7f]  }
 0x817   :  { %v7807_v50 = vmax.f32 %v7799_v10, 0.0  ;;  %v11449_v61 = vld [vmem:[%s15689_s10 + $0xd0] ss:$8 sps:$4 sm:$0xff]   ;;  %v11467_v10 = vld [vmem:[%s15689_s10 + $0x40] ss:$8 sps:$4 sm:$0xff]  }
 0x818   :  { %v7781_v39 = vmul.f32 %v7771_v1, %v7761_v33  ;;  %10229 = vmatprep.mubr.msk.bf16.mxu1 %vm5924_vm13, %v7812_v63  ;;  %10245 = vmatprep.mubr.msk.bf16.mxu0 %vm5924_vm13, %v7812_v63  ;;  %v7801_v58 = vadd.f32 %v7788_v9, %v7780_v43  ;;  %v7808_v25 = vmax.f32 %v7800_v62, 0.0  ;;  %v8235_v1 = vld [vmem:[%s15904_s1 + $0x8] sm:$0x3f]  ;;  %v11458_v43 = vld [vmem:[%s15689_s10 + $0xb0] ss:$8 sps:$4 sm:$0xff]  }
 0x819   :  { %7966 = vmatmul.mubr.bf16.vlgmr.msra.gmra.mxu1 %v7811_v45  ;;  %8128 = vmatmul.mubr.bf16.vlgmr.msra.gmra.mxu0 %v7811_v45  ;;  %v11454_v63 = vld [vmem:[%s15689_s10 + $0xc4] ss:$8 sps:$4 sm:$0xff]   ;;  %v11452_v33 = vld [vmem:[%s15689_s10 + $0xc0] ss:$8 sps:$4 sm:$0xff]   ;;  %v11460_v45 = vld [vmem:[%s15689_s10 + $0xb4] ss:$8 sps:$4 sm:$0xff]  }
 0x81a   :  { %v7802_v3 = vadd.f32 %v7792_v28, %v7781_v39  ;;  %v7809_v38 = vmax.f32 %v7801_v58, 0.0  ;;  %8245 = vperm.xlu0 %10455, %v8235_v1   ;;  %8488 = vmatpush1.bf16.msra.mxu0 %v11455_v21  ;;  %v11466_v62 = vld [vmem:[%s15689_s10 + $0xa4] ss:$8 sps:$4 sm:$0xff]   ;;  %v11464_v39 = vld [vmem:[%s15689_s10 + $0xa0] ss:$8 sps:$4 sm:$0xff]  }
 0x81b   :  { %8261 = vperm.xlu1 %10456, %v8235_v1   ;;  %8489 = vmatprep.subr.bf16.mxu0 %v11463_v36  ;;  %v11469_v58 = vld [vmem:[%s15689_s10 + $0x44] ss:$8 sps:$4 sm:$0xff]   ;;  %v11479_v1 = vld [vmem:[%s15689_s10 + $0x20] ss:$8 sps:$4 sm:$0xff]   ;;  %v11482_v21 = vld [vmem:[%s15689_s10 + $0x70] ss:$8 sps:$4 sm:$0xff]  }
 0x81c   :  { %v7810_v40 = vmax.f32 %v7802_v3, 0.0  ;;  %v7813_v35 = vpack.c.bf16 %v7809_v38, %v7807_v50  ;;  %v11470_v3 = vld [vmem:[%s15689_s10 + $0x90] ss:$8 sps:$4 sm:$0xff]   ;;  %v11472_v38 = vld [vmem:[%s15689_s10 + $0x94] ss:$8 sps:$4 sm:$0xff]  }
 0x81d   :  { %v11476_v50 = vld [vmem:[%s15689_s10 + $0x80] ss:$8 sps:$4 sm:$0xff]   ;;  %v11485_v36 = vld [vmem:[%s15689_s10 + $0x10] ss:$8 sps:$4 sm:$0xff]  }
 0x81e   :  { %v7814_v29 = vpack.c.bf16 %v7810_v40, %v7808_v25  ;;  %10457 = vset.pattern.permute.xlu0 %v15897_v24  ;;  %8490 = vmatpush1.bf16.msra.mxu0 %v11461_v44  ;;  %v11473_v25 = vld [vmem:[%s15689_s10 + $0x30] ss:$8 sps:$4 sm:$0xff]   ;;  %v11475_v40 = vld [vmem:[%s15689_s10 + $0x34] ss:$8 sps:$4 sm:$0xff]   ;;  %v11490_v44 = vld [vmem:[%s15689_s10 + $0x144] ss:$8 sps:$4 sm:$0xff]  }
 0x81f   :  { %8491 = vmatprep.subr.bf16.mxu0 %v11469_v58  ;;  %v11522_v58 = vld [vmem:[%s15697_s18 + $0x58] sm:$0xff]  }
 0x820   :  { %10230 = vmatprep.mubr.msk.bf16.mxu1 %vm5924_vm13, %v7814_v29  ;;  %10246 = vmatprep.mubr.msk.bf16.mxu0 %vm5924_vm13, %v7814_v29  ;;  %v11478_v29 = vld [vmem:[%s15689_s10 + $0x84] ss:$8 sps:$4 sm:$0xff]  }
 0x821   :  { %7974 = vmatmul.mubr.bf16.gmra.mxu1 %v7813_v35  ;;  %8136 = vmatmul.mubr.bf16.gmra.mxu0 %v7813_v35  ;;  %v11481_v35 = vld [vmem:[%s15689_s10 + $0x24] ss:$8 sps:$4 sm:$0xff]  }
 0x822   :  { %8517 = vmatprep.mubr.bf16.mxu0 %v15894_v53  ;;  %10375 = vmatprep.mubr.msk.bf16.mxu1 %vm11722_vm15, %v15901_v34 }
 0x823   :  { %8492 = vmatpush1.bf16.msra.mxu0 %v11467_v10  ;;  %v11521_v10 = vld [vmem:[%s15697_s18 + $0x60] sm:$0xff]  }
 0x824   :  { %8493 = vmatprep.subr.bf16.mxu0 %v11475_v40 }
 0x827   :  { %8494 = vmatpush1.bf16.msra.mxu0 %v11473_v25  ;;  %v11526_v25 = vld [vmem:[#allocation15 + $0x18] ss:$0 sps:$4 sm:$0xff]  }
 0x828   :  { %8495 = vmatprep.subr.bf16.mxu0 %v11481_v35  ;;  %v8899_v40 = vsel %vm5861_vm11, %v11526_v25, 0  ;;  %v8942_v25 = vld [vmem:[%s15701_s22] sm:$0xff] }
 0x82b   :  { %8496 = vmatpush1.bf16.msra.mxu0 %v11479_v1 }
 0x82c   :  { %8497 = vmatprep.subr.bf16.mxu0 %v11487_v54 }
 0x82f   :  { %8498 = vmatpush1.bf16.msra.mxu0 %v11485_v36 }
 0x8d9   :  { %v7967_v5 = vpop.f32.mrf.mxu1  ;;  %v8129_v31 = vpop.f32.mrf.mxu0 }
 0x8da   :  { %v8144_v59 = vmax.f32 %v7967_v5, %v8129_v31  ;;  %v11491_v5 = vld [vmem:[%s15689_s10] ss:$8 sps:$4 sm:$0xff]   ;;  %v11493_v31 = vld [vmem:[%s15689_s10 + $0x4] ss:$8 sps:$4 sm:$0xff]  }
 0x8db   :  { %v7969_v19 = vpop.f32.mrf.mxu1  ;;  %v8131_v20 = vpop.f32.mrf.mxu0  ;;  %8499 = vmatprep.subr.bf16.mxu0 %v11493_v31 }
 0x8dc   :  { %v8152_v32 = vrot.slane %v8144_v59, 1  ;;  %8500 = vmatpush1.bf16.msra.mxu0 %v11491_v5  ;;  %v8663_v5 = vld [vmem:[#allocation12] ss:$2 sm:$0x3] }
 0x8dd   :  { %v7970_v14 = vpop.f32.mrf.mxu1  ;;  %v8132_v24 = vpop.f32.mrf.mxu0  ;;  %8824 = vmatprep.subr.bf16.mxu0 %v15894_v53 }
 0x8de   :  { %v8145_v30 = vmax.f32 %v7970_v14, %v8132_v24 }
 0x8df   :  { %v7972_v8 = vpop.f32.mrf.mxu1  ;;  %v8134_v28 = vpop.f32.mrf.mxu0 }
 0x8e0   :  { %v8153_v23 = vrot.slane %v8145_v30, 1  ;;  %v8246_v28 = vpop.permute.xlu0 %8245 }
 0x8e1   :  { %v7975_v13 = vpop.f32.mrf.mxu1  ;;  %v8137_v47 = vpop.f32.mrf.mxu0 }
 0x8e2   :  { %v8146_v2 = vmax.f32 %v7975_v13, %v8137_v47  ;;  %v8154_v55 = vsel %vm1202_vm4, %v8152_v32, %v8153_v23  ;;  %v11488_v13 = vld [vmem:[%s15689_s10 + $0x140] ss:$8 sps:$4 sm:$0xff]  }
 0x8e3   :  { %v7977_v17 = vpop.f32.mrf.mxu1  ;;  %v8139_v9 = vpop.f32.mrf.mxu0  ;;  %v8163_v12 = vmax.f32 %v8144_v59, %v8154_v55  ;;  %v11494_v59 = vld [vmem:[%s15689_s10 + $0x130] ss:$8 sps:$4 sm:$0xff]   ;;  %v11515_v32 = vld [vmem:[%s15697_s18 + $0x20] sm:$0xff]  }
 0x8e4   :  { %v8155_v26 = vrot.slane %v8146_v2, 1  ;;  %v8241_v9 = vpop.permute.xlu1 %8240  ;;  %v11506_v55 = vld [vmem:[%s15689_s10 + $0xf0] ss:$8 sps:$4 sm:$0xff]  }
 0x8e5   :  { %v7978_v46 = vpop.f32.mrf.mxu1  ;;  %v8140_v7 = vpop.f32.mrf.mxu0 }
 0x8e6   :  { %v8147_v52 = vmax.f32 %v7978_v46, %v8140_v7  ;;  %v8156_v22 = vsel %vm1202_vm4, %v8153_v23, %v8155_v26  ;;  %v11502_v23 = vld [vmem:[%s15689_s10 + $0x114] ss:$8 sps:$4 sm:$0xff]  }
 0x8e7   :  { %v7980_v11 = vpop.f32.mrf.mxu1  ;;  %v8142_v15 = vpop.f32.mrf.mxu0  ;;  %v8164_v51 = vmax.f32 %v8145_v30, %v8156_v22 }
 0x8e8   :  { %v8157_v27 = vrot.slane %v8147_v52, 1  ;;  %v11512_v11 = vld [vmem:[%s15697_s18 + $0x38] sm:$0xff]   ;;  %v8258_v22 = vpop.permute.xlu1 %8257 }
 0x8e9   :  { %v8169_v16 = vpack.c.bf16 %v8164_v51, %v8163_v12  ;;  %v11511_v51 = vld [vmem:[%s15689_s10 + $0xe4] ss:$8 sps:$4 sm:$0xff]  }
 0x8ea   :  { %v8158_v0 = vsel %vm1202_vm4, %v8155_v26, %v8157_v27  ;;  %v8166_v6 = vmax.f32 %v8147_v52, %v8157_v27  ;;  %vm8227_vm4 = vcmask 916480   ;;  %v11496_v52 = vld [vmem:[%s15689_s10 + $0x134] ss:$8 sps:$4 sm:$0xff]   ;;  %v11499_v26 = vld [vmem:[%s15689_s10 + $0x124] ss:$8 sps:$4 sm:$0xff]  }
 0x8eb   :  { %v8165_v56 = vmax.f32 %v8146_v2, %v8158_v0  ;;  %v11513_v27 = vld [vmem:[%s15697_s18 + $0x30] sm:$0xff]   ;;  %v11514_v0 = vld [vmem:[%s15697_s18 + $0x28] sm:$0xff]  }
 0x8ec   :  { %v8262_v12 = vpop.permute.xlu1 %8261 }
 0x8ed   :  { %v8170_v18 = vpack.c.bf16 %v8166_v6, %v8165_v56  ;;  %v11500_v6 = vld [vmem:[%s15689_s10 + $0x110] ss:$8 sps:$4 sm:$0xff]   ;;  %v11505_v56 = vld [vmem:[%s15689_s10 + $0x104] ss:$8 sps:$4 sm:$0xff]  }
 0x8ef   :  { %v8184_v57 = vand.u32 %v8182_v37, %v8170_v18  ;;  %v11503_v37 = vld [vmem:[%s15689_s10 + $0x100] ss:$8 sps:$4 sm:$0xff]   ;;  %v11508_v18 = vld [vmem:[%s15689_s10 + $0xf4] ss:$8 sps:$4 sm:$0xff]  }
 0x8f1   :  { %10372 = vmatpush3.bf16.msra.mxu1 %v8184_v57 }
 0x8f2   :  { %10373 = vmatprep.subr.bf16.mxu1 %v15901_v34 }
 0x8f5   :  { %10374 = vmatpush3.bf16.msra.mxu1 %v8169_v16  ;;  %v11509_v16 = vld [vmem:[%s15689_s10 + $0xe0] ss:$8 sps:$4 sm:$0xff]  }
 0x8f6   :  { %8371 = vmatprep.subr.bf16.mxu1 %v11451_v42 }
 0x8f8   :  { %10376 = vmatmul.mubr.msk.bf16.vlgmr.msra.gmra.mxu1 %vm8176_vm2, %v11448_v48 }
 0x8f9   :  { %8372 = vmatpush1.bf16.msra.mxu1 %v11449_v61  ;;  %8401 = vmatprep.mubr.bf16.mxu1 %v15894_v53 }
 0x8fa   :  { %8373 = vmatprep.subr.bf16.mxu1 %v11454_v63 }
 0x8fd   :  { %8374 = vmatpush1.bf16.msra.mxu1 %v11452_v33  ;;  %v11516_v33 = vld [vmem:[%s15697_s18 + $0x18] sm:$0xff]  }
 0x8fe   :  { %8375 = vmatprep.subr.bf16.mxu1 %v11460_v45  ;;  %v11517_v45 = vld [vmem:[%s15697_s18 + $0x10] sm:$0xff]  }
 0x901   :  { %8376 = vmatpush1.bf16.msra.mxu1 %v11458_v43  ;;  %v11518_v43 = vld [vmem:[%s15697_s18 + $0x8] sm:$0xff]  }
 0x902   :  { %8377 = vmatprep.subr.bf16.mxu1 %v11466_v62  ;;  %v11519_v62 = vld [vmem:[%s15697_s18] sm:$0xff]  }
 0x905   :  { %8378 = vmatpush1.bf16.msra.mxu1 %v11464_v39  ;;  %v11520_v39 = vld [vmem:[%s15697_s18 + $0x68] sm:$0xff]  }
 0x906   :  { %8379 = vmatprep.subr.bf16.mxu1 %v11472_v38  ;;  %v11524_v38 = vld [vmem:[%s15697_s18 + $0x48] sm:$0xff]  }
 0x909   :  { %8380 = vmatpush1.bf16.msra.mxu1 %v11470_v3  ;;  %v11523_v3 = vld [vmem:[%s15697_s18 + $0x50] sm:$0xff]  }
 0x90a   :  { %8381 = vmatprep.subr.bf16.mxu1 %v11478_v29  ;;  %v11527_v29 = vld [vmem:[#allocation15 + $0x10] sm:$0xff]  }
 0x90d   :  { %8382 = vmatpush1.bf16.msra.mxu1 %v11476_v50  ;;  %v11525_v50 = vld [vmem:[%s15697_s18 + $0x40] sm:$0xff]  }
 0x90e   :  { %8383 = vmatprep.subr.bf16.mxu1 %v11484_v41 }
 0x911   :  { %8384 = vmatpush1.bf16.msra.mxu1 %v11482_v21 }
 0x912   :  { %8618 = vmatprep.subr.bf16.mxu1 %v11490_v44 }
 0x9b8   :  { %v8220_v19 = vpop.f32.mrf.mxu1 }
 0x9b9   :  { %8228 = vst.msk [vmem:[#allocation5 + $0x8] sm:$0xff] %vm8227_vm4, %v8220_v19 }
 0x9ba   :  { %v10377_v20 = vpop.f32.mrf.mxu1 }
 0x9bc   :  { %v8223_v14 = vpop.f32.mrf.mxu1 }
 0x9bd   :  { %8230 = vst.msk [vmem:[#allocation5 + $0x10] sm:$0x3f] %vm8229_vm5, %v8223_v14  ;;  %v8672_v14 = vrot.slane %v8663_v5, %v15888_v4 }
 0x9be   :  { %v10378_v24 = vpop.f32.mrf.mxu1 }
 0x9c0   :  { %v8236_v8 = vld [vmem:[#allocation5 + $0x7] sm:$0xff] }
 0x9c1   :  { %v8251_v47 = vld [vmem:[#allocation5 + $0x8] sm:$0xff]  ;;  %v8248_v7 = vmul.f32 %v8241_v9, %v8236_v8  ;;  %v8668_v8 = vrot.slane %v8663_v5, %v15903_v60 }
 0x9c2   :  { %v10346_v5 = vld [vmem:[#allocation17] ss:$0 sm:$0xff] }
 0x9c4   :  { %v8252_v17 = vld [vmem:[#allocation5 + $0x10] sm:$0x3f] }
 0x9c5   :  { %v8237_v2 = vld [vmem:[#allocation5 + $0xf] sm:$0x3f]  ;;  %v8253_v46 = vpack.c.bf16 %v8252_v17, %v8251_v47  ;;  %v8680_v47 = vld [vmem:[#allocation12 + $0x1] ss:$2 sm:$0x3] }
 0x9c6   :  { %v8249_v30 = vmul.f32 %v8246_v28, %v8237_v2  ;;  %v8254_v57 = vld [vmem:[#allocation5 + $0x9] sm:$0xff]  ;;  %v8255_v42 = vld [vmem:[#allocation5 + $0x11] sm:$0x3f] }
 0x9c7   :  { %10277 = vmatmul.mubr.msk.bf16.vlgmr.msra.gmra.mxu1 %vm8227_vm4, %v8253_v46  ;;  %v8264_v48 = vmul.f32 %v8258_v22, %v8254_v57  ;;  %v8265_v61 = vmul.f32 %v8262_v12, %v8255_v42  ;;  %v10322_v12 = vld [vmem:[%s15698_s19] ss:$0 sm:$0xff] }
 0x9c8   :  { %v8250_v15 = vpack.c.bf16 %v8249_v30, %v8248_v7  ;;  %8619 = vmatpush1.bf16.msra.mxu1 %v11488_v13  ;;  %8648 = vmatprep.mubr.bf16.mxu1 %v15894_v53  ;;  %v8689_v7 = vrot.slane %v8680_v47, %v15888_v4  ;;  %v11528_v4 = vld [vmem:[#allocation15 + $0x8] sm:$0xff]  }
 0x9c9   :  { %8620 = vmatprep.subr.bf16.mxu1 %v11496_v52  ;;  %v8266_v63 = vpack.c.bf16 %v8265_v61, %v8264_v48 }
 0x9ca   :  { %10292 = vmatmul.mubr.msk.bf16.vlgmr.msra.gmra.mxu0 %vm8227_vm4, %v8250_v15 }
 0x9cb   :  { %8825 = vmatpush1.bf16.msra.mxu0 %v11512_v11  ;;  %v8685_v11 = vrot.slane %v8680_v47, %v15903_v60  ;;  %v11529_v60 = vld [vmem:[#allocation15] sm:$0xff]  }
 0x9cc   :  { %8826 = vmatprep.subr.bf16.mxu0 %v15894_v53  ;;  %8621 = vmatpush1.bf16.msra.mxu1 %v11494_v59 }
 0x9cd   :  { %8622 = vmatprep.subr.bf16.mxu1 %v11499_v26 }
 0x9cf   :  { %8827 = vmatpush1.bf16.msra.mxu0 %v11513_v27 }
 0x9d0   :  { %8828 = vmatprep.subr.bf16.mxu0 %v15894_v53  ;;  %8623 = vmatpush1.bf16.msra.mxu1 %v11497_v49 }
 0x9d1   :  { %8624 = vmatprep.subr.bf16.mxu1 %v11502_v23 }
 0x9d3   :  { %8829 = vmatpush1.bf16.msra.mxu0 %v11514_v0 }
 0x9d4   :  { %8830 = vmatprep.subr.bf16.mxu0 %v15894_v53  ;;  %8625 = vmatpush1.bf16.msra.mxu1 %v11500_v6 }
 0x9d5   :  { %8626 = vmatprep.subr.bf16.mxu1 %v11505_v56 }
 0x9d7   :  { %8831 = vmatpush1.bf16.msra.mxu0 %v11515_v32 }
 0x9d8   :  { %8832 = vmatprep.subr.bf16.mxu0 %v15894_v53  ;;  %8627 = vmatpush1.bf16.msra.mxu1 %v11503_v37 }
 0x9d9   :  { %8628 = vmatprep.subr.bf16.mxu1 %v11508_v18 }
 0x9db   :  { %8833 = vmatpush1.bf16.msra.mxu0 %v11516_v33 }
 0x9dc   :  { %8629 = vmatpush1.bf16.msra.mxu1 %v11506_v55  ;;  %8834 = vmatprep.subr.bf16.mxu0 %v15894_v53 }
 0x9dd   :  { %8630 = vmatprep.subr.bf16.mxu1 %v11511_v51  ;;  %v8954_v51 = vld [vmem:[%s15702_s23 + $0x40] sm:$0x3f] }
 0x9df   :  { %8835 = vmatpush1.bf16.msra.mxu0 %v11517_v45  ;;  %v8953_v45 = vld [vmem:[%s15702_s23 + $0x38] sm:$0xff] }
 0x9e0   :  { %8631 = vmatpush1.bf16.msra.mxu1 %v11509_v16  ;;  %8836 = vmatprep.subr.bf16.mxu0 %v15894_v53 }
 0x9e1   :  { %10379 = vmatprep.subr.bf16.mxu1 %v15901_v34 }
 0x9e3   :  { %10321 = vmatmul.mubr.msk.bf16.vlgmr.msra.gmra.mxu1 %vm8227_vm4, %v8266_v63  ;;  %8837 = vmatpush1.bf16.msra.mxu0 %v11518_v43  ;;  %v8952_v43 = vld [vmem:[%s15702_s23 + $0x30] sm:$0xff] }
 0x9e4   :  { %10387 = vmatprep.mubr.msk.bf16.mxu1 %vm11722_vm15, %v15901_v34  ;;  %8838 = vmatprep.subr.bf16.mxu0 %v15894_v53 }
 0x9e5   :  { %10380 = vmatpush3.bf16.msra.mxu1 %v8899_v40 }
 0x9e6   :  { %10381 = vmatprep.subr.bf16.mxu1 %v15901_v34 }
 0x9e7   :  { %8839 = vmatpush1.bf16.msra.mxu0 %v11519_v62  ;;  %v8951_v62 = vld [vmem:[%s15702_s23 + $0x28] sm:$0xff] }
 0x9e8   :  { %8844 = vmatprep.subr.bf16.mxu0 %v15894_v53 }
 0x9e9   :  { %10382 = vmatpush3.bf16.msra.mxu1 %v11527_v29 }
 0x9ea   :  { %10383 = vmatprep.subr.bf16.mxu1 %v15901_v34 }
 0x9eb   :  { %8845 = vmatpush2.bf16.msra.mxu0 %v11520_v39  ;;  %v8950_v39 = vld [vmem:[%s15702_s23 + $0x20] sm:$0xff] }
 0x9ec   :  { %8846 = vmatprep.subr.bf16.mxu0 %v15894_v53 }
 0x9ed   :  { %10384 = vmatpush3.bf16.msra.mxu1 %v11528_v4 }
 0x9ee   :  { %10385 = vmatprep.subr.bf16.mxu1 %v15901_v34 }
 0x9ef   :  { %8847 = vmatpush2.bf16.msra.mxu0 %v11521_v10  ;;  %v8949_v10 = vld [vmem:[%s15702_s23 + $0x18] sm:$0xff] }
 0x9f0   :  { %8848 = vmatprep.subr.bf16.mxu0 %v15894_v53 }
 0x9f1   :  { %10386 = vmatpush3.bf16.msra.mxu1 %v11529_v60 }
 0x9f2   :  { %10391 = vmatprep.subr.msk.mxu1 %vm371_vm1, %v8954_v51 }
 0x9f3   :  { %8849 = vmatpush2.bf16.msra.mxu0 %v11522_v58  ;;  %v8948_v58 = vld [vmem:[%s15702_s23 + $0x10] sm:$0xff] }
 0x9f4   :  { %8850 = vmatprep.subr.bf16.mxu0 %v15894_v53 }
 0x9f7   :  { %8851 = vmatpush2.bf16.msra.mxu0 %v11523_v3  ;;  %v8947_v3 = vld [vmem:[%s15702_s23 + $0x8] sm:$0xff] }
 0x9f8   :  { %8852 = vmatprep.subr.bf16.mxu0 %v15894_v53 }
 0x9fb   :  { %8853 = vmatpush2.bf16.msra.mxu0 %v11524_v38  ;;  %v8946_v38 = vld [vmem:[%s15702_s23] sm:$0xff] }
 0x9fc   :  { %8854 = vmatprep.subr.bf16.mxu0 %v15894_v53 }
 0x9ff   :  { %8855 = vmatpush2.bf16.msra.mxu0 %v11525_v50 }
 0xa87   :  { %v8403_v35 = vpop.f32.mrf.mxu1 }
 0xa89   :  { %v8405_v1 = vpop.f32.mrf.mxu1 }
 0xa8a   :  { %v8519_v41 = vpop.f32.mrf.mxu0 }
 0xa8b   :  { %v8407_v54 = vpop.f32.mrf.mxu1  ;;  %v8520_v31 = vadd.f32 %v8519_v41, %v8403_v35  ;;  %v8943_v35 = vld [vmem:[%s15701_s22 + $0x8] sm:$0x3f]  ;;  %s11723_s22 = smov [#allocation18]  }
 0xa8c   :  { %v8521_v21 = vpop.f32.mrf.mxu0 }
 0xa8d   :  { %v8409_v36 = vpop.f32.mrf.mxu1  ;;  %v8522_v20 = vadd.f32 %v8521_v21, %v8405_v1 }
 0xa8e   :  { %v8523_v44 = vpop.f32.mrf.mxu0 }
 0xa8f   :  { %v8524_v13 = vadd.f32 %v8523_v44, %v8407_v54  ;;  %v9040_v44 = vld [vmem:[%s15703_s24] sm:$0x3]  ;;  %s9146_s24 = sshll.u32 %s11723_s22, 4  ;;  %s9147_s24 = int_to_ptr.vmem [resolvable:$true] %s9146_s24 }
 0xa90   :  { %v8525_v53 = vpop.f32.mrf.mxu0  ;;  %s11675_s0 = scalar_lea.vmem %s9147_s24, 32  ;;  %p11680_p8 = scmp.lt.s32.totalorder %s9147_s24, %s9147_s24 }
 0xa91   :  { %v8526_v2 = vadd.f32 %v8525_v53, %v8409_v36  ;;  %p11676_p7 = scmp.ne.s32.totalorder %s9147_s24, %s11675_s0  ;;  %p11681_p9 = scmp.lt.s32.totalorder %s11675_s0, %s11675_s0 }
 0xa93   :  { %p11682_p10 = por %p11681_p9, %p11680_p8 }
 0xa95   :  { %p11683_p11 = pnand %p11682_p10, %p11676_p7 }
 0xaa3   :  { %v8650_v19 = vpop.f32.mrf.mxu1 }
 0xaa4   :  { %v8659_v24 = vadd.f32 %v8650_v19, %v8520_v31 }
 0xaa5   :  { %v8652_v28 = vpop.f32.mrf.mxu1 }
 0xaa6   :  { %v8660_v17 = vadd.f32 %v8652_v28, %v8522_v20  ;;  %v8675_v52 = vmul.f32 %v8668_v8, %v8659_v24 }
 0xaa7   :  { %v8654_v9 = vpop.f32.mrf.mxu1 }
 0xaa8   :  { %v8676_v46 = vmul.f32 %v8672_v14, %v8660_v17  ;;  %v8661_v30 = vadd.f32 %v8654_v9, %v8524_v13  ;;  %v8692_v0 = vadd.f32 %v8685_v11, %v8675_v52 }
 0xaa9   :  { %v8656_v15 = vpop.f32.mrf.mxu1 }
 0xaaa   :  { %v8677_v59 = vmul.f32 %v8668_v8, %v8661_v30  ;;  %v8662_v26 = vadd.f32 %v8656_v15, %v8526_v2  ;;  %v8693_v27 = vadd.f32 %v8689_v7, %v8676_v46  ;;  %v8696_v37 = vmax.f32 %v8692_v0, 0.0 }
 0xaac   :  { %v8694_v49 = vadd.f32 %v8685_v11, %v8677_v59  ;;  %v8678_v23 = vmul.f32 %v8672_v14, %v8662_v26  ;;  %v8697_v32 = vmax.f32 %v8693_v27, 0.0 }
 0xaae   :  { %v8695_v6 = vadd.f32 %v8689_v7, %v8678_v23  ;;  %v8698_v56 = vmax.f32 %v8694_v49, 0.0 }
 0xab0   :  { %v8699_v22 = vmax.f32 %v8695_v6, 0.0  ;;  %v8700_v55 = vpack.c.bf16 %v8698_v56, %v8696_v37 }
 0xab2   :  { %v8701_v18 = vpack.c.bf16 %v8699_v22, %v8697_v32 }
 0xab4   :  { %10337 = vmatprep.mubr.msk.bf16.mxu0 %vm5924_vm13, %v8701_v18 }
 0xab5   :  { %8857 = vmatmul.mubr.bf16.vlgmr.msra.gmra.mxu0 %v8700_v55 }
 0xb75   :  { %v8858_v57 = vpop.f32.mrf.mxu0 }
 0xb76   :  { %v8859_v48 = vadd.f32 %v10322_v12, %v8858_v57 }
 0xb77   :  { %v8860_v42 = vpop.f32.mrf.mxu0 }
 0xb79   :  { %v8861_v16 = vpop.f32.mrf.mxu0 }
 0xb7a   :  { %v8862_v61 = vadd.f32 %v10322_v12, %v8861_v16 }
 0xb7b   :  { %v8863_v63 = vpop.f32.mrf.mxu0 }
 0xb7c   :  { %v8865_v33 = vpack.c.bf16 %v8862_v61, %v8859_v48 }
 0xb7e   :  { %10388 = vmatmul.mubr.msk.bf16.vlgmr.msra.gmra.mxu1 %vm8894_vm6, %v8865_v33 }
 0xb7f   :  { %10392 = vmatpush3.msk.msra.mxu1 %vm371_vm1, %v8954_v51 }
 0xb80   :  { %10393 = vmatprep.subr.mxu1 %v8953_v45 }
 0xb81   :  { %10394 = vmatpush3.msra.mxu1 %v8953_v45 }
 0xb82   :  { %10395 = vmatprep.subr.mxu1 %v8952_v43 }
 0xb83   :  { %10396 = vmatpush3.msra.mxu1 %v8952_v43 }
 0xb84   :  { %10397 = vmatprep.subr.mxu1 %v8951_v62 }
 0xb85   :  { %10398 = vmatpush3.msra.mxu1 %v8951_v62 }
 0xb86   :  { %10399 = vmatprep.subr.mxu1 %v8950_v39 }
 0xb87   :  { %10400 = vmatpush3.msra.mxu1 %v8950_v39 }
 0xb88   :  { %10401 = vmatprep.subr.mxu1 %v8949_v10 }
 0xb89   :  { %10402 = vmatpush3.msra.mxu1 %v8949_v10 }
 0xb8a   :  { %10403 = vmatprep.subr.mxu1 %v8948_v58 }
 0xb8b   :  { %10404 = vmatpush3.msra.mxu1 %v8948_v58 }
 0xb8c   :  { %10405 = vmatprep.subr.mxu1 %v8947_v3 }
 0xb8d   :  { %10406 = vmatpush3.msra.mxu1 %v8947_v3 }
 0xb8e   :  { %10407 = vmatprep.subr.mxu1 %v8946_v38 }
 0xb8f   :  { %10408 = vmatpush3.msra.mxu1 %v8946_v38 }
 0xb90   :  { %10412 = vmatprep.subr.mxu1 %v15901_v34 }
 0xc3e   :  { %v8935_v40 = vpop.f32.mrf.mxu1 }
 0xc3f   :  { %v8944_v50 = vmul.f32 %v8942_v25, %v8935_v40 }
 0xc40   :  { %v10389_v29 = vpop.f32.mrf.mxu1 }
 0xc41   :  { %10409 = vmatprep.mubr.msk.f32.mxu1 %vm8955_vm7, %v8944_v50 }
 0xc42   :  { %v8938_v41 = vpop.f32.mrf.mxu1 }
 0xc43   :  { %v8945_v1 = vmul.f32 %v8943_v35, %v8938_v41 }
 0xc44   :  { %v10390_v21 = vpop.f32.mrf.mxu1 }
 0xc45   :  { %10410 = vmatmul.mubr.msk.f32.vlgmr.msra.gmra.mxu1 %vm8955_vm7, %v8945_v1 }
 0xc46   :  { %10416 = vmatprep.mubr.msk.f32.mxu1 %vm11722_vm15, %v15901_v34 }
 0xd05   :  { %v10411_v54 = vpop.f32.mrf.mxu1 }
 0xd06   :  { %10413 = vmatpush3.msk.msra.mxu1 %vm371_vm1, %v10411_v54 }
 0xd07   :  { %v9031_v36 = vpop.f32.mrf.mxu1  ;;  %10414 = vmatprep.subr.mxu1 %v15901_v34 }
 0xd08   :  { %10415 = vmatpush3.msra.mxu1 %v9031_v36 }
 0xd09   :  { %10417 = vmatmul.mubr.msk.f32.vlgmr.msra.gmra.mxu1 %vm9048_vm8, %v9040_v44 }
 0xdc9   :  { %v9121_v31 = vpop.f32.mrf.mxu1 }
 0xdca   :  { %v9122_v19 = vadd.f32 %v10346_v5, %v9121_v31 }
 0xdcb   :  { %v10418_v20 = vpop.f32.mrf.mxu1 }
 0xdcc   :  { %v9126_v14 = vsel %vm9125_vm9, %v9122_v19, -inf }
 0xdcd   :  { %9127 = vmax.xlane.f32.xlu0 %v9126_v14 }
 0xe56   :  { %v9128_v53 = vpop.xlane.xlu0 %9127 }
 0xe57   :  { %v9129_v24 = vsub.f32 %v9122_v19, %v9128_v53 }
 0xe59   :  { %v9130_v8 = vmul.f32 1.442695, %v9129_v24 }
 0xe5b   :  { %11530 = vpow2.f32 %v9130_v8 }
 0xe68   :  { %v11531_v28 = vpop.eup %11530 }
 0xe69   :  { %v9132_v13 = vsel %vm9125_vm9, %v11531_v28, 0.0 }
 0xe6a   :  { %9133 = vadd.xlane.f32.xlu1 %v9132_v13 }
 0xef3   :  { %v9134_v47 = vpop.xlane.xlu1 %9133 }
 0xef4   :  { %11532 = vlog2.f32 %v9134_v47 }
 0xf01   :  { %v11533_v34 = vpop.eup %11532 }
 0xf02   :  { %v9136_v17 = vmul.f32 0.6931472, %v11533_v34 }
 0xf04   :  { %v9137_v9 = vadd.f32 %v9136_v17, %v9128_v53 }
 0xf06   :  { %v9138_v2 = vsub.f32 %v9122_v19, %v9137_v9 }
 0xf08   :  { %9139 = vst.msk [vmem:[#allocation18] sm:$0x3] %vm9125_vm9, %v9138_v2 }
 0xf09   :  { %11686 = shalt.err (!%p11683_p11)
}
 0xf0a   :  { %9149 = dma.vmem_to_hbm [thread:$0]  %s9147_s24, 32, %s15704_s25, [#allocation8]  }
 0xf0b   :  { %11703 = dma.done.wait [#allocation8], 32  }
 0xf0c   :  { %11704 = vsyncadd [#allocation8], 4294967264 }
 0xf0d   :  { %9153 = vsyncpa [#allocation7], 1 }
 0xf0e   :  { %9154 = vsyncpa [#allocation10], 1 }
 0xf0f   :  { %9155 = vsyncpa [#allocation13], 1 }
 0xf10   :  { %9156 = vsyncpa [#allocation16], 1 }
 0xf11   :  { %9157 = vsyncpa [#allocation8], 1 }

</bundles_post_ra>
